<compile_context>
chip_gen: v7x
topology: tpu7x:2x2x1
jax: 0.10.0
libtpu: 0.0.40
codegen_flags: <defaults>
</compile_context>

<pallas_src>
import jax
import jax.numpy as jnp
from jax.experimental import pallas as pl
from jax.experimental.pallas import tpu as pltpu

EMBED = 128        # embedding dim (LSTM input size, layer 0)
HIDDEN = 64        # LSTM hidden size
NUM_LAYERS = 2
NUM_DIRS = 2       # bidirectional
NUM_CLASSES = 8
PICK_T = 15        # forward() hard-codes x[15, :, :]


# ----------------------------- Pallas kernel ------------------------------

def _lstm_gate_update(gates, c):
    """gates: (B, 4H) with columns [i | f | o | g] (bias already included)."""
    H = HIDDEN
    sig = jax.nn.sigmoid(gates[:, :3 * H])        # one contiguous sigmoid slab
    g_g = jnp.tanh(gates[:, 3 * H:])
    i_g = sig[:, 0:H]
    f_g = sig[:, H:2 * H]
    o_g = sig[:, 2 * H:3 * H]
    c_new = f_g * c + i_g * g_g
    h_new = o_g * jnp.tanh(c_new)
    return h_new, c_new


def _mylstm_kernel(x_ref,                                    # (T*B, 128) time-major, flattened
                   w1xf_ref, w1hf_ref, b1f_ref,              # layer-1 fwd: (128,4H), (H,4H), (1,4H)
                   w1xb_ref, w1hb_ref, b1b_ref,              # layer-1 bwd
                   w2xf_ref, w2hf_ref, b2f_ref,              # layer-2 fwd: (2H,4H), (H,4H), (1,4H)
                   w2xb_ref, w2hb_ref, b2b_ref,              # layer-2 bwd
                   wlf_ref, wlb_ref, bl_ref,                 # linear head: (H,8), (H,8), (1,8)
                   out_ref,                                  # (B, 8)
                   l1_ref,                                   # scratch (T*B, 2H) layer-1 output
                   xp1f_ref, xp1b_ref,                       # scratch (T*B, 4H) layer-1 x-proj
                   xp2f_ref, xp2b_ref):                      # scratch layer-2 x-proj
    f32 = jnp.float32
    H = HIDDEN
    B = out_ref.shape[0]
    T = x_ref.shape[0] // B

    # ---- batched input projections for layer 1 (gate bias folded in) ----
    x = x_ref[...]                                           # (T*B, 128)
    xp1f_ref[...] = jnp.dot(x, w1xf_ref[...], preferred_element_type=f32) + b1f_ref[...]
    xp1b_ref[...] = jnp.dot(x, w1xb_ref[...], preferred_element_type=f32) + b1b_ref[...]

    zeros = jnp.zeros((B, H), f32)

    # ---- layer 1: fwd step t and bwd step T-1-t interleaved (independent chains) ----
    h_f, c_f = zeros, zeros
    h_b, c_b = zeros, zeros
    for t in range(T):                                       # fully unrolled, T static
        tb = T - 1 - t
        gates_f = xp1f_ref[pl.ds(t * B, B), :] + jnp.dot(
            h_f, w1hf_ref[...], preferred_element_type=f32)
        gates_b = xp1b_ref[pl.ds(tb * B, B), :] + jnp.dot(
            h_b, w1hb_ref[...], preferred_element_type=f32)
        h_f, c_f = _lstm_gate_update(gates_f, c_f)
        h_b, c_b = _lstm_gate_update(gates_b, c_b)
        l1_ref[pl.ds(t * B, B), pl.ds(0, H)] = h_f           # stores are off the h->h chain
        l1_ref[pl.ds(tb * B, B), pl.ds(H, H)] = h_b

    # ---- batched input projections for layer 2 (only the rows that feed x[15]) ----
    n_fwd = (PICK_T + 1) * B
    n_bwd = (T - PICK_T) * B
    xp2f_ref[...] = jnp.dot(l1_ref[pl.ds(0, n_fwd), :], w2xf_ref[...],
                            preferred_element_type=f32) + b2f_ref[...]
    xp2b_ref[...] = jnp.dot(l1_ref[pl.ds(PICK_T * B, n_bwd), :], w2xb_ref[...],
                            preferred_element_type=f32) + b2b_ref[...]

    # ---- layer 2 forward: steps 0..PICK_T ----
    h_f, c_f = zeros, zeros
    for t in range(PICK_T + 1):
        gates = xp2f_ref[pl.ds(t * B, B), :] + jnp.dot(
            h_f, w2hf_ref[...], preferred_element_type=f32)
        h_f, c_f = _lstm_gate_update(gates, c_f)

    # ---- layer 2 backward: steps T-1..PICK_T (independent of the fwd chain;
    #      the whole body is one basic block, so the scheduler overlaps them) ----
    h_b, c_b = zeros, zeros
    for t in range(T - 1, PICK_T - 1, -1):
        gates = xp2b_ref[pl.ds((t - PICK_T) * B, B), :] + jnp.dot(
            h_b, w2hb_ref[...], preferred_element_type=f32)
        h_b, c_b = _lstm_gate_update(gates, c_b)

    # ---- fused Linear head on the t = PICK_T bidirectional state (no concat) ----
    out_ref[...] = (jnp.dot(h_f, wlf_ref[...], preferred_element_type=f32)
                    + jnp.dot(h_b, wlb_ref[...], preferred_element_type=f32)
                    + bl_ref[...])


# ------------------------------ wrappers -----------------------------------

def _prep_dir(w_ih, w_hh, b_ih, b_hh):
    """PyTorch (4H, D)/(4H, H)/(4H,) params -> (D,4H), (H,4H), (1,4H), gate cols [i,f,o,g]."""
    H = w_hh.shape[1]

    def reorder_rows(m):  # PyTorch gate row order [i, f, g, o] -> [i, f, o, g]
        return jnp.concatenate([m[0:H], m[H:2 * H], m[3 * H:4 * H], m[2 * H:3 * H]], axis=0)

    w_x = jnp.transpose(reorder_rows(w_ih))                  # (D, 4H)
    w_h = jnp.transpose(reorder_rows(w_hh))                  # (H, 4H)
    b = b_ih + b_hh
    b = jnp.concatenate([b[0:H], b[H:2 * H], b[3 * H:4 * H], b[2 * H:3 * H]]).reshape(1, 4 * H)
    return w_x, w_h, b


def mylstm_forward(tokens, emb, lstm_params, w_lin, b_lin):
    """tokens: (batch, seq) int32 token ids. Returns (batch, NUM_CLASSES)."""
    # Embedding lookup (frozen table) — gather done in JAX glue.
    x = jnp.take(emb, tokens, axis=0)                        # (B, T, 128)
    x = jnp.transpose(x, (1, 0, 2)).astype(jnp.float32)      # (T, B, 128) == x.transpose(1, 0)
    T, B, D = x.shape
    assert T > PICK_T, "forward() indexes x[15]; need seq_len >= 16"
    x_flat = x.reshape(T * B, D)                             # time-major, batch-minor rows

    (l1f, l1b), (l2f, l2b) = lstm_params
    w1xf, w1hf, b1f = _prep_dir(*l1f)
    w1xb, w1hb, b1b = _prep_dir(*l1b)
    w2xf, w2hf, b2f = _prep_dir(*l2f)
    w2xb, w2hb, b2b = _prep_dir(*l2b)

    wl_t = jnp.transpose(w_lin)                              # (2H, out)
    wlf, wlb = wl_t[:HIDDEN], wl_t[HIDDEN:]                  # split -> no in-kernel concat
    bl = b_lin.reshape(1, -1)

    n_out = w_lin.shape[0]
    H = HIDDEN
    vmem_specs = [pl.BlockSpec(memory_space=pltpu.MemorySpace.VMEM) for _ in range(16)]

    return pl.pallas_call(
        _mylstm_kernel,
        out_shape=jax.ShapeDtypeStruct((B, n_out), jnp.float32),
        in_specs=vmem_specs,
        out_specs=pl.BlockSpec(memory_space=pltpu.MemorySpace.VMEM),
        scratch_shapes=[
            pltpu.VMEM((T * B, 2 * H), jnp.float32),              # layer-1 output (lane dense)
            pltpu.VMEM((T * B, 4 * H), jnp.float32),              # layer-1 fwd x-proj
            pltpu.VMEM((T * B, 4 * H), jnp.float32),              # layer-1 bwd x-proj
            pltpu.VMEM(((PICK_T + 1) * B, 4 * H), jnp.float32),   # layer-2 fwd x-proj
            pltpu.VMEM(((T - PICK_T) * B, 4 * H), jnp.float32),   # layer-2 bwd x-proj
        ],
    )(x_flat, w1xf, w1hf, b1f, w1xb, w1hb, b1b,
      w2xf, w2hf, b2f, w2xb, w2hb, b2b, wlf, wlb, bl)


# ---------------------- pure-JAX reference (for checking) -------------------

def _ref_lstm_dir(x, w_ih, w_hh, b_ih, b_hh, reverse):
    T, B, _ = x.shape
    H = w_hh.shape[1]
    h = jnp.zeros((B, H), jnp.float32)
    c = jnp.zeros((B, H), jnp.float32)
    outs = [None] * T
    order = range(T - 1, -1, -1) if reverse else range(T)
    for t in order:
        gates = x[t] @ w_ih.T + h @ w_hh.T + b_ih + b_hh
        i = jax.nn.sigmoid(gates[:, 0:H])
        f = jax.nn.sigmoid(gates[:, H:2 * H])
        g = jnp.tanh(gates[:, 2 * H:3 * H])
        o = jax.nn.sigmoid(gates[:, 3 * H:4 * H])
        c = f * c + i * g
        h = o * jnp.tanh(c)
        outs[t] = h
    return jnp.stack(outs, axis=0)


def mylstm_reference(tokens, emb, lstm_params, w_lin, b_lin):
    x = jnp.transpose(jnp.take(emb, tokens, axis=0), (1, 0, 2))
    for fwd_p, bwd_p in lstm_params:
        hf = _ref_lstm_dir(x, *fwd_p, reverse=False)
        hb = _ref_lstm_dir(x, *bwd_p, reverse=True)
        x = jnp.concatenate([hf, hb], axis=-1)
    return x[PICK_T] @ w_lin.T + b_lin


# --------------------------------- main -------------------------------------

if __name__ == "__main__":
    key = jax.random.PRNGKey(0)
    keys = jax.random.split(key, 32)

    vocab = 100
    batch, seq = 2, 16                                       # forward indexes x[15] => seq >= 16

    # Frozen "pretrained" embedding matrix (deterministic synthetic init).
    emb = jax.random.normal(keys[0], (vocab, EMBED), jnp.float32)

    # LSTM parameters, PyTorch shapes: W_ih (4H, D_in), W_hh (4H, H), biases (4H,)
    k_idx = 1
    scale = 1.0 / (HIDDEN ** 0.5)
    lstm_params = []
    for layer in range(NUM_LAYERS):
        in_size = EMBED if layer == 0 else NUM_DIRS * HIDDEN
        layer_p = []
        for d in range(NUM_DIRS):
            w_ih = jax.random.uniform(keys[k_idx], (4 * HIDDEN, in_size),
                                      jnp.float32, -scale, scale); k_idx += 1
            w_hh = jax.random.uniform(keys[k_idx], (4 * HIDDEN, HIDDEN),
                                      jnp.float32, -scale, scale); k_idx += 1
            b_ih = jax.random.uniform(keys[k_idx], (4 * HIDDEN,),
                                      jnp.float32, -scale, scale); k_idx += 1
            b_hh = jax.random.uniform(keys[k_idx], (4 * HIDDEN,),
                                      jnp.float32, -scale, scale); k_idx += 1
            layer_p.append((w_ih, w_hh, b_ih, b_hh))
        lstm_params.append(tuple(layer_p))

    lin_scale = 1.0 / ((NUM_DIRS * HIDDEN) ** 0.5)
    w_lin = jax.random.uniform(keys[k_idx], (NUM_CLASSES, NUM_DIRS * HIDDEN),
                               jnp.float32, -lin_scale, lin_scale); k_idx += 1
    b_lin = jax.random.uniform(keys[k_idx], (NUM_CLASSES,),
                               jnp.float32, -lin_scale, lin_scale); k_idx += 1

    x_tokens = jax.random.randint(keys[k_idx], (batch, seq), 0, vocab, jnp.int32)

    out = jax.jit(mylstm_forward)(x_tokens, emb, lstm_params, w_lin, b_lin)
    out = jax.block_until_ready(out)
    assert out.shape == (batch, NUM_CLASSES)
    assert bool(jnp.all(jnp.isfinite(out)))

    ref = mylstm_reference(x_tokens, emb, lstm_params, w_lin, b_lin)
    assert bool(jnp.allclose(out, ref, atol=2e-3, rtol=2e-3)), (out, ref)
    print("KERNEL_OK")
</pallas_src>

<mosaic_0001>
module attributes {stable_mosaic.version = 11 : i64} {
  func.func @_mylstm_kernel(%arg0: memref<32x128xf32, #tpu.memory_space<vmem>>, %arg1: memref<128x256xf32, #tpu.memory_space<vmem>>, %arg2: memref<64x256xf32, #tpu.memory_space<vmem>>, %arg3: memref<1x256xf32, #tpu.memory_space<vmem>>, %arg4: memref<128x256xf32, #tpu.memory_space<vmem>>, %arg5: memref<64x256xf32, #tpu.memory_space<vmem>>, %arg6: memref<1x256xf32, #tpu.memory_space<vmem>>, %arg7: memref<128x256xf32, #tpu.memory_space<vmem>>, %arg8: memref<64x256xf32, #tpu.memory_space<vmem>>, %arg9: memref<1x256xf32, #tpu.memory_space<vmem>>, %arg10: memref<128x256xf32, #tpu.memory_space<vmem>>, %arg11: memref<64x256xf32, #tpu.memory_space<vmem>>, %arg12: memref<1x256xf32, #tpu.memory_space<vmem>>, %arg13: memref<64x8xf32, #tpu.memory_space<vmem>>, %arg14: memref<64x8xf32, #tpu.memory_space<vmem>>, %arg15: memref<1x8xf32, #tpu.memory_space<vmem>>, %arg16: memref<2x8xf32, #tpu.memory_space<vmem>>, %arg17: memref<32x128xf32, #tpu.memory_space<vmem>>, %arg18: memref<32x256xf32, #tpu.memory_space<vmem>>, %arg19: memref<32x256xf32, #tpu.memory_space<vmem>>, %arg20: memref<32x256xf32, #tpu.memory_space<vmem>>, %arg21: memref<2x256xf32, #tpu.memory_space<vmem>>) attributes {dimension_semantics = [], scalar_prefetch = 0 : i64, scratch_operands = 5 : i64, tpu.core_type = #tpu.core_type<tc>} {
    %c0 = arith.constant 0 : index
    %c0_0 = arith.constant 0 : index
    %0 = vector.load %arg0[%c0, %c0_0] : memref<32x128xf32, #tpu.memory_space<vmem>>, vector<32x128xf32>
    %c0_1 = arith.constant 0 : index
    %c0_2 = arith.constant 0 : index
    %1 = vector.load %arg1[%c0_1, %c0_2] : memref<128x256xf32, #tpu.memory_space<vmem>>, vector<128x256xf32>
    %cst = arith.constant dense<0.000000e+00> : vector<32x256xf32>
    %2 = tpu.matmul %0, %1, %cst {dimension_numbers = #tpu.dot_dimension_numbers<[1], [0], [0], [1], [0, 0, 1, 1], [], []>} : vector<32x128xf32>, vector<128x256xf32>, vector<32x256xf32> -> vector<32x256xf32>
    %c0_3 = arith.constant 0 : index
    %c0_4 = arith.constant 0 : index
    %3 = vector.load %arg3[%c0_3, %c0_4] : memref<1x256xf32, #tpu.memory_space<vmem>>, vector<1x256xf32>
    %4 = vector.broadcast %3 : vector<1x256xf32> to vector<32x256xf32>
    %5 = arith.addf %2, %4 : vector<32x256xf32>
    %c0_5 = arith.constant 0 : index
    %c0_6 = arith.constant 0 : index
    %6 = vector.load %arg18[%c0_5, %c0_6] : memref<32x256xf32, #tpu.memory_space<vmem>>, vector<32x256xf32>
    tpu.vector_store %arg18[%c0_5, %c0_6], %5 {strides = array<i32>} : memref<32x256xf32, #tpu.memory_space<vmem>>, vector<32x256xf32>,
    %c0_7 = arith.constant 0 : index
    %c0_8 = arith.constant 0 : index
    %7 = vector.load %arg4[%c0_7, %c0_8] : memref<128x256xf32, #tpu.memory_space<vmem>>, vector<128x256xf32>
    %cst_9 = arith.constant dense<0.000000e+00> : vector<32x256xf32>
    %8 = tpu.matmul %0, %7, %cst_9 {dimension_numbers = #tpu.dot_dimension_numbers<[1], [0], [0], [1], [0, 0, 1, 1], [], []>} : vector<32x128xf32>, vector<128x256xf32>, vector<32x256xf32> -> vector<32x256xf32>
    %c0_10 = arith.constant 0 : index
    %c0_11 = arith.constant 0 : index
    %9 = vector.load %arg6[%c0_10, %c0_11] : memref<1x256xf32, #tpu.memory_space<vmem>>, vector<1x256xf32>
    %10 = vector.broadcast %9 : vector<1x256xf32> to vector<32x256xf32>
    %11 = arith.addf %8, %10 : vector<32x256xf32>
    %c0_12 = arith.constant 0 : index
    %c0_13 = arith.constant 0 : index
    %12 = vector.load %arg19[%c0_12, %c0_13] : memref<32x256xf32, #tpu.memory_space<vmem>>, vector<32x256xf32>
    tpu.vector_store %arg19[%c0_12, %c0_13], %11 {strides = array<i32>} : memref<32x256xf32, #tpu.memory_space<vmem>>, vector<32x256xf32>,
    %cst_14 = arith.constant 0.000000e+00 : f32
    %13 = vector.broadcast %cst_14 : f32 to vector<2x64xf32>
    %c0_15 = arith.constant 0 : index
    %c0_16 = arith.constant 0 : index
    %14 = vector.load %arg18[%c0_15, %c0_16] : memref<32x256xf32, #tpu.memory_space<vmem>>, vector<2x256xf32>
    %c0_17 = arith.constant 0 : index
    %c0_18 = arith.constant 0 : index
    %15 = vector.load %arg2[%c0_17, %c0_18] : memref<64x256xf32, #tpu.memory_space<vmem>>, vector<64x256xf32>
    %cst_19 = arith.constant dense<0.000000e+00> : vector<2x256xf32>
    %16 = tpu.matmul %13, %15, %cst_19 {dimension_numbers = #tpu.dot_dimension_numbers<[1], [0], [0], [1], [0, 0, 1, 1], [], []>} : vector<2x64xf32>, vector<64x256xf32>, vector<2x256xf32> -> vector<2x256xf32>
    %17 = arith.addf %14, %16 : vector<2x256xf32>
    %c30 = arith.constant 30 : index
    %c0_20 = arith.constant 0 : index
    %18 = vector.load %arg19[%c30, %c0_20] : memref<32x256xf32, #tpu.memory_space<vmem>>, vector<2x256xf32>
    %c0_21 = arith.constant 0 : index
    %c0_22 = arith.constant 0 : index
    %19 = vector.load %arg5[%c0_21, %c0_22] : memref<64x256xf32, #tpu.memory_space<vmem>>, vector<64x256xf32>
    %cst_23 = arith.constant dense<0.000000e+00> : vector<2x256xf32>
    %20 = tpu.matmul %13, %19, %cst_23 {dimension_numbers = #tpu.dot_dimension_numbers<[1], [0], [0], [1], [0, 0, 1, 1], [], []>} : vector<2x64xf32>, vector<64x256xf32>, vector<2x256xf32> -> vector<2x256xf32>
    %21 = arith.addf %18, %20 : vector<2x256xf32>
    %22 = vector.extract_strided_slice %17 {offsets = [0, 0], sizes = [2, 192], strides = [1, 1]} : vector<2x256xf32> to vector<2x192xf32>
    %23 = arith.negf %22 : vector<2x192xf32>
    %24 = math.exp %23 : vector<2x192xf32>
    %cst_24 = arith.constant 1.000000e+00 : f32
    %25 = vector.broadcast %cst_24 : f32 to vector<2x192xf32>
    %26 = arith.addf %25, %24 : vector<2x192xf32>
    %27 = arith.divf %25, %26 : vector<2x192xf32>
    %28 = vector.extract_strided_slice %17 {offsets = [0, 192], sizes = [2, 64], strides = [1, 1]} : vector<2x256xf32> to vector<2x64xf32>
    %29 = math.tanh %28 : vector<2x64xf32>
    %30 = vector.extract_strided_slice %27 {offsets = [0, 0], sizes = [2, 64], strides = [1, 1]} : vector<2x192xf32> to vector<2x64xf32>
    %31 = vector.extract_strided_slice %27 {offsets = [0, 64], sizes = [2, 64], strides = [1, 1]} : vector<2x192xf32> to vector<2x64xf32>
    %32 = vector.extract_strided_slice %27 {offsets = [0, 128], sizes = [2, 64], strides = [1, 1]} : vector<2x192xf32> to vector<2x64xf32>
    %33 = arith.mulf %31, %13 : vector<2x64xf32>
    %34 = arith.mulf %30, %29 : vector<2x64xf32>
    %35 = arith.addf %33, %34 : vector<2x64xf32>
    %36 = math.tanh %35 : vector<2x64xf32>
    %37 = arith.mulf %32, %36 : vector<2x64xf32>
    %38 = vector.extract_strided_slice %21 {offsets = [0, 0], sizes = [2, 192], strides = [1, 1]} : vector<2x256xf32> to vector<2x192xf32>
    %39 = arith.negf %38 : vector<2x192xf32>
    %40 = math.exp %39 : vector<2x192xf32>
    %cst_25 = arith.constant 1.000000e+00 : f32
    %41 = vector.broadcast %cst_25 : f32 to vector<2x192xf32>
    %42 = arith.addf %41, %40 : vector<2x192xf32>
    %43 = arith.divf %41, %42 : vector<2x192xf32>
    %44 = vector.extract_strided_slice %21 {offsets = [0, 192], sizes = [2, 64], strides = [1, 1]} : vector<2x256xf32> to vector<2x64xf32>
    %45 = math.tanh %44 : vector<2x64xf32>
    %46 = vector.extract_strided_slice %43 {offsets = [0, 0], sizes = [2, 64], strides = [1, 1]} : vector<2x192xf32> to vector<2x64xf32>
    %47 = vector.extract_strided_slice %43 {offsets = [0, 64], sizes = [2, 64], strides = [1, 1]} : vector<2x192xf32> to vector<2x64xf32>
    %48 = vector.extract_strided_slice %43 {offsets = [0, 128], sizes = [2, 64], strides = [1, 1]} : vector<2x192xf32> to vector<2x64xf32>
    %49 = arith.mulf %47, %13 : vector<2x64xf32>
    %50 = arith.mulf %46, %45 : vector<2x64xf32>
    %51 = arith.addf %49, %50 : vector<2x64xf32>
    %52 = math.tanh %51 : vector<2x64xf32>
    %53 = arith.mulf %48, %52 : vector<2x64xf32>
    %c0_26 = arith.constant 0 : index
    %c0_27 = arith.constant 0 : index
    %54 = vector.load %arg17[%c0_26, %c0_27] : memref<32x128xf32, #tpu.memory_space<vmem>>, vector<2x64xf32>
    tpu.vector_store %arg17[%c0_26, %c0_27], %37 {strides = array<i32>} : memref<32x128xf32, #tpu.memory_space<vmem>>, vector<2x64xf32>,
    %c30_28 = arith.constant 30 : index
    %c64 = arith.constant 64 : index
    %55 = vector.load %arg17[%c30_28, %c64] : memref<32x128xf32, #tpu.memory_space<vmem>>, vector<2x64xf32>
    tpu.vector_store %arg17[%c30_28, %c64], %53 {strides = array<i32>} : memref<32x128xf32, #tpu.memory_space<vmem>>, vector<2x64xf32>,
    %c2 = arith.constant 2 : index
    %c0_29 = arith.constant 0 : index
    %56 = vector.load %arg18[%c2, %c0_29] : memref<32x256xf32, #tpu.memory_space<vmem>>, vector<2x256xf32>
    %c0_30 = arith.constant 0 : index
    %c0_31 = arith.constant 0 : index
    %57 = vector.load %arg2[%c0_30, %c0_31] : memref<64x256xf32, #tpu.memory_space<vmem>>, vector<64x256xf32>
    %cst_32 = arith.constant dense<0.000000e+00> : vector<2x256xf32>
    %58 = tpu.matmul %37, %57, %cst_32 {dimension_numbers = #tpu.dot_dimension_numbers<[1], [0], [0], [1], [0, 0, 1, 1], [], []>} : vector<2x64xf32>, vector<64x256xf32>, vector<2x256xf32> -> vector<2x256xf32>
    %59 = arith.addf %56, %58 : vector<2x256xf32>
    %c28 = arith.constant 28 : index
    %c0_33 = arith.constant 0 : index
    %60 = vector.load %arg19[%c28, %c0_33] : memref<32x256xf32, #tpu.memory_space<vmem>>, vector<2x256xf32>
    %c0_34 = arith.constant 0 : index
    %c0_35 = arith.constant 0 : index
    %61 = vector.load %arg5[%c0_34, %c0_35] : memref<64x256xf32, #tpu.memory_space<vmem>>, vector<64x256xf32>
    %cst_36 = arith.constant dense<0.000000e+00> : vector<2x256xf32>
    %62 = tpu.matmul %53, %61, %cst_36 {dimension_numbers = #tpu.dot_dimension_numbers<[1], [0], [0], [1], [0, 0, 1, 1], [], []>} : vector<2x64xf32>, vector<64x256xf32>, vector<2x256xf32> -> vector<2x256xf32>
    %63 = arith.addf %60, %62 : vector<2x256xf32>
    %64 = vector.extract_strided_slice %59 {offsets = [0, 0], sizes = [2, 192], strides = [1, 1]} : vector<2x256xf32> to vector<2x192xf32>
    %65 = arith.negf %64 : vector<2x192xf32>
    %66 = math.exp %65 : vector<2x192xf32>
    %cst_37 = arith.constant 1.000000e+00 : f32
    %67 = vector.broadcast %cst_37 : f32 to vector<2x192xf32>
    %68 = arith.addf %67, %66 : vector<2x192xf32>
    %69 = arith.divf %67, %68 : vector<2x192xf32>
    %70 = vector.extract_strided_slice %59 {offsets = [0, 192], sizes = [2, 64], strides = [1, 1]} : vector<2x256xf32> to vector<2x64xf32>
    %71 = math.tanh %70 : vector<2x64xf32>
    %72 = vector.extract_strided_slice %69 {offsets = [0, 0], sizes = [2, 64], strides = [1, 1]} : vector<2x192xf32> to vector<2x64xf32>
    %73 = vector.extract_strided_slice %69 {offsets = [0, 64], sizes = [2, 64], strides = [1, 1]} : vector<2x192xf32> to vector<2x64xf32>
    %74 = vector.extract_strided_slice %69 {offsets = [0, 128], sizes = [2, 64], strides = [1, 1]} : vector<2x192xf32> to vector<2x64xf32>
    %75 = arith.mulf %73, %35 : vector<2x64xf32>
    %76 = arith.mulf %72, %71 : vector<2x64xf32>
    %77 = arith.addf %75, %76 : vector<2x64xf32>
    %78 = math.tanh %77 : vector<2x64xf32>
    %79 = arith.mulf %74, %78 : vector<2x64xf32>
    %80 = vector.extract_strided_slice %63 {offsets = [0, 0], sizes = [2, 192], strides = [1, 1]} : vector<2x256xf32> to vector<2x192xf32>
    %81 = arith.negf %80 : vector<2x192xf32>
    %82 = math.exp %81 : vector<2x192xf32>
    %cst_38 = arith.constant 1.000000e+00 : f32
    %83 = vector.broadcast %cst_38 : f32 to vector<2x192xf32>
    %84 = arith.addf %83, %82 : vector<2x192xf32>
    %85 = arith.divf %83, %84 : vector<2x192xf32>
    %86 = vector.extract_strided_slice %63 {offsets = [0, 192], sizes = [2, 64], strides = [1, 1]} : vector<2x256xf32> to vector<2x64xf32>
    %87 = math.tanh %86 : vector<2x64xf32>
    %88 = vector.extract_strided_slice %85 {offsets = [0, 0], sizes = [2, 64], strides = [1, 1]} : vector<2x192xf32> to vector<2x64xf32>
    %89 = vector.extract_strided_slice %85 {offsets = [0, 64], sizes = [2, 64], strides = [1, 1]} : vector<2x192xf32> to vector<2x64xf32>
    %90 = vector.extract_strided_slice %85 {offsets = [0, 128], sizes = [2, 64], strides = [1, 1]} : vector<2x192xf32> to vector<2x64xf32>
    %91 = arith.mulf %89, %51 : vector<2x64xf32>
    %92 = arith.mulf %88, %87 : vector<2x64xf32>
    %93 = arith.addf %91, %92 : vector<2x64xf32>
    %94 = math.tanh %93 : vector<2x64xf32>
    %95 = arith.mulf %90, %94 : vector<2x64xf32>
    %c2_39 = arith.constant 2 : index
    %c0_40 = arith.constant 0 : index
    %96 = vector.load %arg17[%c2_39, %c0_40] : memref<32x128xf32, #tpu.memory_space<vmem>>, vector<2x64xf32>
    tpu.vector_store %arg17[%c2_39, %c0_40], %79 {strides = array<i32>} : memref<32x128xf32, #tpu.memory_space<vmem>>, vector<2x64xf32>,
    %c28_41 = arith.constant 28 : index
    %c64_42 = arith.constant 64 : index
    %97 = vector.load %arg17[%c28_41, %c64_42] : memref<32x128xf32, #tpu.memory_space<vmem>>, vector<2x64xf32>
    tpu.vector_store %arg17[%c28_41, %c64_42], %95 {strides = array<i32>} : memref<32x128xf32, #tpu.memory_space<vmem>>, vector<2x64xf32>,
    %c4 = arith.constant 4 : index
    %c0_43 = arith.constant 0 : index
    %98 = vector.load %arg18[%c4, %c0_43] : memref<32x256xf32, #tpu.memory_space<vmem>>, vector<2x256xf32>
    %c0_44 = arith.constant 0 : index
    %c0_45 = arith.constant 0 : index
    %99 = vector.load %arg2[%c0_44, %c0_45] : memref<64x256xf32, #tpu.memory_space<vmem>>, vector<64x256xf32>
    %cst_46 = arith.constant dense<0.000000e+00> : vector<2x256xf32>
    %100 = tpu.matmul %79, %99, %cst_46 {dimension_numbers = #tpu.dot_dimension_numbers<[1], [0], [0], [1], [0, 0, 1, 1], [], []>} : vector<2x64xf32>, vector<64x256xf32>, vector<2x256xf32> -> vector<2x256xf32>
    %101 = arith.addf %98, %100 : vector<2x256xf32>
    %c26 = arith.constant 26 : index
    %c0_47 = arith.constant 0 : index
    %102 = vector.load %arg19[%c26, %c0_47] : memref<32x256xf32, #tpu.memory_space<vmem>>, vector<2x256xf32>
    %c0_48 = arith.constant 0 : index
    %c0_49 = arith.constant 0 : index
    %103 = vector.load %arg5[%c0_48, %c0_49] : memref<64x256xf32, #tpu.memory_space<vmem>>, vector<64x256xf32>
    %cst_50 = arith.constant dense<0.000000e+00> : vector<2x256xf32>
    %104 = tpu.matmul %95, %103, %cst_50 {dimension_numbers = #tpu.dot_dimension_numbers<[1], [0], [0], [1], [0, 0, 1, 1], [], []>} : vector<2x64xf32>, vector<64x256xf32>, vector<2x256xf32> -> vector<2x256xf32>
    %105 = arith.addf %102, %104 : vector<2x256xf32>
    %106 = vector.extract_strided_slice %101 {offsets = [0, 0], sizes = [2, 192], strides = [1, 1]} : vector<2x256xf32> to vector<2x192xf32>
    %107 = arith.negf %106 : vector<2x192xf32>
    %108 = math.exp %107 : vector<2x192xf32>
    %cst_51 = arith.constant 1.000000e+00 : f32
    %109 = vector.broadcast %cst_51 : f32 to vector<2x192xf32>
    %110 = arith.addf %109, %108 : vector<2x192xf32>
    %111 = arith.divf %109, %110 : vector<2x192xf32>
    %112 = vector.extract_strided_slice %101 {offsets = [0, 192], sizes = [2, 64], strides = [1, 1]} : vector<2x256xf32> to vector<2x64xf32>
    %113 = math.tanh %112 : vector<2x64xf32>
    %114 = vector.extract_strided_slice %111 {offsets = [0, 0], sizes = [2, 64], strides = [1, 1]} : vector<2x192xf32> to vector<2x64xf32>
    %115 = vector.extract_strided_slice %111 {offsets = [0, 64], sizes = [2, 64], strides = [1, 1]} : vector<2x192xf32> to vector<2x64xf32>
    %116 = vector.extract_strided_slice %111 {offsets = [0, 128], sizes = [2, 64], strides = [1, 1]} : vector<2x192xf32> to vector<2x64xf32>
    %117 = arith.mulf %115, %77 : vector<2x64xf32>
    %118 = arith.mulf %114, %113 : vector<2x64xf32>
    %119 = arith.addf %117, %118 : vector<2x64xf32>
    %120 = math.tanh %119 : vector<2x64xf32>
    %121 = arith.mulf %116, %120 : vector<2x64xf32>
    %122 = vector.extract_strided_slice %105 {offsets = [0, 0], sizes = [2, 192], strides = [1, 1]} : vector<2x256xf32> to vector<2x192xf32>
    %123 = arith.negf %122 : vector<2x192xf32>
    %124 = math.exp %123 : vector<2x192xf32>
    %cst_52 = arith.constant 1.000000e+00 : f32
    %125 = vector.broadcast %cst_52 : f32 to vector<2x192xf32>
    %126 = arith.addf %125, %124 : vector<2x192xf32>
    %127 = arith.divf %125, %126 : vector<2x192xf32>
    %128 = vector.extract_strided_slice %105 {offsets = [0, 192], sizes = [2, 64], strides = [1, 1]} : vector<2x256xf32> to vector<2x64xf32>
    %129 = math.tanh %128 : vector<2x64xf32>
    %130 = vector.extract_strided_slice %127 {offsets = [0, 0], sizes = [2, 64], strides = [1, 1]} : vector<2x192xf32> to vector<2x64xf32>
    %131 = vector.extract_strided_slice %127 {offsets = [0, 64], sizes = [2, 64], strides = [1, 1]} : vector<2x192xf32> to vector<2x64xf32>
    %132 = vector.extract_strided_slice %127 {offsets = [0, 128], sizes = [2, 64], strides = [1, 1]} : vector<2x192xf32> to vector<2x64xf32>
    %133 = arith.mulf %131, %93 : vector<2x64xf32>
    %134 = arith.mulf %130, %129 : vector<2x64xf32>
    %135 = arith.addf %133, %134 : vector<2x64xf32>
    %136 = math.tanh %135 : vector<2x64xf32>
    %137 = arith.mulf %132, %136 : vector<2x64xf32>
    %c4_53 = arith.constant 4 : index
    %c0_54 = arith.constant 0 : index
    %138 = vector.load %arg17[%c4_53, %c0_54] : memref<32x128xf32, #tpu.memory_space<vmem>>, vector<2x64xf32>
    tpu.vector_store %arg17[%c4_53, %c0_54], %121 {strides = array<i32>} : memref<32x128xf32, #tpu.memory_space<vmem>>, vector<2x64xf32>,
    %c26_55 = arith.constant 26 : index
    %c64_56 = arith.constant 64 : index
    %139 = vector.load %arg17[%c26_55, %c64_56] : memref<32x128xf32, #tpu.memory_space<vmem>>, vector<2x64xf32>
    tpu.vector_store %arg17[%c26_55, %c64_56], %137 {strides = array<i32>} : memref<32x128xf32, #tpu.memory_space<vmem>>, vector<2x64xf32>,
    %c6 = arith.constant 6 : index
    %c0_57 = arith.constant 0 : index
    %140 = vector.load %arg18[%c6, %c0_57] : memref<32x256xf32, #tpu.memory_space<vmem>>, vector<2x256xf32>
    %c0_58 = arith.constant 0 : index
    %c0_59 = arith.constant 0 : index
    %141 = vector.load %arg2[%c0_58, %c0_59] : memref<64x256xf32, #tpu.memory_space<vmem>>, vector<64x256xf32>
    %cst_60 = arith.constant dense<0.000000e+00> : vector<2x256xf32>
    %142 = tpu.matmul %121, %141, %cst_60 {dimension_numbers = #tpu.dot_dimension_numbers<[1], [0], [0], [1], [0, 0, 1, 1], [], []>} : vector<2x64xf32>, vector<64x256xf32>, vector<2x256xf32> -> vector<2x256xf32>
    %143 = arith.addf %140, %142 : vector<2x256xf32>
    %c24 = arith.constant 24 : index
    %c0_61 = arith.constant 0 : index
    %144 = vector.load %arg19[%c24, %c0_61] : memref<32x256xf32, #tpu.memory_space<vmem>>, vector<2x256xf32>
    %c0_62 = arith.constant 0 : index
    %c0_63 = arith.constant 0 : index
    %145 = vector.load %arg5[%c0_62, %c0_63] : memref<64x256xf32, #tpu.memory_space<vmem>>, vector<64x256xf32>
    %cst_64 = arith.constant dense<0.000000e+00> : vector<2x256xf32>
    %146 = tpu.matmul %137, %145, %cst_64 {dimension_numbers = #tpu.dot_dimension_numbers<[1], [0], [0], [1], [0, 0, 1, 1], [], []>} : vector<2x64xf32>, vector<64x256xf32>, vector<2x256xf32> -> vector<2x256xf32>
    %147 = arith.addf %144, %146 : vector<2x256xf32>
    %148 = vector.extract_strided_slice %143 {offsets = [0, 0], sizes = [2, 192], strides = [1, 1]} : vector<2x256xf32> to vector<2x192xf32>
    %149 = arith.negf %148 : vector<2x192xf32>
    %150 = math.exp %149 : vector<2x192xf32>
    %cst_65 = arith.constant 1.000000e+00 : f32
    %151 = vector.broadcast %cst_65 : f32 to vector<2x192xf32>
    %152 = arith.addf %151, %150 : vector<2x192xf32>
    %153 = arith.divf %151, %152 : vector<2x192xf32>
    %154 = vector.extract_strided_slice %143 {offsets = [0, 192], sizes = [2, 64], strides = [1, 1]} : vector<2x256xf32> to vector<2x64xf32>
    %155 = math.tanh %154 : vector<2x64xf32>
    %156 = vector.extract_strided_slice %153 {offsets = [0, 0], sizes = [2, 64], strides = [1, 1]} : vector<2x192xf32> to vector<2x64xf32>
    %157 = vector.extract_strided_slice %153 {offsets = [0, 64], sizes = [2, 64], strides = [1, 1]} : vector<2x192xf32> to vector<2x64xf32>
    %158 = vector.extract_strided_slice %153 {offsets = [0, 128], sizes = [2, 64], strides = [1, 1]} : vector<2x192xf32> to vector<2x64xf32>
    %159 = arith.mulf %157, %119 : vector<2x64xf32>
    %160 = arith.mulf %156, %155 : vector<2x64xf32>
    %161 = arith.addf %159, %160 : vector<2x64xf32>
    %162 = math.tanh %161 : vector<2x64xf32>
    %163 = arith.mulf %158, %162 : vector<2x64xf32>
    %164 = vector.extract_strided_slice %147 {offsets = [0, 0], sizes = [2, 192], strides = [1, 1]} : vector<2x256xf32> to vector<2x192xf32>
    %165 = arith.negf %164 : vector<2x192xf32>
    %166 = math.exp %165 : vector<2x192xf32>
    %cst_66 = arith.constant 1.000000e+00 : f32
    %167 = vector.broadcast %cst_66 : f32 to vector<2x192xf32>
    %168 = arith.addf %167, %166 : vector<2x192xf32>
    %169 = arith.divf %167, %168 : vector<2x192xf32>
    %170 = vector.extract_strided_slice %147 {offsets = [0, 192], sizes = [2, 64], strides = [1, 1]} : vector<2x256xf32> to vector<2x64xf32>
    %171 = math.tanh %170 : vector<2x64xf32>
    %172 = vector.extract_strided_slice %169 {offsets = [0, 0], sizes = [2, 64], strides = [1, 1]} : vector<2x192xf32> to vector<2x64xf32>
    %173 = vector.extract_strided_slice %169 {offsets = [0, 64], sizes = [2, 64], strides = [1, 1]} : vector<2x192xf32> to vector<2x64xf32>
    %174 = vector.extract_strided_slice %169 {offsets = [0, 128], sizes = [2, 64], strides = [1, 1]} : vector<2x192xf32> to vector<2x64xf32>
    %175 = arith.mulf %173, %135 : vector<2x64xf32>
    %176 = arith.mulf %172, %171 : vector<2x64xf32>
    %177 = arith.addf %175, %176 : vector<2x64xf32>
    %178 = math.tanh %177 : vector<2x64xf32>
    %179 = arith.mulf %174, %178 : vector<2x64xf32>
    %c6_67 = arith.constant 6 : index
    %c0_68 = arith.constant 0 : index
    %180 = vector.load %arg17[%c6_67, %c0_68] : memref<32x128xf32, #tpu.memory_space<vmem>>, vector<2x64xf32>
    tpu.vector_store %arg17[%c6_67, %c0_68], %163 {strides = array<i32>} : memref<32x128xf32, #tpu.memory_space<vmem>>, vector<2x64xf32>,
    %c24_69 = arith.constant 24 : index
    %c64_70 = arith.constant 64 : index
    %181 = vector.load %arg17[%c24_69, %c64_70] : memref<32x128xf32, #tpu.memory_space<vmem>>, vector<2x64xf32>
    tpu.vector_store %arg17[%c24_69, %c64_70], %179 {strides = array<i32>} : memref<32x128xf32, #tpu.memory_space<vmem>>, vector<2x64xf32>,
    %c8 = arith.constant 8 : index
    %c0_71 = arith.constant 0 : index
    %182 = vector.load %arg18[%c8, %c0_71] : memref<32x256xf32, #tpu.memory_space<vmem>>, vector<2x256xf32>
    %c0_72 = arith.constant 0 : index
    %c0_73 = arith.constant 0 : index
    %183 = vector.load %arg2[%c0_72, %c0_73] : memref<64x256xf32, #tpu.memory_space<vmem>>, vector<64x256xf32>
    %cst_74 = arith.constant dense<0.000000e+00> : vector<2x256xf32>
    %184 = tpu.matmul %163, %183, %cst_74 {dimension_numbers = #tpu.dot_dimension_numbers<[1], [0], [0], [1], [0, 0, 1, 1], [], []>} : vector<2x64xf32>, vector<64x256xf32>, vector<2x256xf32> -> vector<2x256xf32>
    %185 = arith.addf %182, %184 : vector<2x256xf32>
    %c22 = arith.constant 22 : index
    %c0_75 = arith.constant 0 : index
    %186 = vector.load %arg19[%c22, %c0_75] : memref<32x256xf32, #tpu.memory_space<vmem>>, vector<2x256xf32>
    %c0_76 = arith.constant 0 : index
    %c0_77 = arith.constant 0 : index
    %187 = vector.load %arg5[%c0_76, %c0_77] : memref<64x256xf32, #tpu.memory_space<vmem>>, vector<64x256xf32>
    %cst_78 = arith.constant dense<0.000000e+00> : vector<2x256xf32>
    %188 = tpu.matmul %179, %187, %cst_78 {dimension_numbers = #tpu.dot_dimension_numbers<[1], [0], [0], [1], [0, 0, 1, 1], [], []>} : vector<2x64xf32>, vector<64x256xf32>, vector<2x256xf32> -> vector<2x256xf32>
    %189 = arith.addf %186, %188 : vector<2x256xf32>
    %190 = vector.extract_strided_slice %185 {offsets = [0, 0], sizes = [2, 192], strides = [1, 1]} : vector<2x256xf32> to vector<2x192xf32>
    %191 = arith.negf %190 : vector<2x192xf32>
    %192 = math.exp %191 : vector<2x192xf32>
    %cst_79 = arith.constant 1.000000e+00 : f32
    %193 = vector.broadcast %cst_79 : f32 to vector<2x192xf32>
    %194 = arith.addf %193, %192 : vector<2x192xf32>
    %195 = arith.divf %193, %194 : vector<2x192xf32>
    %196 = vector.extract_strided_slice %185 {offsets = [0, 192], sizes = [2, 64], strides = [1, 1]} : vector<2x256xf32> to vector<2x64xf32>
    %197 = math.tanh %196 : vector<2x64xf32>
    %198 = vector.extract_strided_slice %195 {offsets = [0, 0], sizes = [2, 64], strides = [1, 1]} : vector<2x192xf32> to vector<2x64xf32>
    %199 = vector.extract_strided_slice %195 {offsets = [0, 64], sizes = [2, 64], strides = [1, 1]} : vector<2x192xf32> to vector<2x64xf32>
    %200 = vector.extract_strided_slice %195 {offsets = [0, 128], sizes = [2, 64], strides = [1, 1]} : vector<2x192xf32> to vector<2x64xf32>
    %201 = arith.mulf %199, %161 : vector<2x64xf32>
    %202 = arith.mulf %198, %197 : vector<2x64xf32>
    %203 = arith.addf %201, %202 : vector<2x64xf32>
    %204 = math.tanh %203 : vector<2x64xf32>
    %205 = arith.mulf %200, %204 : vector<2x64xf32>
    %206 = vector.extract_strided_slice %189 {offsets = [0, 0], sizes = [2, 192], strides = [1, 1]} : vector<2x256xf32> to vector<2x192xf32>
    %207 = arith.negf %206 : vector<2x192xf32>
    %208 = math.exp %207 : vector<2x192xf32>
    %cst_80 = arith.constant 1.000000e+00 : f32
    %209 = vector.broadcast %cst_80 : f32 to vector<2x192xf32>
    %210 = arith.addf %209, %208 : vector<2x192xf32>
    %211 = arith.divf %209, %210 : vector<2x192xf32>
    %212 = vector.extract_strided_slice %189 {offsets = [0, 192], sizes = [2, 64], strides = [1, 1]} : vector<2x256xf32> to vector<2x64xf32>
    %213 = math.tanh %212 : vector<2x64xf32>
    %214 = vector.extract_strided_slice %211 {offsets = [0, 0], sizes = [2, 64], strides = [1, 1]} : vector<2x192xf32> to vector<2x64xf32>
    %215 = vector.extract_strided_slice %211 {offsets = [0, 64], sizes = [2, 64], strides = [1, 1]} : vector<2x192xf32> to vector<2x64xf32>
    %216 = vector.extract_strided_slice %211 {offsets = [0, 128], sizes = [2, 64], strides = [1, 1]} : vector<2x192xf32> to vector<2x64xf32>
    %217 = arith.mulf %215, %177 : vector<2x64xf32>
    %218 = arith.mulf %214, %213 : vector<2x64xf32>
    %219 = arith.addf %217, %218 : vector<2x64xf32>
    %220 = math.tanh %219 : vector<2x64xf32>
    %221 = arith.mulf %216, %220 : vector<2x64xf32>
    %c8_81 = arith.constant 8 : index
    %c0_82 = arith.constant 0 : index
    %222 = vector.load %arg17[%c8_81, %c0_82] : memref<32x128xf32, #tpu.memory_space<vmem>>, vector<2x64xf32>
    tpu.vector_store %arg17[%c8_81, %c0_82], %205 {strides = array<i32>} : memref<32x128xf32, #tpu.memory_space<vmem>>, vector<2x64xf32>,
    %c22_83 = arith.constant 22 : index
    %c64_84 = arith.constant 64 : index
    %223 = vector.load %arg17[%c22_83, %c64_84] : memref<32x128xf32, #tpu.memory_space<vmem>>, vector<2x64xf32>
    tpu.vector_store %arg17[%c22_83, %c64_84], %221 {strides = array<i32>} : memref<32x128xf32, #tpu.memory_space<vmem>>, vector<2x64xf32>,
    %c10 = arith.constant 10 : index
    %c0_85 = arith.constant 0 : index
    %224 = vector.load %arg18[%c10, %c0_85] : memref<32x256xf32, #tpu.memory_space<vmem>>, vector<2x256xf32>
    %c0_86 = arith.constant 0 : index
    %c0_87 = arith.constant 0 : index
    %225 = vector.load %arg2[%c0_86, %c0_87] : memref<64x256xf32, #tpu.memory_space<vmem>>, vector<64x256xf32>
    %cst_88 = arith.constant dense<0.000000e+00> : vector<2x256xf32>
    %226 = tpu.matmul %205, %225, %cst_88 {dimension_numbers = #tpu.dot_dimension_numbers<[1], [0], [0], [1], [0, 0, 1, 1], [], []>} : vector<2x64xf32>, vector<64x256xf32>, vector<2x256xf32> -> vector<2x256xf32>
    %227 = arith.addf %224, %226 : vector<2x256xf32>
    %c20 = arith.constant 20 : index
    %c0_89 = arith.constant 0 : index
    %228 = vector.load %arg19[%c20, %c0_89] : memref<32x256xf32, #tpu.memory_space<vmem>>, vector<2x256xf32>
    %c0_90 = arith.constant 0 : index
    %c0_91 = arith.constant 0 : index
    %229 = vector.load %arg5[%c0_90, %c0_91] : memref<64x256xf32, #tpu.memory_space<vmem>>, vector<64x256xf32>
    %cst_92 = arith.constant dense<0.000000e+00> : vector<2x256xf32>
    %230 = tpu.matmul %221, %229, %cst_92 {dimension_numbers = #tpu.dot_dimension_numbers<[1], [0], [0], [1], [0, 0, 1, 1], [], []>} : vector<2x64xf32>, vector<64x256xf32>, vector<2x256xf32> -> vector<2x256xf32>
    %231 = arith.addf %228, %230 : vector<2x256xf32>
    %232 = vector.extract_strided_slice %227 {offsets = [0, 0], sizes = [2, 192], strides = [1, 1]} : vector<2x256xf32> to vector<2x192xf32>
    %233 = arith.negf %232 : vector<2x192xf32>
    %234 = math.exp %233 : vector<2x192xf32>
    %cst_93 = arith.constant 1.000000e+00 : f32
    %235 = vector.broadcast %cst_93 : f32 to vector<2x192xf32>
    %236 = arith.addf %235, %234 : vector<2x192xf32>
    %237 = arith.divf %235, %236 : vector<2x192xf32>
    %238 = vector.extract_strided_slice %227 {offsets = [0, 192], sizes = [2, 64], strides = [1, 1]} : vector<2x256xf32> to vector<2x64xf32>
    %239 = math.tanh %238 : vector<2x64xf32>
    %240 = vector.extract_strided_slice %237 {offsets = [0, 0], sizes = [2, 64], strides = [1, 1]} : vector<2x192xf32> to vector<2x64xf32>
    %241 = vector.extract_strided_slice %237 {offsets = [0, 64], sizes = [2, 64], strides = [1, 1]} : vector<2x192xf32> to vector<2x64xf32>
    %242 = vector.extract_strided_slice %237 {offsets = [0, 128], sizes = [2, 64], strides = [1, 1]} : vector<2x192xf32> to vector<2x64xf32>
    %243 = arith.mulf %241, %203 : vector<2x64xf32>
    %244 = arith.mulf %240, %239 : vector<2x64xf32>
    %245 = arith.addf %243, %244 : vector<2x64xf32>
    %246 = math.tanh %245 : vector<2x64xf32>
    %247 = arith.mulf %242, %246 : vector<2x64xf32>
    %248 = vector.extract_strided_slice %231 {offsets = [0, 0], sizes = [2, 192], strides = [1, 1]} : vector<2x256xf32> to vector<2x192xf32>
    %249 = arith.negf %248 : vector<2x192xf32>
    %250 = math.exp %249 : vector<2x192xf32>
    %cst_94 = arith.constant 1.000000e+00 : f32
    %251 = vector.broadcast %cst_94 : f32 to vector<2x192xf32>
    %252 = arith.addf %251, %250 : vector<2x192xf32>
    %253 = arith.divf %251, %252 : vector<2x192xf32>
    %254 = vector.extract_strided_slice %231 {offsets = [0, 192], sizes = [2, 64], strides = [1, 1]} : vector<2x256xf32> to vector<2x64xf32>
    %255 = math.tanh %254 : vector<2x64xf32>
    %256 = vector.extract_strided_slice %253 {offsets = [0, 0], sizes = [2, 64], strides = [1, 1]} : vector<2x192xf32> to vector<2x64xf32>
    %257 = vector.extract_strided_slice %253 {offsets = [0, 64], sizes = [2, 64], strides = [1, 1]} : vector<2x192xf32> to vector<2x64xf32>
    %258 = vector.extract_strided_slice %253 {offsets = [0, 128], sizes = [2, 64], strides = [1, 1]} : vector<2x192xf32> to vector<2x64xf32>
    %259 = arith.mulf %257, %219 : vector<2x64xf32>
    %260 = arith.mulf %256, %255 : vector<2x64xf32>
    %261 = arith.addf %259, %260 : vector<2x64xf32>
    %262 = math.tanh %261 : vector<2x64xf32>
    %263 = arith.mulf %258, %262 : vector<2x64xf32>
    %c10_95 = arith.constant 10 : index
    %c0_96 = arith.constant 0 : index
    %264 = vector.load %arg17[%c10_95, %c0_96] : memref<32x128xf32, #tpu.memory_space<vmem>>, vector<2x64xf32>
    tpu.vector_store %arg17[%c10_95, %c0_96], %247 {strides = array<i32>} : memref<32x128xf32, #tpu.memory_space<vmem>>, vector<2x64xf32>,
    %c20_97 = arith.constant 20 : index
    %c64_98 = arith.constant 64 : index
    %265 = vector.load %arg17[%c20_97, %c64_98] : memref<32x128xf32, #tpu.memory_space<vmem>>, vector<2x64xf32>
    tpu.vector_store %arg17[%c20_97, %c64_98], %263 {strides = array<i32>} : memref<32x128xf32, #tpu.memory_space<vmem>>, vector<2x64xf32>,
    %c12 = arith.constant 12 : index
    %c0_99 = arith.constant 0 : index
    %266 = vector.load %arg18[%c12, %c0_99] : memref<32x256xf32, #tpu.memory_space<vmem>>, vector<2x256xf32>
    %c0_100 = arith.constant 0 : index
    %c0_101 = arith.constant 0 : index
    %267 = vector.load %arg2[%c0_100, %c0_101] : memref<64x256xf32, #tpu.memory_space<vmem>>, vector<64x256xf32>
    %cst_102 = arith.constant dense<0.000000e+00> : vector<2x256xf32>
    %268 = tpu.matmul %247, %267, %cst_102 {dimension_numbers = #tpu.dot_dimension_numbers<[1], [0], [0], [1], [0, 0, 1, 1], [], []>} : vector<2x64xf32>, vector<64x256xf32>, vector<2x256xf32> -> vector<2x256xf32>
    %269 = arith.addf %266, %268 : vector<2x256xf32>
    %c18 = arith.constant 18 : index
    %c0_103 = arith.constant 0 : index
    %270 = vector.load %arg19[%c18, %c0_103] : memref<32x256xf32, #tpu.memory_space<vmem>>, vector<2x256xf32>
    %c0_104 = arith.constant 0 : index
    %c0_105 = arith.constant 0 : index
    %271 = vector.load %arg5[%c0_104, %c0_105] : memref<64x256xf32, #tpu.memory_space<vmem>>, vector<64x256xf32>
    %cst_106 = arith.constant dense<0.000000e+00> : vector<2x256xf32>
    %272 = tpu.matmul %263, %271, %cst_106 {dimension_numbers = #tpu.dot_dimension_numbers<[1], [0], [0], [1], [0, 0, 1, 1], [], []>} : vector<2x64xf32>, vector<64x256xf32>, vector<2x256xf32> -> vector<2x256xf32>
    %273 = arith.addf %270, %272 : vector<2x256xf32>
    %274 = vector.extract_strided_slice %269 {offsets = [0, 0], sizes = [2, 192], strides = [1, 1]} : vector<2x256xf32> to vector<2x192xf32>
    %275 = arith.negf %274 : vector<2x192xf32>
    %276 = math.exp %275 : vector<2x192xf32>
    %cst_107 = arith.constant 1.000000e+00 : f32
    %277 = vector.broadcast %cst_107 : f32 to vector<2x192xf32>
    %278 = arith.addf %277, %276 : vector<2x192xf32>
    %279 = arith.divf %277, %278 : vector<2x192xf32>
    %280 = vector.extract_strided_slice %269 {offsets = [0, 192], sizes = [2, 64], strides = [1, 1]} : vector<2x256xf32> to vector<2x64xf32>
    %281 = math.tanh %280 : vector<2x64xf32>
    %282 = vector.extract_strided_slice %279 {offsets = [0, 0], sizes = [2, 64], strides = [1, 1]} : vector<2x192xf32> to vector<2x64xf32>
    %283 = vector.extract_strided_slice %279 {offsets = [0, 64], sizes = [2, 64], strides = [1, 1]} : vector<2x192xf32> to vector<2x64xf32>
    %284 = vector.extract_strided_slice %279 {offsets = [0, 128], sizes = [2, 64], strides = [1, 1]} : vector<2x192xf32> to vector<2x64xf32>
    %285 = arith.mulf %283, %245 : vector<2x64xf32>
    %286 = arith.mulf %282, %281 : vector<2x64xf32>
    %287 = arith.addf %285, %286 : vector<2x64xf32>
    %288 = math.tanh %287 : vector<2x64xf32>
    %289 = arith.mulf %284, %288 : vector<2x64xf32>
    %290 = vector.extract_strided_slice %273 {offsets = [0, 0], sizes = [2, 192], strides = [1, 1]} : vector<2x256xf32> to vector<2x192xf32>
    %291 = arith.negf %290 : vector<2x192xf32>
    %292 = math.exp %291 : vector<2x192xf32>
    %cst_108 = arith.constant 1.000000e+00 : f32
    %293 = vector.broadcast %cst_108 : f32 to vector<2x192xf32>
    %294 = arith.addf %293, %292 : vector<2x192xf32>
    %295 = arith.divf %293, %294 : vector<2x192xf32>
    %296 = vector.extract_strided_slice %273 {offsets = [0, 192], sizes = [2, 64], strides = [1, 1]} : vector<2x256xf32> to vector<2x64xf32>
    %297 = math.tanh %296 : vector<2x64xf32>
    %298 = vector.extract_strided_slice %295 {offsets = [0, 0], sizes = [2, 64], strides = [1, 1]} : vector<2x192xf32> to vector<2x64xf32>
    %299 = vector.extract_strided_slice %295 {offsets = [0, 64], sizes = [2, 64], strides = [1, 1]} : vector<2x192xf32> to vector<2x64xf32>
    %300 = vector.extract_strided_slice %295 {offsets = [0, 128], sizes = [2, 64], strides = [1, 1]} : vector<2x192xf32> to vector<2x64xf32>
    %301 = arith.mulf %299, %261 : vector<2x64xf32>
    %302 = arith.mulf %298, %297 : vector<2x64xf32>
    %303 = arith.addf %301, %302 : vector<2x64xf32>
    %304 = math.tanh %303 : vector<2x64xf32>
    %305 = arith.mulf %300, %304 : vector<2x64xf32>
    %c12_109 = arith.constant 12 : index
    %c0_110 = arith.constant 0 : index
    %306 = vector.load %arg17[%c12_109, %c0_110] : memref<32x128xf32, #tpu.memory_space<vmem>>, vector<2x64xf32>
    tpu.vector_store %arg17[%c12_109, %c0_110], %289 {strides = array<i32>} : memref<32x128xf32, #tpu.memory_space<vmem>>, vector<2x64xf32>,
    %c18_111 = arith.constant 18 : index
    %c64_112 = arith.constant 64 : index
    %307 = vector.load %arg17[%c18_111, %c64_112] : memref<32x128xf32, #tpu.memory_space<vmem>>, vector<2x64xf32>
    tpu.vector_store %arg17[%c18_111, %c64_112], %305 {strides = array<i32>} : memref<32x128xf32, #tpu.memory_space<vmem>>, vector<2x64xf32>,
    %c14 = arith.constant 14 : index
    %c0_113 = arith.constant 0 : index
    %308 = vector.load %arg18[%c14, %c0_113] : memref<32x256xf32, #tpu.memory_space<vmem>>, vector<2x256xf32>
    %c0_114 = arith.constant 0 : index
    %c0_115 = arith.constant 0 : index
    %309 = vector.load %arg2[%c0_114, %c0_115] : memref<64x256xf32, #tpu.memory_space<vmem>>, vector<64x256xf32>
    %cst_116 = arith.constant dense<0.000000e+00> : vector<2x256xf32>
    %310 = tpu.matmul %289, %309, %cst_116 {dimension_numbers = #tpu.dot_dimension_numbers<[1], [0], [0], [1], [0, 0, 1, 1], [], []>} : vector<2x64xf32>, vector<64x256xf32>, vector<2x256xf32> -> vector<2x256xf32>
    %311 = arith.addf %308, %310 : vector<2x256xf32>
    %c16 = arith.constant 16 : index
    %c0_117 = arith.constant 0 : index
    %312 = vector.load %arg19[%c16, %c0_117] : memref<32x256xf32, #tpu.memory_space<vmem>>, vector<2x256xf32>
    %c0_118 = arith.constant 0 : index
    %c0_119 = arith.constant 0 : index
    %313 = vector.load %arg5[%c0_118, %c0_119] : memref<64x256xf32, #tpu.memory_space<vmem>>, vector<64x256xf32>
    %cst_120 = arith.constant dense<0.000000e+00> : vector<2x256xf32>
    %314 = tpu.matmul %305, %313, %cst_120 {dimension_numbers = #tpu.dot_dimension_numbers<[1], [0], [0], [1], [0, 0, 1, 1], [], []>} : vector<2x64xf32>, vector<64x256xf32>, vector<2x256xf32> -> vector<2x256xf32>
    %315 = arith.addf %312, %314 : vector<2x256xf32>
    %316 = vector.extract_strided_slice %311 {offsets = [0, 0], sizes = [2, 192], strides = [1, 1]} : vector<2x256xf32> to vector<2x192xf32>
    %317 = arith.negf %316 : vector<2x192xf32>
    %318 = math.exp %317 : vector<2x192xf32>
    %cst_121 = arith.constant 1.000000e+00 : f32
    %319 = vector.broadcast %cst_121 : f32 to vector<2x192xf32>
    %320 = arith.addf %319, %318 : vector<2x192xf32>
    %321 = arith.divf %319, %320 : vector<2x192xf32>
    %322 = vector.extract_strided_slice %311 {offsets = [0, 192], sizes = [2, 64], strides = [1, 1]} : vector<2x256xf32> to vector<2x64xf32>
    %323 = math.tanh %322 : vector<2x64xf32>
    %324 = vector.extract_strided_slice %321 {offsets = [0, 0], sizes = [2, 64], strides = [1, 1]} : vector<2x192xf32> to vector<2x64xf32>
    %325 = vector.extract_strided_slice %321 {offsets = [0, 64], sizes = [2, 64], strides = [1, 1]} : vector<2x192xf32> to vector<2x64xf32>
    %326 = vector.extract_strided_slice %321 {offsets = [0, 128], sizes = [2, 64], strides = [1, 1]} : vector<2x192xf32> to vector<2x64xf32>
    %327 = arith.mulf %325, %287 : vector<2x64xf32>
    %328 = arith.mulf %324, %323 : vector<2x64xf32>
    %329 = arith.addf %327, %328 : vector<2x64xf32>
    %330 = math.tanh %329 : vector<2x64xf32>
    %331 = arith.mulf %326, %330 : vector<2x64xf32>
    %332 = vector.extract_strided_slice %315 {offsets = [0, 0], sizes = [2, 192], strides = [1, 1]} : vector<2x256xf32> to vector<2x192xf32>
    %333 = arith.negf %332 : vector<2x192xf32>
    %334 = math.exp %333 : vector<2x192xf32>
    %cst_122 = arith.constant 1.000000e+00 : f32
    %335 = vector.broadcast %cst_122 : f32 to vector<2x192xf32>
    %336 = arith.addf %335, %334 : vector<2x192xf32>
    %337 = arith.divf %335, %336 : vector<2x192xf32>
    %338 = vector.extract_strided_slice %315 {offsets = [0, 192], sizes = [2, 64], strides = [1, 1]} : vector<2x256xf32> to vector<2x64xf32>
    %339 = math.tanh %338 : vector<2x64xf32>
    %340 = vector.extract_strided_slice %337 {offsets = [0, 0], sizes = [2, 64], strides = [1, 1]} : vector<2x192xf32> to vector<2x64xf32>
    %341 = vector.extract_strided_slice %337 {offsets = [0, 64], sizes = [2, 64], strides = [1, 1]} : vector<2x192xf32> to vector<2x64xf32>
    %342 = vector.extract_strided_slice %337 {offsets = [0, 128], sizes = [2, 64], strides = [1, 1]} : vector<2x192xf32> to vector<2x64xf32>
    %343 = arith.mulf %341, %303 : vector<2x64xf32>
    %344 = arith.mulf %340, %339 : vector<2x64xf32>
    %345 = arith.addf %343, %344 : vector<2x64xf32>
    %346 = math.tanh %345 : vector<2x64xf32>
    %347 = arith.mulf %342, %346 : vector<2x64xf32>
    %c14_123 = arith.constant 14 : index
    %c0_124 = arith.constant 0 : index
    %348 = vector.load %arg17[%c14_123, %c0_124] : memref<32x128xf32, #tpu.memory_space<vmem>>, vector<2x64xf32>
    tpu.vector_store %arg17[%c14_123, %c0_124], %331 {strides = array<i32>} : memref<32x128xf32, #tpu.memory_space<vmem>>, vector<2x64xf32>,
    %c16_125 = arith.constant 16 : index
    %c64_126 = arith.constant 64 : index
    %349 = vector.load %arg17[%c16_125, %c64_126] : memref<32x128xf32, #tpu.memory_space<vmem>>, vector<2x64xf32>
    tpu.vector_store %arg17[%c16_125, %c64_126], %347 {strides = array<i32>} : memref<32x128xf32, #tpu.memory_space<vmem>>, vector<2x64xf32>,
    %c16_127 = arith.constant 16 : index
    %c0_128 = arith.constant 0 : index
    %350 = vector.load %arg18[%c16_127, %c0_128] : memref<32x256xf32, #tpu.memory_space<vmem>>, vector<2x256xf32>
    %c0_129 = arith.constant 0 : index
    %c0_130 = arith.constant 0 : index
    %351 = vector.load %arg2[%c0_129, %c0_130] : memref<64x256xf32, #tpu.memory_space<vmem>>, vector<64x256xf32>
    %cst_131 = arith.constant dense<0.000000e+00> : vector<2x256xf32>
    %352 = tpu.matmul %331, %351, %cst_131 {dimension_numbers = #tpu.dot_dimension_numbers<[1], [0], [0], [1], [0, 0, 1, 1], [], []>} : vector<2x64xf32>, vector<64x256xf32>, vector<2x256xf32> -> vector<2x256xf32>
    %353 = arith.addf %350, %352 : vector<2x256xf32>
    %c14_132 = arith.constant 14 : index
    %c0_133 = arith.constant 0 : index
    %354 = vector.load %arg19[%c14_132, %c0_133] : memref<32x256xf32, #tpu.memory_space<vmem>>, vector<2x256xf32>
    %c0_134 = arith.constant 0 : index
    %c0_135 = arith.constant 0 : index
    %355 = vector.load %arg5[%c0_134, %c0_135] : memref<64x256xf32, #tpu.memory_space<vmem>>, vector<64x256xf32>
    %cst_136 = arith.constant dense<0.000000e+00> : vector<2x256xf32>
    %356 = tpu.matmul %347, %355, %cst_136 {dimension_numbers = #tpu.dot_dimension_numbers<[1], [0], [0], [1], [0, 0, 1, 1], [], []>} : vector<2x64xf32>, vector<64x256xf32>, vector<2x256xf32> -> vector<2x256xf32>
    %357 = arith.addf %354, %356 : vector<2x256xf32>
    %358 = vector.extract_strided_slice %353 {offsets = [0, 0], sizes = [2, 192], strides = [1, 1]} : vector<2x256xf32> to vector<2x192xf32>
    %359 = arith.negf %358 : vector<2x192xf32>
    %360 = math.exp %359 : vector<2x192xf32>
    %cst_137 = arith.constant 1.000000e+00 : f32
    %361 = vector.broadcast %cst_137 : f32 to vector<2x192xf32>
    %362 = arith.addf %361, %360 : vector<2x192xf32>
    %363 = arith.divf %361, %362 : vector<2x192xf32>
    %364 = vector.extract_strided_slice %353 {offsets = [0, 192], sizes = [2, 64], strides = [1, 1]} : vector<2x256xf32> to vector<2x64xf32>
    %365 = math.tanh %364 : vector<2x64xf32>
    %366 = vector.extract_strided_slice %363 {offsets = [0, 0], sizes = [2, 64], strides = [1, 1]} : vector<2x192xf32> to vector<2x64xf32>
    %367 = vector.extract_strided_slice %363 {offsets = [0, 64], sizes = [2, 64], strides = [1, 1]} : vector<2x192xf32> to vector<2x64xf32>
    %368 = vector.extract_strided_slice %363 {offsets = [0, 128], sizes = [2, 64], strides = [1, 1]} : vector<2x192xf32> to vector<2x64xf32>
    %369 = arith.mulf %367, %329 : vector<2x64xf32>
    %370 = arith.mulf %366, %365 : vector<2x64xf32>
    %371 = arith.addf %369, %370 : vector<2x64xf32>
    %372 = math.tanh %371 : vector<2x64xf32>
    %373 = arith.mulf %368, %372 : vector<2x64xf32>
    %374 = vector.extract_strided_slice %357 {offsets = [0, 0], sizes = [2, 192], strides = [1, 1]} : vector<2x256xf32> to vector<2x192xf32>
    %375 = arith.negf %374 : vector<2x192xf32>
    %376 = math.exp %375 : vector<2x192xf32>
    %cst_138 = arith.constant 1.000000e+00 : f32
    %377 = vector.broadcast %cst_138 : f32 to vector<2x192xf32>
    %378 = arith.addf %377, %376 : vector<2x192xf32>
    %379 = arith.divf %377, %378 : vector<2x192xf32>
    %380 = vector.extract_strided_slice %357 {offsets = [0, 192], sizes = [2, 64], strides = [1, 1]} : vector<2x256xf32> to vector<2x64xf32>
    %381 = math.tanh %380 : vector<2x64xf32>
    %382 = vector.extract_strided_slice %379 {offsets = [0, 0], sizes = [2, 64], strides = [1, 1]} : vector<2x192xf32> to vector<2x64xf32>
    %383 = vector.extract_strided_slice %379 {offsets = [0, 64], sizes = [2, 64], strides = [1, 1]} : vector<2x192xf32> to vector<2x64xf32>
    %384 = vector.extract_strided_slice %379 {offsets = [0, 128], sizes = [2, 64], strides = [1, 1]} : vector<2x192xf32> to vector<2x64xf32>
    %385 = arith.mulf %383, %345 : vector<2x64xf32>
    %386 = arith.mulf %382, %381 : vector<2x64xf32>
    %387 = arith.addf %385, %386 : vector<2x64xf32>
    %388 = math.tanh %387 : vector<2x64xf32>
    %389 = arith.mulf %384, %388 : vector<2x64xf32>
    %c16_139 = arith.constant 16 : index
    %c0_140 = arith.constant 0 : index
    %390 = vector.load %arg17[%c16_139, %c0_140] : memref<32x128xf32, #tpu.memory_space<vmem>>, vector<2x64xf32>
    tpu.vector_store %arg17[%c16_139, %c0_140], %373 {strides = array<i32>} : memref<32x128xf32, #tpu.memory_space<vmem>>, vector<2x64xf32>,
    %c14_141 = arith.constant 14 : index
    %c64_142 = arith.constant 64 : index
    %391 = vector.load %arg17[%c14_141, %c64_142] : memref<32x128xf32, #tpu.memory_space<vmem>>, vector<2x64xf32>
    tpu.vector_store %arg17[%c14_141, %c64_142], %389 {strides = array<i32>} : memref<32x128xf32, #tpu.memory_space<vmem>>, vector<2x64xf32>,
    %c18_143 = arith.constant 18 : index
    %c0_144 = arith.constant 0 : index
    %392 = vector.load %arg18[%c18_143, %c0_144] : memref<32x256xf32, #tpu.memory_space<vmem>>, vector<2x256xf32>
    %c0_145 = arith.constant 0 : index
    %c0_146 = arith.constant 0 : index
    %393 = vector.load %arg2[%c0_145, %c0_146] : memref<64x256xf32, #tpu.memory_space<vmem>>, vector<64x256xf32>
    %cst_147 = arith.constant dense<0.000000e+00> : vector<2x256xf32>
    %394 = tpu.matmul %373, %393, %cst_147 {dimension_numbers = #tpu.dot_dimension_numbers<[1], [0], [0], [1], [0, 0, 1, 1], [], []>} : vector<2x64xf32>, vector<64x256xf32>, vector<2x256xf32> -> vector<2x256xf32>
    %395 = arith.addf %392, %394 : vector<2x256xf32>
    %c12_148 = arith.constant 12 : index
    %c0_149 = arith.constant 0 : index
    %396 = vector.load %arg19[%c12_148, %c0_149] : memref<32x256xf32, #tpu.memory_space<vmem>>, vector<2x256xf32>
    %c0_150 = arith.constant 0 : index
    %c0_151 = arith.constant 0 : index
    %397 = vector.load %arg5[%c0_150, %c0_151] : memref<64x256xf32, #tpu.memory_space<vmem>>, vector<64x256xf32>
    %cst_152 = arith.constant dense<0.000000e+00> : vector<2x256xf32>
    %398 = tpu.matmul %389, %397, %cst_152 {dimension_numbers = #tpu.dot_dimension_numbers<[1], [0], [0], [1], [0, 0, 1, 1], [], []>} : vector<2x64xf32>, vector<64x256xf32>, vector<2x256xf32> -> vector<2x256xf32>
    %399 = arith.addf %396, %398 : vector<2x256xf32>
    %400 = vector.extract_strided_slice %395 {offsets = [0, 0], sizes = [2, 192], strides = [1, 1]} : vector<2x256xf32> to vector<2x192xf32>
    %401 = arith.negf %400 : vector<2x192xf32>
    %402 = math.exp %401 : vector<2x192xf32>
    %cst_153 = arith.constant 1.000000e+00 : f32
    %403 = vector.broadcast %cst_153 : f32 to vector<2x192xf32>
    %404 = arith.addf %403, %402 : vector<2x192xf32>
    %405 = arith.divf %403, %404 : vector<2x192xf32>
    %406 = vector.extract_strided_slice %395 {offsets = [0, 192], sizes = [2, 64], strides = [1, 1]} : vector<2x256xf32> to vector<2x64xf32>
    %407 = math.tanh %406 : vector<2x64xf32>
    %408 = vector.extract_strided_slice %405 {offsets = [0, 0], sizes = [2, 64], strides = [1, 1]} : vector<2x192xf32> to vector<2x64xf32>
    %409 = vector.extract_strided_slice %405 {offsets = [0, 64], sizes = [2, 64], strides = [1, 1]} : vector<2x192xf32> to vector<2x64xf32>
    %410 = vector.extract_strided_slice %405 {offsets = [0, 128], sizes = [2, 64], strides = [1, 1]} : vector<2x192xf32> to vector<2x64xf32>
    %411 = arith.mulf %409, %371 : vector<2x64xf32>
    %412 = arith.mulf %408, %407 : vector<2x64xf32>
    %413 = arith.addf %411, %412 : vector<2x64xf32>
    %414 = math.tanh %413 : vector<2x64xf32>
    %415 = arith.mulf %410, %414 : vector<2x64xf32>
    %416 = vector.extract_strided_slice %399 {offsets = [0, 0], sizes = [2, 192], strides = [1, 1]} : vector<2x256xf32> to vector<2x192xf32>
    %417 = arith.negf %416 : vector<2x192xf32>
    %418 = math.exp %417 : vector<2x192xf32>
    %cst_154 = arith.constant 1.000000e+00 : f32
    %419 = vector.broadcast %cst_154 : f32 to vector<2x192xf32>
    %420 = arith.addf %419, %418 : vector<2x192xf32>
    %421 = arith.divf %419, %420 : vector<2x192xf32>
    %422 = vector.extract_strided_slice %399 {offsets = [0, 192], sizes = [2, 64], strides = [1, 1]} : vector<2x256xf32> to vector<2x64xf32>
    %423 = math.tanh %422 : vector<2x64xf32>
    %424 = vector.extract_strided_slice %421 {offsets = [0, 0], sizes = [2, 64], strides = [1, 1]} : vector<2x192xf32> to vector<2x64xf32>
    %425 = vector.extract_strided_slice %421 {offsets = [0, 64], sizes = [2, 64], strides = [1, 1]} : vector<2x192xf32> to vector<2x64xf32>
    %426 = vector.extract_strided_slice %421 {offsets = [0, 128], sizes = [2, 64], strides = [1, 1]} : vector<2x192xf32> to vector<2x64xf32>
    %427 = arith.mulf %425, %387 : vector<2x64xf32>
    %428 = arith.mulf %424, %423 : vector<2x64xf32>
    %429 = arith.addf %427, %428 : vector<2x64xf32>
    %430 = math.tanh %429 : vector<2x64xf32>
    %431 = arith.mulf %426, %430 : vector<2x64xf32>
    %c18_155 = arith.constant 18 : index
    %c0_156 = arith.constant 0 : index
    %432 = vector.load %arg17[%c18_155, %c0_156] : memref<32x128xf32, #tpu.memory_space<vmem>>, vector<2x64xf32>
    tpu.vector_store %arg17[%c18_155, %c0_156], %415 {strides = array<i32>} : memref<32x128xf32, #tpu.memory_space<vmem>>, vector<2x64xf32>,
    %c12_157 = arith.constant 12 : index
    %c64_158 = arith.constant 64 : index
    %433 = vector.load %arg17[%c12_157, %c64_158] : memref<32x128xf32, #tpu.memory_space<vmem>>, vector<2x64xf32>
    tpu.vector_store %arg17[%c12_157, %c64_158], %431 {strides = array<i32>} : memref<32x128xf32, #tpu.memory_space<vmem>>, vector<2x64xf32>,
    %c20_159 = arith.constant 20 : index
    %c0_160 = arith.constant 0 : index
    %434 = vector.load %arg18[%c20_159, %c0_160] : memref<32x256xf32, #tpu.memory_space<vmem>>, vector<2x256xf32>
    %c0_161 = arith.constant 0 : index
    %c0_162 = arith.constant 0 : index
    %435 = vector.load %arg2[%c0_161, %c0_162] : memref<64x256xf32, #tpu.memory_space<vmem>>, vector<64x256xf32>
    %cst_163 = arith.constant dense<0.000000e+00> : vector<2x256xf32>
    %436 = tpu.matmul %415, %435, %cst_163 {dimension_numbers = #tpu.dot_dimension_numbers<[1], [0], [0], [1], [0, 0, 1, 1], [], []>} : vector<2x64xf32>, vector<64x256xf32>, vector<2x256xf32> -> vector<2x256xf32>
    %437 = arith.addf %434, %436 : vector<2x256xf32>
    %c10_164 = arith.constant 10 : index
    %c0_165 = arith.constant 0 : index
    %438 = vector.load %arg19[%c10_164, %c0_165] : memref<32x256xf32, #tpu.memory_space<vmem>>, vector<2x256xf32>
    %c0_166 = arith.constant 0 : index
    %c0_167 = arith.constant 0 : index
    %439 = vector.load %arg5[%c0_166, %c0_167] : memref<64x256xf32, #tpu.memory_space<vmem>>, vector<64x256xf32>
    %cst_168 = arith.constant dense<0.000000e+00> : vector<2x256xf32>
    %440 = tpu.matmul %431, %439, %cst_168 {dimension_numbers = #tpu.dot_dimension_numbers<[1], [0], [0], [1], [0, 0, 1, 1], [], []>} : vector<2x64xf32>, vector<64x256xf32>, vector<2x256xf32> -> vector<2x256xf32>
    %441 = arith.addf %438, %440 : vector<2x256xf32>
    %442 = vector.extract_strided_slice %437 {offsets = [0, 0], sizes = [2, 192], strides = [1, 1]} : vector<2x256xf32> to vector<2x192xf32>
    %443 = arith.negf %442 : vector<2x192xf32>
    %444 = math.exp %443 : vector<2x192xf32>
    %cst_169 = arith.constant 1.000000e+00 : f32
    %445 = vector.broadcast %cst_169 : f32 to vector<2x192xf32>
    %446 = arith.addf %445, %444 : vector<2x192xf32>
    %447 = arith.divf %445, %446 : vector<2x192xf32>
    %448 = vector.extract_strided_slice %437 {offsets = [0, 192], sizes = [2, 64], strides = [1, 1]} : vector<2x256xf32> to vector<2x64xf32>
    %449 = math.tanh %448 : vector<2x64xf32>
    %450 = vector.extract_strided_slice %447 {offsets = [0, 0], sizes = [2, 64], strides = [1, 1]} : vector<2x192xf32> to vector<2x64xf32>
    %451 = vector.extract_strided_slice %447 {offsets = [0, 64], sizes = [2, 64], strides = [1, 1]} : vector<2x192xf32> to vector<2x64xf32>
    %452 = vector.extract_strided_slice %447 {offsets = [0, 128], sizes = [2, 64], strides = [1, 1]} : vector<2x192xf32> to vector<2x64xf32>
    %453 = arith.mulf %451, %413 : vector<2x64xf32>
    %454 = arith.mulf %450, %449 : vector<2x64xf32>
    %455 = arith.addf %453, %454 : vector<2x64xf32>
    %456 = math.tanh %455 : vector<2x64xf32>
    %457 = arith.mulf %452, %456 : vector<2x64xf32>
    %458 = vector.extract_strided_slice %441 {offsets = [0, 0], sizes = [2, 192], strides = [1, 1]} : vector<2x256xf32> to vector<2x192xf32>
    %459 = arith.negf %458 : vector<2x192xf32>
    %460 = math.exp %459 : vector<2x192xf32>
    %cst_170 = arith.constant 1.000000e+00 : f32
    %461 = vector.broadcast %cst_170 : f32 to vector<2x192xf32>
    %462 = arith.addf %461, %460 : vector<2x192xf32>
    %463 = arith.divf %461, %462 : vector<2x192xf32>
    %464 = vector.extract_strided_slice %441 {offsets = [0, 192], sizes = [2, 64], strides = [1, 1]} : vector<2x256xf32> to vector<2x64xf32>
    %465 = math.tanh %464 : vector<2x64xf32>
    %466 = vector.extract_strided_slice %463 {offsets = [0, 0], sizes = [2, 64], strides = [1, 1]} : vector<2x192xf32> to vector<2x64xf32>
    %467 = vector.extract_strided_slice %463 {offsets = [0, 64], sizes = [2, 64], strides = [1, 1]} : vector<2x192xf32> to vector<2x64xf32>
    %468 = vector.extract_strided_slice %463 {offsets = [0, 128], sizes = [2, 64], strides = [1, 1]} : vector<2x192xf32> to vector<2x64xf32>
    %469 = arith.mulf %467, %429 : vector<2x64xf32>
    %470 = arith.mulf %466, %465 : vector<2x64xf32>
    %471 = arith.addf %469, %470 : vector<2x64xf32>
    %472 = math.tanh %471 : vector<2x64xf32>
    %473 = arith.mulf %468, %472 : vector<2x64xf32>
    %c20_171 = arith.constant 20 : index
    %c0_172 = arith.constant 0 : index
    %474 = vector.load %arg17[%c20_171, %c0_172] : memref<32x128xf32, #tpu.memory_space<vmem>>, vector<2x64xf32>
    tpu.vector_store %arg17[%c20_171, %c0_172], %457 {strides = array<i32>} : memref<32x128xf32, #tpu.memory_space<vmem>>, vector<2x64xf32>,
    %c10_173 = arith.constant 10 : index
    %c64_174 = arith.constant 64 : index
    %475 = vector.load %arg17[%c10_173, %c64_174] : memref<32x128xf32, #tpu.memory_space<vmem>>, vector<2x64xf32>
    tpu.vector_store %arg17[%c10_173, %c64_174], %473 {strides = array<i32>} : memref<32x128xf32, #tpu.memory_space<vmem>>, vector<2x64xf32>,
    %c22_175 = arith.constant 22 : index
    %c0_176 = arith.constant 0 : index
    %476 = vector.load %arg18[%c22_175, %c0_176] : memref<32x256xf32, #tpu.memory_space<vmem>>, vector<2x256xf32>
    %c0_177 = arith.constant 0 : index
    %c0_178 = arith.constant 0 : index
    %477 = vector.load %arg2[%c0_177, %c0_178] : memref<64x256xf32, #tpu.memory_space<vmem>>, vector<64x256xf32>
    %cst_179 = arith.constant dense<0.000000e+00> : vector<2x256xf32>
    %478 = tpu.matmul %457, %477, %cst_179 {dimension_numbers = #tpu.dot_dimension_numbers<[1], [0], [0], [1], [0, 0, 1, 1], [], []>} : vector<2x64xf32>, vector<64x256xf32>, vector<2x256xf32> -> vector<2x256xf32>
    %479 = arith.addf %476, %478 : vector<2x256xf32>
    %c8_180 = arith.constant 8 : index
    %c0_181 = arith.constant 0 : index
    %480 = vector.load %arg19[%c8_180, %c0_181] : memref<32x256xf32, #tpu.memory_space<vmem>>, vector<2x256xf32>
    %c0_182 = arith.constant 0 : index
    %c0_183 = arith.constant 0 : index
    %481 = vector.load %arg5[%c0_182, %c0_183] : memref<64x256xf32, #tpu.memory_space<vmem>>, vector<64x256xf32>
    %cst_184 = arith.constant dense<0.000000e+00> : vector<2x256xf32>
    %482 = tpu.matmul %473, %481, %cst_184 {dimension_numbers = #tpu.dot_dimension_numbers<[1], [0], [0], [1], [0, 0, 1, 1], [], []>} : vector<2x64xf32>, vector<64x256xf32>, vector<2x256xf32> -> vector<2x256xf32>
    %483 = arith.addf %480, %482 : vector<2x256xf32>
    %484 = vector.extract_strided_slice %479 {offsets = [0, 0], sizes = [2, 192], strides = [1, 1]} : vector<2x256xf32> to vector<2x192xf32>
    %485 = arith.negf %484 : vector<2x192xf32>
    %486 = math.exp %485 : vector<2x192xf32>
    %cst_185 = arith.constant 1.000000e+00 : f32
    %487 = vector.broadcast %cst_185 : f32 to vector<2x192xf32>
    %488 = arith.addf %487, %486 : vector<2x192xf32>
    %489 = arith.divf %487, %488 : vector<2x192xf32>
    %490 = vector.extract_strided_slice %479 {offsets = [0, 192], sizes = [2, 64], strides = [1, 1]} : vector<2x256xf32> to vector<2x64xf32>
    %491 = math.tanh %490 : vector<2x64xf32>
    %492 = vector.extract_strided_slice %489 {offsets = [0, 0], sizes = [2, 64], strides = [1, 1]} : vector<2x192xf32> to vector<2x64xf32>
    %493 = vector.extract_strided_slice %489 {offsets = [0, 64], sizes = [2, 64], strides = [1, 1]} : vector<2x192xf32> to vector<2x64xf32>
    %494 = vector.extract_strided_slice %489 {offsets = [0, 128], sizes = [2, 64], strides = [1, 1]} : vector<2x192xf32> to vector<2x64xf32>
    %495 = arith.mulf %493, %455 : vector<2x64xf32>
    %496 = arith.mulf %492, %491 : vector<2x64xf32>
    %497 = arith.addf %495, %496 : vector<2x64xf32>
    %498 = math.tanh %497 : vector<2x64xf32>
    %499 = arith.mulf %494, %498 : vector<2x64xf32>
    %500 = vector.extract_strided_slice %483 {offsets = [0, 0], sizes = [2, 192], strides = [1, 1]} : vector<2x256xf32> to vector<2x192xf32>
    %501 = arith.negf %500 : vector<2x192xf32>
    %502 = math.exp %501 : vector<2x192xf32>
    %cst_186 = arith.constant 1.000000e+00 : f32
    %503 = vector.broadcast %cst_186 : f32 to vector<2x192xf32>
    %504 = arith.addf %503, %502 : vector<2x192xf32>
    %505 = arith.divf %503, %504 : vector<2x192xf32>
    %506 = vector.extract_strided_slice %483 {offsets = [0, 192], sizes = [2, 64], strides = [1, 1]} : vector<2x256xf32> to vector<2x64xf32>
    %507 = math.tanh %506 : vector<2x64xf32>
    %508 = vector.extract_strided_slice %505 {offsets = [0, 0], sizes = [2, 64], strides = [1, 1]} : vector<2x192xf32> to vector<2x64xf32>
    %509 = vector.extract_strided_slice %505 {offsets = [0, 64], sizes = [2, 64], strides = [1, 1]} : vector<2x192xf32> to vector<2x64xf32>
    %510 = vector.extract_strided_slice %505 {offsets = [0, 128], sizes = [2, 64], strides = [1, 1]} : vector<2x192xf32> to vector<2x64xf32>
    %511 = arith.mulf %509, %471 : vector<2x64xf32>
    %512 = arith.mulf %508, %507 : vector<2x64xf32>
    %513 = arith.addf %511, %512 : vector<2x64xf32>
    %514 = math.tanh %513 : vector<2x64xf32>
    %515 = arith.mulf %510, %514 : vector<2x64xf32>
    %c22_187 = arith.constant 22 : index
    %c0_188 = arith.constant 0 : index
    %516 = vector.load %arg17[%c22_187, %c0_188] : memref<32x128xf32, #tpu.memory_space<vmem>>, vector<2x64xf32>
    tpu.vector_store %arg17[%c22_187, %c0_188], %499 {strides = array<i32>} : memref<32x128xf32, #tpu.memory_space<vmem>>, vector<2x64xf32>,
    %c8_189 = arith.constant 8 : index
    %c64_190 = arith.constant 64 : index
    %517 = vector.load %arg17[%c8_189, %c64_190] : memref<32x128xf32, #tpu.memory_space<vmem>>, vector<2x64xf32>
    tpu.vector_store %arg17[%c8_189, %c64_190], %515 {strides = array<i32>} : memref<32x128xf32, #tpu.memory_space<vmem>>, vector<2x64xf32>,
    %c24_191 = arith.constant 24 : index
    %c0_192 = arith.constant 0 : index
    %518 = vector.load %arg18[%c24_191, %c0_192] : memref<32x256xf32, #tpu.memory_space<vmem>>, vector<2x256xf32>
    %c0_193 = arith.constant 0 : index
    %c0_194 = arith.constant 0 : index
    %519 = vector.load %arg2[%c0_193, %c0_194] : memref<64x256xf32, #tpu.memory_space<vmem>>, vector<64x256xf32>
    %cst_195 = arith.constant dense<0.000000e+00> : vector<2x256xf32>
    %520 = tpu.matmul %499, %519, %cst_195 {dimension_numbers = #tpu.dot_dimension_numbers<[1], [0], [0], [1], [0, 0, 1, 1], [], []>} : vector<2x64xf32>, vector<64x256xf32>, vector<2x256xf32> -> vector<2x256xf32>
    %521 = arith.addf %518, %520 : vector<2x256xf32>
    %c6_196 = arith.constant 6 : index
    %c0_197 = arith.constant 0 : index
    %522 = vector.load %arg19[%c6_196, %c0_197] : memref<32x256xf32, #tpu.memory_space<vmem>>, vector<2x256xf32>
    %c0_198 = arith.constant 0 : index
    %c0_199 = arith.constant 0 : index
    %523 = vector.load %arg5[%c0_198, %c0_199] : memref<64x256xf32, #tpu.memory_space<vmem>>, vector<64x256xf32>
    %cst_200 = arith.constant dense<0.000000e+00> : vector<2x256xf32>
    %524 = tpu.matmul %515, %523, %cst_200 {dimension_numbers = #tpu.dot_dimension_numbers<[1], [0], [0], [1], [0, 0, 1, 1], [], []>} : vector<2x64xf32>, vector<64x256xf32>, vector<2x256xf32> -> vector<2x256xf32>
    %525 = arith.addf %522, %524 : vector<2x256xf32>
    %526 = vector.extract_strided_slice %521 {offsets = [0, 0], sizes = [2, 192], strides = [1, 1]} : vector<2x256xf32> to vector<2x192xf32>
    %527 = arith.negf %526 : vector<2x192xf32>
    %528 = math.exp %527 : vector<2x192xf32>
    %cst_201 = arith.constant 1.000000e+00 : f32
    %529 = vector.broadcast %cst_201 : f32 to vector<2x192xf32>
    %530 = arith.addf %529, %528 : vector<2x192xf32>
    %531 = arith.divf %529, %530 : vector<2x192xf32>
    %532 = vector.extract_strided_slice %521 {offsets = [0, 192], sizes = [2, 64], strides = [1, 1]} : vector<2x256xf32> to vector<2x64xf32>
    %533 = math.tanh %532 : vector<2x64xf32>
    %534 = vector.extract_strided_slice %531 {offsets = [0, 0], sizes = [2, 64], strides = [1, 1]} : vector<2x192xf32> to vector<2x64xf32>
    %535 = vector.extract_strided_slice %531 {offsets = [0, 64], sizes = [2, 64], strides = [1, 1]} : vector<2x192xf32> to vector<2x64xf32>
    %536 = vector.extract_strided_slice %531 {offsets = [0, 128], sizes = [2, 64], strides = [1, 1]} : vector<2x192xf32> to vector<2x64xf32>
    %537 = arith.mulf %535, %497 : vector<2x64xf32>
    %538 = arith.mulf %534, %533 : vector<2x64xf32>
    %539 = arith.addf %537, %538 : vector<2x64xf32>
    %540 = math.tanh %539 : vector<2x64xf32>
    %541 = arith.mulf %536, %540 : vector<2x64xf32>
    %542 = vector.extract_strided_slice %525 {offsets = [0, 0], sizes = [2, 192], strides = [1, 1]} : vector<2x256xf32> to vector<2x192xf32>
    %543 = arith.negf %542 : vector<2x192xf32>
    %544 = math.exp %543 : vector<2x192xf32>
    %cst_202 = arith.constant 1.000000e+00 : f32
    %545 = vector.broadcast %cst_202 : f32 to vector<2x192xf32>
    %546 = arith.addf %545, %544 : vector<2x192xf32>
    %547 = arith.divf %545, %546 : vector<2x192xf32>
    %548 = vector.extract_strided_slice %525 {offsets = [0, 192], sizes = [2, 64], strides = [1, 1]} : vector<2x256xf32> to vector<2x64xf32>
    %549 = math.tanh %548 : vector<2x64xf32>
    %550 = vector.extract_strided_slice %547 {offsets = [0, 0], sizes = [2, 64], strides = [1, 1]} : vector<2x192xf32> to vector<2x64xf32>
    %551 = vector.extract_strided_slice %547 {offsets = [0, 64], sizes = [2, 64], strides = [1, 1]} : vector<2x192xf32> to vector<2x64xf32>
    %552 = vector.extract_strided_slice %547 {offsets = [0, 128], sizes = [2, 64], strides = [1, 1]} : vector<2x192xf32> to vector<2x64xf32>
    %553 = arith.mulf %551, %513 : vector<2x64xf32>
    %554 = arith.mulf %550, %549 : vector<2x64xf32>
    %555 = arith.addf %553, %554 : vector<2x64xf32>
    %556 = math.tanh %555 : vector<2x64xf32>
    %557 = arith.mulf %552, %556 : vector<2x64xf32>
    %c24_203 = arith.constant 24 : index
    %c0_204 = arith.constant 0 : index
    %558 = vector.load %arg17[%c24_203, %c0_204] : memref<32x128xf32, #tpu.memory_space<vmem>>, vector<2x64xf32>
    tpu.vector_store %arg17[%c24_203, %c0_204], %541 {strides = array<i32>} : memref<32x128xf32, #tpu.memory_space<vmem>>, vector<2x64xf32>,
    %c6_205 = arith.constant 6 : index
    %c64_206 = arith.constant 64 : index
    %559 = vector.load %arg17[%c6_205, %c64_206] : memref<32x128xf32, #tpu.memory_space<vmem>>, vector<2x64xf32>
    tpu.vector_store %arg17[%c6_205, %c64_206], %557 {strides = array<i32>} : memref<32x128xf32, #tpu.memory_space<vmem>>, vector<2x64xf32>,
    %c26_207 = arith.constant 26 : index
    %c0_208 = arith.constant 0 : index
    %560 = vector.load %arg18[%c26_207, %c0_208] : memref<32x256xf32, #tpu.memory_space<vmem>>, vector<2x256xf32>
    %c0_209 = arith.constant 0 : index
    %c0_210 = arith.constant 0 : index
    %561 = vector.load %arg2[%c0_209, %c0_210] : memref<64x256xf32, #tpu.memory_space<vmem>>, vector<64x256xf32>
    %cst_211 = arith.constant dense<0.000000e+00> : vector<2x256xf32>
    %562 = tpu.matmul %541, %561, %cst_211 {dimension_numbers = #tpu.dot_dimension_numbers<[1], [0], [0], [1], [0, 0, 1, 1], [], []>} : vector<2x64xf32>, vector<64x256xf32>, vector<2x256xf32> -> vector<2x256xf32>
    %563 = arith.addf %560, %562 : vector<2x256xf32>
    %c4_212 = arith.constant 4 : index
    %c0_213 = arith.constant 0 : index
    %564 = vector.load %arg19[%c4_212, %c0_213] : memref<32x256xf32, #tpu.memory_space<vmem>>, vector<2x256xf32>
    %c0_214 = arith.constant 0 : index
    %c0_215 = arith.constant 0 : index
    %565 = vector.load %arg5[%c0_214, %c0_215] : memref<64x256xf32, #tpu.memory_space<vmem>>, vector<64x256xf32>
    %cst_216 = arith.constant dense<0.000000e+00> : vector<2x256xf32>
    %566 = tpu.matmul %557, %565, %cst_216 {dimension_numbers = #tpu.dot_dimension_numbers<[1], [0], [0], [1], [0, 0, 1, 1], [], []>} : vector<2x64xf32>, vector<64x256xf32>, vector<2x256xf32> -> vector<2x256xf32>
    %567 = arith.addf %564, %566 : vector<2x256xf32>
    %568 = vector.extract_strided_slice %563 {offsets = [0, 0], sizes = [2, 192], strides = [1, 1]} : vector<2x256xf32> to vector<2x192xf32>
    %569 = arith.negf %568 : vector<2x192xf32>
    %570 = math.exp %569 : vector<2x192xf32>
    %cst_217 = arith.constant 1.000000e+00 : f32
    %571 = vector.broadcast %cst_217 : f32 to vector<2x192xf32>
    %572 = arith.addf %571, %570 : vector<2x192xf32>
    %573 = arith.divf %571, %572 : vector<2x192xf32>
    %574 = vector.extract_strided_slice %563 {offsets = [0, 192], sizes = [2, 64], strides = [1, 1]} : vector<2x256xf32> to vector<2x64xf32>
    %575 = math.tanh %574 : vector<2x64xf32>
    %576 = vector.extract_strided_slice %573 {offsets = [0, 0], sizes = [2, 64], strides = [1, 1]} : vector<2x192xf32> to vector<2x64xf32>
    %577 = vector.extract_strided_slice %573 {offsets = [0, 64], sizes = [2, 64], strides = [1, 1]} : vector<2x192xf32> to vector<2x64xf32>
    %578 = vector.extract_strided_slice %573 {offsets = [0, 128], sizes = [2, 64], strides = [1, 1]} : vector<2x192xf32> to vector<2x64xf32>
    %579 = arith.mulf %577, %539 : vector<2x64xf32>
    %580 = arith.mulf %576, %575 : vector<2x64xf32>
    %581 = arith.addf %579, %580 : vector<2x64xf32>
    %582 = math.tanh %581 : vector<2x64xf32>
    %583 = arith.mulf %578, %582 : vector<2x64xf32>
    %584 = vector.extract_strided_slice %567 {offsets = [0, 0], sizes = [2, 192], strides = [1, 1]} : vector<2x256xf32> to vector<2x192xf32>
    %585 = arith.negf %584 : vector<2x192xf32>
    %586 = math.exp %585 : vector<2x192xf32>
    %cst_218 = arith.constant 1.000000e+00 : f32
    %587 = vector.broadcast %cst_218 : f32 to vector<2x192xf32>
    %588 = arith.addf %587, %586 : vector<2x192xf32>
    %589 = arith.divf %587, %588 : vector<2x192xf32>
    %590 = vector.extract_strided_slice %567 {offsets = [0, 192], sizes = [2, 64], strides = [1, 1]} : vector<2x256xf32> to vector<2x64xf32>
    %591 = math.tanh %590 : vector<2x64xf32>
    %592 = vector.extract_strided_slice %589 {offsets = [0, 0], sizes = [2, 64], strides = [1, 1]} : vector<2x192xf32> to vector<2x64xf32>
    %593 = vector.extract_strided_slice %589 {offsets = [0, 64], sizes = [2, 64], strides = [1, 1]} : vector<2x192xf32> to vector<2x64xf32>
    %594 = vector.extract_strided_slice %589 {offsets = [0, 128], sizes = [2, 64], strides = [1, 1]} : vector<2x192xf32> to vector<2x64xf32>
    %595 = arith.mulf %593, %555 : vector<2x64xf32>
    %596 = arith.mulf %592, %591 : vector<2x64xf32>
    %597 = arith.addf %595, %596 : vector<2x64xf32>
    %598 = math.tanh %597 : vector<2x64xf32>
    %599 = arith.mulf %594, %598 : vector<2x64xf32>
    %c26_219 = arith.constant 26 : index
    %c0_220 = arith.constant 0 : index
    %600 = vector.load %arg17[%c26_219, %c0_220] : memref<32x128xf32, #tpu.memory_space<vmem>>, vector<2x64xf32>
    tpu.vector_store %arg17[%c26_219, %c0_220], %583 {strides = array<i32>} : memref<32x128xf32, #tpu.memory_space<vmem>>, vector<2x64xf32>,
    %c4_221 = arith.constant 4 : index
    %c64_222 = arith.constant 64 : index
    %601 = vector.load %arg17[%c4_221, %c64_222] : memref<32x128xf32, #tpu.memory_space<vmem>>, vector<2x64xf32>
    tpu.vector_store %arg17[%c4_221, %c64_222], %599 {strides = array<i32>} : memref<32x128xf32, #tpu.memory_space<vmem>>, vector<2x64xf32>,
    %c28_223 = arith.constant 28 : index
    %c0_224 = arith.constant 0 : index
    %602 = vector.load %arg18[%c28_223, %c0_224] : memref<32x256xf32, #tpu.memory_space<vmem>>, vector<2x256xf32>
    %c0_225 = arith.constant 0 : index
    %c0_226 = arith.constant 0 : index
    %603 = vector.load %arg2[%c0_225, %c0_226] : memref<64x256xf32, #tpu.memory_space<vmem>>, vector<64x256xf32>
    %cst_227 = arith.constant dense<0.000000e+00> : vector<2x256xf32>
    %604 = tpu.matmul %583, %603, %cst_227 {dimension_numbers = #tpu.dot_dimension_numbers<[1], [0], [0], [1], [0, 0, 1, 1], [], []>} : vector<2x64xf32>, vector<64x256xf32>, vector<2x256xf32> -> vector<2x256xf32>
    %605 = arith.addf %602, %604 : vector<2x256xf32>
    %c2_228 = arith.constant 2 : index
    %c0_229 = arith.constant 0 : index
    %606 = vector.load %arg19[%c2_228, %c0_229] : memref<32x256xf32, #tpu.memory_space<vmem>>, vector<2x256xf32>
    %c0_230 = arith.constant 0 : index
    %c0_231 = arith.constant 0 : index
    %607 = vector.load %arg5[%c0_230, %c0_231] : memref<64x256xf32, #tpu.memory_space<vmem>>, vector<64x256xf32>
    %cst_232 = arith.constant dense<0.000000e+00> : vector<2x256xf32>
    %608 = tpu.matmul %599, %607, %cst_232 {dimension_numbers = #tpu.dot_dimension_numbers<[1], [0], [0], [1], [0, 0, 1, 1], [], []>} : vector<2x64xf32>, vector<64x256xf32>, vector<2x256xf32> -> vector<2x256xf32>
    %609 = arith.addf %606, %608 : vector<2x256xf32>
    %610 = vector.extract_strided_slice %605 {offsets = [0, 0], sizes = [2, 192], strides = [1, 1]} : vector<2x256xf32> to vector<2x192xf32>
    %611 = arith.negf %610 : vector<2x192xf32>
    %612 = math.exp %611 : vector<2x192xf32>
    %cst_233 = arith.constant 1.000000e+00 : f32
    %613 = vector.broadcast %cst_233 : f32 to vector<2x192xf32>
    %614 = arith.addf %613, %612 : vector<2x192xf32>
    %615 = arith.divf %613, %614 : vector<2x192xf32>
    %616 = vector.extract_strided_slice %605 {offsets = [0, 192], sizes = [2, 64], strides = [1, 1]} : vector<2x256xf32> to vector<2x64xf32>
    %617 = math.tanh %616 : vector<2x64xf32>
    %618 = vector.extract_strided_slice %615 {offsets = [0, 0], sizes = [2, 64], strides = [1, 1]} : vector<2x192xf32> to vector<2x64xf32>
    %619 = vector.extract_strided_slice %615 {offsets = [0, 64], sizes = [2, 64], strides = [1, 1]} : vector<2x192xf32> to vector<2x64xf32>
    %620 = vector.extract_strided_slice %615 {offsets = [0, 128], sizes = [2, 64], strides = [1, 1]} : vector<2x192xf32> to vector<2x64xf32>
    %621 = arith.mulf %619, %581 : vector<2x64xf32>
    %622 = arith.mulf %618, %617 : vector<2x64xf32>
    %623 = arith.addf %621, %622 : vector<2x64xf32>
    %624 = math.tanh %623 : vector<2x64xf32>
    %625 = arith.mulf %620, %624 : vector<2x64xf32>
    %626 = vector.extract_strided_slice %609 {offsets = [0, 0], sizes = [2, 192], strides = [1, 1]} : vector<2x256xf32> to vector<2x192xf32>
    %627 = arith.negf %626 : vector<2x192xf32>
    %628 = math.exp %627 : vector<2x192xf32>
    %cst_234 = arith.constant 1.000000e+00 : f32
    %629 = vector.broadcast %cst_234 : f32 to vector<2x192xf32>
    %630 = arith.addf %629, %628 : vector<2x192xf32>
    %631 = arith.divf %629, %630 : vector<2x192xf32>
    %632 = vector.extract_strided_slice %609 {offsets = [0, 192], sizes = [2, 64], strides = [1, 1]} : vector<2x256xf32> to vector<2x64xf32>
    %633 = math.tanh %632 : vector<2x64xf32>
    %634 = vector.extract_strided_slice %631 {offsets = [0, 0], sizes = [2, 64], strides = [1, 1]} : vector<2x192xf32> to vector<2x64xf32>
    %635 = vector.extract_strided_slice %631 {offsets = [0, 64], sizes = [2, 64], strides = [1, 1]} : vector<2x192xf32> to vector<2x64xf32>
    %636 = vector.extract_strided_slice %631 {offsets = [0, 128], sizes = [2, 64], strides = [1, 1]} : vector<2x192xf32> to vector<2x64xf32>
    %637 = arith.mulf %635, %597 : vector<2x64xf32>
    %638 = arith.mulf %634, %633 : vector<2x64xf32>
    %639 = arith.addf %637, %638 : vector<2x64xf32>
    %640 = math.tanh %639 : vector<2x64xf32>
    %641 = arith.mulf %636, %640 : vector<2x64xf32>
    %c28_235 = arith.constant 28 : index
    %c0_236 = arith.constant 0 : index
    %642 = vector.load %arg17[%c28_235, %c0_236] : memref<32x128xf32, #tpu.memory_space<vmem>>, vector<2x64xf32>
    tpu.vector_store %arg17[%c28_235, %c0_236], %625 {strides = array<i32>} : memref<32x128xf32, #tpu.memory_space<vmem>>, vector<2x64xf32>,
    %c2_237 = arith.constant 2 : index
    %c64_238 = arith.constant 64 : index
    %643 = vector.load %arg17[%c2_237, %c64_238] : memref<32x128xf32, #tpu.memory_space<vmem>>, vector<2x64xf32>
    tpu.vector_store %arg17[%c2_237, %c64_238], %641 {strides = array<i32>} : memref<32x128xf32, #tpu.memory_space<vmem>>, vector<2x64xf32>,
    %c30_239 = arith.constant 30 : index
    %c0_240 = arith.constant 0 : index
    %644 = vector.load %arg18[%c30_239, %c0_240] : memref<32x256xf32, #tpu.memory_space<vmem>>, vector<2x256xf32>
    %c0_241 = arith.constant 0 : index
    %c0_242 = arith.constant 0 : index
    %645 = vector.load %arg2[%c0_241, %c0_242] : memref<64x256xf32, #tpu.memory_space<vmem>>, vector<64x256xf32>
    %cst_243 = arith.constant dense<0.000000e+00> : vector<2x256xf32>
    %646 = tpu.matmul %625, %645, %cst_243 {dimension_numbers = #tpu.dot_dimension_numbers<[1], [0], [0], [1], [0, 0, 1, 1], [], []>} : vector<2x64xf32>, vector<64x256xf32>, vector<2x256xf32> -> vector<2x256xf32>
    %647 = arith.addf %644, %646 : vector<2x256xf32>
    %c0_244 = arith.constant 0 : index
    %c0_245 = arith.constant 0 : index
    %648 = vector.load %arg19[%c0_244, %c0_245] : memref<32x256xf32, #tpu.memory_space<vmem>>, vector<2x256xf32>
    %c0_246 = arith.constant 0 : index
    %c0_247 = arith.constant 0 : index
    %649 = vector.load %arg5[%c0_246, %c0_247] : memref<64x256xf32, #tpu.memory_space<vmem>>, vector<64x256xf32>
    %cst_248 = arith.constant dense<0.000000e+00> : vector<2x256xf32>
    %650 = tpu.matmul %641, %649, %cst_248 {dimension_numbers = #tpu.dot_dimension_numbers<[1], [0], [0], [1], [0, 0, 1, 1], [], []>} : vector<2x64xf32>, vector<64x256xf32>, vector<2x256xf32> -> vector<2x256xf32>
    %651 = arith.addf %648, %650 : vector<2x256xf32>
    %652 = vector.extract_strided_slice %647 {offsets = [0, 0], sizes = [2, 192], strides = [1, 1]} : vector<2x256xf32> to vector<2x192xf32>
    %653 = arith.negf %652 : vector<2x192xf32>
    %654 = math.exp %653 : vector<2x192xf32>
    %cst_249 = arith.constant 1.000000e+00 : f32
    %655 = vector.broadcast %cst_249 : f32 to vector<2x192xf32>
    %656 = arith.addf %655, %654 : vector<2x192xf32>
    %657 = arith.divf %655, %656 : vector<2x192xf32>
    %658 = vector.extract_strided_slice %647 {offsets = [0, 192], sizes = [2, 64], strides = [1, 1]} : vector<2x256xf32> to vector<2x64xf32>
    %659 = math.tanh %658 : vector<2x64xf32>
    %660 = vector.extract_strided_slice %657 {offsets = [0, 0], sizes = [2, 64], strides = [1, 1]} : vector<2x192xf32> to vector<2x64xf32>
    %661 = vector.extract_strided_slice %657 {offsets = [0, 64], sizes = [2, 64], strides = [1, 1]} : vector<2x192xf32> to vector<2x64xf32>
    %662 = vector.extract_strided_slice %657 {offsets = [0, 128], sizes = [2, 64], strides = [1, 1]} : vector<2x192xf32> to vector<2x64xf32>
    %663 = arith.mulf %661, %623 : vector<2x64xf32>
    %664 = arith.mulf %660, %659 : vector<2x64xf32>
    %665 = arith.addf %663, %664 : vector<2x64xf32>
    %666 = math.tanh %665 : vector<2x64xf32>
    %667 = arith.mulf %662, %666 : vector<2x64xf32>
    %668 = vector.extract_strided_slice %651 {offsets = [0, 0], sizes = [2, 192], strides = [1, 1]} : vector<2x256xf32> to vector<2x192xf32>
    %669 = arith.negf %668 : vector<2x192xf32>
    %670 = math.exp %669 : vector<2x192xf32>
    %cst_250 = arith.constant 1.000000e+00 : f32
    %671 = vector.broadcast %cst_250 : f32 to vector<2x192xf32>
    %672 = arith.addf %671, %670 : vector<2x192xf32>
    %673 = arith.divf %671, %672 : vector<2x192xf32>
    %674 = vector.extract_strided_slice %651 {offsets = [0, 192], sizes = [2, 64], strides = [1, 1]} : vector<2x256xf32> to vector<2x64xf32>
    %675 = math.tanh %674 : vector<2x64xf32>
    %676 = vector.extract_strided_slice %673 {offsets = [0, 0], sizes = [2, 64], strides = [1, 1]} : vector<2x192xf32> to vector<2x64xf32>
    %677 = vector.extract_strided_slice %673 {offsets = [0, 64], sizes = [2, 64], strides = [1, 1]} : vector<2x192xf32> to vector<2x64xf32>
    %678 = vector.extract_strided_slice %673 {offsets = [0, 128], sizes = [2, 64], strides = [1, 1]} : vector<2x192xf32> to vector<2x64xf32>
    %679 = arith.mulf %677, %639 : vector<2x64xf32>
    %680 = arith.mulf %676, %675 : vector<2x64xf32>
    %681 = arith.addf %679, %680 : vector<2x64xf32>
    %682 = math.tanh %681 : vector<2x64xf32>
    %683 = arith.mulf %678, %682 : vector<2x64xf32>
    %c30_251 = arith.constant 30 : index
    %c0_252 = arith.constant 0 : index
    %684 = vector.load %arg17[%c30_251, %c0_252] : memref<32x128xf32, #tpu.memory_space<vmem>>, vector<2x64xf32>
    tpu.vector_store %arg17[%c30_251, %c0_252], %667 {strides = array<i32>} : memref<32x128xf32, #tpu.memory_space<vmem>>, vector<2x64xf32>,
    %c0_253 = arith.constant 0 : index
    %c64_254 = arith.constant 64 : index
    %685 = vector.load %arg17[%c0_253, %c64_254] : memref<32x128xf32, #tpu.memory_space<vmem>>, vector<2x64xf32>
    tpu.vector_store %arg17[%c0_253, %c64_254], %683 {strides = array<i32>} : memref<32x128xf32, #tpu.memory_space<vmem>>, vector<2x64xf32>,
    %c0_255 = arith.constant 0 : index
    %c0_256 = arith.constant 0 : index
    %686 = vector.load %arg17[%c0_255, %c0_256] : memref<32x128xf32, #tpu.memory_space<vmem>>, vector<32x128xf32>
    %c0_257 = arith.constant 0 : index
    %c0_258 = arith.constant 0 : index
    %687 = vector.load %arg7[%c0_257, %c0_258] : memref<128x256xf32, #tpu.memory_space<vmem>>, vector<128x256xf32>
    %cst_259 = arith.constant dense<0.000000e+00> : vector<32x256xf32>
    %688 = tpu.matmul %686, %687, %cst_259 {dimension_numbers = #tpu.dot_dimension_numbers<[1], [0], [0], [1], [0, 0, 1, 1], [], []>} : vector<32x128xf32>, vector<128x256xf32>, vector<32x256xf32> -> vector<32x256xf32>
    %c0_260 = arith.constant 0 : index
    %c0_261 = arith.constant 0 : index
    %689 = vector.load %arg9[%c0_260, %c0_261] : memref<1x256xf32, #tpu.memory_space<vmem>>, vector<1x256xf32>
    %690 = vector.broadcast %689 : vector<1x256xf32> to vector<32x256xf32>
    %691 = arith.addf %688, %690 : vector<32x256xf32>
    %c0_262 = arith.constant 0 : index
    %c0_263 = arith.constant 0 : index
    %692 = vector.load %arg20[%c0_262, %c0_263] : memref<32x256xf32, #tpu.memory_space<vmem>>, vector<32x256xf32>
    tpu.vector_store %arg20[%c0_262, %c0_263], %691 {strides = array<i32>} : memref<32x256xf32, #tpu.memory_space<vmem>>, vector<32x256xf32>,
    %c30_264 = arith.constant 30 : index
    %c0_265 = arith.constant 0 : index
    %693 = vector.load %arg17[%c30_264, %c0_265] : memref<32x128xf32, #tpu.memory_space<vmem>>, vector<2x128xf32>
    %c0_266 = arith.constant 0 : index
    %c0_267 = arith.constant 0 : index
    %694 = vector.load %arg10[%c0_266, %c0_267] : memref<128x256xf32, #tpu.memory_space<vmem>>, vector<128x256xf32>
    %cst_268 = arith.constant dense<0.000000e+00> : vector<2x256xf32>
    %695 = tpu.matmul %693, %694, %cst_268 {dimension_numbers = #tpu.dot_dimension_numbers<[1], [0], [0], [1], [0, 0, 1, 1], [], []>} : vector<2x128xf32>, vector<128x256xf32>, vector<2x256xf32> -> vector<2x256xf32>
    %c0_269 = arith.constant 0 : index
    %c0_270 = arith.constant 0 : index
    %696 = vector.load %arg12[%c0_269, %c0_270] : memref<1x256xf32, #tpu.memory_space<vmem>>, vector<1x256xf32>
    %697 = vector.broadcast %696 : vector<1x256xf32> to vector<2x256xf32>
    %698 = arith.addf %695, %697 : vector<2x256xf32>
    %c0_271 = arith.constant 0 : index
    %c0_272 = arith.constant 0 : index
    %699 = vector.load %arg21[%c0_271, %c0_272] : memref<2x256xf32, #tpu.memory_space<vmem>>, vector<2x256xf32>
    tpu.vector_store %arg21[%c0_271, %c0_272], %698 {strides = array<i32>} : memref<2x256xf32, #tpu.memory_space<vmem>>, vector<2x256xf32>,
    %c0_273 = arith.constant 0 : index
    %c0_274 = arith.constant 0 : index
    %700 = vector.load %arg20[%c0_273, %c0_274] : memref<32x256xf32, #tpu.memory_space<vmem>>, vector<2x256xf32>
    %c0_275 = arith.constant 0 : index
    %c0_276 = arith.constant 0 : index
    %701 = vector.load %arg8[%c0_275, %c0_276] : memref<64x256xf32, #tpu.memory_space<vmem>>, vector<64x256xf32>
    %cst_277 = arith.constant dense<0.000000e+00> : vector<2x256xf32>
    %702 = tpu.matmul %13, %701, %cst_277 {dimension_numbers = #tpu.dot_dimension_numbers<[1], [0], [0], [1], [0, 0, 1, 1], [], []>} : vector<2x64xf32>, vector<64x256xf32>, vector<2x256xf32> -> vector<2x256xf32>
    %703 = arith.addf %700, %702 : vector<2x256xf32>
    %704 = vector.extract_strided_slice %703 {offsets = [0, 0], sizes = [2, 192], strides = [1, 1]} : vector<2x256xf32> to vector<2x192xf32>
    %705 = arith.negf %704 : vector<2x192xf32>
    %706 = math.exp %705 : vector<2x192xf32>
    %cst_278 = arith.constant 1.000000e+00 : f32
    %707 = vector.broadcast %cst_278 : f32 to vector<2x192xf32>
    %708 = arith.addf %707, %706 : vector<2x192xf32>
    %709 = arith.divf %707, %708 : vector<2x192xf32>
    %710 = vector.extract_strided_slice %703 {offsets = [0, 192], sizes = [2, 64], strides = [1, 1]} : vector<2x256xf32> to vector<2x64xf32>
    %711 = math.tanh %710 : vector<2x64xf32>
    %712 = vector.extract_strided_slice %709 {offsets = [0, 0], sizes = [2, 64], strides = [1, 1]} : vector<2x192xf32> to vector<2x64xf32>
    %713 = vector.extract_strided_slice %709 {offsets = [0, 64], sizes = [2, 64], strides = [1, 1]} : vector<2x192xf32> to vector<2x64xf32>
    %714 = vector.extract_strided_slice %709 {offsets = [0, 128], sizes = [2, 64], strides = [1, 1]} : vector<2x192xf32> to vector<2x64xf32>
    %715 = arith.mulf %713, %13 : vector<2x64xf32>
    %716 = arith.mulf %712, %711 : vector<2x64xf32>
    %717 = arith.addf %715, %716 : vector<2x64xf32>
    %718 = math.tanh %717 : vector<2x64xf32>
    %719 = arith.mulf %714, %718 : vector<2x64xf32>
    %c2_279 = arith.constant 2 : index
    %c0_280 = arith.constant 0 : index
    %720 = vector.load %arg20[%c2_279, %c0_280] : memref<32x256xf32, #tpu.memory_space<vmem>>, vector<2x256xf32>
    %c0_281 = arith.constant 0 : index
    %c0_282 = arith.constant 0 : index
    %721 = vector.load %arg8[%c0_281, %c0_282] : memref<64x256xf32, #tpu.memory_space<vmem>>, vector<64x256xf32>
    %cst_283 = arith.constant dense<0.000000e+00> : vector<2x256xf32>
    %722 = tpu.matmul %719, %721, %cst_283 {dimension_numbers = #tpu.dot_dimension_numbers<[1], [0], [0], [1], [0, 0, 1, 1], [], []>} : vector<2x64xf32>, vector<64x256xf32>, vector<2x256xf32> -> vector<2x256xf32>
    %723 = arith.addf %720, %722 : vector<2x256xf32>
    %724 = vector.extract_strided_slice %723 {offsets = [0, 0], sizes = [2, 192], strides = [1, 1]} : vector<2x256xf32> to vector<2x192xf32>
    %725 = arith.negf %724 : vector<2x192xf32>
    %726 = math.exp %725 : vector<2x192xf32>
    %cst_284 = arith.constant 1.000000e+00 : f32
    %727 = vector.broadcast %cst_284 : f32 to vector<2x192xf32>
    %728 = arith.addf %727, %726 : vector<2x192xf32>
    %729 = arith.divf %727, %728 : vector<2x192xf32>
    %730 = vector.extract_strided_slice %723 {offsets = [0, 192], sizes = [2, 64], strides = [1, 1]} : vector<2x256xf32> to vector<2x64xf32>
    %731 = math.tanh %730 : vector<2x64xf32>
    %732 = vector.extract_strided_slice %729 {offsets = [0, 0], sizes = [2, 64], strides = [1, 1]} : vector<2x192xf32> to vector<2x64xf32>
    %733 = vector.extract_strided_slice %729 {offsets = [0, 64], sizes = [2, 64], strides = [1, 1]} : vector<2x192xf32> to vector<2x64xf32>
    %734 = vector.extract_strided_slice %729 {offsets = [0, 128], sizes = [2, 64], strides = [1, 1]} : vector<2x192xf32> to vector<2x64xf32>
    %735 = arith.mulf %733, %717 : vector<2x64xf32>
    %736 = arith.mulf %732, %731 : vector<2x64xf32>
    %737 = arith.addf %735, %736 : vector<2x64xf32>
    %738 = math.tanh %737 : vector<2x64xf32>
    %739 = arith.mulf %734, %738 : vector<2x64xf32>
    %c4_285 = arith.constant 4 : index
    %c0_286 = arith.constant 0 : index
    %740 = vector.load %arg20[%c4_285, %c0_286] : memref<32x256xf32, #tpu.memory_space<vmem>>, vector<2x256xf32>
    %c0_287 = arith.constant 0 : index
    %c0_288 = arith.constant 0 : index
    %741 = vector.load %arg8[%c0_287, %c0_288] : memref<64x256xf32, #tpu.memory_space<vmem>>, vector<64x256xf32>
    %cst_289 = arith.constant dense<0.000000e+00> : vector<2x256xf32>
    %742 = tpu.matmul %739, %741, %cst_289 {dimension_numbers = #tpu.dot_dimension_numbers<[1], [0], [0], [1], [0, 0, 1, 1], [], []>} : vector<2x64xf32>, vector<64x256xf32>, vector<2x256xf32> -> vector<2x256xf32>
    %743 = arith.addf %740, %742 : vector<2x256xf32>
    %744 = vector.extract_strided_slice %743 {offsets = [0, 0], sizes = [2, 192], strides = [1, 1]} : vector<2x256xf32> to vector<2x192xf32>
    %745 = arith.negf %744 : vector<2x192xf32>
    %746 = math.exp %745 : vector<2x192xf32>
    %cst_290 = arith.constant 1.000000e+00 : f32
    %747 = vector.broadcast %cst_290 : f32 to vector<2x192xf32>
    %748 = arith.addf %747, %746 : vector<2x192xf32>
    %749 = arith.divf %747, %748 : vector<2x192xf32>
    %750 = vector.extract_strided_slice %743 {offsets = [0, 192], sizes = [2, 64], strides = [1, 1]} : vector<2x256xf32> to vector<2x64xf32>
    %751 = math.tanh %750 : vector<2x64xf32>
    %752 = vector.extract_strided_slice %749 {offsets = [0, 0], sizes = [2, 64], strides = [1, 1]} : vector<2x192xf32> to vector<2x64xf32>
    %753 = vector.extract_strided_slice %749 {offsets = [0, 64], sizes = [2, 64], strides = [1, 1]} : vector<2x192xf32> to vector<2x64xf32>
    %754 = vector.extract_strided_slice %749 {offsets = [0, 128], sizes = [2, 64], strides = [1, 1]} : vector<2x192xf32> to vector<2x64xf32>
    %755 = arith.mulf %753, %737 : vector<2x64xf32>
    %756 = arith.mulf %752, %751 : vector<2x64xf32>
    %757 = arith.addf %755, %756 : vector<2x64xf32>
    %758 = math.tanh %757 : vector<2x64xf32>
    %759 = arith.mulf %754, %758 : vector<2x64xf32>
    %c6_291 = arith.constant 6 : index
    %c0_292 = arith.constant 0 : index
    %760 = vector.load %arg20[%c6_291, %c0_292] : memref<32x256xf32, #tpu.memory_space<vmem>>, vector<2x256xf32>
    %c0_293 = arith.constant 0 : index
    %c0_294 = arith.constant 0 : index
    %761 = vector.load %arg8[%c0_293, %c0_294] : memref<64x256xf32, #tpu.memory_space<vmem>>, vector<64x256xf32>
    %cst_295 = arith.constant dense<0.000000e+00> : vector<2x256xf32>
    %762 = tpu.matmul %759, %761, %cst_295 {dimension_numbers = #tpu.dot_dimension_numbers<[1], [0], [0], [1], [0, 0, 1, 1], [], []>} : vector<2x64xf32>, vector<64x256xf32>, vector<2x256xf32> -> vector<2x256xf32>
    %763 = arith.addf %760, %762 : vector<2x256xf32>
    %764 = vector.extract_strided_slice %763 {offsets = [0, 0], sizes = [2, 192], strides = [1, 1]} : vector<2x256xf32> to vector<2x192xf32>
    %765 = arith.negf %764 : vector<2x192xf32>
    %766 = math.exp %765 : vector<2x192xf32>
    %cst_296 = arith.constant 1.000000e+00 : f32
    %767 = vector.broadcast %cst_296 : f32 to vector<2x192xf32>
    %768 = arith.addf %767, %766 : vector<2x192xf32>
    %769 = arith.divf %767, %768 : vector<2x192xf32>
    %770 = vector.extract_strided_slice %763 {offsets = [0, 192], sizes = [2, 64], strides = [1, 1]} : vector<2x256xf32> to vector<2x64xf32>
    %771 = math.tanh %770 : vector<2x64xf32>
    %772 = vector.extract_strided_slice %769 {offsets = [0, 0], sizes = [2, 64], strides = [1, 1]} : vector<2x192xf32> to vector<2x64xf32>
    %773 = vector.extract_strided_slice %769 {offsets = [0, 64], sizes = [2, 64], strides = [1, 1]} : vector<2x192xf32> to vector<2x64xf32>
    %774 = vector.extract_strided_slice %769 {offsets = [0, 128], sizes = [2, 64], strides = [1, 1]} : vector<2x192xf32> to vector<2x64xf32>
    %775 = arith.mulf %773, %757 : vector<2x64xf32>
    %776 = arith.mulf %772, %771 : vector<2x64xf32>
    %777 = arith.addf %775, %776 : vector<2x64xf32>
    %778 = math.tanh %777 : vector<2x64xf32>
    %779 = arith.mulf %774, %778 : vector<2x64xf32>
    %c8_297 = arith.constant 8 : index
    %c0_298 = arith.constant 0 : index
    %780 = vector.load %arg20[%c8_297, %c0_298] : memref<32x256xf32, #tpu.memory_space<vmem>>, vector<2x256xf32>
    %c0_299 = arith.constant 0 : index
    %c0_300 = arith.constant 0 : index
    %781 = vector.load %arg8[%c0_299, %c0_300] : memref<64x256xf32, #tpu.memory_space<vmem>>, vector<64x256xf32>
    %cst_301 = arith.constant dense<0.000000e+00> : vector<2x256xf32>
    %782 = tpu.matmul %779, %781, %cst_301 {dimension_numbers = #tpu.dot_dimension_numbers<[1], [0], [0], [1], [0, 0, 1, 1], [], []>} : vector<2x64xf32>, vector<64x256xf32>, vector<2x256xf32> -> vector<2x256xf32>
    %783 = arith.addf %780, %782 : vector<2x256xf32>
    %784 = vector.extract_strided_slice %783 {offsets = [0, 0], sizes = [2, 192], strides = [1, 1]} : vector<2x256xf32> to vector<2x192xf32>
    %785 = arith.negf %784 : vector<2x192xf32>
    %786 = math.exp %785 : vector<2x192xf32>
    %cst_302 = arith.constant 1.000000e+00 : f32
    %787 = vector.broadcast %cst_302 : f32 to vector<2x192xf32>
    %788 = arith.addf %787, %786 : vector<2x192xf32>
    %789 = arith.divf %787, %788 : vector<2x192xf32>
    %790 = vector.extract_strided_slice %783 {offsets = [0, 192], sizes = [2, 64], strides = [1, 1]} : vector<2x256xf32> to vector<2x64xf32>
    %791 = math.tanh %790 : vector<2x64xf32>
    %792 = vector.extract_strided_slice %789 {offsets = [0, 0], sizes = [2, 64], strides = [1, 1]} : vector<2x192xf32> to vector<2x64xf32>
    %793 = vector.extract_strided_slice %789 {offsets = [0, 64], sizes = [2, 64], strides = [1, 1]} : vector<2x192xf32> to vector<2x64xf32>
    %794 = vector.extract_strided_slice %789 {offsets = [0, 128], sizes = [2, 64], strides = [1, 1]} : vector<2x192xf32> to vector<2x64xf32>
    %795 = arith.mulf %793, %777 : vector<2x64xf32>
    %796 = arith.mulf %792, %791 : vector<2x64xf32>
    %797 = arith.addf %795, %796 : vector<2x64xf32>
    %798 = math.tanh %797 : vector<2x64xf32>
    %799 = arith.mulf %794, %798 : vector<2x64xf32>
    %c10_303 = arith.constant 10 : index
    %c0_304 = arith.constant 0 : index
    %800 = vector.load %arg20[%c10_303, %c0_304] : memref<32x256xf32, #tpu.memory_space<vmem>>, vector<2x256xf32>
    %c0_305 = arith.constant 0 : index
    %c0_306 = arith.constant 0 : index
    %801 = vector.load %arg8[%c0_305, %c0_306] : memref<64x256xf32, #tpu.memory_space<vmem>>, vector<64x256xf32>
    %cst_307 = arith.constant dense<0.000000e+00> : vector<2x256xf32>
    %802 = tpu.matmul %799, %801, %cst_307 {dimension_numbers = #tpu.dot_dimension_numbers<[1], [0], [0], [1], [0, 0, 1, 1], [], []>} : vector<2x64xf32>, vector<64x256xf32>, vector<2x256xf32> -> vector<2x256xf32>
    %803 = arith.addf %800, %802 : vector<2x256xf32>
    %804 = vector.extract_strided_slice %803 {offsets = [0, 0], sizes = [2, 192], strides = [1, 1]} : vector<2x256xf32> to vector<2x192xf32>
    %805 = arith.negf %804 : vector<2x192xf32>
    %806 = math.exp %805 : vector<2x192xf32>
    %cst_308 = arith.constant 1.000000e+00 : f32
    %807 = vector.broadcast %cst_308 : f32 to vector<2x192xf32>
    %808 = arith.addf %807, %806 : vector<2x192xf32>
    %809 = arith.divf %807, %808 : vector<2x192xf32>
    %810 = vector.extract_strided_slice %803 {offsets = [0, 192], sizes = [2, 64], strides = [1, 1]} : vector<2x256xf32> to vector<2x64xf32>
    %811 = math.tanh %810 : vector<2x64xf32>
    %812 = vector.extract_strided_slice %809 {offsets = [0, 0], sizes = [2, 64], strides = [1, 1]} : vector<2x192xf32> to vector<2x64xf32>
    %813 = vector.extract_strided_slice %809 {offsets = [0, 64], sizes = [2, 64], strides = [1, 1]} : vector<2x192xf32> to vector<2x64xf32>
    %814 = vector.extract_strided_slice %809 {offsets = [0, 128], sizes = [2, 64], strides = [1, 1]} : vector<2x192xf32> to vector<2x64xf32>
    %815 = arith.mulf %813, %797 : vector<2x64xf32>
    %816 = arith.mulf %812, %811 : vector<2x64xf32>
    %817 = arith.addf %815, %816 : vector<2x64xf32>
    %818 = math.tanh %817 : vector<2x64xf32>
    %819 = arith.mulf %814, %818 : vector<2x64xf32>
    %c12_309 = arith.constant 12 : index
    %c0_310 = arith.constant 0 : index
    %820 = vector.load %arg20[%c12_309, %c0_310] : memref<32x256xf32, #tpu.memory_space<vmem>>, vector<2x256xf32>
    %c0_311 = arith.constant 0 : index
    %c0_312 = arith.constant 0 : index
    %821 = vector.load %arg8[%c0_311, %c0_312] : memref<64x256xf32, #tpu.memory_space<vmem>>, vector<64x256xf32>
    %cst_313 = arith.constant dense<0.000000e+00> : vector<2x256xf32>
    %822 = tpu.matmul %819, %821, %cst_313 {dimension_numbers = #tpu.dot_dimension_numbers<[1], [0], [0], [1], [0, 0, 1, 1], [], []>} : vector<2x64xf32>, vector<64x256xf32>, vector<2x256xf32> -> vector<2x256xf32>
    %823 = arith.addf %820, %822 : vector<2x256xf32>
    %824 = vector.extract_strided_slice %823 {offsets = [0, 0], sizes = [2, 192], strides = [1, 1]} : vector<2x256xf32> to vector<2x192xf32>
    %825 = arith.negf %824 : vector<2x192xf32>
    %826 = math.exp %825 : vector<2x192xf32>
    %cst_314 = arith.constant 1.000000e+00 : f32
    %827 = vector.broadcast %cst_314 : f32 to vector<2x192xf32>
    %828 = arith.addf %827, %826 : vector<2x192xf32>
    %829 = arith.divf %827, %828 : vector<2x192xf32>
    %830 = vector.extract_strided_slice %823 {offsets = [0, 192], sizes = [2, 64], strides = [1, 1]} : vector<2x256xf32> to vector<2x64xf32>
    %831 = math.tanh %830 : vector<2x64xf32>
    %832 = vector.extract_strided_slice %829 {offsets = [0, 0], sizes = [2, 64], strides = [1, 1]} : vector<2x192xf32> to vector<2x64xf32>
    %833 = vector.extract_strided_slice %829 {offsets = [0, 64], sizes = [2, 64], strides = [1, 1]} : vector<2x192xf32> to vector<2x64xf32>
    %834 = vector.extract_strided_slice %829 {offsets = [0, 128], sizes = [2, 64], strides = [1, 1]} : vector<2x192xf32> to vector<2x64xf32>
    %835 = arith.mulf %833, %817 : vector<2x64xf32>
    %836 = arith.mulf %832, %831 : vector<2x64xf32>
    %837 = arith.addf %835, %836 : vector<2x64xf32>
    %838 = math.tanh %837 : vector<2x64xf32>
    %839 = arith.mulf %834, %838 : vector<2x64xf32>
    %c14_315 = arith.constant 14 : index
    %c0_316 = arith.constant 0 : index
    %840 = vector.load %arg20[%c14_315, %c0_316] : memref<32x256xf32, #tpu.memory_space<vmem>>, vector<2x256xf32>
    %c0_317 = arith.constant 0 : index
    %c0_318 = arith.constant 0 : index
    %841 = vector.load %arg8[%c0_317, %c0_318] : memref<64x256xf32, #tpu.memory_space<vmem>>, vector<64x256xf32>
    %cst_319 = arith.constant dense<0.000000e+00> : vector<2x256xf32>
    %842 = tpu.matmul %839, %841, %cst_319 {dimension_numbers = #tpu.dot_dimension_numbers<[1], [0], [0], [1], [0, 0, 1, 1], [], []>} : vector<2x64xf32>, vector<64x256xf32>, vector<2x256xf32> -> vector<2x256xf32>
    %843 = arith.addf %840, %842 : vector<2x256xf32>
    %844 = vector.extract_strided_slice %843 {offsets = [0, 0], sizes = [2, 192], strides = [1, 1]} : vector<2x256xf32> to vector<2x192xf32>
    %845 = arith.negf %844 : vector<2x192xf32>
    %846 = math.exp %845 : vector<2x192xf32>
    %cst_320 = arith.constant 1.000000e+00 : f32
    %847 = vector.broadcast %cst_320 : f32 to vector<2x192xf32>
    %848 = arith.addf %847, %846 : vector<2x192xf32>
    %849 = arith.divf %847, %848 : vector<2x192xf32>
    %850 = vector.extract_strided_slice %843 {offsets = [0, 192], sizes = [2, 64], strides = [1, 1]} : vector<2x256xf32> to vector<2x64xf32>
    %851 = math.tanh %850 : vector<2x64xf32>
    %852 = vector.extract_strided_slice %849 {offsets = [0, 0], sizes = [2, 64], strides = [1, 1]} : vector<2x192xf32> to vector<2x64xf32>
    %853 = vector.extract_strided_slice %849 {offsets = [0, 64], sizes = [2, 64], strides = [1, 1]} : vector<2x192xf32> to vector<2x64xf32>
    %854 = vector.extract_strided_slice %849 {offsets = [0, 128], sizes = [2, 64], strides = [1, 1]} : vector<2x192xf32> to vector<2x64xf32>
    %855 = arith.mulf %853, %837 : vector<2x64xf32>
    %856 = arith.mulf %852, %851 : vector<2x64xf32>
    %857 = arith.addf %855, %856 : vector<2x64xf32>
    %858 = math.tanh %857 : vector<2x64xf32>
    %859 = arith.mulf %854, %858 : vector<2x64xf32>
    %c16_321 = arith.constant 16 : index
    %c0_322 = arith.constant 0 : index
    %860 = vector.load %arg20[%c16_321, %c0_322] : memref<32x256xf32, #tpu.memory_space<vmem>>, vector<2x256xf32>
    %c0_323 = arith.constant 0 : index
    %c0_324 = arith.constant 0 : index
    %861 = vector.load %arg8[%c0_323, %c0_324] : memref<64x256xf32, #tpu.memory_space<vmem>>, vector<64x256xf32>
    %cst_325 = arith.constant dense<0.000000e+00> : vector<2x256xf32>
    %862 = tpu.matmul %859, %861, %cst_325 {dimension_numbers = #tpu.dot_dimension_numbers<[1], [0], [0], [1], [0, 0, 1, 1], [], []>} : vector<2x64xf32>, vector<64x256xf32>, vector<2x256xf32> -> vector<2x256xf32>
    %863 = arith.addf %860, %862 : vector<2x256xf32>
    %864 = vector.extract_strided_slice %863 {offsets = [0, 0], sizes = [2, 192], strides = [1, 1]} : vector<2x256xf32> to vector<2x192xf32>
    %865 = arith.negf %864 : vector<2x192xf32>
    %866 = math.exp %865 : vector<2x192xf32>
    %cst_326 = arith.constant 1.000000e+00 : f32
    %867 = vector.broadcast %cst_326 : f32 to vector<2x192xf32>
    %868 = arith.addf %867, %866 : vector<2x192xf32>
    %869 = arith.divf %867, %868 : vector<2x192xf32>
    %870 = vector.extract_strided_slice %863 {offsets = [0, 192], sizes = [2, 64], strides = [1, 1]} : vector<2x256xf32> to vector<2x64xf32>
    %871 = math.tanh %870 : vector<2x64xf32>
    %872 = vector.extract_strided_slice %869 {offsets = [0, 0], sizes = [2, 64], strides = [1, 1]} : vector<2x192xf32> to vector<2x64xf32>
    %873 = vector.extract_strided_slice %869 {offsets = [0, 64], sizes = [2, 64], strides = [1, 1]} : vector<2x192xf32> to vector<2x64xf32>
    %874 = vector.extract_strided_slice %869 {offsets = [0, 128], sizes = [2, 64], strides = [1, 1]} : vector<2x192xf32> to vector<2x64xf32>
    %875 = arith.mulf %873, %857 : vector<2x64xf32>
    %876 = arith.mulf %872, %871 : vector<2x64xf32>
    %877 = arith.addf %875, %876 : vector<2x64xf32>
    %878 = math.tanh %877 : vector<2x64xf32>
    %879 = arith.mulf %874, %878 : vector<2x64xf32>
    %c18_327 = arith.constant 18 : index
    %c0_328 = arith.constant 0 : index
    %880 = vector.load %arg20[%c18_327, %c0_328] : memref<32x256xf32, #tpu.memory_space<vmem>>, vector<2x256xf32>
    %c0_329 = arith.constant 0 : index
    %c0_330 = arith.constant 0 : index
    %881 = vector.load %arg8[%c0_329, %c0_330] : memref<64x256xf32, #tpu.memory_space<vmem>>, vector<64x256xf32>
    %cst_331 = arith.constant dense<0.000000e+00> : vector<2x256xf32>
    %882 = tpu.matmul %879, %881, %cst_331 {dimension_numbers = #tpu.dot_dimension_numbers<[1], [0], [0], [1], [0, 0, 1, 1], [], []>} : vector<2x64xf32>, vector<64x256xf32>, vector<2x256xf32> -> vector<2x256xf32>
    %883 = arith.addf %880, %882 : vector<2x256xf32>
    %884 = vector.extract_strided_slice %883 {offsets = [0, 0], sizes = [2, 192], strides = [1, 1]} : vector<2x256xf32> to vector<2x192xf32>
    %885 = arith.negf %884 : vector<2x192xf32>
    %886 = math.exp %885 : vector<2x192xf32>
    %cst_332 = arith.constant 1.000000e+00 : f32
    %887 = vector.broadcast %cst_332 : f32 to vector<2x192xf32>
    %888 = arith.addf %887, %886 : vector<2x192xf32>
    %889 = arith.divf %887, %888 : vector<2x192xf32>
    %890 = vector.extract_strided_slice %883 {offsets = [0, 192], sizes = [2, 64], strides = [1, 1]} : vector<2x256xf32> to vector<2x64xf32>
    %891 = math.tanh %890 : vector<2x64xf32>
    %892 = vector.extract_strided_slice %889 {offsets = [0, 0], sizes = [2, 64], strides = [1, 1]} : vector<2x192xf32> to vector<2x64xf32>
    %893 = vector.extract_strided_slice %889 {offsets = [0, 64], sizes = [2, 64], strides = [1, 1]} : vector<2x192xf32> to vector<2x64xf32>
    %894 = vector.extract_strided_slice %889 {offsets = [0, 128], sizes = [2, 64], strides = [1, 1]} : vector<2x192xf32> to vector<2x64xf32>
    %895 = arith.mulf %893, %877 : vector<2x64xf32>
    %896 = arith.mulf %892, %891 : vector<2x64xf32>
    %897 = arith.addf %895, %896 : vector<2x64xf32>
    %898 = math.tanh %897 : vector<2x64xf32>
    %899 = arith.mulf %894, %898 : vector<2x64xf32>
    %c20_333 = arith.constant 20 : index
    %c0_334 = arith.constant 0 : index
    %900 = vector.load %arg20[%c20_333, %c0_334] : memref<32x256xf32, #tpu.memory_space<vmem>>, vector<2x256xf32>
    %c0_335 = arith.constant 0 : index
    %c0_336 = arith.constant 0 : index
    %901 = vector.load %arg8[%c0_335, %c0_336] : memref<64x256xf32, #tpu.memory_space<vmem>>, vector<64x256xf32>
    %cst_337 = arith.constant dense<0.000000e+00> : vector<2x256xf32>
    %902 = tpu.matmul %899, %901, %cst_337 {dimension_numbers = #tpu.dot_dimension_numbers<[1], [0], [0], [1], [0, 0, 1, 1], [], []>} : vector<2x64xf32>, vector<64x256xf32>, vector<2x256xf32> -> vector<2x256xf32>
    %903 = arith.addf %900, %902 : vector<2x256xf32>
    %904 = vector.extract_strided_slice %903 {offsets = [0, 0], sizes = [2, 192], strides = [1, 1]} : vector<2x256xf32> to vector<2x192xf32>
    %905 = arith.negf %904 : vector<2x192xf32>
    %906 = math.exp %905 : vector<2x192xf32>
    %cst_338 = arith.constant 1.000000e+00 : f32
    %907 = vector.broadcast %cst_338 : f32 to vector<2x192xf32>
    %908 = arith.addf %907, %906 : vector<2x192xf32>
    %909 = arith.divf %907, %908 : vector<2x192xf32>
    %910 = vector.extract_strided_slice %903 {offsets = [0, 192], sizes = [2, 64], strides = [1, 1]} : vector<2x256xf32> to vector<2x64xf32>
    %911 = math.tanh %910 : vector<2x64xf32>
    %912 = vector.extract_strided_slice %909 {offsets = [0, 0], sizes = [2, 64], strides = [1, 1]} : vector<2x192xf32> to vector<2x64xf32>
    %913 = vector.extract_strided_slice %909 {offsets = [0, 64], sizes = [2, 64], strides = [1, 1]} : vector<2x192xf32> to vector<2x64xf32>
    %914 = vector.extract_strided_slice %909 {offsets = [0, 128], sizes = [2, 64], strides = [1, 1]} : vector<2x192xf32> to vector<2x64xf32>
    %915 = arith.mulf %913, %897 : vector<2x64xf32>
    %916 = arith.mulf %912, %911 : vector<2x64xf32>
    %917 = arith.addf %915, %916 : vector<2x64xf32>
    %918 = math.tanh %917 : vector<2x64xf32>
    %919 = arith.mulf %914, %918 : vector<2x64xf32>
    %c22_339 = arith.constant 22 : index
    %c0_340 = arith.constant 0 : index
    %920 = vector.load %arg20[%c22_339, %c0_340] : memref<32x256xf32, #tpu.memory_space<vmem>>, vector<2x256xf32>
    %c0_341 = arith.constant 0 : index
    %c0_342 = arith.constant 0 : index
    %921 = vector.load %arg8[%c0_341, %c0_342] : memref<64x256xf32, #tpu.memory_space<vmem>>, vector<64x256xf32>
    %cst_343 = arith.constant dense<0.000000e+00> : vector<2x256xf32>
    %922 = tpu.matmul %919, %921, %cst_343 {dimension_numbers = #tpu.dot_dimension_numbers<[1], [0], [0], [1], [0, 0, 1, 1], [], []>} : vector<2x64xf32>, vector<64x256xf32>, vector<2x256xf32> -> vector<2x256xf32>
    %923 = arith.addf %920, %922 : vector<2x256xf32>
    %924 = vector.extract_strided_slice %923 {offsets = [0, 0], sizes = [2, 192], strides = [1, 1]} : vector<2x256xf32> to vector<2x192xf32>
    %925 = arith.negf %924 : vector<2x192xf32>
    %926 = math.exp %925 : vector<2x192xf32>
    %cst_344 = arith.constant 1.000000e+00 : f32
    %927 = vector.broadcast %cst_344 : f32 to vector<2x192xf32>
    %928 = arith.addf %927, %926 : vector<2x192xf32>
    %929 = arith.divf %927, %928 : vector<2x192xf32>
    %930 = vector.extract_strided_slice %923 {offsets = [0, 192], sizes = [2, 64], strides = [1, 1]} : vector<2x256xf32> to vector<2x64xf32>
    %931 = math.tanh %930 : vector<2x64xf32>
    %932 = vector.extract_strided_slice %929 {offsets = [0, 0], sizes = [2, 64], strides = [1, 1]} : vector<2x192xf32> to vector<2x64xf32>
    %933 = vector.extract_strided_slice %929 {offsets = [0, 64], sizes = [2, 64], strides = [1, 1]} : vector<2x192xf32> to vector<2x64xf32>
    %934 = vector.extract_strided_slice %929 {offsets = [0, 128], sizes = [2, 64], strides = [1, 1]} : vector<2x192xf32> to vector<2x64xf32>
    %935 = arith.mulf %933, %917 : vector<2x64xf32>
    %936 = arith.mulf %932, %931 : vector<2x64xf32>
    %937 = arith.addf %935, %936 : vector<2x64xf32>
    %938 = math.tanh %937 : vector<2x64xf32>
    %939 = arith.mulf %934, %938 : vector<2x64xf32>
    %c24_345 = arith.constant 24 : index
    %c0_346 = arith.constant 0 : index
    %940 = vector.load %arg20[%c24_345, %c0_346] : memref<32x256xf32, #tpu.memory_space<vmem>>, vector<2x256xf32>
    %c0_347 = arith.constant 0 : index
    %c0_348 = arith.constant 0 : index
    %941 = vector.load %arg8[%c0_347, %c0_348] : memref<64x256xf32, #tpu.memory_space<vmem>>, vector<64x256xf32>
    %cst_349 = arith.constant dense<0.000000e+00> : vector<2x256xf32>
    %942 = tpu.matmul %939, %941, %cst_349 {dimension_numbers = #tpu.dot_dimension_numbers<[1], [0], [0], [1], [0, 0, 1, 1], [], []>} : vector<2x64xf32>, vector<64x256xf32>, vector<2x256xf32> -> vector<2x256xf32>
    %943 = arith.addf %940, %942 : vector<2x256xf32>
    %944 = vector.extract_strided_slice %943 {offsets = [0, 0], sizes = [2, 192], strides = [1, 1]} : vector<2x256xf32> to vector<2x192xf32>
    %945 = arith.negf %944 : vector<2x192xf32>
    %946 = math.exp %945 : vector<2x192xf32>
    %cst_350 = arith.constant 1.000000e+00 : f32
    %947 = vector.broadcast %cst_350 : f32 to vector<2x192xf32>
    %948 = arith.addf %947, %946 : vector<2x192xf32>
    %949 = arith.divf %947, %948 : vector<2x192xf32>
    %950 = vector.extract_strided_slice %943 {offsets = [0, 192], sizes = [2, 64], strides = [1, 1]} : vector<2x256xf32> to vector<2x64xf32>
    %951 = math.tanh %950 : vector<2x64xf32>
    %952 = vector.extract_strided_slice %949 {offsets = [0, 0], sizes = [2, 64], strides = [1, 1]} : vector<2x192xf32> to vector<2x64xf32>
    %953 = vector.extract_strided_slice %949 {offsets = [0, 64], sizes = [2, 64], strides = [1, 1]} : vector<2x192xf32> to vector<2x64xf32>
    %954 = vector.extract_strided_slice %949 {offsets = [0, 128], sizes = [2, 64], strides = [1, 1]} : vector<2x192xf32> to vector<2x64xf32>
    %955 = arith.mulf %953, %937 : vector<2x64xf32>
    %956 = arith.mulf %952, %951 : vector<2x64xf32>
    %957 = arith.addf %955, %956 : vector<2x64xf32>
    %958 = math.tanh %957 : vector<2x64xf32>
    %959 = arith.mulf %954, %958 : vector<2x64xf32>
    %c26_351 = arith.constant 26 : index
    %c0_352 = arith.constant 0 : index
    %960 = vector.load %arg20[%c26_351, %c0_352] : memref<32x256xf32, #tpu.memory_space<vmem>>, vector<2x256xf32>
    %c0_353 = arith.constant 0 : index
    %c0_354 = arith.constant 0 : index
    %961 = vector.load %arg8[%c0_353, %c0_354] : memref<64x256xf32, #tpu.memory_space<vmem>>, vector<64x256xf32>
    %cst_355 = arith.constant dense<0.000000e+00> : vector<2x256xf32>
    %962 = tpu.matmul %959, %961, %cst_355 {dimension_numbers = #tpu.dot_dimension_numbers<[1], [0], [0], [1], [0, 0, 1, 1], [], []>} : vector<2x64xf32>, vector<64x256xf32>, vector<2x256xf32> -> vector<2x256xf32>
    %963 = arith.addf %960, %962 : vector<2x256xf32>
    %964 = vector.extract_strided_slice %963 {offsets = [0, 0], sizes = [2, 192], strides = [1, 1]} : vector<2x256xf32> to vector<2x192xf32>
    %965 = arith.negf %964 : vector<2x192xf32>
    %966 = math.exp %965 : vector<2x192xf32>
    %cst_356 = arith.constant 1.000000e+00 : f32
    %967 = vector.broadcast %cst_356 : f32 to vector<2x192xf32>
    %968 = arith.addf %967, %966 : vector<2x192xf32>
    %969 = arith.divf %967, %968 : vector<2x192xf32>
    %970 = vector.extract_strided_slice %963 {offsets = [0, 192], sizes = [2, 64], strides = [1, 1]} : vector<2x256xf32> to vector<2x64xf32>
    %971 = math.tanh %970 : vector<2x64xf32>
    %972 = vector.extract_strided_slice %969 {offsets = [0, 0], sizes = [2, 64], strides = [1, 1]} : vector<2x192xf32> to vector<2x64xf32>
    %973 = vector.extract_strided_slice %969 {offsets = [0, 64], sizes = [2, 64], strides = [1, 1]} : vector<2x192xf32> to vector<2x64xf32>
    %974 = vector.extract_strided_slice %969 {offsets = [0, 128], sizes = [2, 64], strides = [1, 1]} : vector<2x192xf32> to vector<2x64xf32>
    %975 = arith.mulf %973, %957 : vector<2x64xf32>
    %976 = arith.mulf %972, %971 : vector<2x64xf32>
    %977 = arith.addf %975, %976 : vector<2x64xf32>
    %978 = math.tanh %977 : vector<2x64xf32>
    %979 = arith.mulf %974, %978 : vector<2x64xf32>
    %c28_357 = arith.constant 28 : index
    %c0_358 = arith.constant 0 : index
    %980 = vector.load %arg20[%c28_357, %c0_358] : memref<32x256xf32, #tpu.memory_space<vmem>>, vector<2x256xf32>
    %c0_359 = arith.constant 0 : index
    %c0_360 = arith.constant 0 : index
    %981 = vector.load %arg8[%c0_359, %c0_360] : memref<64x256xf32, #tpu.memory_space<vmem>>, vector<64x256xf32>
    %cst_361 = arith.constant dense<0.000000e+00> : vector<2x256xf32>
    %982 = tpu.matmul %979, %981, %cst_361 {dimension_numbers = #tpu.dot_dimension_numbers<[1], [0], [0], [1], [0, 0, 1, 1], [], []>} : vector<2x64xf32>, vector<64x256xf32>, vector<2x256xf32> -> vector<2x256xf32>
    %983 = arith.addf %980, %982 : vector<2x256xf32>
    %984 = vector.extract_strided_slice %983 {offsets = [0, 0], sizes = [2, 192], strides = [1, 1]} : vector<2x256xf32> to vector<2x192xf32>
    %985 = arith.negf %984 : vector<2x192xf32>
    %986 = math.exp %985 : vector<2x192xf32>
    %cst_362 = arith.constant 1.000000e+00 : f32
    %987 = vector.broadcast %cst_362 : f32 to vector<2x192xf32>
    %988 = arith.addf %987, %986 : vector<2x192xf32>
    %989 = arith.divf %987, %988 : vector<2x192xf32>
    %990 = vector.extract_strided_slice %983 {offsets = [0, 192], sizes = [2, 64], strides = [1, 1]} : vector<2x256xf32> to vector<2x64xf32>
    %991 = math.tanh %990 : vector<2x64xf32>
    %992 = vector.extract_strided_slice %989 {offsets = [0, 0], sizes = [2, 64], strides = [1, 1]} : vector<2x192xf32> to vector<2x64xf32>
    %993 = vector.extract_strided_slice %989 {offsets = [0, 64], sizes = [2, 64], strides = [1, 1]} : vector<2x192xf32> to vector<2x64xf32>
    %994 = vector.extract_strided_slice %989 {offsets = [0, 128], sizes = [2, 64], strides = [1, 1]} : vector<2x192xf32> to vector<2x64xf32>
    %995 = arith.mulf %993, %977 : vector<2x64xf32>
    %996 = arith.mulf %992, %991 : vector<2x64xf32>
    %997 = arith.addf %995, %996 : vector<2x64xf32>
    %998 = math.tanh %997 : vector<2x64xf32>
    %999 = arith.mulf %994, %998 : vector<2x64xf32>
    %c30_363 = arith.constant 30 : index
    %c0_364 = arith.constant 0 : index
    %1000 = vector.load %arg20[%c30_363, %c0_364] : memref<32x256xf32, #tpu.memory_space<vmem>>, vector<2x256xf32>
    %c0_365 = arith.constant 0 : index
    %c0_366 = arith.constant 0 : index
    %1001 = vector.load %arg8[%c0_365, %c0_366] : memref<64x256xf32, #tpu.memory_space<vmem>>, vector<64x256xf32>
    %cst_367 = arith.constant dense<0.000000e+00> : vector<2x256xf32>
    %1002 = tpu.matmul %999, %1001, %cst_367 {dimension_numbers = #tpu.dot_dimension_numbers<[1], [0], [0], [1], [0, 0, 1, 1], [], []>} : vector<2x64xf32>, vector<64x256xf32>, vector<2x256xf32> -> vector<2x256xf32>
    %1003 = arith.addf %1000, %1002 : vector<2x256xf32>
    %1004 = vector.extract_strided_slice %1003 {offsets = [0, 0], sizes = [2, 192], strides = [1, 1]} : vector<2x256xf32> to vector<2x192xf32>
    %1005 = arith.negf %1004 : vector<2x192xf32>
    %1006 = math.exp %1005 : vector<2x192xf32>
    %cst_368 = arith.constant 1.000000e+00 : f32
    %1007 = vector.broadcast %cst_368 : f32 to vector<2x192xf32>
    %1008 = arith.addf %1007, %1006 : vector<2x192xf32>
    %1009 = arith.divf %1007, %1008 : vector<2x192xf32>
    %1010 = vector.extract_strided_slice %1003 {offsets = [0, 192], sizes = [2, 64], strides = [1, 1]} : vector<2x256xf32> to vector<2x64xf32>
    %1011 = math.tanh %1010 : vector<2x64xf32>
    %1012 = vector.extract_strided_slice %1009 {offsets = [0, 0], sizes = [2, 64], strides = [1, 1]} : vector<2x192xf32> to vector<2x64xf32>
    %1013 = vector.extract_strided_slice %1009 {offsets = [0, 64], sizes = [2, 64], strides = [1, 1]} : vector<2x192xf32> to vector<2x64xf32>
    %1014 = vector.extract_strided_slice %1009 {offsets = [0, 128], sizes = [2, 64], strides = [1, 1]} : vector<2x192xf32> to vector<2x64xf32>
    %1015 = arith.mulf %1013, %997 : vector<2x64xf32>
    %1016 = arith.mulf %1012, %1011 : vector<2x64xf32>
    %1017 = arith.addf %1015, %1016 : vector<2x64xf32>
    %1018 = math.tanh %1017 : vector<2x64xf32>
    %1019 = arith.mulf %1014, %1018 : vector<2x64xf32>
    %c0_369 = arith.constant 0 : index
    %c0_370 = arith.constant 0 : index
    %1020 = vector.load %arg21[%c0_369, %c0_370] : memref<2x256xf32, #tpu.memory_space<vmem>>, vector<2x256xf32>
    %c0_371 = arith.constant 0 : index
    %c0_372 = arith.constant 0 : index
    %1021 = vector.load %arg11[%c0_371, %c0_372] : memref<64x256xf32, #tpu.memory_space<vmem>>, vector<64x256xf32>
    %cst_373 = arith.constant dense<0.000000e+00> : vector<2x256xf32>
    %1022 = tpu.matmul %13, %1021, %cst_373 {dimension_numbers = #tpu.dot_dimension_numbers<[1], [0], [0], [1], [0, 0, 1, 1], [], []>} : vector<2x64xf32>, vector<64x256xf32>, vector<2x256xf32> -> vector<2x256xf32>
    %1023 = arith.addf %1020, %1022 : vector<2x256xf32>
    %1024 = vector.extract_strided_slice %1023 {offsets = [0, 0], sizes = [2, 192], strides = [1, 1]} : vector<2x256xf32> to vector<2x192xf32>
    %1025 = arith.negf %1024 : vector<2x192xf32>
    %1026 = math.exp %1025 : vector<2x192xf32>
    %cst_374 = arith.constant 1.000000e+00 : f32
    %1027 = vector.broadcast %cst_374 : f32 to vector<2x192xf32>
    %1028 = arith.addf %1027, %1026 : vector<2x192xf32>
    %1029 = arith.divf %1027, %1028 : vector<2x192xf32>
    %1030 = vector.extract_strided_slice %1023 {offsets = [0, 192], sizes = [2, 64], strides = [1, 1]} : vector<2x256xf32> to vector<2x64xf32>
    %1031 = math.tanh %1030 : vector<2x64xf32>
    %1032 = vector.extract_strided_slice %1029 {offsets = [0, 0], sizes = [2, 64], strides = [1, 1]} : vector<2x192xf32> to vector<2x64xf32>
    %1033 = vector.extract_strided_slice %1029 {offsets = [0, 64], sizes = [2, 64], strides = [1, 1]} : vector<2x192xf32> to vector<2x64xf32>
    %1034 = vector.extract_strided_slice %1029 {offsets = [0, 128], sizes = [2, 64], strides = [1, 1]} : vector<2x192xf32> to vector<2x64xf32>
    %1035 = arith.mulf %1033, %13 : vector<2x64xf32>
    %1036 = arith.mulf %1032, %1031 : vector<2x64xf32>
    %1037 = arith.addf %1035, %1036 : vector<2x64xf32>
    %1038 = math.tanh %1037 : vector<2x64xf32>
    %1039 = arith.mulf %1034, %1038 : vector<2x64xf32>
    %c0_375 = arith.constant 0 : index
    %c0_376 = arith.constant 0 : index
    %1040 = vector.load %arg13[%c0_375, %c0_376] : memref<64x8xf32, #tpu.memory_space<vmem>>, vector<64x8xf32>
    %cst_377 = arith.constant dense<0.000000e+00> : vector<2x8xf32>
    %1041 = tpu.matmul %1019, %1040, %cst_377 {dimension_numbers = #tpu.dot_dimension_numbers<[1], [0], [0], [1], [0, 0, 1, 1], [], []>} : vector<2x64xf32>, vector<64x8xf32>, vector<2x8xf32> -> vector<2x8xf32>
    %c0_378 = arith.constant 0 : index
    %c0_379 = arith.constant 0 : index
    %1042 = vector.load %arg14[%c0_378, %c0_379] : memref<64x8xf32, #tpu.memory_space<vmem>>, vector<64x8xf32>
    %cst_380 = arith.constant dense<0.000000e+00> : vector<2x8xf32>
    %1043 = tpu.matmul %1039, %1042, %cst_380 {dimension_numbers = #tpu.dot_dimension_numbers<[1], [0], [0], [1], [0, 0, 1, 1], [], []>} : vector<2x64xf32>, vector<64x8xf32>, vector<2x8xf32> -> vector<2x8xf32>
    %1044 = arith.addf %1041, %1043 : vector<2x8xf32>
    %c0_381 = arith.constant 0 : index
    %c0_382 = arith.constant 0 : index
    %1045 = vector.load %arg15[%c0_381, %c0_382] : memref<1x8xf32, #tpu.memory_space<vmem>>, vector<1x8xf32>
    %1046 = vector.broadcast %1045 : vector<1x8xf32> to vector<2x8xf32>
    %1047 = arith.addf %1044, %1046 : vector<2x8xf32>
    %c0_383 = arith.constant 0 : index
    %c0_384 = arith.constant 0 : index
    %1048 = vector.load %arg16[%c0_383, %c0_384] : memref<2x8xf32, #tpu.memory_space<vmem>>, vector<2x8xf32>
    tpu.vector_store %arg16[%c0_383, %c0_384], %1047 {strides = array<i32>} : memref<2x8xf32, #tpu.memory_space<vmem>>, vector<2x8xf32>,
    return
  }
}

</mosaic_0001>

<bundles_post_ra>
// kernel: mylstm_forward.1
= control target key start
LH: loop header
LB: loop body
LE: loop exit
PB: predicated region body
PF: predicated region fallthrough
CT: control target
= control target key end

     0   :  { %s10991_s0 = inlined_call_operand.vmem [shape: f32[32,128], index: 0, kind: input, shape index: {}]   ;;  %s10992_s1 = inlined_call_operand.vmem [shape: f32[128,256], index: 1, kind: input, shape index: {}]   ;;  %s10993_s2 = inlined_call_operand.vmem [shape: f32[64,256], index: 2, kind: input, shape index: {}]   ;;  %s10994_s3 = inlined_call_operand.vmem [shape: f32[1,256], index: 3, kind: input, shape index: {}]   ;;  %s10995_s4 = inlined_call_operand.vmem [shape: f32[128,256], index: 4, kind: input, shape index: {}]   ;;  %s10996_s5 = inlined_call_operand.vmem [shape: f32[64,256], index: 5, kind: input, shape index: {}]   ;;  %s10997_s6 = inlined_call_operand.vmem [shape: f32[1,256], index: 6, kind: input, shape index: {}]   ;;  %s10998_s7 = inlined_call_operand.vmem [shape: f32[128,256], index: 7, kind: input, shape index: {}]   ;;  %s10999_s8 = inlined_call_operand.vmem [shape: f32[64,256], index: 8, kind: input, shape index: {}]   ;;  %s11000_s9 = inlined_call_operand.vmem [shape: f32[1,256], index: 9, kind: input, shape index: {}]   ;;  %s11001_s10 = inlined_call_operand.vmem [shape: f32[128,256], index: 10, kind: input, shape index: {}]   ;;  %s11002_s11 = inlined_call_operand.vmem [shape: f32[64,256], index: 11, kind: input, shape index: {}]   ;;  %s11003_s12 = inlined_call_operand.vmem [shape: f32[1,256], index: 12, kind: input, shape index: {}]   ;;  %s11004_s13 = inlined_call_operand.vmem [shape: f32[64,8], index: 13, kind: input, shape index: {}]   ;;  %s11005_s14 = inlined_call_operand.vmem [shape: f32[64,8], index: 14, kind: input, shape index: {}]   ;;  %s11006_s15 = inlined_call_operand.vmem [shape: f32[1,8], index: 15, kind: input, shape index: {}]   ;;  %s11007_s16 = inlined_call_operand.hbm [shape: f32[2,8], index: 16, kind: output, shape index: {}]  }
   0x1   :  { %11009 = sst [smem:[#allocation10_spill]] %s10991_s0 }
   0x2   :  { %v59_v0 = vld [vmem:[%s10992_s1 + $0x8] sm:$0xff]  ;;  %v61_v1 = vld [vmem:[%s10992_s1 + $0x18] sm:$0xff]  ;;  %v58_v5 = vld [vmem:[%s10992_s1] sm:$0xff]  ;;  %v8861_v7 = vmov 0.0  }
   0x3   :  { %v200_v2 = vld [vmem:[%s10995_s4 + $0x8] sm:$0xff]  ;;  %v7311_v3 = vpack.c.bf16 %v61_v1, %v59_v0  ;;  %v202_v4 = vld [vmem:[%s10995_s4 + $0x18] sm:$0xff]  ;;  %v60_v6 = vld [vmem:[%s10992_s1 + $0x10] sm:$0xff]  ;;  %166 = vmatprep.mubr.f32.mxu0 %v8861_v7  ;;  %307 = vmatprep.mubr.f32.mxu1 %v8861_v7 }
   0x4   :  { %v7343_v8 = vpack.c.bf16 %v202_v4, %v200_v2  ;;  %v7313_v9 = vpack.c.bf16 %v60_v6, %v58_v5  ;;  %v199_v10 = vld [vmem:[%s10995_s4] sm:$0xff]  ;;  %v201_v11 = vld [vmem:[%s10995_s4 + $0x10] sm:$0xff]  ;;  %v63_v12 = vld [vmem:[%s10992_s1 + $0x28] sm:$0xff] }
   0x5   :  { %7312 = vmatprep.subr.bf16.mxu0 %v7311_v3  ;;  %v7345_v13 = vpack.c.bf16 %v201_v11, %v199_v10  ;;  %v65_v14 = vld [vmem:[%s10992_s1 + $0x38] sm:$0xff]  ;;  %v204_v15 = vld [vmem:[%s10995_s4 + $0x28] sm:$0xff]  ;;  %v62_v19 = vld [vmem:[%s10992_s1 + $0x20] sm:$0xff] }
   0x6   :  { %v206_v16 = vld [vmem:[%s10995_s4 + $0x38] sm:$0xff]  ;;  %7344 = vmatprep.subr.bf16.mxu1 %v7343_v8  ;;  %7314 = vmatpush1.bf16.msra.mxu0 %v7313_v9  ;;  %v7315_v17 = vpack.c.bf16 %v65_v14, %v63_v12  ;;  %v64_v20 = vld [vmem:[%s10992_s1 + $0x30] sm:$0xff]  ;;  %v203_v21 = vld [vmem:[%s10995_s4 + $0x20] sm:$0xff] }
   0x7   :  { %v7347_v18 = vpack.c.bf16 %v206_v16, %v204_v15  ;;  %7346 = vmatpush1.bf16.msra.mxu1 %v7345_v13  ;;  %v7317_v22 = vpack.c.bf16 %v64_v20, %v62_v19  ;;  %v205_v23 = vld [vmem:[%s10995_s4 + $0x30] sm:$0xff]  ;;  %v67_v24 = vld [vmem:[%s10992_s1 + $0x48] sm:$0xff]  ;;  %v69_v25 = vld [vmem:[%s10992_s1 + $0x58] sm:$0xff] }
   0x8   :  { %7316 = vmatprep.subr.bf16.mxu0 %v7315_v17  ;;  %v7349_v26 = vpack.c.bf16 %v205_v23, %v203_v21  ;;  %v7319_v27 = vpack.c.bf16 %v69_v25, %v67_v24  ;;  %v208_v28 = vld [vmem:[%s10995_s4 + $0x48] sm:$0xff]  ;;  %v210_v29 = vld [vmem:[%s10995_s4 + $0x58] sm:$0xff]  ;;  %v66_v30 = vld [vmem:[%s10992_s1 + $0x40] sm:$0xff] }
   0x9   :  { %7348 = vmatprep.subr.bf16.mxu1 %v7347_v18  ;;  %v7351_v31 = vpack.c.bf16 %v210_v29, %v208_v28  ;;  %v68_v32 = vld [vmem:[%s10992_s1 + $0x50] sm:$0xff]  ;;  %v207_v33 = vld [vmem:[%s10995_s4 + $0x40] sm:$0xff]  ;;  %v71_v36 = vld [vmem:[%s10992_s1 + $0x68] sm:$0xff] }
   0xa   :  { %v209_v34 = vld [vmem:[%s10995_s4 + $0x50] sm:$0xff]  ;;  %7318 = vmatpush1.bf16.msra.mxu0 %v7317_v22  ;;  %v7321_v35 = vpack.c.bf16 %v68_v32, %v66_v30  ;;  %v73_v37 = vld [vmem:[%s10992_s1 + $0x78] sm:$0xff]  ;;  %v212_v38 = vld [vmem:[%s10995_s4 + $0x68] sm:$0xff] }
   0xb   :  { %7350 = vmatpush1.bf16.msra.mxu1 %v7349_v26  ;;  %7320 = vmatprep.subr.bf16.mxu0 %v7319_v27  ;;  %v7353_v39 = vpack.c.bf16 %v209_v34, %v207_v33  ;;  %v7323_v40 = vpack.c.bf16 %v73_v37, %v71_v36  ;;  %v214_v41 = vld [vmem:[%s10995_s4 + $0x78] sm:$0xff]  ;;  %v70_v42 = vld [vmem:[%s10992_s1 + $0x60] sm:$0xff]  ;;  %v72_v43 = vld [vmem:[%s10992_s1 + $0x70] sm:$0xff] }
   0xc   :  { %7352 = vmatprep.subr.bf16.mxu1 %v7351_v31  ;;  %v7355_v44 = vpack.c.bf16 %v214_v41, %v212_v38  ;;  %v211_v45 = vld [vmem:[%s10995_s4 + $0x60] sm:$0xff]  ;;  %v213_v46 = vld [vmem:[%s10995_s4 + $0x70] sm:$0xff]  ;;  %v75_v47 = vld [vmem:[%s10992_s1 + $0x88] sm:$0xff]  ;;  %v7325_v51 = vpack.c.bf16 %v72_v43, %v70_v42 }
   0xd   :  { %v77_v48 = vld [vmem:[%s10992_s1 + $0x98] sm:$0xff]  ;;  %v216_v49 = vld [vmem:[%s10995_s4 + $0x88] sm:$0xff]  ;;  %v7357_v52 = vpack.c.bf16 %v213_v46, %v211_v45  ;;  %v74_v54 = vld [vmem:[%s10992_s1 + $0x80] sm:$0xff] }
   0xe   :  { %v218_v50 = vld [vmem:[%s10995_s4 + $0x98] sm:$0xff]  ;;  %7322 = vmatpush1.bf16.msra.mxu0 %v7321_v35  ;;  %v7327_v53 = vpack.c.bf16 %v77_v48, %v75_v47  ;;  %v76_v55 = vld [vmem:[%s10992_s1 + $0x90] sm:$0xff]  ;;  %v215_v56 = vld [vmem:[%s10995_s4 + $0x80] sm:$0xff] }
   0xf   :  { %7354 = vmatpush1.bf16.msra.mxu1 %v7353_v39  ;;  %7324 = vmatprep.subr.bf16.mxu0 %v7323_v40  ;;  %v7359_v57 = vpack.c.bf16 %v218_v50, %v216_v49  ;;  %v217_v58 = vld [vmem:[%s10995_s4 + $0x90] sm:$0xff]  ;;  %v79_v59 = vld [vmem:[%s10992_s1 + $0xa8] sm:$0xff]  ;;  %v81_v60 = vld [vmem:[%s10992_s1 + $0xb8] sm:$0xff]  ;;  %v7329_v63 = vpack.c.bf16 %v76_v55, %v74_v54 }
  0x10   :  { %7356 = vmatprep.subr.bf16.mxu1 %v7355_v44  ;;  %v220_v61 = vld [vmem:[%s10995_s4 + $0xa8] sm:$0xff]  ;;  %v222_v62 = vld [vmem:[%s10995_s4 + $0xb8] sm:$0xff]  ;;  %v7361_v0 = vpack.c.bf16 %v217_v58, %v215_v56  ;;  %v7331_v1 = vpack.c.bf16 %v81_v60, %v79_v59  ;;  %v78_v2 = vld [vmem:[%s10992_s1 + $0xa0] sm:$0xff] }
  0x11   :  { %v80_v3 = vld [vmem:[%s10992_s1 + $0xb0] sm:$0xff]  ;;  %v219_v4 = vld [vmem:[%s10995_s4 + $0xa0] sm:$0xff]  ;;  %v7363_v5 = vpack.c.bf16 %v222_v62, %v220_v61  ;;  %v83_v8 = vld [vmem:[%s10992_s1 + $0xc8] sm:$0xff] }
  0x12   :  { %7326 = vmatpush1.bf16.msra.mxu0 %v7325_v51  ;;  %v221_v6 = vld [vmem:[%s10995_s4 + $0xb0] sm:$0xff]  ;;  %v85_v9 = vld [vmem:[%s10992_s1 + $0xd8] sm:$0xff]  ;;  %v224_v10 = vld [vmem:[%s10995_s4 + $0xc8] sm:$0xff]  ;;  %v7333_v12 = vpack.c.bf16 %v80_v3, %v78_v2 }
  0x13   :  { %7358 = vmatpush1.bf16.msra.mxu1 %v7357_v52  ;;  %7328 = vmatprep.subr.bf16.mxu0 %v7327_v53  ;;  %v226_v11 = vld [vmem:[%s10995_s4 + $0xd8] sm:$0xff]  ;;  %v7365_v13 = vpack.c.bf16 %v221_v6, %v219_v4  ;;  %v7335_v14 = vpack.c.bf16 %v85_v9, %v83_v8  ;;  %v82_v15 = vld [vmem:[%s10992_s1 + $0xc0] sm:$0xff]  ;;  %v84_v16 = vld [vmem:[%s10992_s1 + $0xd0] sm:$0xff] }
  0x14   :  { %7360 = vmatprep.subr.bf16.mxu1 %v7359_v57  ;;  %v223_v17 = vld [vmem:[%s10995_s4 + $0xc0] sm:$0xff]  ;;  %v7367_v18 = vpack.c.bf16 %v226_v11, %v224_v10  ;;  %v225_v19 = vld [vmem:[%s10995_s4 + $0xd0] sm:$0xff]  ;;  %v87_v20 = vld [vmem:[%s10992_s1 + $0xe8] sm:$0xff]  ;;  %v7337_v24 = vpack.c.bf16 %v84_v16, %v82_v15 }
  0x15   :  { %v89_v21 = vld [vmem:[%s10992_s1 + $0xf8] sm:$0xff]  ;;  %v228_v22 = vld [vmem:[%s10995_s4 + $0xe8] sm:$0xff]  ;;  %v7369_v25 = vpack.c.bf16 %v225_v19, %v223_v17  ;;  %v86_v27 = vld [vmem:[%s10992_s1 + $0xe0] sm:$0xff] }
  0x16   :  { %7330 = vmatpush1.bf16.msra.mxu0 %v7329_v63  ;;  %v230_v23 = vld [vmem:[%s10995_s4 + $0xf8] sm:$0xff]  ;;  %v7339_v26 = vpack.c.bf16 %v89_v21, %v87_v20  ;;  %v88_v28 = vld [vmem:[%s10992_s1 + $0xf0] sm:$0xff]  ;;  %v227_v29 = vld [vmem:[%s10995_s4 + $0xe0] sm:$0xff]  ;;  %s11010_s1 = sld [smem:[#allocation10_spill]] }
  0x17   :  { %7362 = vmatpush1.bf16.msra.mxu1 %v7361_v0  ;;  %7332 = vmatprep.subr.bf16.mxu0 %v7331_v1  ;;  %v7371_v30 = vpack.c.bf16 %v230_v23, %v228_v22  ;;  %v229_v31 = vld [vmem:[%s10995_s4 + $0xf0] sm:$0xff]  ;;  %v343_v32 = vld [vmem:[%s10993_s2 + $0x8] sm:$0xff]  ;;  %v345_v33 = vld [vmem:[%s10993_s2 + $0x18] sm:$0xff]  ;;  %v7341_v36 = vpack.c.bf16 %v88_v28, %v86_v27 }
  0x18   :  { %7364 = vmatprep.subr.bf16.mxu1 %v7363_v5  ;;  %v438_v34 = vld [vmem:[%s10996_s5 + $0x8] sm:$0xff]  ;;  %v440_v35 = vld [vmem:[%s10996_s5 + $0x18] sm:$0xff]  ;;  %v7373_v37 = vpack.c.bf16 %v229_v31, %v227_v29  ;;  %v9158_v38 = vpack.c.bf16 %v345_v33, %v343_v32  ;;  %v342_v39 = vld [vmem:[%s10993_s2] sm:$0xff] }
  0x19   :  { %v344_v40 = vld [vmem:[%s10993_s2 + $0x10] sm:$0xff]  ;;  %v9166_v41 = vpack.c.bf16 %v440_v35, %v438_v34  ;;  %v347_v42 = vld [vmem:[%s10993_s2 + $0x28] sm:$0xff]  ;;  %v349_v43 = vld [vmem:[%s10993_s2 + $0x38] sm:$0xff] }
  0x1a   :  { %7334 = vmatpush1.bf16.msra.mxu0 %v7333_v12  ;;  %v437_v44 = vld [vmem:[%s10996_s5] sm:$0xff]  ;;  %v439_v45 = vld [vmem:[%s10996_s5 + $0x10] sm:$0xff]  ;;  %v9183_v47 = vpack.c.bf16 %v344_v40, %v342_v39  ;;  %v442_v48 = vld [vmem:[%s10996_s5 + $0x28] sm:$0xff] }
  0x1b   :  { %7366 = vmatpush1.bf16.msra.mxu1 %v7365_v13  ;;  %7336 = vmatprep.subr.bf16.mxu0 %v7335_v14  ;;  %v444_v49 = vld [vmem:[%s10996_s5 + $0x38] sm:$0xff]  ;;  %v346_v50 = vld [vmem:[%s10993_s2 + $0x20] sm:$0xff]  ;;  %v348_v51 = vld [vmem:[%s10993_s2 + $0x30] sm:$0xff] }
  0x1c   :  { %7368 = vmatprep.subr.bf16.mxu1 %v7367_v18  ;;  %v54_v46 = vld [vmem:[%s11010_s1] sm:$0xff] }
  0x1e   :  { %7338 = vmatpush1.bf16.msra.mxu0 %v7337_v24 }
  0x1f   :  { %7370 = vmatpush1.bf16.msra.mxu1 %v7369_v25  ;;  %7340 = vmatprep.subr.bf16.mxu0 %v7339_v26 }
  0x20   :  { %7372 = vmatprep.subr.bf16.mxu1 %v7371_v30 }
  0x22   :  { %7342 = vmatpush1.bf16.msra.mxu0 %v7341_v36 }
  0x23   :  { %7374 = vmatpush1.bf16.msra.mxu1 %v7373_v37  ;;  %7376 = vmatprep.subr.bf16.mxu0 %v9158_v38 }
  0x24   :  { %21 = vsyncpa [#allocation8], 0  ;;  %7392 = vmatprep.subr.bf16.mxu1 %v9166_v41  ;;  %v9199_v52 = vpack.c.bf16 %v349_v43, %v347_v42  ;;  %v9201_v53 = vpack.c.bf16 %v439_v45, %v437_v44  ;;  %v351_v54 = vld [vmem:[%s10993_s2 + $0x48] sm:$0xff]  ;;  %v9206_v55 = vpack.c.bf16 %v444_v49, %v442_v48  ;;  %v353_v56 = vld [vmem:[%s10993_s2 + $0x58] sm:$0xff]  ;;  %v9221_v60 = vpack.c.bf16 %v348_v51, %v346_v50  ;;  %s8866_s22 = smov [#allocation7]  }
  0x25   :  { %167 = vmatmul.mubr.f32.vlgmr.msra.gmra.mrb[0].mxu0 %v54_v46  ;;  %v441_v57 = vld [vmem:[%s10996_s5 + $0x20] sm:$0xff]  ;;  %v443_v58 = vld [vmem:[%s10996_s5 + $0x30] sm:$0xff]  ;;  %v55_v59 = vld [vmem:[%s11010_s1 + $0x8] sm:$0xff]  ;;  %v9239_v1 = vpack.c.bf16 %v353_v56, %v351_v54  ;;  %v92_v23 = vlaneseq  ;;  %vm592_vm0 = vcmask 517120   ;;  %vm358_vm1 = vcmask 523264  }
  0x26   :  { %308 = vmatmul.mubr.f32.vlgmr.msra.gmra.mrb[0].mxu1 %v54_v46  ;;  %7378 = vmatpush1.bf16.msra.mxu0 %v9183_v47  ;;  %v446_v61 = vld [vmem:[%s10996_s5 + $0x48] sm:$0xff]  ;;  %v448_v62 = vld [vmem:[%s10996_s5 + $0x58] sm:$0xff]  ;;  %v350_v63 = vld [vmem:[%s10993_s2 + $0x40] sm:$0xff]  ;;  %v9241_v2 = vpack.c.bf16 %v443_v58, %v441_v57  ;;  %vm866_vm2 = vcmask 519170   ;;  %vm1141_vm3 = vcmask 521220   ;;  %vm1410_vm4 = vcmask 523270  }
  0x27   :  { %172 = vmatprep.mubr.f32.mxu0 %v8861_v7  ;;  %313 = vmatprep.mubr.f32.mxu1 %v8861_v7  ;;  %v352_v0 = vld [vmem:[%s10993_s2 + $0x50] sm:$0xff]  ;;  %v355_v3 = vld [vmem:[%s10993_s2 + $0x68] sm:$0xff]  ;;  %v9247_v4 = vpack.c.bf16 %v448_v62, %v446_v61  ;;  %v357_v5 = vld [vmem:[%s10993_s2 + $0x78] sm:$0xff]  ;;  %v9332_v24 = vshrl.u32 %v92_v23, 7  ;;  %vm598_vm5 = vcmask 1048070   ;;  %vm1147_vm6 = vcmask 1043970  }
  0x28   :  { %7380 = vmatprep.subr.bf16.mxu0 %v9199_v52  ;;  %7394 = vmatpush1.bf16.msra.mxu1 %v9201_v53  ;;  %v445_v6 = vld [vmem:[%s10996_s5 + $0x40] sm:$0xff]  ;;  %v447_v8 = vld [vmem:[%s10996_s5 + $0x50] sm:$0xff]  ;;  %v9262_v10 = vpack.c.bf16 %v352_v0, %v350_v63  ;;  %v450_v11 = vld [vmem:[%s10996_s5 + $0x68] sm:$0xff]  ;;  %v9280_v15 = vpack.c.bf16 %v357_v5, %v355_v3  ;;  %vm872_vm7 = vcmask 1046020   ;;  %vm1416_vm8 = vcmask 1041920  }
  0x29   :  { %173 = vmatmul.mubr.f32.gmra.mrb[2].mxu0 %v55_v59  ;;  %7396 = vmatprep.subr.bf16.mxu1 %v9206_v55  ;;  %v56_v9 = vld [vmem:[%s11010_s1 + $0x10] sm:$0xff]  ;;  %v452_v12 = vld [vmem:[%s10996_s5 + $0x78] sm:$0xff]  ;;  %v354_v13 = vld [vmem:[%s10993_s2 + $0x60] sm:$0xff]  ;;  %v9282_v16 = vpack.c.bf16 %v447_v8, %v445_v6  ;;  %v9335_v25 = vsub.s32 0, %v9332_v24  ;;  %v9341_v27 = vsub.s32 1, %v9332_v24  ;;  %vm8865_vm9 = vmmov 0  }
  0x2a   :  { %314 = vmatmul.mubr.f32.gmra.mrb[2].mxu1 %v55_v59  ;;  %7382 = vmatpush1.bf16.msra.mxu0 %v9221_v60  ;;  %v356_v14 = vld [vmem:[%s10993_s2 + $0x70] sm:$0xff]  ;;  %v9285_v17 = vpack.c.bf16 %v452_v12, %v450_v11  ;;  %v449_v18 = vld [vmem:[%s10996_s5 + $0x60] sm:$0xff]  ;;  %v57_v20 = vld [vmem:[%s11010_s1 + $0x18] sm:$0xff]  ;;  %vm7093_vm10 = vcmask 58368  }
  0x2b   :  { %178 = vmatprep.mubr.f32.mxu0 %v8861_v7  ;;  %319 = vmatprep.mubr.f32.mxu1 %v8861_v7  ;;  %v451_v19 = vld [vmem:[%s10996_s5 + $0x70] sm:$0xff]  ;;  %v9297_v21 = vpack.c.bf16 %v356_v14, %v354_v13  ;;  %v231_v26 = vld [vmem:[%s10997_s6] sm:$0x3]  ;;  %s7101_s6 = sshll.u32 %s8866_s22, 4  ;;  %s7102_s6 = int_to_ptr.vmem [resolvable:$true] %s7101_s6 }
  0x2c   :  { %7384 = vmatprep.subr.bf16.mxu0 %v9239_v1  ;;  %7398 = vmatpush1.bf16.msra.mxu1 %v9241_v2  ;;  %v9303_v22 = vpack.c.bf16 %v451_v19, %v449_v18  ;;  %v90_v28 = vld [vmem:[%s10994_s3] sm:$0x3]  ;;  %v236_v30 = vrot.slane %v231_v26, %v9335_v25  ;;  %v240_v32 = vrot.slane %v231_v26, %v9341_v27  ;;  %s8862_s3 = smov 64   ;;  %s8837_s23 = scalar_lea.vmem %s7102_s6, 32 }
  0x2d   :  { %179 = vmatmul.mubr.f32.gmra.mrb[4].mxu0 %v56_v9  ;;  %7400 = vmatprep.subr.bf16.mxu1 %v9247_v4  ;;  %v95_v29 = vrot.slane %v90_v28, %v9335_v25  ;;  %v99_v31 = vrot.slane %v90_v28, %v9341_v27  ;;  %p8838_p0 = scmp.ne.s32.totalorder %s7102_s6, %s8837_s23  ;;  %p8842_p1 = scmp.lt.s32.totalorder %s7102_s6, %s7102_s6 }
  0x2e   :  { %320 = vmatmul.mubr.f32.gmra.mrb[4].mxu1 %v56_v9  ;;  %7386 = vmatpush1.bf16.msra.mxu0 %v9262_v10  ;;  %p8843_p2 = scmp.lt.s32.totalorder %s8837_s23, %s8837_s23 }
  0x2f   :  { %184 = vmatprep.mubr.f32.mxu0 %v8861_v7  ;;  %325 = vmatprep.mubr.f32.mxu1 %v8861_v7 }
  0x30   :  { %7388 = vmatprep.subr.bf16.mxu0 %v9280_v15  ;;  %7402 = vmatpush1.bf16.msra.mxu1 %v9282_v16  ;;  %p8844_p3 = por %p8843_p2, %p8842_p1 }
  0x31   :  { %185 = vmatmul.mubr.f32.gmra.mrb[6].mxu0 %v57_v20  ;;  %7404 = vmatprep.subr.bf16.mxu1 %v9285_v17 }
  0x32   :  { %326 = vmatmul.mubr.f32.gmra.mrb[6].mxu1 %v57_v20  ;;  %7390 = vmatpush1.bf16.msra.mxu0 %v9297_v21  ;;  %p8845_p4 = pnand %p8844_p3, %p8838_p0 }
  0x33   :  { %426 = vmatprep.mubr.f32.mxu0 %v8861_v7  ;;  %517 = vmatprep.mubr.f32.mxu1 %v8861_v7 }
  0x34   :  { %7406 = vmatpush1.bf16.msra.mxu1 %v9303_v22  ;;  %7408 = vmatprep.subr.bf16.mxu0 %v9158_v38 }
  0x35   :  { %427 = vmatmul.mubr.f32.vlgmr.msra.gmra.mrb[8].mxu0 %v8861_v7  ;;  %7424 = vmatprep.subr.bf16.mxu1 %v9166_v41 }
  0x36   :  { %7410 = vmatpush1.bf16.msra.mxu0 %v9183_v47  ;;  %685 = vmatprep.mubr.f32.mxu0 %v8861_v7 }
  0x37   :  { %518 = vmatmul.mubr.f32.vlgmr.msra.gmra.mrb[8].mxu1 %v8861_v7  ;;  %7412 = vmatprep.subr.bf16.mxu0 %v9199_v52 }
  0x38   :  { %7426 = vmatpush1.bf16.msra.mxu1 %v9201_v53  ;;  %785 = vmatprep.mubr.f32.mxu1 %v8861_v7 }
  0x39   :  { %7428 = vmatprep.subr.bf16.mxu1 %v9206_v55 }
  0x3a   :  { %7414 = vmatpush1.bf16.msra.mxu0 %v9221_v60 }
  0x3b   :  { %7416 = vmatprep.subr.bf16.mxu0 %v9239_v1 }
  0x3c   :  { %7430 = vmatpush1.bf16.msra.mxu1 %v9241_v2 }
  0x3d   :  { %7432 = vmatprep.subr.bf16.mxu1 %v9247_v4 }
  0x3e   :  { %7418 = vmatpush1.bf16.msra.mxu0 %v9262_v10 }
  0x3f   :  { %7420 = vmatprep.subr.bf16.mxu0 %v9280_v15 }
  0x40   :  { %7434 = vmatpush1.bf16.msra.mxu1 %v9282_v16 }
  0x41   :  { %7436 = vmatprep.subr.bf16.mxu1 %v9285_v17 }
  0x42   :  { %7422 = vmatpush1.bf16.msra.mxu0 %v9297_v21 }
  0x43   :  { %7440 = vmatprep.subr.bf16.mxu0 %v9158_v38 }
  0x44   :  { %7438 = vmatpush1.bf16.msra.mxu1 %v9303_v22 }
  0x45   :  { %7456 = vmatprep.subr.bf16.mxu1 %v9166_v41 }
  0xf8   :  { %v168_v33 = vpop.f32.mrb[0].mxu0 }
  0xf9   :  { %v309_v34 = vpop.f32.mrb[0].mxu1  ;;  %v169_v35 = vadd.f32 %v168_v33, %v95_v29  ;;  %v170_v36 = vpop.f32.mrb[1].mxu0 }
  0xfa   :  { %v310_v37 = vadd.f32 %v309_v34, %v236_v30  ;;  %v311_v39 = vpop.f32.mrb[1].mxu1  ;;  %v171_v40 = vadd.f32 %v170_v36, %v99_v31 }
  0xfb   :  { %v312_v42 = vadd.f32 %v311_v39, %v240_v32  ;;  %191 = vst [vmem:[#allocation3] sm:$0xff] %v169_v35 }
  0xfc   :  { %332 = vst [vmem:[#allocation4] sm:$0xff] %v310_v37  ;;  %192 = vst [vmem:[#allocation3 + $0x8] sm:$0xff] %v171_v40  ;;  %v174_v43 = vpop.f32.mrb[2].mxu0 }
  0xfd   :  { %333 = vst [vmem:[#allocation4 + $0x8] sm:$0xff] %v312_v42  ;;  %v315_v44 = vpop.f32.mrb[2].mxu1  ;;  %v175_v45 = vadd.f32 %v174_v43, %v95_v29  ;;  %v176_v46 = vpop.f32.mrb[3].mxu0 }
  0xfe   :  { %v316_v48 = vadd.f32 %v315_v44, %v236_v30  ;;  %v317_v49 = vpop.f32.mrb[3].mxu1  ;;  %v177_v50 = vadd.f32 %v176_v46, %v99_v31 }
  0xff   :  { %v318_v51 = vadd.f32 %v317_v49, %v240_v32  ;;  %193 = vst [vmem:[#allocation3 + $0x10] sm:$0xff] %v175_v45 }
 0x100   :  { %334 = vst [vmem:[#allocation4 + $0x10] sm:$0xff] %v316_v48  ;;  %194 = vst [vmem:[#allocation3 + $0x18] sm:$0xff] %v177_v50  ;;  %v180_v54 = vpop.f32.mrb[4].mxu0 }
 0x101   :  { %335 = vst [vmem:[#allocation4 + $0x18] sm:$0xff] %v318_v51  ;;  %v321_v56 = vpop.f32.mrb[4].mxu1  ;;  %v181_v57 = vadd.f32 %v180_v54, %v95_v29  ;;  %v182_v58 = vpop.f32.mrb[5].mxu0 }
 0x102   :  { %v322_v59 = vadd.f32 %v321_v56, %v236_v30  ;;  %v323_v61 = vpop.f32.mrb[5].mxu1  ;;  %v183_v62 = vadd.f32 %v182_v58, %v99_v31 }
 0x103   :  { %v324_v63 = vadd.f32 %v323_v61, %v240_v32  ;;  %195 = vst [vmem:[#allocation3 + $0x20] sm:$0xff] %v181_v57  ;;  %v341_v13 = vld [vmem:[#allocation3 + $0x8] sm:$0x3] }
 0x104   :  { %336 = vst [vmem:[#allocation4 + $0x20] sm:$0xff] %v322_v59  ;;  %196 = vst [vmem:[#allocation3 + $0x28] sm:$0xff] %v183_v62  ;;  %v186_v0 = vpop.f32.mrb[6].mxu0 }
 0x105   :  { %337 = vst [vmem:[#allocation4 + $0x28] sm:$0xff] %v324_v63  ;;  %v327_v3 = vpop.f32.mrb[6].mxu1  ;;  %v187_v5 = vadd.f32 %v186_v0, %v95_v29  ;;  %v188_v6 = vpop.f32.mrb[7].mxu0 }
 0x106   :  { %v328_v8 = vadd.f32 %v327_v3, %v236_v30  ;;  %v329_v9 = vpop.f32.mrb[7].mxu1  ;;  %v189_v11 = vadd.f32 %v188_v6, %v99_v31  ;;  %v340_v31 = vld [vmem:[#allocation3] sm:$0x3] }
 0x107   :  { %v330_v12 = vadd.f32 %v329_v9, %v240_v32  ;;  %197 = vst [vmem:[#allocation3 + $0x30] sm:$0xff] %v187_v5 }
 0x108   :  { %338 = vst [vmem:[#allocation4 + $0x30] sm:$0xff] %v328_v8  ;;  %198 = vst [vmem:[#allocation3 + $0x38] sm:$0xff] %v189_v11  ;;  %v428_v14 = vpop.f32.mrb[8].mxu0 }
 0x109   :  { %339 = vst [vmem:[#allocation4 + $0x38] sm:$0xff] %v330_v12  ;;  %v430_v18 = vpop.f32.mrb[9].mxu0  ;;  %v433_v32 = vadd.f32 %v428_v14, %v340_v31 }
 0x10a   :  { %v434_v19 = vadd.f32 %v430_v18, %v341_v13  ;;  %v519_v20 = vpop.f32.mrb[8].mxu1 }
 0x10b   :  { %v521_v23 = vpop.f32.mrb[9].mxu1  ;;  %v7109_v34 = vmul.f32 -1.442695, %v433_v32  ;;  %v526_v35 = vrot.slane %v519_v20, 2 }
 0x10c   :  { %8253 = vtanh.f32 %v434_v19  ;;  %v527_v26 = vrot.slane %v521_v23, 2  ;;  %v7110_v0 = vmul.f32 -1.442695, %v434_v19 }
 0x10f   :  { %v435_v36 = vld [vmem:[#allocation4 + $0x30] sm:$0xc0] }
 0x110   :  { %v436_v28 = vld [vmem:[#allocation4 + $0x38] sm:$0xc0]  ;;  %v530_v37 = vadd.f32 %v526_v35, %v435_v36  ;;  %v701_v31 = vld [vmem:[#allocation4 + $0x38] sm:$0x30] }
 0x111   :  { %v531_v33 = vadd.f32 %v527_v26, %v436_v28 }
 0x112   :  { %v7111_v39 = vmul.f32 -1.442695, %v530_v37 }
 0x113   :  { %8255 = vtanh.f32 %v531_v33  ;;  %v7112_v3 = vmul.f32 -1.442695, %v531_v33 }
 0x114   :  { %8257 = vpow2.f32 %v7109_v34  ;;  %v601_v34 = vld [vmem:[#allocation3 + $0x8] sm:$0xc] }
 0x115   :  { %8259 = vpow2.f32 %v7111_v39 }
 0x116   :  { %v8254_v29 = vpop.eup %8253 }
 0x117   :  { %547 = vrot.lane.b32.xlu1 %v8254_v29, %s8862_s3 }
 0x11d   :  { %v8256_v30 = vpop.eup %8255 }
 0x11e   :  { %577 = vrot.lane.b32.xlu0 %v8256_v30, %s8862_s3  ;;  %v8258_v40 = vpop.eup %8257 }
 0x11f   :  { %v538_v42 = vadd.f32 1.0, %v8258_v40  ;;  %v8260_v43 = vpop.eup %8259 }
 0x120   :  { %v568_v44 = vadd.f32 1.0, %v8260_v43 }
 0x121   :  { %8261 = vrcp.f32 %v538_v42  ;;  %v600_v42 = vld [vmem:[#allocation3] sm:$0xc] }
 0x122   :  { %8263 = vrcp.f32 %v568_v44 }
 0x12b   :  { %v8262_v45 = vpop.eup %8261 }
 0x12c   :  { %v8264_v49 = vpop.eup %8263  ;;  %v545_v54 = vmul.f32 0.0, %v8262_v45 }
 0x12d   :  { %v575_v58 = vmul.f32 0.0, %v8264_v49 }
 0x189   :  { %v548_v46 = vpop.permute.xlu1 %547 }
 0x18a   :  { %v550_v48 = vmul.f32 %v8262_v45, %v548_v46 }
 0x18c   :  { %552 = vrot.lane.b32.xlu1 %v550_v48, %s8862_s3 }
 0x190   :  { %v578_v50 = vpop.permute.xlu0 %577 }
 0x191   :  { %v580_v51 = vmul.f32 %v8264_v49, %v578_v50 }
 0x193   :  { %582 = vrot.lane.b32.xlu0 %v580_v51, %s8862_s3 }
 0x1fe   :  { %v553_v56 = vpop.permute.xlu1 %552 }
 0x1ff   :  { %v9354_v57 = vadd.f32 %v553_v56, %v545_v54 }
 0x201   :  { %8265 = vtanh.f32 %v9354_v57 }
 0x205   :  { %v583_v59 = vpop.permute.xlu0 %582 }
 0x206   :  { %v9357_v61 = vadd.f32 %v583_v59, %v575_v58 }
 0x208   :  { %8267 = vtanh.f32 %v9357_v61 }
 0x209   :  { %8269 = vpow2.f32 %v7110_v0 }
 0x20a   :  { %8271 = vpow2.f32 %v7112_v3 }
 0x20b   :  { %v8266_v62 = vpop.eup %8265 }
 0x20c   :  { %558 = vrot.lane.b32.xlu1 %v8266_v62, %s8862_s3 }
 0x212   :  { %v8268_v63 = vpop.eup %8267 }
 0x213   :  { %588 = vrot.lane.b32.xlu0 %v8268_v63, %s8862_s3  ;;  %v8270_v5 = vpop.eup %8269  ;;  %v847_v63 = vrot.slane %v9357_v61, 2 }
 0x214   :  { %v539_v6 = vadd.f32 1.0, %v8270_v5  ;;  %v8272_v8 = vpop.eup %8271  ;;  %v814_v5 = vrot.slane %v9354_v57, 6 }
 0x215   :  { %v569_v9 = vadd.f32 1.0, %v8272_v8 }
 0x216   :  { %8273 = vrcp.f32 %v539_v6 }
 0x217   :  { %8275 = vrcp.f32 %v569_v9 }
 0x220   :  { %v8274_v11 = vpop.eup %8273 }
 0x221   :  { %v8276_v14 = vpop.eup %8275 }
 0x27e   :  { %v559_v12 = vpop.permute.xlu1 %558 }
 0x27f   :  { %v561_v13 = vmul.f32 %v8274_v11, %v559_v12 }
 0x281   :  { %593 = vst.msk [vmem:[#allocation2] sm:$0x3] %vm592_vm0, %v561_v13  ;;  %7113 = vmatmul.mubr.msk.f32.vlgmr.msra.gmra.mrb[10].mxu0 %vm358_vm1, %v561_v13 }
 0x282   :  { %7442 = vmatpush1.bf16.msra.mxu0 %v9183_v47  ;;  %960 = vmatprep.mubr.f32.mxu0 %v8861_v7 }
 0x283   :  { %7444 = vmatprep.subr.bf16.mxu0 %v9199_v52 }
 0x285   :  { %v589_v18 = vpop.permute.xlu0 %588 }
 0x286   :  { %v9367_v19 = vmul.f32 %v8276_v14, %v589_v18  ;;  %7446 = vmatpush1.bf16.msra.mxu0 %v9221_v60 }
 0x287   :  { %7448 = vmatprep.subr.bf16.mxu0 %v9239_v1 }
 0x288   :  { %v718_v20 = vrot.slane %v9367_v19, 6 }
 0x28a   :  { %7114 = vmatmul.mubr.msk.f32.vlgmr.msra.gmra.mrb[10].mxu1 %vm358_vm1, %v718_v20  ;;  %7450 = vmatpush1.bf16.msra.mxu0 %v9262_v10 }
 0x28b   :  { %7458 = vmatpush1.bf16.msra.mxu1 %v9201_v53  ;;  %1060 = vmatprep.mubr.f32.mxu1 %v8861_v7 }
 0x28c   :  { %7460 = vmatprep.subr.bf16.mxu1 %v9206_v55  ;;  %7452 = vmatprep.subr.bf16.mxu0 %v9280_v15 }
 0x28e   :  { %7454 = vmatpush1.bf16.msra.mxu0 %v9297_v21 }
 0x28f   :  { %7462 = vmatpush1.bf16.msra.mxu1 %v9241_v2  ;;  %7472 = vmatprep.subr.bf16.mxu0 %v9158_v38 }
 0x290   :  { %7464 = vmatprep.subr.bf16.mxu1 %v9247_v4 }
 0x293   :  { %7466 = vmatpush1.bf16.msra.mxu1 %v9282_v16 }
 0x294   :  { %7468 = vmatprep.subr.bf16.mxu1 %v9285_v17 }
 0x297   :  { %7470 = vmatpush1.bf16.msra.mxu1 %v9303_v22 }
 0x298   :  { %7488 = vmatprep.subr.bf16.mxu1 %v9166_v41  ;;  %v700_v41 = vld [vmem:[#allocation4 + $0x30] sm:$0x30] }
 0x354   :  { %v687_v23 = vpop.f32.mrb[10].mxu0 }
 0x355   :  { %v689_v26 = vpop.f32.mrb[11].mxu0  ;;  %v694_v39 = vrot.slane %v687_v23, 6 }
 0x356   :  { %v695_v29 = vrot.slane %v689_v26, 6 }
 0x357   :  { %v698_v43 = vadd.f32 %v694_v39, %v600_v42 }
 0x358   :  { %v699_v38 = vadd.f32 %v695_v29, %v601_v34 }
 0x359   :  { %v7115_v45 = vmul.f32 -1.442695, %v698_v43 }
 0x35a   :  { %v7116_v14 = vmul.f32 -1.442695, %v699_v38 }
 0x35d   :  { %v787_v28 = vpop.f32.mrb[10].mxu1 }
 0x35e   :  { %v789_v33 = vpop.f32.mrb[11].mxu1  ;;  %v794_v37 = vrot.slane %v787_v28, 4 }
 0x35f   :  { %v795_v30 = vrot.slane %v789_v33, 4 }
 0x360   :  { %v798_v40 = vadd.f32 %v794_v37, %v700_v41 }
 0x361   :  { %v799_v32 = vadd.f32 %v795_v30, %v701_v31 }
 0x362   :  { %v7117_v44 = vmul.f32 -1.442695, %v798_v40 }
 0x363   :  { %8277 = vtanh.f32 %v799_v32  ;;  %v7118_v61 = vmul.f32 -1.442695, %v799_v32 }
 0x364   :  { %8279 = vtanh.f32 %v699_v38 }
 0x365   :  { %8281 = vpow2.f32 %v7117_v44 }
 0x366   :  { %8283 = vpow2.f32 %v7115_v45 }
 0x36d   :  { %v8278_v35 = vpop.eup %8277 }
 0x36e   :  { %851 = vrot.lane.b32.xlu0 %v8278_v35, %s8862_s3  ;;  %v8280_v36 = vpop.eup %8279 }
 0x36f   :  { %v8282_v46 = vpop.eup %8281 }
 0x370   :  { %v839_v48 = vadd.f32 1.0, %v8282_v46  ;;  %v8284_v49 = vpop.eup %8283 }
 0x371   :  { %v806_v50 = vadd.f32 1.0, %v8284_v49 }
 0x372   :  { %818 = vrot.lane.b32.xlu0 %v8280_v36, %s8862_s3  ;;  %8285 = vrcp.f32 %v839_v48  ;;  %v874_v36 = vld [vmem:[#allocation3] sm:$0x30] }
 0x373   :  { %8287 = vrcp.f32 %v806_v50 }
 0x37c   :  { %v8286_v51 = vpop.eup %8285 }
 0x37d   :  { %v8288_v58 = vpop.eup %8287  ;;  %v849_v0 = vmul.f32 %v8286_v51, %v847_v63 }
 0x37e   :  { %v816_v8 = vmul.f32 %v8288_v58, %v814_v5 }
 0x3e0   :  { %v852_v54 = vpop.permute.xlu0 %851 }
 0x3e1   :  { %v854_v56 = vmul.f32 %v8286_v51, %v852_v54 }
 0x3e3   :  { %856 = vrot.lane.b32.xlu1 %v854_v56, %s8862_s3 }
 0x3e4   :  { %v819_v59 = vpop.permute.xlu0 %818 }
 0x3e5   :  { %v821_v62 = vmul.f32 %v8288_v58, %v819_v59 }
 0x3e7   :  { %823 = vrot.lane.b32.xlu1 %v821_v62, %s8862_s3 }
 0x455   :  { %v857_v3 = vpop.permute.xlu1 %856 }
 0x456   :  { %v9392_v6 = vadd.f32 %v857_v3, %v849_v0 }
 0x458   :  { %8289 = vtanh.f32 %v9392_v6  ;;  %v1122_v54 = vrot.slane %v9392_v6, 2 }
 0x459   :  { %v824_v9 = vpop.permute.xlu1 %823 }
 0x45a   :  { %v9395_v11 = vadd.f32 %v824_v9, %v816_v8 }
 0x45c   :  { %8291 = vtanh.f32 %v9395_v11  ;;  %v1089_v59 = vrot.slane %v9395_v11, 6 }
 0x45d   :  { %8293 = vpow2.f32 %v7118_v61 }
 0x45e   :  { %8295 = vpow2.f32 %v7116_v14 }
 0x462   :  { %v8290_v12 = vpop.eup %8289 }
 0x463   :  { %862 = vrot.lane.b32.xlu0 %v8290_v12, %s8862_s3 }
 0x466   :  { %v8292_v13 = vpop.eup %8291 }
 0x467   :  { %829 = vrot.lane.b32.xlu1 %v8292_v13, %s8862_s3  ;;  %v8294_v57 = vpop.eup %8293 }
 0x468   :  { %v840_v18 = vadd.f32 1.0, %v8294_v57  ;;  %v8296_v20 = vpop.eup %8295 }
 0x469   :  { %v807_v23 = vadd.f32 1.0, %v8296_v20 }
 0x46a   :  { %8297 = vrcp.f32 %v840_v18 }
 0x46b   :  { %8299 = vrcp.f32 %v807_v23 }
 0x474   :  { %v8298_v26 = vpop.eup %8297 }
 0x475   :  { %v8300_v30 = vpop.eup %8299 }
 0x4d5   :  { %v863_v28 = vpop.permute.xlu0 %862 }
 0x4d6   :  { %v9400_v33 = vmul.f32 %v8298_v26, %v863_v28 }
 0x4d8   :  { %v993_v29 = vrot.slane %v9400_v33, 4 }
 0x4d9   :  { %v830_v31 = vpop.permute.xlu1 %829 }
 0x4da   :  { %v832_v34 = vmul.f32 %v8300_v30, %v830_v31  ;;  %7120 = vmatmul.mubr.msk.f32.vlgmr.msra.gmra.mrb[12].mxu1 %vm358_vm1, %v993_v29  ;;  %v1251_v31 = vld [vmem:[#allocation4 + $0x38] sm:$0x3] }
 0x4db   :  { %7490 = vmatpush1.bf16.msra.mxu1 %v9201_v53  ;;  %1335 = vmatprep.mubr.f32.mxu1 %v8861_v7 }
 0x4dc   :  { %867 = vst.msk [vmem:[#allocation2] sm:$0xc] %vm866_vm2, %v832_v34  ;;  %v893_v32 = vrot.slane %v832_v34, 2  ;;  %7492 = vmatprep.subr.bf16.mxu1 %v9206_v55  ;;  %v976_v55 = vld [vmem:[#allocation4 + $0x38] sm:$0xc] }
 0x4de   :  { %7119 = vmatmul.mubr.msk.f32.vlgmr.msra.gmra.mrb[12].mxu0 %vm358_vm1, %v893_v32 }
 0x4df   :  { %7474 = vmatpush1.bf16.msra.mxu0 %v9183_v47  ;;  %7494 = vmatpush1.bf16.msra.mxu1 %v9241_v2 }
 0x4e0   :  { %7476 = vmatprep.subr.bf16.mxu0 %v9199_v52  ;;  %7496 = vmatprep.subr.bf16.mxu1 %v9247_v4 }
 0x4e1   :  { %1235 = vmatprep.mubr.f32.mxu0 %v8861_v7 }
 0x4e3   :  { %7478 = vmatpush1.bf16.msra.mxu0 %v9221_v60  ;;  %7498 = vmatpush1.bf16.msra.mxu1 %v9282_v16 }
 0x4e4   :  { %7480 = vmatprep.subr.bf16.mxu0 %v9239_v1  ;;  %7500 = vmatprep.subr.bf16.mxu1 %v9285_v17  ;;  %v875_v1 = vld [vmem:[#allocation3 + $0x8] sm:$0x30] }
 0x4e7   :  { %7482 = vmatpush1.bf16.msra.mxu0 %v9262_v10  ;;  %7502 = vmatpush1.bf16.msra.mxu1 %v9303_v22 }
 0x4e8   :  { %7484 = vmatprep.subr.bf16.mxu0 %v9280_v15 }
 0x4eb   :  { %7486 = vmatpush1.bf16.msra.mxu0 %v9297_v21  ;;  %v975_v21 = vld [vmem:[#allocation4 + $0x30] sm:$0xc] }
 0x5ad   :  { %v1062_v47 = vpop.f32.mrb[12].mxu1 }
 0x5ae   :  { %v1064_v52 = vpop.f32.mrb[13].mxu1  ;;  %v1069_v15 = vrot.slane %v1062_v47, 6 }
 0x5af   :  { %v1070_v53 = vrot.slane %v1064_v52, 6 }
 0x5b0   :  { %v1073_v22 = vadd.f32 %v1069_v15, %v975_v21 }
 0x5b1   :  { %v1074_v2 = vadd.f32 %v1070_v53, %v976_v55  ;;  %v962_v60 = vpop.f32.mrb[12].mxu0  ;;  %v1150_v55 = vld [vmem:[#allocation3 + $0x8] sm:$0xc0] }
 0x5b2   :  { %v964_v4 = vpop.f32.mrb[13].mxu0  ;;  %v969_v35 = vrot.slane %v962_v60, 4  ;;  %v7123_v37 = vmul.f32 -1.442695, %v1073_v22 }
 0x5b3   :  { %8301 = vtanh.f32 %v1074_v2  ;;  %v970_v16 = vrot.slane %v964_v4, 4  ;;  %v7124_v6 = vmul.f32 -1.442695, %v1074_v2 }
 0x5b4   :  { %v973_v41 = vadd.f32 %v969_v35, %v874_v36 }
 0x5b5   :  { %v974_v38 = vadd.f32 %v970_v16, %v875_v1  ;;  %v1250_v16 = vld [vmem:[#allocation4 + $0x30] sm:$0x3] }
 0x5b6   :  { %v7121_v39 = vmul.f32 -1.442695, %v973_v41 }
 0x5b7   :  { %8303 = vtanh.f32 %v974_v38  ;;  %v7122_v9 = vmul.f32 -1.442695, %v974_v38 }
 0x5b8   :  { %8305 = vpow2.f32 %v7123_v37 }
 0x5b9   :  { %8307 = vpow2.f32 %v7121_v39 }
 0x5bd   :  { %v8302_v17 = vpop.eup %8301 }
 0x5be   :  { %1126 = vrot.lane.b32.xlu0 %v8302_v17, %s8862_s3 }
 0x5c1   :  { %v8304_v10 = vpop.eup %8303 }
 0x5c2   :  { %1093 = vrot.lane.b32.xlu0 %v8304_v10, %s8862_s3  ;;  %v8306_v40 = vpop.eup %8305  ;;  %v1149_v10 = vld [vmem:[#allocation3] sm:$0xc0] }
 0x5c3   :  { %v1114_v42 = vadd.f32 1.0, %v8306_v40  ;;  %v8308_v43 = vpop.eup %8307 }
 0x5c4   :  { %v1081_v44 = vadd.f32 1.0, %v8308_v43 }
 0x5c5   :  { %8309 = vrcp.f32 %v1114_v42 }
 0x5c6   :  { %8311 = vrcp.f32 %v1081_v44 }
 0x5cf   :  { %v8310_v45 = vpop.eup %8309 }
 0x5d0   :  { %v8312_v49 = vpop.eup %8311  ;;  %v1124_v56 = vmul.f32 %v8310_v45, %v1122_v54  ;;  %v1522_v54 = vld [vmem:[%s10996_s5 + $0x38] sm:$0xff] }
 0x5d1   :  { %v1091_v63 = vmul.f32 %v8312_v49, %v1089_v59  ;;  %v1519_v59 = vld [vmem:[%s10996_s5 + $0x20] sm:$0xff] }
 0x630   :  { %v1127_v46 = vpop.permute.xlu0 %1126 }
 0x631   :  { %v1129_v48 = vmul.f32 %v8310_v45, %v1127_v46  ;;  %v1516_v45 = vld [vmem:[%s10996_s5 + $0x8] sm:$0xff]  ;;  %v1518_v46 = vld [vmem:[%s10996_s5 + $0x18] sm:$0xff] }
 0x633   :  { %1131 = vrot.lane.b32.xlu1 %v1129_v48, %s8862_s3  ;;  %v1515_v48 = vld [vmem:[%s10996_s5] sm:$0xff] }
 0x634   :  { %v1094_v50 = vpop.permute.xlu0 %1093 }
 0x635   :  { %v1096_v51 = vmul.f32 %v8312_v49, %v1094_v50  ;;  %v9466_v49 = vpack.c.bf16 %v1518_v46, %v1516_v45  ;;  %v1517_v50 = vld [vmem:[%s10996_s5 + $0x10] sm:$0xff] }
 0x637   :  { %1098 = vrot.lane.b32.xlu1 %v1096_v51, %s8862_s3  ;;  %v1520_v51 = vld [vmem:[%s10996_s5 + $0x28] sm:$0xff]  ;;  %7520 = vmatprep.subr.bf16.mxu1 %v9466_v49 }
 0x6a5   :  { %v1132_v58 = vpop.permute.xlu1 %1131 }
 0x6a6   :  { %v9428_v62 = vadd.f32 %v1132_v58, %v1124_v56  ;;  %v9477_v56 = vpack.c.bf16 %v1517_v50, %v1515_v48  ;;  %v9479_v58 = vpack.c.bf16 %v1522_v54, %v1520_v51 }
 0x6a8   :  { %8313 = vtanh.f32 %v9428_v62 }
 0x6a9   :  { %v1099_v0 = vpop.permute.xlu1 %1098 }
 0x6aa   :  { %v9431_v3 = vadd.f32 %v1099_v0, %v1091_v63  ;;  %v1521_v63 = vld [vmem:[%s10996_s5 + $0x30] sm:$0xff]  ;;  %v1421_v0 = vld [vmem:[%s10993_s2 + $0x8] sm:$0xff] }
 0x6ac   :  { %8315 = vtanh.f32 %v9431_v3 }
 0x6ad   :  { %8317 = vpow2.f32 %v7124_v6  ;;  %v1526_v6 = vld [vmem:[%s10996_s5 + $0x58] sm:$0xff] }
 0x6ae   :  { %8319 = vpow2.f32 %v7122_v9  ;;  %v9501_v9 = vpack.c.bf16 %v1521_v63, %v1519_v59 }
 0x6b2   :  { %v8314_v5 = vpop.eup %8313 }
 0x6b3   :  { %1137 = vrot.lane.b32.xlu0 %v8314_v5, %s8862_s3  ;;  %v1423_v5 = vld [vmem:[%s10993_s2 + $0x18] sm:$0xff] }
 0x6b6   :  { %v8316_v8 = vpop.eup %8315 }
 0x6b7   :  { %1104 = vrot.lane.b32.xlu1 %v8316_v8, %s8862_s3  ;;  %v8318_v11 = vpop.eup %8317  ;;  %v1524_v8 = vld [vmem:[%s10996_s5 + $0x48] sm:$0xff] }
 0x6b8   :  { %v1115_v12 = vadd.f32 1.0, %v8318_v11  ;;  %v8320_v13 = vpop.eup %8319  ;;  %v9503_v11 = vpack.c.bf16 %v1423_v5, %v1421_v0 }
 0x6b9   :  { %v1082_v61 = vadd.f32 1.0, %v8320_v13  ;;  %v1422_v13 = vld [vmem:[%s10993_s2 + $0x10] sm:$0xff] }
 0x6ba   :  { %8321 = vrcp.f32 %v1115_v12  ;;  %v1420_v12 = vld [vmem:[%s10993_s2] sm:$0xff]  ;;  %7504 = vmatprep.subr.bf16.mxu0 %v9503_v11 }
 0x6bb   :  { %8323 = vrcp.f32 %v1082_v61  ;;  %v1523_v61 = vld [vmem:[%s10996_s5 + $0x40] sm:$0xff] }
 0x6c4   :  { %v8322_v14 = vpop.eup %8321 }
 0x6c5   :  { %v8324_v23 = vpop.eup %8323 }
 0x725   :  { %v1138_v57 = vpop.permute.xlu0 %1137 }
 0x726   :  { %v9436_v18 = vmul.f32 %v8322_v14, %v1138_v57  ;;  %v9515_v14 = vpack.c.bf16 %v1526_v6, %v1524_v8  ;;  %v9517_v57 = vpack.c.bf16 %v1422_v13, %v1420_v12 }
 0x728   :  { %v1268_v20 = vrot.slane %v9436_v18, 2 }
 0x729   :  { %v1105_v26 = vpop.permute.xlu1 %1104 }
 0x72a   :  { %v1107_v28 = vmul.f32 %v8324_v23, %v1105_v26  ;;  %7126 = vmatmul.mubr.msk.f32.vlgmr.msra.gmra.mrb[14].mxu1 %vm358_vm1, %v1268_v20  ;;  %v1525_v20 = vld [vmem:[%s10996_s5 + $0x50] sm:$0xff]  ;;  %v1425_v23 = vld [vmem:[%s10993_s2 + $0x28] sm:$0xff]  ;;  %v1427_v26 = vld [vmem:[%s10993_s2 + $0x38] sm:$0xff] }
 0x72b   :  { %1597 = vmatprep.mubr.f32.mxu1 %v8861_v7  ;;  %7522 = vmatpush1.bf16.msra.mxu1 %v9477_v56 }
 0x72c   :  { %1142 = vst.msk [vmem:[#allocation2] sm:$0x30] %vm1141_vm3, %v1107_v28  ;;  %v1168_v29 = vrot.slane %v1107_v28, 4  ;;  %7524 = vmatprep.subr.bf16.mxu1 %v9479_v58  ;;  %v9529_v28 = vpack.c.bf16 %v1427_v26, %v1425_v23  ;;  %v1514_v26 = vld [vmem:[#allocation4 + $0x28] sm:$0xc0] }
 0x72e   :  { %7125 = vmatmul.mubr.msk.f32.vlgmr.msra.gmra.mrb[14].mxu0 %vm358_vm1, %v1168_v29  ;;  %v1528_v29 = vld [vmem:[%s10996_s5 + $0x68] sm:$0xff] }
 0x72f   :  { %1504 = vmatprep.mubr.f32.mxu0 %v8861_v7  ;;  %7506 = vmatpush1.bf16.msra.mxu0 %v9517_v57 }
 0x730   :  { %7526 = vmatpush1.bf16.msra.mxu1 %v9501_v9  ;;  %7508 = vmatprep.subr.bf16.mxu0 %v9529_v28 }
 0x731   :  { %7528 = vmatprep.subr.bf16.mxu1 %v9515_v14 }
 0x7fd   :  { %v1337_v30 = vpop.f32.mrb[14].mxu1 }
 0x7fe   :  { %v1339_v34 = vpop.f32.mrb[15].mxu1  ;;  %v1342_v1 = vadd.f32 %v1337_v30, %v1250_v16  ;;  %v1530_v30 = vld [vmem:[%s10996_s5 + $0x78] sm:$0xff]  ;;  %v1391_v16 = vrot.slane %v9428_v62, 2  ;;  %v1428_v62 = vld [vmem:[%s10993_s2 + $0x40] sm:$0xff] }
 0x7ff   :  { %v9444_v32 = vadd.f32 %v1339_v34, %v1251_v31  ;;  %v1424_v31 = vld [vmem:[%s10993_s2 + $0x20] sm:$0xff]  ;;  %v1426_v34 = vld [vmem:[%s10993_s2 + $0x30] sm:$0xff] }
 0x800   :  { %v7129_v17 = vmul.f32 -1.442695, %v1342_v1 }
 0x801   :  { %8325 = vtanh.f32 %v9444_v32  ;;  %v1237_v47 = vpop.f32.mrb[14].mxu0  ;;  %v7130_v50 = vmul.f32 -1.442695, %v9444_v32 }
 0x802   :  { %v1239_v52 = vpop.f32.mrb[15].mxu0  ;;  %v1244_v38 = vrot.slane %v1237_v47, 2  ;;  %v9545_v47 = vpack.c.bf16 %v1525_v20, %v1523_v61 }
 0x803   :  { %v1245_v53 = vrot.slane %v1239_v52, 2  ;;  %v9548_v52 = vpack.c.bf16 %v1426_v34, %v1424_v31  ;;  %v1419_v31 = vld [vmem:[#allocation3 + $0x18] sm:$0x3] }
 0x804   :  { %v1248_v15 = vadd.f32 %v1244_v38, %v1149_v10  ;;  %7530 = vmatpush1.bf16.msra.mxu1 %v9545_v47  ;;  %v1429_v10 = vld [vmem:[%s10993_s2 + $0x48] sm:$0xff] }
 0x805   :  { %v9447_v2 = vadd.f32 %v1245_v53, %v1150_v55  ;;  %v9551_v53 = vpack.c.bf16 %v1530_v30, %v1528_v29  ;;  %v1527_v55 = vld [vmem:[%s10996_s5 + $0x60] sm:$0xff]  ;;  %7510 = vmatpush1.bf16.msra.mxu0 %v9548_v52 }
 0x806   :  { %v7127_v21 = vmul.f32 -1.442695, %v1248_v15  ;;  %v1431_v15 = vld [vmem:[%s10993_s2 + $0x58] sm:$0xff] }
 0x807   :  { %8327 = vtanh.f32 %v9447_v2  ;;  %7532 = vmatprep.subr.bf16.mxu1 %v9551_v53  ;;  %v7128_v51 = vmul.f32 -1.442695, %v9447_v2 }
 0x808   :  { %8329 = vpow2.f32 %v7129_v17 }
 0x809   :  { %8331 = vpow2.f32 %v7127_v21  ;;  %v9575_v21 = vpack.c.bf16 %v1431_v15, %v1429_v10 }
 0x80b   :  { %v8326_v60 = vpop.eup %8325  ;;  %7512 = vmatprep.subr.bf16.mxu0 %v9575_v21 }
 0x80c   :  { %1395 = vrot.lane.b32.xlu0 %v8326_v60, %s8862_s3  ;;  %v1529_v60 = vld [vmem:[%s10996_s5 + $0x70] sm:$0xff] }
 0x811   :  { %v8328_v4 = vpop.eup %8327 }
 0x812   :  { %1362 = vrot.lane.b32.xlu0 %v8328_v4, %s8862_s3  ;;  %v8330_v22 = vpop.eup %8329  ;;  %v9561_v4 = vpack.c.bf16 %v1529_v60, %v1527_v55 }
 0x813   :  { %v1383_v35 = vadd.f32 1.0, %v8330_v22  ;;  %v8332_v36 = vpop.eup %8331  ;;  %v1358_v22 = vrot.slane %v9431_v3, 6  ;;  %v1433_v3 = vld [vmem:[%s10993_s2 + $0x68] sm:$0xff] }
 0x814   :  { %v1350_v37 = vadd.f32 1.0, %v8332_v36  ;;  %7534 = vmatpush1.bf16.msra.mxu1 %v9561_v4 }
 0x815   :  { %8333 = vrcp.f32 %v1383_v35  ;;  %7552 = vmatprep.subr.bf16.mxu1 %v9466_v49  ;;  %v1430_v35 = vld [vmem:[%s10993_s2 + $0x50] sm:$0xff] }
 0x816   :  { %8335 = vrcp.f32 %v1350_v37  ;;  %v9586_v36 = vpack.c.bf16 %v1430_v35, %v1428_v62 }
 0x818   :  { %7514 = vmatpush1.bf16.msra.mxu0 %v9586_v36 }
 0x81f   :  { %v8334_v41 = vpop.eup %8333 }
 0x820   :  { %v9453_v42 = vpop.eup %8335  ;;  %v1393_v1 = vmul.f32 %v8334_v41, %v1391_v16 }
 0x821   :  { %v1360_v37 = vmul.f32 %v9453_v42, %v1358_v22  ;;  %v1418_v22 = vld [vmem:[#allocation3 + $0x10] sm:$0x3] }
 0x87e   :  { %v1396_v39 = vpop.permute.xlu0 %1395 }
 0x87f   :  { %v1398_v40 = vmul.f32 %v8334_v41, %v1396_v39  ;;  %v1435_v39 = vld [vmem:[%s10993_s2 + $0x78] sm:$0xff] }
 0x881   :  { %1400 = vrot.lane.b32.xlu1 %v1398_v40, %s8862_s3 }
 0x884   :  { %v1363_v43 = vpop.permute.xlu0 %1362 }
 0x885   :  { %v1365_v44 = vmul.f32 %v9453_v42, %v1363_v43  ;;  %v9598_v43 = vpack.c.bf16 %v1435_v39, %v1433_v3  ;;  %v1434_v42 = vld [vmem:[%s10993_s2 + $0x70] sm:$0xff] }
 0x887   :  { %1367 = vrot.lane.b32.xlu1 %v1365_v44, %s8862_s3  ;;  %v1432_v44 = vld [vmem:[%s10993_s2 + $0x60] sm:$0xff]  ;;  %7516 = vmatprep.subr.bf16.mxu0 %v9598_v43 }
 0x888   :  { %v9606_v45 = vpack.c.bf16 %v1434_v42, %v1432_v44 }
 0x88a   :  { %7518 = vmatpush1.bf16.msra.mxu0 %v9606_v45 }
 0x88b   :  { %7536 = vmatprep.subr.bf16.mxu0 %v9503_v11 }
 0x8f3   :  { %v1401_v38 = vpop.permute.xlu1 %1400 }
 0x8f4   :  { %v9567_v17 = vadd.f32 %v1401_v38, %v1393_v1  ;;  %v1513_v38 = vld [vmem:[#allocation4 + $0x20] sm:$0xc0] }
 0x8f6   :  { %8337 = vtanh.f32 %v9567_v17 }
 0x8f9   :  { %v1368_v41 = vpop.permute.xlu1 %1367 }
 0x8fa   :  { %v9596_v40 = vadd.f32 %v1368_v41, %v1360_v37 }
 0x8fc   :  { %8339 = vtanh.f32 %v9596_v40 }
 0x8fd   :  { %8341 = vpow2.f32 %v7130_v50 }
 0x8fe   :  { %8343 = vpow2.f32 %v7128_v51 }
 0x900   :  { %v8338_v46 = vpop.eup %8337 }
 0x901   :  { %1406 = vrot.lane.b32.xlu0 %v8338_v46, %s8862_s3 }
 0x906   :  { %v8340_v48 = vpop.eup %8339 }
 0x907   :  { %1373 = vrot.lane.b32.xlu1 %v8340_v48, %s8862_s3  ;;  %v8342_v54 = vpop.eup %8341 }
 0x908   :  { %v1384_v59 = vadd.f32 1.0, %v8342_v54  ;;  %v8344_v63 = vpop.eup %8343  ;;  %v1659_v54 = vrot.slane %v9567_v17, 2 }
 0x909   :  { %v1351_v0 = vadd.f32 1.0, %v8344_v63 }
 0x90a   :  { %8345 = vrcp.f32 %v1384_v59 }
 0x90b   :  { %8347 = vrcp.f32 %v1351_v0 }
 0x914   :  { %v8346_v5 = vpop.eup %8345 }
 0x915   :  { %v8348_v32 = vpop.eup %8347 }
 0x973   :  { %v1407_v8 = vpop.permute.xlu0 %1406 }
 0x974   :  { %v9616_v6 = vmul.f32 %v8346_v5, %v1407_v8  ;;  %v1626_v5 = vrot.slane %v9596_v40, 6 }
 0x976   :  { %7132 = vmatmul.mubr.msk.f32.vlgmr.msra.gmra.mrb[16].mxu1 %vm358_vm1, %v9616_v6 }
 0x977   :  { %7554 = vmatpush1.bf16.msra.mxu1 %v9477_v56  ;;  %1869 = vmatprep.mubr.f32.mxu1 %v8861_v7 }
 0x978   :  { %7556 = vmatprep.subr.bf16.mxu1 %v9479_v58 }
 0x979   :  { %v1374_v2 = vpop.permute.xlu1 %1373 }
 0x97a   :  { %v1376_v12 = vmul.f32 %v8348_v32, %v1374_v2 }
 0x97b   :  { %7558 = vmatpush1.bf16.msra.mxu1 %v9501_v9 }
 0x97c   :  { %1411 = vst.msk [vmem:[#allocation2] sm:$0xc0] %vm1410_vm4, %v1376_v12  ;;  %v1437_v13 = vrot.slane %v1376_v12, 6  ;;  %7560 = vmatprep.subr.bf16.mxu1 %v9515_v14 }
 0x97e   :  { %7131 = vmatmul.mubr.msk.f32.vlgmr.msra.gmra.mrb[16].mxu0 %vm358_vm1, %v1437_v13 }
 0x97f   :  { %7538 = vmatpush1.bf16.msra.mxu0 %v9517_v57  ;;  %7562 = vmatpush1.bf16.msra.mxu1 %v9545_v47 }
 0x980   :  { %7540 = vmatprep.subr.bf16.mxu0 %v9529_v28  ;;  %7564 = vmatprep.subr.bf16.mxu1 %v9551_v53 }
 0x981   :  { %1769 = vmatprep.mubr.f32.mxu0 %v8861_v7 }
 0x983   :  { %7542 = vmatpush1.bf16.msra.mxu0 %v9548_v52  ;;  %7566 = vmatpush1.bf16.msra.mxu1 %v9561_v4 }
 0x984   :  { %7544 = vmatprep.subr.bf16.mxu0 %v9575_v21  ;;  %7584 = vmatprep.subr.bf16.mxu1 %v9466_v49 }
 0x987   :  { %7546 = vmatpush1.bf16.msra.mxu0 %v9586_v36 }
 0x988   :  { %7548 = vmatprep.subr.bf16.mxu0 %v9598_v43 }
 0x98b   :  { %7550 = vmatpush1.bf16.msra.mxu0 %v9606_v45 }
 0x98c   :  { %7568 = vmatprep.subr.bf16.mxu0 %v9503_v11 }
 0xa49   :  { %v1599_v61 = vpop.f32.mrb[16].mxu1 }
 0xa4a   :  { %v1601_v20 = vpop.f32.mrb[17].mxu1  ;;  %v1606_v1 = vrot.slane %v1599_v61, 2 }
 0xa4b   :  { %v1607_v23 = vrot.slane %v1601_v20, 2 }
 0xa4c   :  { %v1610_v10 = vadd.f32 %v1606_v1, %v1513_v38 }
 0xa4d   :  { %v1611_v29 = vadd.f32 %v1607_v23, %v1514_v26 }
 0xa4e   :  { %v7135_v15 = vmul.f32 -1.442695, %v1610_v10 }
 0xa4f   :  { %8349 = vtanh.f32 %v1611_v29  ;;  %v7136_v17 = vmul.f32 -1.442695, %v1611_v29 }
 0xa51   :  { %v1506_v30 = vpop.f32.mrb[16].mxu0 }
 0xa52   :  { %v1508_v34 = vpop.f32.mrb[17].mxu0  ;;  %v1511_v62 = vadd.f32 %v1506_v30, %v1418_v22 }
 0xa53   :  { %v1512_v55 = vadd.f32 %v1508_v34, %v1419_v31 }
 0xa54   :  { %v7133_v35 = vmul.f32 -1.442695, %v1511_v62 }
 0xa55   :  { %8351 = vtanh.f32 %v1512_v55  ;;  %v7134_v61 = vmul.f32 -1.442695, %v1512_v55 }
 0xa56   :  { %8353 = vpow2.f32 %v7135_v15  ;;  %v1785_v15 = vld [vmem:[#allocation4 + $0x28] sm:$0x30] }
 0xa57   :  { %8355 = vpow2.f32 %v7133_v35 }
 0xa59   :  { %v8350_v60 = vpop.eup %8349 }
 0xa5a   :  { %1663 = vrot.lane.b32.xlu0 %v8350_v60, %s8862_s3 }
 0xa5f   :  { %v8352_v16 = vpop.eup %8351 }
 0xa60   :  { %1630 = vrot.lane.b32.xlu0 %v8352_v16, %s8862_s3  ;;  %v8354_v37 = vpop.eup %8353 }
 0xa61   :  { %v1651_v41 = vadd.f32 1.0, %v8354_v37  ;;  %v8356_v3 = vpop.eup %8355 }
 0xa62   :  { %v1618_v39 = vadd.f32 1.0, %v8356_v3 }
 0xa63   :  { %8357 = vrcp.f32 %v1651_v41  ;;  %v1685_v41 = vld [vmem:[#allocation3 + $0x18] sm:$0xc] }
 0xa64   :  { %8359 = vrcp.f32 %v1618_v39 }
 0xa6d   :  { %v8358_v44 = vpop.eup %8357 }
 0xa6e   :  { %v8360_v48 = vpop.eup %8359  ;;  %v1661_v59 = vmul.f32 %v8358_v44, %v1659_v54 }
 0xa6f   :  { %v1628_v8 = vmul.f32 %v8360_v48, %v1626_v5 }
 0xacc   :  { %v1664_v42 = vpop.permute.xlu0 %1663 }
 0xacd   :  { %v1666_v46 = vmul.f32 %v8358_v44, %v1664_v42 }
 0xacf   :  { %1668 = vrot.lane.b32.xlu1 %v1666_v46, %s8862_s3  ;;  %v1784_v46 = vld [vmem:[#allocation4 + $0x20] sm:$0x30] }
 0xad2   :  { %v1631_v50 = vpop.permute.xlu0 %1630 }
 0xad3   :  { %v1633_v51 = vmul.f32 %v8360_v48, %v1631_v50 }
 0xad5   :  { %1635 = vrot.lane.b32.xlu1 %v1633_v51, %s8862_s3  ;;  %v1684_v51 = vld [vmem:[#allocation3 + $0x10] sm:$0xc] }
 0xb41   :  { %v1669_v63 = vpop.permute.xlu1 %1668 }
 0xb42   :  { %v9645_v0 = vadd.f32 %v1669_v63, %v1661_v59 }
 0xb44   :  { %8361 = vtanh.f32 %v9645_v0 }
 0xb47   :  { %v1636_v32 = vpop.permute.xlu1 %1635 }
 0xb48   :  { %v9649_v2 = vadd.f32 %v1636_v32, %v1628_v8 }
 0xb4a   :  { %8363 = vtanh.f32 %v9649_v2 }
 0xb4b   :  { %8365 = vpow2.f32 %v7136_v17 }
 0xb4c   :  { %8367 = vpow2.f32 %v7134_v61 }
 0xb4e   :  { %v8362_v12 = vpop.eup %8361 }
 0xb4f   :  { %1674 = vrot.lane.b32.xlu0 %v8362_v12, %s8862_s3 }
 0xb54   :  { %v8364_v13 = vpop.eup %8363 }
 0xb55   :  { %1641 = vrot.lane.b32.xlu1 %v8364_v13, %s8862_s3  ;;  %v8366_v20 = vpop.eup %8365 }
 0xb56   :  { %v1652_v40 = vadd.f32 1.0, %v8366_v20  ;;  %v8368_v23 = vpop.eup %8367 }
 0xb57   :  { %v1619_v26 = vadd.f32 1.0, %v8368_v23 }
 0xb58   :  { %8369 = vrcp.f32 %v1652_v40 }
 0xb59   :  { %8371 = vrcp.f32 %v1619_v26  ;;  %v1931_v26 = vrot.slane %v9645_v0, 2 }
 0xb62   :  { %v8370_v30 = vpop.eup %8369 }
 0xb63   :  { %v8372_v16 = vpop.eup %8371 }
 0xbc1   :  { %v1675_v31 = vpop.permute.xlu0 %1674 }
 0xbc2   :  { %v9654_v34 = vmul.f32 %v8370_v30, %v1675_v31 }
 0xbc4   :  { %v1802_v60 = vrot.slane %v9654_v34, 6 }
 0xbc6   :  { %7138 = vmatmul.mubr.msk.f32.vlgmr.msra.gmra.mrb[18].mxu1 %vm358_vm1, %v1802_v60  ;;  %v1898_v60 = vrot.slane %v9649_v2, 6 }
 0xbc7   :  { %v1642_v1 = vpop.permute.xlu1 %1641  ;;  %7586 = vmatpush1.bf16.msra.mxu1 %v9477_v56  ;;  %2142 = vmatprep.mubr.f32.mxu1 %v8861_v7 }
 0xbc8   :  { %v1644_v29 = vmul.f32 %v8372_v16, %v1642_v1  ;;  %7588 = vmatprep.subr.bf16.mxu1 %v9479_v58 }
 0xbca   :  { %1678 = vst.msk [vmem:[#allocation2 + $0x8] sm:$0x3] %vm592_vm0, %v1644_v29  ;;  %7137 = vmatmul.mubr.msk.f32.vlgmr.msra.gmra.mrb[18].mxu0 %vm358_vm1, %v1644_v29 }
 0xbcb   :  { %7570 = vmatpush1.bf16.msra.mxu0 %v9517_v57  ;;  %7590 = vmatpush1.bf16.msra.mxu1 %v9501_v9 }
 0xbcc   :  { %7572 = vmatprep.subr.bf16.mxu0 %v9529_v28  ;;  %7592 = vmatprep.subr.bf16.mxu1 %v9515_v14 }
 0xbcd   :  { %2042 = vmatprep.mubr.f32.mxu0 %v8861_v7 }
 0xbcf   :  { %7574 = vmatpush1.bf16.msra.mxu0 %v9548_v52  ;;  %7594 = vmatpush1.bf16.msra.mxu1 %v9545_v47 }
 0xbd0   :  { %7576 = vmatprep.subr.bf16.mxu0 %v9575_v21  ;;  %7596 = vmatprep.subr.bf16.mxu1 %v9551_v53 }
 0xbd3   :  { %7578 = vmatpush1.bf16.msra.mxu0 %v9586_v36  ;;  %7598 = vmatpush1.bf16.msra.mxu1 %v9561_v4 }
 0xbd4   :  { %7580 = vmatprep.subr.bf16.mxu0 %v9598_v43  ;;  %7616 = vmatprep.subr.bf16.mxu1 %v9466_v49 }
 0xbd7   :  { %7582 = vmatpush1.bf16.msra.mxu0 %v9606_v45 }
 0xbd8   :  { %7600 = vmatprep.subr.bf16.mxu0 %v9503_v11 }
 0xc99   :  { %v1871_v55 = vpop.f32.mrb[18].mxu1 }
 0xc9a   :  { %v1873_v38 = vpop.f32.mrb[19].mxu1  ;;  %v1878_v42 = vrot.slane %v1871_v55, 4 }
 0xc9b   :  { %v1879_v10 = vrot.slane %v1873_v38, 4 }
 0xc9c   :  { %v1882_v48 = vadd.f32 %v1878_v42, %v1784_v46 }
 0xc9d   :  { %v1883_v22 = vadd.f32 %v1879_v10, %v1785_v15  ;;  %v1771_v62 = vpop.f32.mrb[18].mxu0 }
 0xc9e   :  { %v1773_v35 = vpop.f32.mrb[19].mxu0  ;;  %v1778_v50 = vrot.slane %v1771_v62, 6  ;;  %v7141_v54 = vmul.f32 -1.442695, %v1882_v48 }
 0xc9f   :  { %8373 = vtanh.f32 %v1883_v22  ;;  %v1779_v37 = vrot.slane %v1773_v35, 6  ;;  %v7142_v0 = vmul.f32 -1.442695, %v1883_v22 }
 0xca0   :  { %v1782_v59 = vadd.f32 %v1778_v50, %v1684_v51 }
 0xca1   :  { %v1783_v3 = vadd.f32 %v1779_v37, %v1685_v41 }
 0xca2   :  { %v7139_v63 = vmul.f32 -1.442695, %v1782_v59  ;;  %v2058_v59 = vld [vmem:[#allocation4 + $0x28] sm:$0xc] }
 0xca3   :  { %8375 = vtanh.f32 %v1783_v3  ;;  %v7140_v15 = vmul.f32 -1.442695, %v1783_v3 }
 0xca4   :  { %8377 = vpow2.f32 %v7141_v54 }
 0xca5   :  { %8379 = vpow2.f32 %v7139_v63 }
 0xca9   :  { %v8374_v39 = vpop.eup %8373 }
 0xcaa   :  { %1935 = vrot.lane.b32.xlu0 %v8374_v39, %s8862_s3 }
 0xcad   :  { %v8376_v44 = vpop.eup %8375 }
 0xcae   :  { %1902 = vrot.lane.b32.xlu0 %v8376_v44, %s8862_s3  ;;  %v8378_v5 = vpop.eup %8377 }
 0xcaf   :  { %v1923_v8 = vadd.f32 1.0, %v8378_v5  ;;  %v8380_v32 = vpop.eup %8379 }
 0xcb0   :  { %v1890_v12 = vadd.f32 1.0, %v8380_v32 }
 0xcb1   :  { %8381 = vrcp.f32 %v1923_v8 }
 0xcb2   :  { %8383 = vrcp.f32 %v1890_v12  ;;  %v1957_v12 = vld [vmem:[#allocation3 + $0x18] sm:$0x30] }
 0xcbb   :  { %v8382_v13 = vpop.eup %8381 }
 0xcbc   :  { %v8384_v20 = vpop.eup %8383  ;;  %v1933_v30 = vmul.f32 %v8382_v13, %v1931_v26 }
 0xcbd   :  { %v1900_v1 = vmul.f32 %v8384_v20, %v1898_v60 }
 0xd1c   :  { %v1936_v17 = vpop.permute.xlu0 %1935 }
 0xd1d   :  { %v1938_v61 = vmul.f32 %v8382_v13, %v1936_v17 }
 0xd1f   :  { %1940 = vrot.lane.b32.xlu1 %v1938_v61, %s8862_s3 }
 0xd20   :  { %v1903_v40 = vpop.permute.xlu0 %1902 }
 0xd21   :  { %v1905_v23 = vmul.f32 %v8384_v20, %v1903_v40 }
 0xd23   :  { %1907 = vrot.lane.b32.xlu1 %v1905_v23, %s8862_s3  ;;  %v1956_v23 = vld [vmem:[#allocation3 + $0x10] sm:$0x30] }
 0xd91   :  { %v1941_v31 = vpop.permute.xlu1 %1940 }
 0xd92   :  { %v9684_v16 = vadd.f32 %v1941_v31, %v1933_v30 }
 0xd94   :  { %8385 = vtanh.f32 %v9684_v16 }
 0xd95   :  { %v1908_v29 = vpop.permute.xlu1 %1907 }
 0xd96   :  { %v9687_v55 = vadd.f32 %v1908_v29, %v1900_v1 }
 0xd98   :  { %8387 = vtanh.f32 %v9687_v55 }
 0xd99   :  { %8389 = vpow2.f32 %v7142_v0 }
 0xd9a   :  { %8391 = vpow2.f32 %v7140_v15 }
 0xd9e   :  { %v8386_v38 = vpop.eup %8385 }
 0xd9f   :  { %1946 = vrot.lane.b32.xlu0 %v8386_v38, %s8862_s3 }
 0xda2   :  { %v8388_v10 = vpop.eup %8387 }
 0xda3   :  { %1913 = vrot.lane.b32.xlu1 %v8388_v10, %s8862_s3  ;;  %v8390_v2 = vpop.eup %8389 }
 0xda4   :  { %v1924_v62 = vadd.f32 1.0, %v8390_v2  ;;  %v8392_v35 = vpop.eup %8391 }
 0xda5   :  { %v1891_v37 = vadd.f32 1.0, %v8392_v35 }
 0xda6   :  { %8393 = vrcp.f32 %v1924_v62 }
 0xda7   :  { %8395 = vrcp.f32 %v1891_v37  ;;  %v2204_v37 = vrot.slane %v9684_v16, 2 }
 0xdb0   :  { %v8394_v41 = vpop.eup %8393 }
 0xdb1   :  { %v8396_v46 = vpop.eup %8395 }
 0xe11   :  { %v1947_v39 = vpop.permute.xlu0 %1946 }
 0xe12   :  { %v9692_v44 = vmul.f32 %v8394_v41, %v1947_v39 }
 0xe14   :  { %v2075_v42 = vrot.slane %v9692_v44, 4 }
 0xe15   :  { %v1914_v48 = vpop.permute.xlu1 %1913 }
 0xe16   :  { %v1916_v50 = vmul.f32 %v8396_v46, %v1914_v48  ;;  %7144 = vmatmul.mubr.msk.f32.vlgmr.msra.gmra.mrb[20].mxu1 %vm358_vm1, %v2075_v42  ;;  %v2171_v42 = vrot.slane %v9687_v55, 6 }
 0xe17   :  { %7618 = vmatpush1.bf16.msra.mxu1 %v9477_v56  ;;  %2415 = vmatprep.mubr.f32.mxu1 %v8861_v7 }
 0xe18   :  { %1950 = vst.msk [vmem:[#allocation2 + $0x8] sm:$0xc] %vm866_vm2, %v1916_v50  ;;  %v1975_v22 = vrot.slane %v1916_v50, 2  ;;  %7620 = vmatprep.subr.bf16.mxu1 %v9479_v58 }
 0xe1a   :  { %7143 = vmatmul.mubr.msk.f32.vlgmr.msra.gmra.mrb[20].mxu0 %vm358_vm1, %v1975_v22 }
 0xe1b   :  { %7602 = vmatpush1.bf16.msra.mxu0 %v9517_v57  ;;  %7622 = vmatpush1.bf16.msra.mxu1 %v9501_v9 }
 0xe1c   :  { %7604 = vmatprep.subr.bf16.mxu0 %v9529_v28  ;;  %7624 = vmatprep.subr.bf16.mxu1 %v9515_v14 }
 0xe1d   :  { %2315 = vmatprep.mubr.f32.mxu0 %v8861_v7 }
 0xe1f   :  { %7606 = vmatpush1.bf16.msra.mxu0 %v9548_v52  ;;  %7626 = vmatpush1.bf16.msra.mxu1 %v9545_v47 }
 0xe20   :  { %7608 = vmatprep.subr.bf16.mxu0 %v9575_v21  ;;  %7628 = vmatprep.subr.bf16.mxu1 %v9551_v53 }
 0xe23   :  { %7610 = vmatpush1.bf16.msra.mxu0 %v9586_v36  ;;  %7630 = vmatpush1.bf16.msra.mxu1 %v9561_v4 }
 0xe24   :  { %7612 = vmatprep.subr.bf16.mxu0 %v9598_v43  ;;  %7648 = vmatprep.subr.bf16.mxu1 %v9466_v49 }
 0xe27   :  { %7614 = vmatpush1.bf16.msra.mxu0 %v9606_v45 }
 0xe28   :  { %7632 = vmatprep.subr.bf16.mxu0 %v9503_v11  ;;  %v2057_v11 = vld [vmem:[#allocation4 + $0x20] sm:$0xc] }
 0xee9   :  { %v2144_v3 = vpop.f32.mrb[20].mxu1 }
 0xeea   :  { %v2146_v51 = vpop.f32.mrb[21].mxu1  ;;  %v2151_v61 = vrot.slane %v2144_v3, 6 }
 0xeeb   :  { %v2152_v54 = vrot.slane %v2146_v51, 6 }
 0xeec   :  { %v2155_v20 = vadd.f32 %v2151_v61, %v2057_v11 }
 0xeed   :  { %v2156_v63 = vadd.f32 %v2152_v54, %v2058_v59  ;;  %v2044_v5 = vpop.f32.mrb[20].mxu0 }
 0xeee   :  { %v2046_v8 = vpop.f32.mrb[21].mxu0  ;;  %v2051_v40 = vrot.slane %v2044_v5, 4  ;;  %v7147_v26 = vmul.f32 -1.442695, %v2155_v20 }
 0xeef   :  { %8397 = vtanh.f32 %v2156_v63  ;;  %v2052_v32 = vrot.slane %v2046_v8, 4  ;;  %v7148_v16 = vmul.f32 -1.442695, %v2156_v63 }
 0xef0   :  { %v2055_v30 = vadd.f32 %v2051_v40, %v1956_v23  ;;  %v2229_v40 = vld [vmem:[#allocation3 + $0x10] sm:$0xc0] }
 0xef1   :  { %v2056_v13 = vadd.f32 %v2052_v32, %v1957_v12 }
 0xef2   :  { %v7145_v31 = vmul.f32 -1.442695, %v2055_v30 }
 0xef3   :  { %8399 = vtanh.f32 %v2056_v13  ;;  %v7146_v54 = vmul.f32 -1.442695, %v2056_v13 }
 0xef4   :  { %8401 = vpow2.f32 %v7147_v26 }
 0xef5   :  { %8403 = vpow2.f32 %v7145_v31 }
 0xef9   :  { %v8398_v17 = vpop.eup %8397 }
 0xefa   :  { %2208 = vrot.lane.b32.xlu0 %v8398_v17, %s8862_s3 }
 0xefd   :  { %v8400_v49 = vpop.eup %8399 }
 0xefe   :  { %2175 = vrot.lane.b32.xlu0 %v8400_v49, %s8862_s3  ;;  %v8402_v60 = vpop.eup %8401 }
 0xeff   :  { %v2196_v1 = vadd.f32 1.0, %v8402_v60  ;;  %v8404_v29 = vpop.eup %8403 }
 0xf00   :  { %v2163_v38 = vadd.f32 1.0, %v8404_v29 }
 0xf01   :  { %8405 = vrcp.f32 %v2196_v1 }
 0xf02   :  { %8407 = vrcp.f32 %v2163_v38 }
 0xf0b   :  { %v8406_v10 = vpop.eup %8405 }
 0xf0c   :  { %v8408_v2 = vpop.eup %8407  ;;  %v2206_v41 = vmul.f32 %v8406_v10, %v2204_v37 }
 0xf0d   :  { %v2173_v48 = vmul.f32 %v8408_v2, %v2171_v42 }
 0xf6c   :  { %v2209_v0 = vpop.permute.xlu0 %2208 }
 0xf6d   :  { %v2211_v15 = vmul.f32 %v8406_v10, %v2209_v0 }
 0xf6f   :  { %2213 = vrot.lane.b32.xlu1 %v2211_v15, %s8862_s3 }
 0xf70   :  { %v2176_v62 = vpop.permute.xlu0 %2175 }
 0xf71   :  { %v2178_v35 = vmul.f32 %v8408_v2, %v2176_v62 }
 0xf73   :  { %2180 = vrot.lane.b32.xlu1 %v2178_v35, %s8862_s3 }
 0xfe1   :  { %v2214_v39 = vpop.permute.xlu1 %2213 }
 0xfe2   :  { %v9722_v46 = vadd.f32 %v2214_v39, %v2206_v41 }
 0xfe4   :  { %8409 = vtanh.f32 %v9722_v46  ;;  %v2471_v62 = vrot.slane %v9722_v46, 2 }
 0xfe5   :  { %v2181_v50 = vpop.permute.xlu1 %2180 }
 0xfe6   :  { %v9725_v22 = vadd.f32 %v2181_v50, %v2173_v48 }
 0xfe8   :  { %8411 = vtanh.f32 %v9725_v22  ;;  %v2438_v39 = vrot.slane %v9725_v22, 6 }
 0xfe9   :  { %8413 = vpow2.f32 %v7148_v16 }
 0xfea   :  { %8415 = vpow2.f32 %v7146_v54 }
 0xfee   :  { %v8410_v3 = vpop.eup %8409 }
 0xfef   :  { %2219 = vrot.lane.b32.xlu0 %v8410_v3, %s8862_s3 }
 0xff2   :  { %v8412_v51 = vpop.eup %8411 }
 0xff3   :  { %2186 = vrot.lane.b32.xlu1 %v8412_v51, %s8862_s3  ;;  %v8414_v55 = vpop.eup %8413 }
 0xff4   :  { %v2197_v59 = vadd.f32 1.0, %v8414_v55  ;;  %v8416_v5 = vpop.eup %8415 }
 0xff5   :  { %v2164_v8 = vadd.f32 1.0, %v8416_v5 }
 0xff6   :  { %8417 = vrcp.f32 %v2197_v59 }
 0xff7   :  { %8419 = vrcp.f32 %v2164_v8 }
0x1000   :  { %v8418_v32 = vpop.eup %8417 }
0x1001   :  { %v8420_v61 = vpop.eup %8419 }
0x1061   :  { %v2220_v12 = vpop.permute.xlu0 %2219 }
0x1062   :  { %v9730_v17 = vmul.f32 %v8418_v32, %v2220_v12 }
0x1064   :  { %v2348_v49 = vrot.slane %v9730_v17, 2 }
0x1065   :  { %v2187_v11 = vpop.permute.xlu1 %2186 }
0x1066   :  { %v2189_v20 = vmul.f32 %v8420_v61, %v2187_v11  ;;  %7150 = vmatmul.mubr.msk.f32.vlgmr.msra.gmra.mrb[22].mxu1 %vm358_vm1, %v2348_v49 }
0x1067   :  { %7650 = vmatpush1.bf16.msra.mxu1 %v9477_v56  ;;  %2675 = vmatprep.mubr.f32.mxu1 %v8861_v7 }
0x1068   :  { %2223 = vst.msk [vmem:[#allocation2 + $0x8] sm:$0x30] %vm1141_vm3, %v2189_v20  ;;  %v2248_v63 = vrot.slane %v2189_v20, 4  ;;  %7652 = vmatprep.subr.bf16.mxu1 %v9479_v58  ;;  %v2331_v58 = vld [vmem:[#allocation4 + $0x28] sm:$0x3] }
0x106a   :  { %7149 = vmatmul.mubr.msk.f32.vlgmr.msra.gmra.mrb[22].mxu0 %vm358_vm1, %v2248_v63 }
0x106b   :  { %7654 = vmatpush1.bf16.msra.mxu1 %v9501_v9  ;;  %7634 = vmatpush1.bf16.msra.mxu0 %v9517_v57 }
0x106c   :  { %7656 = vmatprep.subr.bf16.mxu1 %v9515_v14  ;;  %7636 = vmatprep.subr.bf16.mxu0 %v9529_v28 }
0x106d   :  { %2582 = vmatprep.mubr.f32.mxu0 %v8861_v7 }
0x106f   :  { %7658 = vmatpush1.bf16.msra.mxu1 %v9545_v47  ;;  %7638 = vmatpush1.bf16.msra.mxu0 %v9548_v52  ;;  %v2230_v52 = vld [vmem:[#allocation3 + $0x18] sm:$0xc0] }
0x1070   :  { %7660 = vmatprep.subr.bf16.mxu1 %v9551_v53  ;;  %7640 = vmatprep.subr.bf16.mxu0 %v9575_v21 }
0x1073   :  { %7662 = vmatpush1.bf16.msra.mxu1 %v9561_v4  ;;  %7642 = vmatpush1.bf16.msra.mxu0 %v9586_v36  ;;  %v2330_v36 = vld [vmem:[#allocation4 + $0x20] sm:$0x3] }
0x1074   :  { %7644 = vmatprep.subr.bf16.mxu0 %v9598_v43 }
0x1077   :  { %7646 = vmatpush1.bf16.msra.mxu0 %v9606_v45 }
0x1139   :  { %v2417_v56 = vpop.f32.mrb[22].mxu1 }
0x113a   :  { %v2419_v9 = vpop.f32.mrb[23].mxu1  ;;  %v2422_v43 = vadd.f32 %v2417_v56, %v2330_v36 }
0x113b   :  { %v2423_v14 = vadd.f32 %v2419_v9, %v2331_v58  ;;  %v2592_v58 = vld [vmem:[#allocation4 + $0x18] sm:$0xc0] }
0x113c   :  { %v7153_v13 = vmul.f32 -1.442695, %v2422_v43 }
0x113d   :  { %8421 = vtanh.f32 %v2423_v14  ;;  %v2317_v57 = vpop.f32.mrb[22].mxu0  ;;  %v7154_v46 = vmul.f32 -1.442695, %v2423_v14 }
0x113e   :  { %v2319_v28 = vpop.f32.mrb[23].mxu0  ;;  %v2324_v45 = vrot.slane %v2317_v57, 2  ;;  %v2497_v57 = vld [vmem:[#allocation3 + $0x28] sm:$0x3] }
0x113f   :  { %v2325_v47 = vrot.slane %v2319_v28, 2 }
0x1140   :  { %v2328_v23 = vadd.f32 %v2324_v45, %v2229_v40  ;;  %v2496_v45 = vld [vmem:[#allocation3 + $0x20] sm:$0x3] }
0x1141   :  { %v2329_v53 = vadd.f32 %v2325_v47, %v2230_v52 }
0x1142   :  { %v7151_v26 = vmul.f32 -1.442695, %v2328_v23 }
0x1143   :  { %8423 = vtanh.f32 %v2329_v53  ;;  %v7152_v16 = vmul.f32 -1.442695, %v2329_v53 }
0x1144   :  { %8425 = vpow2.f32 %v7153_v13 }
0x1145   :  { %8427 = vpow2.f32 %v7151_v26 }
0x1147   :  { %v8422_v21 = vpop.eup %8421 }
0x1148   :  { %2475 = vrot.lane.b32.xlu0 %v8422_v21, %s8862_s3 }
0x114d   :  { %v8424_v4 = vpop.eup %8423 }
0x114e   :  { %2442 = vrot.lane.b32.xlu0 %v8424_v4, %s8862_s3  ;;  %v8426_v30 = vpop.eup %8425  ;;  %v2591_v4 = vld [vmem:[#allocation4 + $0x10] sm:$0xc0] }
0x114f   :  { %v2463_v31 = vadd.f32 1.0, %v8426_v30  ;;  %v8428_v60 = vpop.eup %8427 }
0x1150   :  { %v2430_v1 = vadd.f32 1.0, %v8428_v60 }
0x1151   :  { %8429 = vrcp.f32 %v2463_v31 }
0x1152   :  { %8431 = vrcp.f32 %v2430_v1 }
0x115b   :  { %v8430_v29 = vpop.eup %8429 }
0x115c   :  { %v8432_v0 = vpop.eup %8431  ;;  %v2473_v35 = vmul.f32 %v8430_v29, %v2471_v62  ;;  %v2864_v62 = vld [vmem:[%s10996_s5] sm:$0xff] }
0x115d   :  { %v2440_v42 = vmul.f32 %v8432_v0, %v2438_v39  ;;  %v2765_v39 = vld [vmem:[%s10993_s2 + $0x8] sm:$0xff] }
0x11ba   :  { %v2476_v38 = vpop.permute.xlu0 %2475 }
0x11bb   :  { %v2478_v10 = vmul.f32 %v8430_v29, %v2476_v38 }
0x11bd   :  { %2480 = vrot.lane.b32.xlu1 %v2478_v10, %s8862_s3 }
0x11c0   :  { %v2443_v15 = vpop.permute.xlu0 %2442 }
0x11c1   :  { %v2445_v2 = vmul.f32 %v8432_v0, %v2443_v15  ;;  %v2865_v15 = vld [vmem:[%s10996_s5 + $0x8] sm:$0xff] }
0x11c3   :  { %2447 = vrot.lane.b32.xlu1 %v2445_v2, %s8862_s3  ;;  %v2867_v2 = vld [vmem:[%s10996_s5 + $0x18] sm:$0xff] }
0x122f   :  { %v2481_v37 = vpop.permute.xlu1 %2480 }
0x1230   :  { %v9757_v41 = vadd.f32 %v2481_v37, %v2473_v35  ;;  %v9793_v35 = vpack.c.bf16 %v2867_v2, %v2865_v15  ;;  %v2866_v37 = vld [vmem:[%s10996_s5 + $0x10] sm:$0xff]  ;;  %v2779_v15 = vld [vmem:[%s10993_s2 + $0x78] sm:$0xff]  ;;  %v2776_v2 = vld [vmem:[%s10993_s2 + $0x60] sm:$0xff] }
0x1232   :  { %8433 = vtanh.f32 %v9757_v41  ;;  %7680 = vmatprep.subr.bf16.mxu1 %v9793_v35 }
0x1235   :  { %v2448_v48 = vpop.permute.xlu1 %2447 }
0x1236   :  { %v9761_v50 = vadd.f32 %v2448_v48, %v2440_v42  ;;  %v2767_v42 = vld [vmem:[%s10993_s2 + $0x18] sm:$0xff]  ;;  %v9804_v48 = vpack.c.bf16 %v2866_v37, %v2864_v62  ;;  %v2778_v62 = vld [vmem:[%s10993_s2 + $0x70] sm:$0xff] }
0x1238   :  { %8435 = vtanh.f32 %v9761_v50 }
0x1239   :  { %8437 = vpow2.f32 %v7154_v46  ;;  %v2871_v46 = vld [vmem:[%s10996_s5 + $0x38] sm:$0xff] }
0x123a   :  { %8439 = vpow2.f32 %v7152_v16  ;;  %v2764_v16 = vld [vmem:[%s10993_s2] sm:$0xff] }
0x123c   :  { %v8434_v3 = vpop.eup %8433 }
0x123d   :  { %2486 = vrot.lane.b32.xlu0 %v8434_v3, %s8862_s3  ;;  %v9806_v3 = vpack.c.bf16 %v2767_v42, %v2765_v39  ;;  %v9930_v42 = vpack.c.bf16 %v2778_v62, %v2776_v2 }
0x123f   :  { %7664 = vmatprep.subr.bf16.mxu0 %v9806_v3 }
0x1242   :  { %v8436_v51 = vpop.eup %8435 }
0x1243   :  { %2453 = vrot.lane.b32.xlu1 %v8436_v51, %s8862_s3  ;;  %v8438_v54 = vpop.eup %8437  ;;  %v2869_v51 = vld [vmem:[%s10996_s5 + $0x28] sm:$0xff] }
0x1244   :  { %v2464_v22 = vadd.f32 1.0, %v8438_v54  ;;  %v8440_v55 = vpop.eup %8439  ;;  %v9818_v54 = vpack.c.bf16 %v2871_v46, %v2869_v51 }
0x1245   :  { %v2431_v59 = vadd.f32 1.0, %v8440_v55  ;;  %v2868_v55 = vld [vmem:[%s10996_s5 + $0x20] sm:$0xff] }
0x1246   :  { %8441 = vrcp.f32 %v2464_v22  ;;  %v2766_v22 = vld [vmem:[%s10993_s2 + $0x10] sm:$0xff] }
0x1247   :  { %8443 = vrcp.f32 %v2431_v59  ;;  %v2870_v59 = vld [vmem:[%s10996_s5 + $0x30] sm:$0xff] }
0x1250   :  { %v8442_v5 = vpop.eup %8441 }
0x1251   :  { %v8444_v12 = vpop.eup %8443 }
0x12af   :  { %v2487_v8 = vpop.permute.xlu0 %2486 }
0x12b0   :  { %v9766_v32 = vmul.f32 %v8442_v5, %v2487_v8  ;;  %v9831_v5 = vpack.c.bf16 %v2766_v22, %v2764_v16  ;;  %v9833_v8 = vpack.c.bf16 %v2870_v59, %v2868_v55 }
0x12b2   :  { %7156 = vmatmul.mubr.msk.f32.vlgmr.msra.gmra.mrb[24].mxu1 %vm358_vm1, %v9766_v32 }
0x12b3   :  { %2947 = vmatprep.mubr.f32.mxu1 %v8861_v7  ;;  %7682 = vmatpush1.bf16.msra.mxu1 %v9804_v48 }
0x12b4   :  { %7684 = vmatprep.subr.bf16.mxu1 %v9818_v54 }
0x12b5   :  { %v2454_v49 = vpop.permute.xlu1 %2453 }
0x12b6   :  { %v2456_v61 = vmul.f32 %v8444_v12, %v2454_v49  ;;  %v2769_v12 = vld [vmem:[%s10993_s2 + $0x28] sm:$0xff]  ;;  %v2771_v49 = vld [vmem:[%s10993_s2 + $0x38] sm:$0xff] }
0x12b7   :  { %7686 = vmatpush1.bf16.msra.mxu1 %v9833_v8 }
0x12b8   :  { %2490 = vst.msk [vmem:[#allocation2 + $0x8] sm:$0xc0] %vm1410_vm4, %v2456_v61  ;;  %v2515_v11 = vrot.slane %v2456_v61, 6  ;;  %v2873_v61 = vld [vmem:[%s10996_s5 + $0x48] sm:$0xff] }
0x12ba   :  { %7155 = vmatmul.mubr.msk.f32.vlgmr.msra.gmra.mrb[24].mxu0 %vm358_vm1, %v2515_v11  ;;  %v9845_v11 = vpack.c.bf16 %v2771_v49, %v2769_v12 }
0x12bb   :  { %2847 = vmatprep.mubr.f32.mxu0 %v8861_v7  ;;  %7666 = vmatpush1.bf16.msra.mxu0 %v9831_v5 }
0x12bc   :  { %7668 = vmatprep.subr.bf16.mxu0 %v9845_v11 }
0x1385   :  { %v2677_v20 = vpop.f32.mrb[24].mxu1 }
0x1386   :  { %v2679_v63 = vpop.f32.mrb[25].mxu1  ;;  %v2684_v21 = vrot.slane %v2677_v20, 2  ;;  %v2875_v20 = vld [vmem:[%s10996_s5 + $0x58] sm:$0xff] }
0x1387   :  { %v2685_v56 = vrot.slane %v2679_v63, 2  ;;  %v2768_v63 = vld [vmem:[%s10993_s2 + $0x20] sm:$0xff] }
0x1388   :  { %v2688_v36 = vadd.f32 %v2684_v21, %v2591_v4 }
0x1389   :  { %v9774_v9 = vadd.f32 %v2685_v56, %v2592_v58  ;;  %v2770_v56 = vld [vmem:[%s10993_s2 + $0x30] sm:$0xff]  ;;  %v9857_v58 = vpack.c.bf16 %v2875_v20, %v2873_v61 }
0x138a   :  { %v7159_v43 = vmul.f32 -1.442695, %v2688_v36 }
0x138b   :  { %8445 = vtanh.f32 %v9774_v9  ;;  %7688 = vmatprep.subr.bf16.mxu1 %v9857_v58  ;;  %v7160_v16 = vmul.f32 -1.442695, %v9774_v9 }
0x138d   :  { %v2584_v14 = vpop.f32.mrb[24].mxu0 }
0x138e   :  { %v2586_v28 = vpop.f32.mrb[25].mxu0  ;;  %v2589_v13 = vadd.f32 %v2584_v14, %v2496_v45  ;;  %v9859_v14 = vpack.c.bf16 %v2770_v56, %v2768_v63  ;;  %v2773_v45 = vld [vmem:[%s10993_s2 + $0x48] sm:$0xff] }
0x138f   :  { %v9777_v47 = vadd.f32 %v2586_v28, %v2497_v57  ;;  %v2872_v57 = vld [vmem:[%s10996_s5 + $0x40] sm:$0xff]  ;;  %v2874_v28 = vld [vmem:[%s10996_s5 + $0x50] sm:$0xff] }
0x1390   :  { %v7157_v40 = vmul.f32 -1.442695, %v2589_v13  ;;  %7670 = vmatpush1.bf16.msra.mxu0 %v9859_v14  ;;  %v2775_v13 = vld [vmem:[%s10993_s2 + $0x58] sm:$0xff] }
0x1391   :  { %8447 = vtanh.f32 %v9777_v47  ;;  %v7158_v22 = vmul.f32 -1.442695, %v9777_v47 }
0x1392   :  { %8449 = vpow2.f32 %v7159_v43  ;;  %v2704_v43 = vrot.slane %v9761_v50, 6  ;;  %v2879_v50 = vld [vmem:[%s10996_s5 + $0x78] sm:$0xff] }
0x1393   :  { %8451 = vpow2.f32 %v7157_v40  ;;  %v9888_v40 = vpack.c.bf16 %v2775_v13, %v2773_v45 }
0x1395   :  { %v8446_v52 = vpop.eup %8445  ;;  %7672 = vmatprep.subr.bf16.mxu0 %v9888_v40 }
0x1396   :  { %2741 = vrot.lane.b32.xlu0 %v8446_v52, %s8862_s3  ;;  %v9869_v52 = vpack.c.bf16 %v2874_v28, %v2872_v57 }
0x1398   :  { %7690 = vmatpush1.bf16.msra.mxu1 %v9869_v52 }
0x139b   :  { %v8448_v53 = vpop.eup %8447 }
0x139c   :  { %2708 = vrot.lane.b32.xlu0 %v8448_v53, %s8862_s3  ;;  %v8450_v23 = vpop.eup %8449  ;;  %v2737_v53 = vrot.slane %v9757_v41, 2  ;;  %v2877_v41 = vld [vmem:[%s10996_s5 + $0x68] sm:$0xff] }
0x139d   :  { %v2729_v26 = vadd.f32 1.0, %v8450_v23  ;;  %v8452_v30 = vpop.eup %8451  ;;  %v2772_v23 = vld [vmem:[%s10993_s2 + $0x40] sm:$0xff] }
0x139e   :  { %v2696_v31 = vadd.f32 1.0, %v8452_v30 }
0x139f   :  { %8453 = vrcp.f32 %v2729_v26  ;;  %v2774_v26 = vld [vmem:[%s10993_s2 + $0x50] sm:$0xff] }
0x13a0   :  { %8455 = vrcp.f32 %v2696_v31  ;;  %v9899_v31 = vpack.c.bf16 %v2879_v50, %v2877_v41  ;;  %v2763_v50 = vld [vmem:[#allocation3 + $0x28] sm:$0xc] }
0x13a2   :  { %7692 = vmatprep.subr.bf16.mxu1 %v9899_v31 }
0x13a9   :  { %v8454_v60 = vpop.eup %8453 }
0x13aa   :  { %v8456_v38 = vpop.eup %8455  ;;  %v2739_v21 = vmul.f32 %v8454_v60, %v2737_v53 }
0x13ab   :  { %v2706_v30 = vmul.f32 %v8456_v38, %v2704_v43 }
0x1408   :  { %v2742_v1 = vpop.permute.xlu0 %2741 }
0x1409   :  { %v2744_v29 = vmul.f32 %v8454_v60, %v2742_v1  ;;  %v9901_v60 = vpack.c.bf16 %v2774_v26, %v2772_v23  ;;  %v2876_v1 = vld [vmem:[%s10996_s5 + $0x60] sm:$0xff] }
0x140b   :  { %2746 = vrot.lane.b32.xlu1 %v2744_v29, %s8862_s3  ;;  %v2878_v29 = vld [vmem:[%s10996_s5 + $0x70] sm:$0xff]  ;;  %7674 = vmatpush1.bf16.msra.mxu0 %v9901_v60 }
0x140e   :  { %v2709_v10 = vpop.permute.xlu0 %2708 }
0x140f   :  { %v2711_v0 = vmul.f32 %v8456_v38, %v2709_v10  ;;  %v2777_v10 = vld [vmem:[%s10993_s2 + $0x68] sm:$0xff]  ;;  %v9913_v38 = vpack.c.bf16 %v2878_v29, %v2876_v1  ;;  %v2862_v29 = vld [vmem:[#allocation4 + $0x10] sm:$0x30] }
0x1410   :  { %v9928_v39 = vpack.c.bf16 %v2779_v15, %v2777_v10  ;;  %v2762_v15 = vld [vmem:[#allocation3 + $0x20] sm:$0xc] }
0x1411   :  { %2713 = vrot.lane.b32.xlu1 %v2711_v0, %s8862_s3  ;;  %7694 = vmatpush1.bf16.msra.mxu1 %v9913_v38 }
0x1412   :  { %7676 = vmatprep.subr.bf16.mxu0 %v9928_v39  ;;  %7712 = vmatprep.subr.bf16.mxu1 %v9793_v35 }
0x1413   :  { %7678 = vmatpush1.bf16.msra.mxu0 %v9930_v42 }
0x1414   :  { %7696 = vmatprep.subr.bf16.mxu0 %v9806_v3 }
0x147d   :  { %v2747_v4 = vpop.permute.xlu1 %2746 }
0x147e   :  { %v9875_v36 = vadd.f32 %v2747_v4, %v2739_v21  ;;  %v2863_v4 = vld [vmem:[#allocation4 + $0x18] sm:$0x30] }
0x1480   :  { %8457 = vtanh.f32 %v9875_v36 }
0x1483   :  { %v2714_v0 = vpop.permute.xlu1 %2713 }
0x1484   :  { %v9924_v37 = vadd.f32 %v2714_v0, %v2706_v30 }
0x1486   :  { %8459 = vtanh.f32 %v9924_v37 }
0x1487   :  { %8461 = vpow2.f32 %v7160_v16 }
0x1488   :  { %8463 = vpow2.f32 %v7158_v22 }
0x148a   :  { %v8458_v51 = vpop.eup %8457 }
0x148b   :  { %2752 = vrot.lane.b32.xlu0 %v8458_v51, %s8862_s3 }
0x1490   :  { %v8460_v46 = vpop.eup %8459 }
0x1491   :  { %2719 = vrot.lane.b32.xlu1 %v8460_v46, %s8862_s3  ;;  %v8462_v55 = vpop.eup %8461 }
0x1492   :  { %v2730_v59 = vadd.f32 1.0, %v8462_v55  ;;  %v8464_v12 = vpop.eup %8463 }
0x1493   :  { %v2697_v49 = vadd.f32 1.0, %v8464_v12 }
0x1494   :  { %8465 = vrcp.f32 %v2730_v59 }
0x1495   :  { %8467 = vrcp.f32 %v2697_v49 }
0x149e   :  { %v8466_v61 = vpop.eup %8465 }
0x149f   :  { %v8468_v57 = vpop.eup %8467 }
0x14fd   :  { %v2753_v20 = vpop.permute.xlu0 %2752 }
0x14fe   :  { %v9942_v63 = vmul.f32 %v8466_v61, %v2753_v20 }
0x1500   :  { %v2880_v56 = vrot.slane %v9942_v63, 6 }
0x1502   :  { %7162 = vmatmul.mubr.msk.f32.vlgmr.msra.gmra.mrb[26].mxu1 %vm358_vm1, %v2880_v56 }
0x1503   :  { %v2720_v9 = vpop.permute.xlu1 %2719  ;;  %7714 = vmatpush1.bf16.msra.mxu1 %v9804_v48  ;;  %3220 = vmatprep.mubr.f32.mxu1 %v8861_v7 }
0x1504   :  { %v9948_v47 = vmul.f32 %v8468_v57, %v2720_v9  ;;  %7716 = vmatprep.subr.bf16.mxu1 %v9818_v54  ;;  %v3009_v57 = vrot.slane %v9875_v36, 2 }
0x1506   :  { %7161 = vmatmul.mubr.msk.f32.vlgmr.msra.gmra.mrb[26].mxu0 %vm358_vm1, %v9948_v47 }
0x1507   :  { %7698 = vmatpush1.bf16.msra.mxu0 %v9831_v5  ;;  %7718 = vmatpush1.bf16.msra.mxu1 %v9833_v8 }
0x1508   :  { %7700 = vmatprep.subr.bf16.mxu0 %v9845_v11  ;;  %7720 = vmatprep.subr.bf16.mxu1 %v9857_v58 }
0x1509   :  { %3120 = vmatprep.mubr.f32.mxu0 %v8861_v7 }
0x150b   :  { %7702 = vmatpush1.bf16.msra.mxu0 %v9859_v14  ;;  %7722 = vmatpush1.bf16.msra.mxu1 %v9869_v52 }
0x150c   :  { %7704 = vmatprep.subr.bf16.mxu0 %v9888_v40  ;;  %7724 = vmatprep.subr.bf16.mxu1 %v9899_v31 }
0x150f   :  { %7706 = vmatpush1.bf16.msra.mxu0 %v9901_v60  ;;  %7726 = vmatpush1.bf16.msra.mxu1 %v9913_v38 }
0x1510   :  { %7708 = vmatprep.subr.bf16.mxu0 %v9928_v39  ;;  %7744 = vmatprep.subr.bf16.mxu1 %v9793_v35 }
0x1513   :  { %7710 = vmatpush1.bf16.msra.mxu0 %v9930_v42 }
0x1514   :  { %7728 = vmatprep.subr.bf16.mxu0 %v9806_v3 }
0x15d5   :  { %v2949_v28 = vpop.f32.mrb[26].mxu1 }
0x15d6   :  { %v2951_v53 = vpop.f32.mrb[27].mxu1  ;;  %v2956_v1 = vrot.slane %v2949_v28, 4 }
0x15d7   :  { %v2957_v21 = vrot.slane %v2951_v53, 4  ;;  %v2976_v53 = vrot.slane %v9924_v37, 6 }
0x15d8   :  { %v2960_v10 = vadd.f32 %v2956_v1, %v2862_v29 }
0x15d9   :  { %v2961_v43 = vadd.f32 %v2957_v21, %v2863_v4  ;;  %v2849_v45 = vpop.f32.mrb[26].mxu0 }
0x15da   :  { %v2851_v13 = vpop.f32.mrb[27].mxu0  ;;  %v2856_v0 = vrot.slane %v2849_v45, 6  ;;  %v7165_v2 = vmul.f32 -1.442695, %v2960_v10 }
0x15db   :  { %8469 = vtanh.f32 %v2961_v43  ;;  %v2857_v41 = vrot.slane %v2851_v13, 6  ;;  %v7166_v36 = vmul.f32 -1.442695, %v2961_v43 }
0x15dc   :  { %v2860_v62 = vadd.f32 %v2856_v0, %v2762_v15 }
0x15dd   :  { %v2861_v23 = vadd.f32 %v2857_v41, %v2763_v50 }
0x15de   :  { %v7163_v51 = vmul.f32 -1.442695, %v2860_v62 }
0x15df   :  { %8471 = vtanh.f32 %v2861_v23 }
0x15e0   :  { %8473 = vpow2.f32 %v7165_v2 }
0x15e1   :  { %8475 = vpow2.f32 %v7163_v51 }
0x15e5   :  { %v8470_v26 = vpop.eup %8469 }
0x15e6   :  { %3013 = vrot.lane.b32.xlu0 %v8470_v26, %s8862_s3  ;;  %v7164_v26 = vmul.f32 -1.442695, %v2861_v23 }
0x15e9   :  { %v8472_v30 = vpop.eup %8471 }
0x15ea   :  { %2980 = vrot.lane.b32.xlu0 %v8472_v30, %s8862_s3  ;;  %v8474_v46 = vpop.eup %8473 }
0x15eb   :  { %v3001_v16 = vadd.f32 1.0, %v8474_v46  ;;  %v8476_v22 = vpop.eup %8475 }
0x15ec   :  { %v2968_v55 = vadd.f32 1.0, %v8476_v22 }
0x15ed   :  { %8477 = vrcp.f32 %v3001_v16 }
0x15ee   :  { %8479 = vrcp.f32 %v2968_v55  ;;  %v3136_v55 = vld [vmem:[#allocation4 + $0x18] sm:$0xc] }
0x15f7   :  { %v8478_v59 = vpop.eup %8477 }
0x15f8   :  { %v8480_v61 = vpop.eup %8479  ;;  %v3011_v9 = vmul.f32 %v8478_v59, %v3009_v57 }
0x15f9   :  { %v2978_v4 = vmul.f32 %v8480_v61, %v2976_v53  ;;  %v3135_v53 = vld [vmem:[#allocation4 + $0x10] sm:$0xc] }
0x1658   :  { %v3014_v12 = vpop.permute.xlu0 %3013 }
0x1659   :  { %v3016_v49 = vmul.f32 %v8478_v59, %v3014_v12 }
0x165b   :  { %3018 = vrot.lane.b32.xlu1 %v3016_v49, %s8862_s3 }
0x165c   :  { %v2981_v20 = vpop.permute.xlu0 %2980 }
0x165d   :  { %v2983_v56 = vmul.f32 %v8480_v61, %v2981_v20  ;;  %v3035_v20 = vld [vmem:[#allocation3 + $0x28] sm:$0x30] }
0x165f   :  { %2985 = vrot.lane.b32.xlu1 %v2983_v56, %s8862_s3 }
0x16cd   :  { %v3019_v28 = vpop.permute.xlu1 %3018 }
0x16ce   :  { %v9974_v21 = vadd.f32 %v3019_v28, %v3011_v9 }
0x16d0   :  { %8481 = vtanh.f32 %v9974_v21 }
0x16d1   :  { %v2986_v45 = vpop.permute.xlu1 %2985 }
0x16d2   :  { %v9977_v13 = vadd.f32 %v2986_v45, %v2978_v4 }
0x16d4   :  { %8483 = vtanh.f32 %v9977_v13 }
0x16d5   :  { %8485 = vpow2.f32 %v7166_v36 }
0x16d6   :  { %8487 = vpow2.f32 %v7164_v26 }
0x16da   :  { %v8482_v41 = vpop.eup %8481 }
0x16db   :  { %3024 = vrot.lane.b32.xlu0 %v8482_v41, %s8862_s3  ;;  %v3034_v41 = vld [vmem:[#allocation3 + $0x20] sm:$0x30] }
0x16de   :  { %v8484_v50 = vpop.eup %8483 }
0x16df   :  { %2991 = vrot.lane.b32.xlu1 %v8484_v50, %s8862_s3  ;;  %v8486_v37 = vpop.eup %8485 }
0x16e0   :  { %v3002_v30 = vadd.f32 1.0, %v8486_v37  ;;  %v8488_v1 = vpop.eup %8487 }
0x16e1   :  { %v2969_v29 = vadd.f32 1.0, %v8488_v1 }
0x16e2   :  { %8489 = vrcp.f32 %v3002_v30 }
0x16e3   :  { %8491 = vrcp.f32 %v2969_v29 }
0x16ec   :  { %v8490_v10 = vpop.eup %8489 }
0x16ed   :  { %v8492_v62 = vpop.eup %8491 }
0x174d   :  { %v3025_v0 = vpop.permute.xlu0 %3024 }
0x174e   :  { %v9982_v15 = vmul.f32 %v8490_v10, %v3025_v0 }
0x1750   :  { %v3153_v2 = vrot.slane %v9982_v15, 4 }
0x1751   :  { %v2992_v51 = vpop.permute.xlu1 %2991 }
0x1752   :  { %v9985_v46 = vmul.f32 %v8492_v62, %v2992_v51  ;;  %7168 = vmatmul.mubr.msk.f32.vlgmr.msra.gmra.mrb[28].mxu1 %vm358_vm1, %v3153_v2 }
0x1753   :  { %7746 = vmatpush1.bf16.msra.mxu1 %v9804_v48  ;;  %3493 = vmatprep.mubr.f32.mxu1 %v8861_v7 }
0x1754   :  { %v3053_v43 = vrot.slane %v9985_v46, 2  ;;  %7748 = vmatprep.subr.bf16.mxu1 %v9818_v54 }
0x1756   :  { %7167 = vmatmul.mubr.msk.f32.vlgmr.msra.gmra.mrb[28].mxu0 %vm358_vm1, %v3053_v43 }
0x1757   :  { %7730 = vmatpush1.bf16.msra.mxu0 %v9831_v5  ;;  %7750 = vmatpush1.bf16.msra.mxu1 %v9833_v8 }
0x1758   :  { %7732 = vmatprep.subr.bf16.mxu0 %v9845_v11  ;;  %7752 = vmatprep.subr.bf16.mxu1 %v9857_v58 }
0x1759   :  { %3393 = vmatprep.mubr.f32.mxu0 %v8861_v7 }
0x175b   :  { %7734 = vmatpush1.bf16.msra.mxu0 %v9859_v14  ;;  %7754 = vmatpush1.bf16.msra.mxu1 %v9869_v52 }
0x175c   :  { %7736 = vmatprep.subr.bf16.mxu0 %v9888_v40  ;;  %7756 = vmatprep.subr.bf16.mxu1 %v9899_v31 }
0x175f   :  { %7738 = vmatpush1.bf16.msra.mxu0 %v9901_v60  ;;  %7758 = vmatpush1.bf16.msra.mxu1 %v9913_v38 }
0x1760   :  { %7740 = vmatprep.subr.bf16.mxu0 %v9928_v39  ;;  %7776 = vmatprep.subr.bf16.mxu1 %v9793_v35 }
0x1763   :  { %7742 = vmatpush1.bf16.msra.mxu0 %v9930_v42 }
0x1764   :  { %7760 = vmatprep.subr.bf16.mxu0 %v9806_v3 }
0x1825   :  { %v3222_v23 = vpop.f32.mrb[28].mxu1 }
0x1826   :  { %v3224_v16 = vpop.f32.mrb[29].mxu1  ;;  %v3229_v28 = vrot.slane %v3222_v23, 6  ;;  %v3282_v23 = vrot.slane %v9974_v21, 2 }
0x1827   :  { %v3230_v22 = vrot.slane %v3224_v16, 6 }
0x1828   :  { %v3233_v4 = vadd.f32 %v3229_v28, %v3135_v53 }
0x1829   :  { %v3234_v59 = vadd.f32 %v3230_v22, %v3136_v55  ;;  %v3122_v12 = vpop.f32.mrb[28].mxu0  ;;  %v3249_v55 = vrot.slane %v9977_v13, 6 }
0x182a   :  { %v3124_v49 = vpop.f32.mrb[29].mxu0  ;;  %v3129_v45 = vrot.slane %v3122_v12, 4  ;;  %v7171_v50 = vmul.f32 -1.442695, %v3233_v4 }
0x182b   :  { %8493 = vtanh.f32 %v3234_v59  ;;  %v3130_v61 = vrot.slane %v3124_v49, 4  ;;  %v7172_v21 = vmul.f32 -1.442695, %v3234_v59 }
0x182c   :  { %v3133_v36 = vadd.f32 %v3129_v45, %v3034_v41 }
0x182d   :  { %v3134_v56 = vadd.f32 %v3130_v61, %v3035_v20 }
0x182e   :  { %v7169_v26 = vmul.f32 -1.442695, %v3133_v36 }
0x182f   :  { %8495 = vtanh.f32 %v3134_v56  ;;  %v7170_v28 = vmul.f32 -1.442695, %v3134_v56 }
0x1830   :  { %8497 = vpow2.f32 %v7171_v50 }
0x1831   :  { %8499 = vpow2.f32 %v7169_v26 }
0x1835   :  { %v8494_v57 = vpop.eup %8493 }
0x1836   :  { %3286 = vrot.lane.b32.xlu0 %v8494_v57, %s8862_s3 }
0x1839   :  { %v8496_v9 = vpop.eup %8495 }
0x183a   :  { %3253 = vrot.lane.b32.xlu0 %v8496_v9, %s8862_s3  ;;  %v8498_v37 = vpop.eup %8497 }
0x183b   :  { %v3274_v30 = vadd.f32 1.0, %v8498_v37  ;;  %v8500_v1 = vpop.eup %8499 }
0x183c   :  { %v3241_v29 = vadd.f32 1.0, %v8500_v1 }
0x183d   :  { %8501 = vrcp.f32 %v3274_v30 }
0x183e   :  { %8503 = vrcp.f32 %v3241_v29  ;;  %v3409_v29 = vld [vmem:[#allocation4 + $0x18] sm:$0x3] }
0x1847   :  { %v8502_v10 = vpop.eup %8501 }
0x1848   :  { %v8504_v62 = vpop.eup %8503  ;;  %v3284_v16 = vmul.f32 %v8502_v10, %v3282_v23 }
0x1849   :  { %v3251_v49 = vmul.f32 %v8504_v62, %v3249_v55 }
0x18a8   :  { %v3287_v0 = vpop.permute.xlu0 %3286 }
0x18a9   :  { %v3289_v2 = vmul.f32 %v8502_v10, %v3287_v0 }
0x18ab   :  { %3291 = vrot.lane.b32.xlu1 %v3289_v2, %s8862_s3 }
0x18ac   :  { %v3254_v51 = vpop.permute.xlu0 %3253 }
0x18ad   :  { %v3256_v43 = vmul.f32 %v8504_v62, %v3254_v51 }
0x18af   :  { %3258 = vrot.lane.b32.xlu1 %v3256_v43, %s8862_s3  ;;  %v3308_v43 = vld [vmem:[#allocation3 + $0x28] sm:$0xc0] }
0x191d   :  { %v3292_v22 = vpop.permute.xlu1 %3291 }
0x191e   :  { %v10014_v12 = vadd.f32 %v3292_v22, %v3284_v16 }
0x1920   :  { %8505 = vtanh.f32 %v10014_v12 }
0x1921   :  { %v3259_v61 = vpop.permute.xlu1 %3258 }
0x1922   :  { %v10017_v20 = vadd.f32 %v3259_v61, %v3251_v49  ;;  %v3307_v61 = vld [vmem:[#allocation3 + $0x20] sm:$0xc0] }
0x1924   :  { %8507 = vtanh.f32 %v10017_v20 }
0x1925   :  { %8509 = vpow2.f32 %v7172_v21 }
0x1926   :  { %8511 = vpow2.f32 %v7170_v28 }
0x192a   :  { %v8506_v57 = vpop.eup %8505 }
0x192b   :  { %3297 = vrot.lane.b32.xlu0 %v8506_v57, %s8862_s3 }
0x192e   :  { %v8508_v9 = vpop.eup %8507 }
0x192f   :  { %3264 = vrot.lane.b32.xlu1 %v8508_v9, %s8862_s3  ;;  %v8510_v13 = vpop.eup %8509 }
0x1930   :  { %v3275_v53 = vadd.f32 1.0, %v8510_v13  ;;  %v8512_v4 = vpop.eup %8511 }
0x1931   :  { %v3242_v45 = vadd.f32 1.0, %v8512_v4 }
0x1932   :  { %8513 = vrcp.f32 %v3275_v53 }
0x1933   :  { %8515 = vrcp.f32 %v3242_v45 }
0x193c   :  { %v8514_v41 = vpop.eup %8513 }
0x193d   :  { %v8516_v37 = vpop.eup %8515 }
0x199d   :  { %v3298_v50 = vpop.permute.xlu0 %3297 }
0x199e   :  { %v10022_v36 = vmul.f32 %v8514_v41, %v3298_v50 }
0x19a0   :  { %v3426_v26 = vrot.slane %v10022_v36, 2 }
0x19a1   :  { %v3265_v30 = vpop.permute.xlu1 %3264 }
0x19a2   :  { %v10025_v1 = vmul.f32 %v8516_v37, %v3265_v30  ;;  %7174 = vmatmul.mubr.msk.f32.vlgmr.msra.gmra.mrb[30].mxu1 %vm358_vm1, %v3426_v26  ;;  %v3549_v30 = vrot.slane %v10014_v12, 2 }
0x19a3   :  { %7778 = vmatpush1.bf16.msra.mxu1 %v9804_v48  ;;  %3753 = vmatprep.mubr.f32.mxu1 %v8861_v7 }
0x19a4   :  { %v3326_v59 = vrot.slane %v10025_v1, 4  ;;  %7780 = vmatprep.subr.bf16.mxu1 %v9818_v54 }
0x19a6   :  { %7173 = vmatmul.mubr.msk.f32.vlgmr.msra.gmra.mrb[30].mxu0 %vm358_vm1, %v3326_v59 }
0x19a7   :  { %7782 = vmatpush1.bf16.msra.mxu1 %v9833_v8  ;;  %7762 = vmatpush1.bf16.msra.mxu0 %v9831_v5 }
0x19a8   :  { %7784 = vmatprep.subr.bf16.mxu1 %v9857_v58  ;;  %7764 = vmatprep.subr.bf16.mxu0 %v9845_v11 }
0x19a9   :  { %3660 = vmatprep.mubr.f32.mxu0 %v8861_v7 }
0x19ab   :  { %7786 = vmatpush1.bf16.msra.mxu1 %v9869_v52  ;;  %7766 = vmatpush1.bf16.msra.mxu0 %v9859_v14 }
0x19ac   :  { %7788 = vmatprep.subr.bf16.mxu1 %v9899_v31  ;;  %7768 = vmatprep.subr.bf16.mxu0 %v9888_v40 }
0x19af   :  { %7790 = vmatpush1.bf16.msra.mxu1 %v9913_v38  ;;  %7770 = vmatpush1.bf16.msra.mxu0 %v9901_v60 }
0x19b0   :  { %7772 = vmatprep.subr.bf16.mxu0 %v9928_v39  ;;  %7808 = vmatprep.subr.bf16.mxu1 %v9793_v35  ;;  %v3408_v35 = vld [vmem:[#allocation4 + $0x10] sm:$0x3] }
0x19b3   :  { %7774 = vmatpush1.bf16.msra.mxu0 %v9930_v42 }
0x19b4   :  { %7792 = vmatprep.subr.bf16.mxu0 %v9806_v3 }
0x1a75   :  { %v3495_v56 = vpop.f32.mrb[30].mxu1 }
0x1a76   :  { %v3497_v10 = vpop.f32.mrb[31].mxu1  ;;  %v3500_v55 = vadd.f32 %v3495_v56, %v3408_v35 }
0x1a77   :  { %v3501_v0 = vadd.f32 %v3497_v10, %v3409_v29  ;;  %v3516_v10 = vrot.slane %v10017_v20, 6 }
0x1a78   :  { %v7177_v49 = vmul.f32 -1.442695, %v3500_v55 }
0x1a79   :  { %8517 = vtanh.f32 %v3501_v0  ;;  %v3395_v2 = vpop.f32.mrb[30].mxu0  ;;  %v7178_v12 = vmul.f32 -1.442695, %v3501_v0 }
0x1a7a   :  { %v3397_v62 = vpop.f32.mrb[31].mxu0  ;;  %v3402_v3 = vrot.slane %v3395_v2, 2 }
0x1a7b   :  { %v3403_v51 = vrot.slane %v3397_v62, 2 }
0x1a7c   :  { %v3406_v57 = vadd.f32 %v3402_v3, %v3307_v61 }
0x1a7d   :  { %v3407_v23 = vadd.f32 %v3403_v51, %v3308_v43 }
0x1a7e   :  { %v7175_v9 = vmul.f32 -1.442695, %v3406_v57 }
0x1a7f   :  { %8519 = vtanh.f32 %v3407_v23 }
0x1a80   :  { %8521 = vpow2.f32 %v7177_v49 }
0x1a81   :  { %8523 = vpow2.f32 %v7175_v9 }
0x1a83   :  { %v8518_v16 = vpop.eup %8517 }
0x1a84   :  { %3553 = vrot.lane.b32.xlu0 %v8518_v16, %s8862_s3 }
0x1a89   :  { %v8520_v22 = vpop.eup %8519 }
0x1a8a   :  { %3520 = vrot.lane.b32.xlu0 %v8520_v22, %s8862_s3  ;;  %v8522_v21 = vpop.eup %8521  ;;  %v7176_v22 = vmul.f32 -1.442695, %v3407_v23 }
0x1a8b   :  { %v3541_v28 = vadd.f32 1.0, %v8522_v21  ;;  %v8524_v13 = vpop.eup %8523 }
0x1a8c   :  { %v3508_v53 = vadd.f32 1.0, %v8524_v13  ;;  %v3574_v13 = vld [vmem:[#allocation3 + $0x30] sm:$0x3] }
0x1a8d   :  { %8525 = vrcp.f32 %v3541_v28 }
0x1a8e   :  { %8527 = vrcp.f32 %v3508_v53 }
0x1a97   :  { %v8526_v4 = vpop.eup %8525 }
0x1a98   :  { %v8528_v50 = vpop.eup %8527  ;;  %v3551_v59 = vmul.f32 %v8526_v4, %v3549_v30 }
0x1a99   :  { %v3518_v2 = vmul.f32 %v8528_v50, %v3516_v10 }
0x1af6   :  { %v3554_v45 = vpop.permute.xlu0 %3553 }
0x1af7   :  { %v3556_v41 = vmul.f32 %v8526_v4, %v3554_v45 }
0x1af9   :  { %3558 = vrot.lane.b32.xlu1 %v3556_v41, %s8862_s3 }
0x1afc   :  { %v3521_v26 = vpop.permute.xlu0 %3520 }
0x1afd   :  { %v3523_v37 = vmul.f32 %v8528_v50, %v3521_v26 }
0x1aff   :  { %3525 = vrot.lane.b32.xlu1 %v3523_v37, %s8862_s3 }
0x1b6b   :  { %v3559_v56 = vpop.permute.xlu1 %3558 }
0x1b6c   :  { %v10053_v29 = vadd.f32 %v3559_v56, %v3551_v59 }
0x1b6e   :  { %8529 = vtanh.f32 %v10053_v29 }
0x1b71   :  { %v3526_v62 = vpop.permute.xlu1 %3525 }
0x1b72   :  { %v10057_v51 = vadd.f32 %v3526_v62, %v3518_v2  ;;  %v3815_v62 = vrot.slane %v10053_v29, 2 }
0x1b74   :  { %8531 = vtanh.f32 %v10057_v51 }
0x1b75   :  { %8533 = vpow2.f32 %v7178_v12 }
0x1b76   :  { %8535 = vpow2.f32 %v7176_v22  ;;  %v3782_v22 = vrot.slane %v10057_v51, 6 }
0x1b78   :  { %v8530_v43 = vpop.eup %8529 }
0x1b79   :  { %3564 = vrot.lane.b32.xlu0 %v8530_v43, %s8862_s3 }
0x1b7e   :  { %v8532_v16 = vpop.eup %8531 }
0x1b7f   :  { %3531 = vrot.lane.b32.xlu1 %v8532_v16, %s8862_s3  ;;  %v8534_v35 = vpop.eup %8533 }
0x1b80   :  { %v3542_v20 = vadd.f32 1.0, %v8534_v35  ;;  %v8536_v55 = vpop.eup %8535 }
0x1b81   :  { %v3509_v3 = vadd.f32 1.0, %v8536_v55 }
0x1b82   :  { %8537 = vrcp.f32 %v3542_v20 }
0x1b83   :  { %8539 = vrcp.f32 %v3509_v3 }
0x1b8c   :  { %v8538_v49 = vpop.eup %8537 }
0x1b8d   :  { %v8540_v0 = vpop.eup %8539 }
0x1beb   :  { %v3565_v61 = vpop.permute.xlu0 %3564 }
0x1bec   :  { %v10062_v57 = vmul.f32 %v8538_v49, %v3565_v61 }
0x1bee   :  { %7180 = vmatmul.mubr.msk.f32.vlgmr.msra.gmra.mrb[32].mxu1 %vm358_vm1, %v10062_v57 }
0x1bef   :  { %7810 = vmatpush1.bf16.msra.mxu1 %v9804_v48  ;;  %4025 = vmatprep.mubr.f32.mxu1 %v8861_v7 }
0x1bf0   :  { %7812 = vmatprep.subr.bf16.mxu1 %v9818_v54 }
0x1bf1   :  { %v3532_v23 = vpop.permute.xlu1 %3531 }
0x1bf2   :  { %v10069_v9 = vmul.f32 %v8540_v0, %v3532_v23 }
0x1bf3   :  { %7814 = vmatpush1.bf16.msra.mxu1 %v9833_v8  ;;  %v3670_v8 = vld [vmem:[#allocation4 + $0x8] sm:$0xc0] }
0x1bf4   :  { %v3593_v21 = vrot.slane %v10069_v9, 6  ;;  %7816 = vmatprep.subr.bf16.mxu1 %v9857_v58 }
0x1bf6   :  { %7179 = vmatmul.mubr.msk.f32.vlgmr.msra.gmra.mrb[32].mxu0 %vm358_vm1, %v3593_v21 }
0x1bf7   :  { %7794 = vmatpush1.bf16.msra.mxu0 %v9831_v5  ;;  %7818 = vmatpush1.bf16.msra.mxu1 %v9869_v52  ;;  %v3575_v52 = vld [vmem:[#allocation3 + $0x38] sm:$0x3] }
0x1bf8   :  { %7796 = vmatprep.subr.bf16.mxu0 %v9845_v11  ;;  %7820 = vmatprep.subr.bf16.mxu1 %v9899_v31 }
0x1bf9   :  { %3925 = vmatprep.mubr.f32.mxu0 %v8861_v7 }
0x1bfb   :  { %7798 = vmatpush1.bf16.msra.mxu0 %v9859_v14  ;;  %7822 = vmatpush1.bf16.msra.mxu1 %v9913_v38 }
0x1bfc   :  { %7800 = vmatprep.subr.bf16.mxu0 %v9888_v40 }
0x1bff   :  { %7802 = vmatpush1.bf16.msra.mxu0 %v9901_v60 }
0x1c00   :  { %7804 = vmatprep.subr.bf16.mxu0 %v9928_v39  ;;  %v3669_v39 = vld [vmem:[#allocation4] sm:$0xc0] }
0x1c03   :  { %7806 = vmatpush1.bf16.msra.mxu0 %v9930_v42 }
0x1cc1   :  { %v3755_v48 = vpop.f32.mrb[32].mxu1 }
0x1cc2   :  { %v3757_v54 = vpop.f32.mrb[33].mxu1  ;;  %v3762_v60 = vrot.slane %v3755_v48, 2 }
0x1cc3   :  { %v3763_v5 = vrot.slane %v3757_v54, 2 }
0x1cc4   :  { %v3766_v42 = vadd.f32 %v3762_v60, %v3669_v39 }
0x1cc5   :  { %v3767_v11 = vadd.f32 %v3763_v5, %v3670_v8 }
0x1cc6   :  { %v7183_v28 = vmul.f32 -1.442695, %v3766_v42 }
0x1cc7   :  { %8541 = vtanh.f32 %v3767_v11  ;;  %v7184_v29 = vmul.f32 -1.442695, %v3767_v11 }
0x1cc9   :  { %v3662_v58 = vpop.f32.mrb[32].mxu0 }
0x1cca   :  { %v3664_v31 = vpop.f32.mrb[33].mxu0  ;;  %v3667_v53 = vadd.f32 %v3662_v58, %v3574_v13  ;;  %v3841_v13 = vld [vmem:[#allocation3 + $0x38] sm:$0xc] }
0x1ccb   :  { %v3668_v14 = vadd.f32 %v3664_v31, %v3575_v52 }
0x1ccc   :  { %v7181_v4 = vmul.f32 -1.442695, %v3667_v53 }
0x1ccd   :  { %8543 = vtanh.f32 %v3668_v14  ;;  %v7182_v61 = vmul.f32 -1.442695, %v3668_v14 }
0x1cce   :  { %8545 = vpow2.f32 %v7183_v28 }
0x1ccf   :  { %8547 = vpow2.f32 %v7181_v4 }
0x1cd1   :  { %v8542_v38 = vpop.eup %8541 }
0x1cd2   :  { %3819 = vrot.lane.b32.xlu0 %v8542_v38, %s8862_s3 }
0x1cd7   :  { %v8544_v40 = vpop.eup %8543 }
0x1cd8   :  { %3786 = vrot.lane.b32.xlu0 %v8544_v40, %s8862_s3  ;;  %v8546_v45 = vpop.eup %8545  ;;  %v3941_v40 = vld [vmem:[#allocation4 + $0x8] sm:$0x30] }
0x1cd9   :  { %v3807_v41 = vadd.f32 1.0, %v8546_v45  ;;  %v8548_v50 = vpop.eup %8547 }
0x1cda   :  { %v3774_v26 = vadd.f32 1.0, %v8548_v50  ;;  %v3940_v50 = vld [vmem:[#allocation4] sm:$0x30] }
0x1cdb   :  { %8549 = vrcp.f32 %v3807_v41 }
0x1cdc   :  { %8551 = vrcp.f32 %v3774_v26 }
0x1ce5   :  { %v8550_v37 = vpop.eup %8549 }
0x1ce6   :  { %v8552_v56 = vpop.eup %8551  ;;  %v3817_v43 = vmul.f32 %v8550_v37, %v3815_v62 }
0x1ce7   :  { %v3784_v35 = vmul.f32 %v8552_v56, %v3782_v22 }
0x1d44   :  { %v3820_v30 = vpop.permute.xlu0 %3819 }
0x1d45   :  { %v3822_v59 = vmul.f32 %v8550_v37, %v3820_v30  ;;  %v3840_v30 = vld [vmem:[#allocation3 + $0x30] sm:$0xc] }
0x1d47   :  { %3824 = vrot.lane.b32.xlu1 %v3822_v59, %s8862_s3 }
0x1d4a   :  { %v3787_v10 = vpop.permute.xlu0 %3786 }
0x1d4b   :  { %v3789_v2 = vmul.f32 %v8552_v56, %v3787_v10 }
0x1d4d   :  { %3791 = vrot.lane.b32.xlu1 %v3789_v2, %s8862_s3 }
0x1db9   :  { %v3825_v16 = vpop.permute.xlu1 %3824 }
0x1dba   :  { %v10091_v12 = vadd.f32 %v3825_v16, %v3817_v43 }
0x1dbc   :  { %8553 = vtanh.f32 %v10091_v12 }
0x1dbf   :  { %v3792_v20 = vpop.permute.xlu1 %3791 }
0x1dc0   :  { %v10095_v55 = vadd.f32 %v3792_v20, %v3784_v35 }
0x1dc2   :  { %8555 = vtanh.f32 %v10095_v55 }
0x1dc3   :  { %8557 = vpow2.f32 %v7184_v29 }
0x1dc4   :  { %8559 = vpow2.f32 %v7182_v61  ;;  %v4216_v61 = vld [vmem:[%s10996_s5 + $0x8] sm:$0xff] }
0x1dc6   :  { %v8554_v3 = vpop.eup %8553 }
0x1dc7   :  { %3830 = vrot.lane.b32.xlu0 %v8554_v3, %s8862_s3 }
0x1dcc   :  { %v8556_v49 = vpop.eup %8555 }
0x1dcd   :  { %3797 = vrot.lane.b32.xlu1 %v8556_v49, %s8862_s3  ;;  %v8558_v0 = vpop.eup %8557 }
0x1dce   :  { %v3808_v51 = vadd.f32 1.0, %v8558_v0  ;;  %v8560_v23 = vpop.eup %8559  ;;  %v4218_v0 = vld [vmem:[%s10996_s5 + $0x18] sm:$0xff] }
0x1dcf   :  { %v3775_v21 = vadd.f32 1.0, %v8560_v23  ;;  %v10129_v23 = vpack.c.bf16 %v4218_v0, %v4216_v61  ;;  %v4123_v61 = vld [vmem:[%s10993_s2 + $0x48] sm:$0xff]  ;;  %v4125_v0 = vld [vmem:[%s10993_s2 + $0x58] sm:$0xff] }
0x1dd0   :  { %8561 = vrcp.f32 %v3808_v51  ;;  %v4215_v51 = vld [vmem:[%s10996_s5] sm:$0xff] }
0x1dd1   :  { %8563 = vrcp.f32 %v3775_v21  ;;  %v4217_v21 = vld [vmem:[%s10996_s5 + $0x10] sm:$0xff]  ;;  %7840 = vmatprep.subr.bf16.mxu1 %v10129_v23 }
0x1dda   :  { %v8562_v48 = vpop.eup %8561 }
0x1ddb   :  { %v8564_v58 = vpop.eup %8563 }
0x1e39   :  { %v3831_v54 = vpop.permute.xlu0 %3830 }
0x1e3a   :  { %v10100_v5 = vmul.f32 %v8562_v48, %v3831_v54  ;;  %v4115_v48 = vld [vmem:[%s10993_s2 + $0x8] sm:$0xff]  ;;  %v4117_v54 = vld [vmem:[%s10993_s2 + $0x18] sm:$0xff] }
0x1e3c   :  { %v3958_v8 = vrot.slane %v10100_v5, 6 }
0x1e3e   :  { %7186 = vmatmul.mubr.msk.f32.vlgmr.msra.gmra.mrb[34].mxu1 %vm358_vm1, %v3958_v8  ;;  %v10140_v8 = vpack.c.bf16 %v4217_v21, %v4215_v51  ;;  %v7831_v51 = vpack.c.bf16 %v4125_v0, %v4123_v61  ;;  %v4124_v21 = vld [vmem:[%s10993_s2 + $0x50] sm:$0xff] }
0x1e3f   :  { %v3798_v52 = vpop.permute.xlu1 %3797  ;;  %4298 = vmatprep.mubr.f32.mxu1 %v8861_v7 }
0x1e40   :  { %v10105_v11 = vmul.f32 %v8564_v58, %v3798_v52  ;;  %v10142_v58 = vpack.c.bf16 %v4117_v54, %v4115_v48  ;;  %v4220_v52 = vld [vmem:[%s10996_s5 + $0x28] sm:$0xff]  ;;  %7842 = vmatpush1.bf16.msra.mxu1 %v10140_v8 }
0x1e42   :  { %7185 = vmatmul.mubr.msk.f32.vlgmr.msra.gmra.mrb[34].mxu0 %vm358_vm1, %v10105_v11  ;;  %7824 = vmatprep.subr.bf16.mxu0 %v10142_v58 }
0x1e43   :  { %4198 = vmatprep.mubr.f32.mxu0 %v8861_v7 }
0x1f11   :  { %v4027_v31 = vpop.f32.mrb[34].mxu1 }
0x1f12   :  { %v4029_v14 = vpop.f32.mrb[35].mxu1  ;;  %v4034_v41 = vrot.slane %v4027_v31, 4  ;;  %v4222_v31 = vld [vmem:[%s10996_s5 + $0x38] sm:$0xff] }
0x1f13   :  { %v4035_v38 = vrot.slane %v4029_v14, 4  ;;  %v4114_v14 = vld [vmem:[%s10993_s2] sm:$0xff] }
0x1f14   :  { %v4038_v26 = vadd.f32 %v4034_v41, %v3940_v50  ;;  %v4224_v41 = vld [vmem:[%s10996_s5 + $0x48] sm:$0xff] }
0x1f15   :  { %v10110_v60 = vadd.f32 %v4035_v38, %v3941_v40  ;;  %v3927_v39 = vpop.f32.mrb[34].mxu0  ;;  %v10154_v38 = vpack.c.bf16 %v4222_v31, %v4220_v52  ;;  %v4116_v40 = vld [vmem:[%s10993_s2 + $0x10] sm:$0xff]  ;;  %v4227_v31 = vld [vmem:[%s10996_s5 + $0x60] sm:$0xff] }
0x1f16   :  { %v3929_v42 = vpop.f32.mrb[35].mxu0  ;;  %v3934_v37 = vrot.slane %v3927_v39, 6  ;;  %v7189_v59 = vmul.f32 -1.442695, %v4038_v26  ;;  %v4219_v39 = vld [vmem:[%s10996_s5 + $0x20] sm:$0xff]  ;;  %v4226_v26 = vld [vmem:[%s10996_s5 + $0x58] sm:$0xff] }
0x1f17   :  { %8565 = vtanh.f32 %v10110_v60  ;;  %v3935_v28 = vrot.slane %v3929_v42, 6  ;;  %v4221_v42 = vld [vmem:[%s10996_s5 + $0x30] sm:$0xff]  ;;  %7844 = vmatprep.subr.bf16.mxu1 %v10154_v38 }
0x1f18   :  { %v3938_v56 = vadd.f32 %v3934_v37, %v3840_v30  ;;  %v4118_v37 = vld [vmem:[%s10993_s2 + $0x20] sm:$0xff]  ;;  %v4120_v30 = vld [vmem:[%s10993_s2 + $0x30] sm:$0xff] }
0x1f19   :  { %v10113_v53 = vadd.f32 %v3935_v28, %v3841_v13  ;;  %v10167_v28 = vpack.c.bf16 %v4116_v40, %v4114_v14  ;;  %v10169_v13 = vpack.c.bf16 %v4221_v42, %v4219_v39  ;;  %v4229_v14 = vld [vmem:[%s10996_s5 + $0x70] sm:$0xff]  ;;  %v4127_v39 = vld [vmem:[%s10993_s2 + $0x68] sm:$0xff]  ;;  %v4129_v42 = vld [vmem:[%s10993_s2 + $0x78] sm:$0xff] }
0x1f1a   :  { %v7187_v10 = vmul.f32 -1.442695, %v3938_v56  ;;  %v10195_v56 = vpack.c.bf16 %v4120_v30, %v4118_v37  ;;  %v7853_v40 = vpack.c.bf16 %v4229_v14, %v4227_v31  ;;  %v4112_v14 = vld [vmem:[#allocation3 + $0x30] sm:$0x30] }
0x1f1b   :  { %8567 = vtanh.f32 %v10113_v53  ;;  %7826 = vmatpush1.bf16.msra.mxu0 %v10167_v28  ;;  %7846 = vmatpush1.bf16.msra.mxu1 %v10169_v13 }
0x1f1c   :  { %8569 = vpow2.f32 %v7189_v59  ;;  %v10193_v59 = vpack.c.bf16 %v4226_v26, %v4224_v41  ;;  %v4128_v41 = vld [vmem:[%s10993_s2 + $0x70] sm:$0xff] }
0x1f1d   :  { %8571 = vpow2.f32 %v7187_v10  ;;  %v4223_v10 = vld [vmem:[%s10996_s5 + $0x40] sm:$0xff] }
0x1f1e   :  { %7848 = vmatprep.subr.bf16.mxu1 %v10193_v59 }
0x1f21   :  { %v8566_v4 = vpop.eup %8565 }
0x1f22   :  { %4091 = vrot.lane.b32.xlu0 %v8566_v4, %s8862_s3  ;;  %v4119_v4 = vld [vmem:[%s10993_s2 + $0x28] sm:$0xff] }
0x1f25   :  { %v8568_v45 = vpop.eup %8567 }
0x1f26   :  { %4058 = vrot.lane.b32.xlu0 %v8568_v45, %s8862_s3  ;;  %v8570_v2 = vpop.eup %8569  ;;  %v4121_v45 = vld [vmem:[%s10993_s2 + $0x38] sm:$0xff] }
0x1f27   :  { %v4079_v62 = vadd.f32 1.0, %v8570_v2  ;;  %v8572_v43 = vpop.eup %8571  ;;  %v10181_v50 = vpack.c.bf16 %v4121_v45, %v4119_v4  ;;  %v4225_v2 = vld [vmem:[%s10996_s5 + $0x50] sm:$0xff]  ;;  %v4126_v4 = vld [vmem:[%s10993_s2 + $0x60] sm:$0xff]  ;;  %v7835_v45 = vpack.c.bf16 %v4129_v42, %v4127_v39 }
0x1f28   :  { %v4046_v16 = vadd.f32 1.0, %v8572_v43  ;;  %v4087_v43 = vrot.slane %v10091_v12, 2  ;;  %v4228_v12 = vld [vmem:[%s10996_s5 + $0x68] sm:$0xff]  ;;  %v7837_v26 = vpack.c.bf16 %v4128_v41, %v4126_v4 }
0x1f29   :  { %8573 = vrcp.f32 %v4079_v62  ;;  %7828 = vmatprep.subr.bf16.mxu0 %v10181_v50  ;;  %v10205_v62 = vpack.c.bf16 %v4225_v2, %v4223_v10  ;;  %v7190_v10 = vmul.f32 -1.442695, %v10110_v60  ;;  %v7188_v2 = vmul.f32 -1.442695, %v10113_v53 }
0x1f2a   :  { %8575 = vrcp.f32 %v4046_v16  ;;  %7830 = vmatpush1.bf16.msra.mxu0 %v10195_v56 }
0x1f2b   :  { %7850 = vmatpush1.bf16.msra.mxu1 %v10205_v62  ;;  %7832 = vmatprep.subr.bf16.mxu0 %v7831_v51 }
0x1f33   :  { %v8574_v22 = vpop.eup %8573 }
0x1f34   :  { %v8576_v3 = vpop.eup %8575  ;;  %v4089_v16 = vmul.f32 %v8574_v22, %v4087_v43 }
0x1f94   :  { %v4092_v35 = vpop.permute.xlu0 %4091 }
0x1f95   :  { %v4094_v20 = vmul.f32 %v8574_v22, %v4092_v35 }
0x1f97   :  { %4096 = vrot.lane.b32.xlu1 %v4094_v20, %s8862_s3  ;;  %v4054_v20 = vrot.slane %v10095_v55, 6  ;;  %v4230_v55 = vld [vmem:[%s10996_s5 + $0x78] sm:$0xff] }
0x1f98   :  { %v4059_v49 = vpop.permute.xlu0 %4058  ;;  %v7851_v54 = vpack.c.bf16 %v4230_v55, %v4228_v12 }
0x1f99   :  { %v4061_v29 = vmul.f32 %v8576_v3, %v4059_v49 }
0x1f9a   :  { %7852 = vmatprep.subr.bf16.mxu1 %v7851_v54 }
0x1f9b   :  { %4063 = vrot.lane.b32.xlu1 %v4061_v29, %s8862_s3  ;;  %v4056_v29 = vmul.f32 %v8576_v3, %v4054_v20  ;;  %v4122_v3 = vld [vmem:[%s10993_s2 + $0x40] sm:$0xff]  ;;  %7854 = vmatpush1.bf16.msra.mxu1 %v7853_v40 }
0x1f9c   :  { %v7833_v52 = vpack.c.bf16 %v4124_v21, %v4122_v3  ;;  %7872 = vmatprep.subr.bf16.mxu1 %v10129_v23  ;;  %v4113_v3 = vld [vmem:[#allocation3 + $0x38] sm:$0x30] }
0x1f9e   :  { %7834 = vmatpush1.bf16.msra.mxu0 %v7833_v52 }
0x1f9f   :  { %7836 = vmatprep.subr.bf16.mxu0 %v7835_v45 }
0x1fa2   :  { %7838 = vmatpush1.bf16.msra.mxu0 %v7837_v26 }
0x1fa3   :  { %7856 = vmatprep.subr.bf16.mxu0 %v10142_v58 }
0x2009   :  { %v4097_v35 = vpop.permute.xlu1 %4096 }
0x200a   :  { %v10212_v49 = vadd.f32 %v4097_v35, %v4089_v16 }
0x200c   :  { %8577 = vtanh.f32 %v10212_v49 }
0x200d   :  { %v4064_v22 = vpop.permute.xlu1 %4063 }
0x200e   :  { %v10233_v48 = vadd.f32 %v4064_v22, %v4056_v29 }
0x2010   :  { %8579 = vtanh.f32 %v10233_v48 }
0x2011   :  { %8581 = vpow2.f32 %v7190_v10 }
0x2012   :  { %8583 = vpow2.f32 %v7188_v2 }
0x2016   :  { %v8578_v37 = vpop.eup %8577 }
0x2017   :  { %4102 = vrot.lane.b32.xlu0 %v8578_v37, %s8862_s3 }
0x201a   :  { %v8580_v30 = vpop.eup %8579 }
0x201b   :  { %4069 = vrot.lane.b32.xlu1 %v8580_v30, %s8862_s3  ;;  %v8582_v43 = vpop.eup %8581 }
0x201c   :  { %v4080_v16 = vadd.f32 1.0, %v8582_v43  ;;  %v8584_v35 = vpop.eup %8583 }
0x201d   :  { %v4047_v23 = vadd.f32 1.0, %v8584_v35  ;;  %v4360_v35 = vrot.slane %v10212_v49, 2 }
0x201e   :  { %8585 = vrcp.f32 %v4080_v16 }
0x201f   :  { %8587 = vrcp.f32 %v4047_v23 }
0x2028   :  { %v8586_v20 = vpop.eup %8585 }
0x2029   :  { %v8588_v0 = vpop.eup %8587 }
0x2089   :  { %v4103_v58 = vpop.permute.xlu0 %4102 }
0x208a   :  { %v10260_v29 = vmul.f32 %v8586_v20, %v4103_v58  ;;  %v4327_v58 = vrot.slane %v10233_v48, 6 }
0x208c   :  { %v4231_v61 = vrot.slane %v10260_v29, 4 }
0x208d   :  { %v4070_v12 = vpop.permute.xlu1 %4069 }
0x208e   :  { %v10263_v22 = vmul.f32 %v8588_v0, %v4070_v12  ;;  %7192 = vmatmul.mubr.msk.f32.vlgmr.msra.gmra.mrb[36].mxu1 %vm358_vm1, %v4231_v61 }
0x208f   :  { %7874 = vmatpush1.bf16.msra.mxu1 %v10140_v8  ;;  %4571 = vmatprep.mubr.f32.mxu1 %v8861_v7 }
0x2090   :  { %v4131_v60 = vrot.slane %v10263_v22, 2  ;;  %7876 = vmatprep.subr.bf16.mxu1 %v10154_v38 }
0x2092   :  { %7191 = vmatmul.mubr.msk.f32.vlgmr.msra.gmra.mrb[36].mxu0 %vm358_vm1, %v4131_v60 }
0x2093   :  { %7858 = vmatpush1.bf16.msra.mxu0 %v10167_v28  ;;  %7878 = vmatpush1.bf16.msra.mxu1 %v10169_v13  ;;  %v4214_v28 = vld [vmem:[#allocation4 + $0x8] sm:$0xc] }
0x2094   :  { %7860 = vmatprep.subr.bf16.mxu0 %v10181_v50  ;;  %7880 = vmatprep.subr.bf16.mxu1 %v10193_v59 }
0x2095   :  { %4471 = vmatprep.mubr.f32.mxu0 %v8861_v7 }
0x2097   :  { %7862 = vmatpush1.bf16.msra.mxu0 %v10195_v56  ;;  %7882 = vmatpush1.bf16.msra.mxu1 %v10205_v62 }
0x2098   :  { %7864 = vmatprep.subr.bf16.mxu0 %v7831_v51  ;;  %7884 = vmatprep.subr.bf16.mxu1 %v7851_v54  ;;  %v4213_v54 = vld [vmem:[#allocation4] sm:$0xc] }
0x209b   :  { %7866 = vmatpush1.bf16.msra.mxu0 %v7833_v52  ;;  %7886 = vmatpush1.bf16.msra.mxu1 %v7853_v40 }
0x209c   :  { %7868 = vmatprep.subr.bf16.mxu0 %v7835_v45 }
0x209f   :  { %7870 = vmatpush1.bf16.msra.mxu0 %v7837_v26 }
0x2161   :  { %v4300_v53 = vpop.f32.mrb[36].mxu1 }
0x2162   :  { %v4302_v8 = vpop.f32.mrb[37].mxu1  ;;  %v4307_v51 = vrot.slane %v4300_v53, 6 }
0x2163   :  { %v4308_v38 = vrot.slane %v4302_v8, 6 }
0x2164   :  { %v4311_v52 = vadd.f32 %v4307_v51, %v4213_v54 }
0x2165   :  { %v4312_v13 = vadd.f32 %v4308_v38, %v4214_v28  ;;  %v4200_v50 = vpop.f32.mrb[36].mxu0 }
0x2166   :  { %v4202_v55 = vpop.f32.mrb[37].mxu0  ;;  %v4207_v31 = vrot.slane %v4200_v50, 4  ;;  %v7195_v40 = vmul.f32 -1.442695, %v4311_v52 }
0x2167   :  { %8589 = vtanh.f32 %v4312_v13  ;;  %v4208_v59 = vrot.slane %v4202_v55, 4  ;;  %v7196_v49 = vmul.f32 -1.442695, %v4312_v13 }
0x2168   :  { %v4211_v39 = vadd.f32 %v4207_v31, %v4112_v14  ;;  %v4487_v31 = vld [vmem:[#allocation4 + $0x8] sm:$0x3] }
0x2169   :  { %v4212_v21 = vadd.f32 %v4208_v59, %v4113_v3 }
0x216a   :  { %v7193_v42 = vmul.f32 -1.442695, %v4211_v39 }
0x216b   :  { %8591 = vtanh.f32 %v4212_v21  ;;  %v7194_v38 = vmul.f32 -1.442695, %v4212_v21 }
0x216c   :  { %8593 = vpow2.f32 %v7195_v40 }
0x216d   :  { %8595 = vpow2.f32 %v7193_v42 }
0x2171   :  { %v8590_v56 = vpop.eup %8589 }
0x2172   :  { %4364 = vrot.lane.b32.xlu0 %v8590_v56, %s8862_s3 }
0x2175   :  { %v8592_v62 = vpop.eup %8591 }
0x2176   :  { %4331 = vrot.lane.b32.xlu0 %v8592_v62, %s8862_s3  ;;  %v8594_v4 = vpop.eup %8593 }
0x2177   :  { %v4352_v45 = vadd.f32 1.0, %v8594_v4  ;;  %v8596_v41 = vpop.eup %8595 }
0x2178   :  { %v4319_v26 = vadd.f32 1.0, %v8596_v41 }
0x2179   :  { %8597 = vrcp.f32 %v4352_v45  ;;  %v4386_v45 = vld [vmem:[#allocation3 + $0x38] sm:$0xc0] }
0x217a   :  { %8599 = vrcp.f32 %v4319_v26 }
0x2183   :  { %v8598_v37 = vpop.eup %8597 }
0x2184   :  { %v8600_v2 = vpop.eup %8599  ;;  %v4362_v23 = vmul.f32 %v8598_v37, %v4360_v35 }
0x2185   :  { %v4329_v0 = vmul.f32 %v8600_v2, %v4327_v58 }
0x21e4   :  { %v4365_v30 = vpop.permute.xlu0 %4364 }
0x21e5   :  { %v4367_v10 = vmul.f32 %v8598_v37, %v4365_v30  ;;  %v4486_v30 = vld [vmem:[#allocation4] sm:$0x3] }
0x21e7   :  { %4369 = vrot.lane.b32.xlu1 %v4367_v10, %s8862_s3 }
0x21e8   :  { %v4332_v43 = vpop.permute.xlu0 %4331 }
0x21e9   :  { %v4334_v16 = vmul.f32 %v8600_v2, %v4332_v43 }
0x21eb   :  { %4336 = vrot.lane.b32.xlu1 %v4334_v16, %s8862_s3  ;;  %v4385_v16 = vld [vmem:[#allocation3 + $0x30] sm:$0xc0] }
0x2259   :  { %v4370_v20 = vpop.permute.xlu1 %4369 }
0x225a   :  { %v10284_v61 = vadd.f32 %v4370_v20, %v4362_v23 }
0x225c   :  { %8601 = vtanh.f32 %v10284_v61 }
0x225d   :  { %v4337_v12 = vpop.permute.xlu1 %4336 }
0x225e   :  { %v10287_v60 = vadd.f32 %v4337_v12, %v4329_v0 }
0x2260   :  { %8603 = vtanh.f32 %v10287_v60 }
0x2261   :  { %8605 = vpow2.f32 %v7196_v49 }
0x2262   :  { %8607 = vpow2.f32 %v7194_v38 }
0x2266   :  { %v8602_v53 = vpop.eup %8601 }
0x2267   :  { %4375 = vrot.lane.b32.xlu0 %v8602_v53, %s8862_s3 }
0x226a   :  { %v8604_v8 = vpop.eup %8603 }
0x226b   :  { %4342 = vrot.lane.b32.xlu1 %v8604_v8, %s8862_s3  ;;  %v8606_v48 = vpop.eup %8605 }
0x226c   :  { %v4353_v28 = vadd.f32 1.0, %v8606_v48  ;;  %v8608_v50 = vpop.eup %8607 }
0x226d   :  { %v4320_v55 = vadd.f32 1.0, %v8608_v50  ;;  %v4627_v50 = vrot.slane %v10284_v61, 2 }
0x226e   :  { %8609 = vrcp.f32 %v4353_v28 }
0x226f   :  { %8611 = vrcp.f32 %v4320_v55 }
0x2278   :  { %v8610_v59 = vpop.eup %8609 }
0x2279   :  { %v8612_v51 = vpop.eup %8611 }
0x22d9   :  { %v4376_v3 = vpop.permute.xlu0 %4375 }
0x22da   :  { %v4378_v56 = vmul.f32 %v8610_v59, %v4376_v3 }
0x22dc   :  { %v4504_v62 = vrot.slane %v4378_v56, 2 }
0x22dd   :  { %v4343_v54 = vpop.permute.xlu1 %4342 }
0x22de   :  { %v10292_v52 = vmul.f32 %v8612_v51, %v4343_v54  ;;  %7198 = vmatmul.mubr.msk.f32.vlgmr.msra.gmra.mrb[38].mxu1 %vm358_vm1, %v4504_v62  ;;  %v4659_v51 = vld [vmem:[%s10998_s7 + $0x18] sm:$0xff]  ;;  %v4656_v54 = vld [vmem:[%s10998_s7] sm:$0xff] }
0x22df   :  { %4906 = vmatprep.mubr.f32.mxu1 %v8861_v7 }
0x22e0   :  { %v4404_v13 = vrot.slane %v10292_v52, 4 }
0x22e2   :  { %7197 = vmatmul.mubr.msk.f32.vlgmr.msra.gmra.mrb[38].mxu0 %vm358_vm1, %v4404_v13 }
0x22e3   :  { %4764 = vmatprep.mubr.f32.mxu0 %v8861_v7 }
0x23b1   :  { %v4573_v21 = vpop.f32.mrb[38].mxu1 }
0x23b2   :  { %v4575_v14 = vpop.f32.mrb[39].mxu1  ;;  %v4578_v10 = vadd.f32 %v4573_v21, %v4486_v30 }
0x23b3   :  { %v10299_v40 = vadd.f32 %v4575_v14, %v4487_v31  ;;  %v4661_v31 = vld [vmem:[%s10998_s7 + $0x28] sm:$0xff]  ;;  %v4663_v14 = vld [vmem:[%s10998_s7 + $0x38] sm:$0xff] }
0x23b4   :  { %v7201_v43 = vmul.f32 -1.442695, %v4578_v10 }
0x23b5   :  { %8613 = vtanh.f32 %v10299_v40  ;;  %v4473_v39 = vpop.f32.mrb[38].mxu0 }
0x23b6   :  { %v4475_v42 = vpop.f32.mrb[39].mxu0  ;;  %v4480_v2 = vrot.slane %v4473_v39, 2 }
0x23b7   :  { %v4481_v4 = vrot.slane %v4475_v42, 2  ;;  %v7891_v42 = vpack.c.bf16 %v4663_v14, %v4661_v31  ;;  %v4810_v14 = vld [vmem:[%s11001_s10 + $0x60] sm:$0xff] }
0x23b8   :  { %v4484_v35 = vadd.f32 %v4480_v2, %v4385_v16  ;;  %v4799_v2 = vld [vmem:[%s11001_s10 + $0x8] sm:$0xff]  ;;  %v4798_v16 = vld [vmem:[%s11001_s10] sm:$0xff] }
0x23b9   :  { %v10302_v41 = vadd.f32 %v4481_v4, %v4386_v45  ;;  %v4660_v4 = vld [vmem:[%s10998_s7 + $0x20] sm:$0xff]  ;;  %v4662_v45 = vld [vmem:[%s10998_s7 + $0x30] sm:$0xff] }
0x23ba   :  { %v7199_v23 = vmul.f32 -1.442695, %v4484_v35  ;;  %v7893_v10 = vpack.c.bf16 %v4662_v45, %v4660_v4  ;;  %v4678_v45 = vld [vmem:[%s10998_s7 + $0xb0] sm:$0xff] }
0x23bb   :  { %8615 = vtanh.f32 %v10302_v41 }
0x23bc   :  { %8617 = vpow2.f32 %v7201_v43  ;;  %v4801_v43 = vld [vmem:[%s11001_s10 + $0x18] sm:$0xff] }
0x23bd   :  { %8619 = vpow2.f32 %v7199_v23  ;;  %v4666_v23 = vld [vmem:[%s10998_s7 + $0x50] sm:$0xff] }
0x23bf   :  { %v8614_v26 = vpop.eup %8613 }
0x23c0   :  { %4631 = vrot.lane.b32.xlu0 %v8614_v26, %s8862_s3  ;;  %v4665_v26 = vld [vmem:[%s10998_s7 + $0x48] sm:$0xff] }
0x23c5   :  { %v8616_v37 = vpop.eup %8615 }
0x23c6   :  { %4598 = vrot.lane.b32.xlu0 %v8616_v37, %s8862_s3  ;;  %v8618_v20 = vpop.eup %8617  ;;  %v4667_v37 = vld [vmem:[%s10998_s7 + $0x58] sm:$0xff] }
0x23c7   :  { %v4619_v58 = vadd.f32 1.0, %v8618_v20  ;;  %v8620_v0 = vpop.eup %8619  ;;  %v7895_v35 = vpack.c.bf16 %v4667_v37, %v4665_v26  ;;  %v7919_v20 = vpack.c.bf16 %v4801_v43, %v4799_v2 }
0x23c8   :  { %v4586_v12 = vadd.f32 1.0, %v8620_v0 }
0x23c9   :  { %8621 = vrcp.f32 %v4619_v58  ;;  %v4800_v58 = vld [vmem:[%s11001_s10 + $0x10] sm:$0xff]  ;;  %7920 = vmatprep.subr.bf16.mxu1 %v7919_v20  ;;  %v4815_v20 = vld [vmem:[%s11001_s10 + $0x88] sm:$0xff] }
0x23ca   :  { %8623 = vrcp.f32 %v4586_v12  ;;  %v7921_v0 = vpack.c.bf16 %v4800_v58, %v4798_v16  ;;  %v4669_v12 = vld [vmem:[%s10998_s7 + $0x68] sm:$0xff]  ;;  %v4817_v58 = vld [vmem:[%s11001_s10 + $0x98] sm:$0xff] }
0x23cc   :  { %7922 = vmatpush1.bf16.msra.mxu1 %v7921_v0 }
0x23d3   :  { %v8622_v53 = vpop.eup %8621 }
0x23d4   :  { %v8624_v38 = vpop.eup %8623  ;;  %v4629_v55 = vmul.f32 %v8622_v53, %v4627_v50  ;;  %v4668_v50 = vld [vmem:[%s10998_s7 + $0x60] sm:$0xff] }
0x2432   :  { %v4632_v8 = vpop.permute.xlu0 %4631 }
0x2433   :  { %v4634_v49 = vmul.f32 %v8622_v53, %v4632_v8  ;;  %v4671_v53 = vld [vmem:[%s10998_s7 + $0x78] sm:$0xff]  ;;  %v4803_v8 = vld [vmem:[%s11001_s10 + $0x28] sm:$0xff] }
0x2435   :  { %4636 = vrot.lane.b32.xlu1 %v4634_v49, %s8862_s3  ;;  %v4805_v49 = vld [vmem:[%s11001_s10 + $0x38] sm:$0xff] }
0x2438   :  { %v4599_v48 = vpop.permute.xlu0 %4598 }
0x2439   :  { %v4601_v28 = vmul.f32 %v8624_v38, %v4599_v48 }
0x243b   :  { %4603 = vrot.lane.b32.xlu1 %v4601_v28, %s8862_s3 }
0x243f   :  { %3836 = vrot.lane.b32.xlu1 %v10100_v5, %s8862_s3  ;;  %v4594_v5 = vrot.slane %v10287_v60, 6  ;;  %v4657_v60 = vld [vmem:[%s10998_s7 + $0x8] sm:$0xff] }
0x2440   :  { %v7887_v21 = vpack.c.bf16 %v4659_v51, %v4657_v60  ;;  %v4813_v60 = vld [vmem:[%s11001_s10 + $0x78] sm:$0xff] }
0x2442   :  { %7888 = vmatprep.subr.bf16.mxu0 %v7887_v21  ;;  %v4677_v21 = vld [vmem:[%s10998_s7 + $0xa8] sm:$0xff] }
0x2443   :  { %4381 = vrot.lane.b32.xlu1 %v4378_v56, %s8862_s3  ;;  %v4596_v56 = vmul.f32 %v8624_v38, %v4594_v5  ;;  %v4804_v38 = vld [vmem:[%s11001_s10 + $0x30] sm:$0xff] }
0x2447   :  { %2758 = vrot.lane.b32.xlu1 %v9942_v63, %s8862_s3 }
0x244b   :  { %3303 = vrot.lane.b32.xlu1 %v10022_v36, %s8862_s3 }
0x244f   :  { %1680 = vrot.lane.b32.xlu1 %v9654_v34, %s8862_s3 }
0x2453   :  { %2225 = vrot.lane.b32.xlu1 %v9730_v17, %s8862_s3 }
0x24a7   :  { %v4637_v59 = vpop.permute.xlu1 %4636 }
0x24a8   :  { %v4639_v3 = vadd.f32 %v4637_v59, %v4629_v55  ;;  %v4670_v55 = vld [vmem:[%s10998_s7 + $0x70] sm:$0xff]  ;;  %v7923_v59 = vpack.c.bf16 %v4805_v49, %v4803_v8  ;;  %v4814_v8 = vld [vmem:[%s11001_s10 + $0x80] sm:$0xff] }
0x24a9   :  { %v4816_v49 = vld [vmem:[%s11001_s10 + $0x90] sm:$0xff] }
0x24aa   :  { %8625 = vtanh.f32 %v4639_v3  ;;  %v7899_v3 = vpack.c.bf16 %v4671_v53, %v4669_v12  ;;  %7924 = vmatprep.subr.bf16.mxu1 %v7923_v59  ;;  %v7935_v53 = vpack.c.bf16 %v4817_v58, %v4815_v20  ;;  %v4819_v59 = vld [vmem:[%s11001_s10 + $0xa8] sm:$0xff] }
0x24ab   :  { %v4936_v58 = vld [vmem:[%s10999_s8 + $0x48] sm:$0xff] }
0x24ad   :  { %v4604_v62 = vpop.permute.xlu1 %4603 }
0x24ae   :  { %v4606_v63 = vadd.f32 %v4604_v62, %v4596_v56  ;;  %v4807_v56 = vld [vmem:[%s11001_s10 + $0x48] sm:$0xff]  ;;  %v4809_v62 = vld [vmem:[%s11001_s10 + $0x58] sm:$0xff] }
0x24b0   :  { %8627 = vtanh.f32 %v4606_v63  ;;  %v4675_v63 = vld [vmem:[%s10998_s7 + $0x98] sm:$0xff] }
0x24b1   :  { %v3837_v36 = vpop.permute.xlu1 %3836 }
0x24b2   :  { %3839 = vst.msk [vmem:[#allocation2] sm:$0xc0] %vm598_vm5, %v3837_v36  ;;  %v7927_v36 = vpack.c.bf16 %v4809_v62, %v4807_v56  ;;  %v4818_v56 = vld [vmem:[%s11001_s10 + $0xa0] sm:$0xff]  ;;  %v4820_v62 = vld [vmem:[%s11001_s10 + $0xb0] sm:$0xff] }
0x24b4   :  { %v8626_v34 = vpop.eup %8625 }
0x24b5   :  { %4642 = vrot.lane.b32.xlu0 %v8626_v34, %s8862_s3  ;;  %v4382_v17 = vpop.permute.xlu1 %4381  ;;  %v4806_v34 = vld [vmem:[%s11001_s10 + $0x40] sm:$0xff] }
0x24b6   :  { %4384 = vst.msk [vmem:[#allocation2] sm:$0xc] %vm1147_vm6, %v4382_v17  ;;  %v4808_v17 = vld [vmem:[%s11001_s10 + $0x50] sm:$0xff] }
0x24b9   :  { %4108 = vrot.lane.b32.xlu0 %v10260_v29, %s8862_s3  ;;  %v2759_v61 = vpop.permute.xlu1 %2758  ;;  %v4658_v29 = vld [vmem:[%s10998_s7 + $0x10] sm:$0xff] }
0x24ba   :  { %v8628_v13 = vpop.eup %8627  ;;  %2761 = vst.msk [vmem:[#allocation2 + $0x8] sm:$0xc0] %vm598_vm5, %v2759_v61  ;;  %v7889_v39 = vpack.c.bf16 %v4658_v29, %v4656_v54  ;;  %v4811_v61 = vld [vmem:[%s11001_s10 + $0x68] sm:$0xff]  ;;  %v4674_v54 = vld [vmem:[%s10998_s7 + $0x90] sm:$0xff]  ;;  %v4679_v29 = vld [vmem:[%s10998_s7 + $0xb8] sm:$0xff] }
0x24bb   :  { %4609 = vrot.lane.b32.xlu1 %v8628_v13, %s8862_s3  ;;  %v7929_v13 = vpack.c.bf16 %v4808_v17, %v4806_v34  ;;  %v7931_v31 = vpack.c.bf16 %v4813_v60, %v4811_v61  ;;  %v7907_v4 = vpack.c.bf16 %v4679_v29, %v4677_v21  ;;  %v4930_v34 = vld [vmem:[%s10999_s8 + $0x18] sm:$0xff]  ;;  %v4823_v17 = vld [vmem:[%s11001_s10 + $0xc8] sm:$0xff] }
0x24bc   :  { %7890 = vmatpush1.bf16.msra.mxu0 %v7889_v39  ;;  %v4812_v39 = vld [vmem:[%s11001_s10 + $0x70] sm:$0xff]  ;;  %v4825_v60 = vld [vmem:[%s11001_s10 + $0xd8] sm:$0xff]  ;;  %v4827_v29 = vld [vmem:[%s11001_s10 + $0xe8] sm:$0xff] }
0x24bd   :  { %3030 = vrot.lane.b32.xlu0 %v9982_v15, %s8862_s3  ;;  %v3304_v30 = vpop.permute.xlu1 %3303  ;;  %7892 = vmatprep.subr.bf16.mxu0 %v7891_v42  ;;  %v4664_v15 = vld [vmem:[%s10998_s7 + $0x40] sm:$0xff]  ;;  %v7933_v26 = vpack.c.bf16 %v4812_v39, %v4810_v14  ;;  %v4829_v14 = vld [vmem:[%s11001_s10 + $0xf8] sm:$0xff] }
0x24be   :  { %3306 = vst.msk [vmem:[#allocation2 + $0x8] sm:$0xc] %vm1147_vm6, %v3304_v30  ;;  %v7897_v28 = vpack.c.bf16 %v4666_v23, %v4664_v15  ;;  %v7202_v30 = vmul.f32 -1.442695, %v10299_v40  ;;  %v4683_v15 = vld [vmem:[%s10998_s7 + $0xd8] sm:$0xff]  ;;  %v4680_v40 = vld [vmem:[%s10998_s7 + $0xc0] sm:$0xff]  ;;  %v7947_v39 = vpack.c.bf16 %v4829_v14, %v4827_v29 }
0x24bf   :  { %869 = vrot.lane.b32.xlu1 %v9400_v33, %s8862_s3  ;;  %v4802_v33 = vld [vmem:[%s11001_s10 + $0x20] sm:$0xff] }
0x24c0   :  { %7894 = vmatpush1.bf16.msra.mxu0 %v7893_v10  ;;  %v7925_v5 = vpack.c.bf16 %v4804_v38, %v4802_v33  ;;  %8629 = vpow2.f32 %v7202_v30  ;;  %v7200_v10 = vmul.f32 -1.442695, %v10302_v41  ;;  %v4682_v41 = vld [vmem:[%s10998_s7 + $0xd0] sm:$0xff]  ;;  %v7937_v33 = vpack.c.bf16 %v4816_v49, %v4814_v8  ;;  %v4685_v38 = vld [vmem:[%s10998_s7 + $0xe8] sm:$0xff] }
0x24c1   :  { %3570 = vrot.lane.b32.xlu0 %v10062_v57, %s8862_s3  ;;  %v1681_v48 = vpop.permute.xlu1 %1680  ;;  %7896 = vmatprep.subr.bf16.mxu0 %v7895_v35  ;;  %v4673_v57 = vld [vmem:[%s10998_s7 + $0x88] sm:$0xff]  ;;  %v7913_v12 = vpack.c.bf16 %v4682_v41, %v4680_v40  ;;  %v4931_v40 = vld [vmem:[%s10999_s8 + $0x20] sm:$0xff]  ;;  %v4937_v8 = vld [vmem:[%s10999_s8 + $0x50] sm:$0xff] }
0x24c2   :  { %1683 = vst.msk [vmem:[#allocation2 + $0x10] sm:$0xc0] %vm598_vm5, %v1681_v48  ;;  %7926 = vmatpush1.bf16.msra.mxu1 %v7925_v5  ;;  %v7903_v51 = vpack.c.bf16 %v4675_v63, %v4673_v57  ;;  %8631 = vpow2.f32 %v7200_v10  ;;  %v4681_v35 = vld [vmem:[%s10998_s7 + $0xc8] sm:$0xff]  ;;  %v4687_v48 = vld [vmem:[%s10998_s7 + $0xf8] sm:$0xff]  ;;  %v7941_v63 = vpack.c.bf16 %v4820_v62, %v4818_v56  ;;  %v4688_v56 = vld [vmem:[%s11000_s9] sm:$0x3] }
0x24c3   :  { %3568 = vst.msk [vmem:[#allocation2 + $0x10] sm:$0xc0] %vm1410_vm4, %v10069_v9  ;;  %1413 = vrot.lane.b32.xlu1 %v9616_v6, %s8862_s3  ;;  %v7901_v6 = vpack.c.bf16 %v4670_v55, %v4668_v50  ;;  %7928 = vmatprep.subr.bf16.mxu1 %v7927_v36  ;;  %v7911_v23 = vpack.c.bf16 %v4683_v15, %v4681_v35  ;;  %v4686_v55 = vld [vmem:[%s10998_s7 + $0xf0] sm:$0xff]  ;;  %v4928_v36 = vld [vmem:[%s10999_s8 + $0x8] sm:$0xff] }
0x24c4   :  { %7898 = vmatpush1.bf16.msra.mxu0 %v7897_v28  ;;  %v4684_v28 = vld [vmem:[%s10998_s7 + $0xe0] sm:$0xff]  ;;  %v7915_v50 = vpack.c.bf16 %v4687_v48, %v4685_v38  ;;  %v10525_v61 = vpack.c.bf16 %v4930_v34, %v4928_v36  ;;  %v4940_v38 = vld [vmem:[%s10999_s8 + $0x68] sm:$0xff]  ;;  %v4942_v48 = vld [vmem:[%s10999_s8 + $0x78] sm:$0xff]  ;;  %v4693_v62 = vrot.slane %v4688_v56, %v9335_v25 }
0x24c5   :  { %1952 = vrot.lane.b32.xlu0 %v9692_v44, %s8862_s3  ;;  %v2226_v9 = vpop.permute.xlu1 %2225  ;;  %7900 = vmatprep.subr.bf16.mxu0 %v7899_v3  ;;  %v4672_v44 = vld [vmem:[%s10998_s7 + $0x80] sm:$0xff]  ;;  %v4821_v3 = vld [vmem:[%s11001_s10 + $0xb8] sm:$0xff]  ;;  %v7917_v5 = vpack.c.bf16 %v4686_v55, %v4684_v28 }
0x24c6   :  { %2228 = vst.msk [vmem:[#allocation2 + $0x10] sm:$0xc] %vm1147_vm6, %v2226_v9  ;;  %v7905_v42 = vpack.c.bf16 %v4674_v54, %v4672_v44  ;;  %7930 = vmatpush1.bf16.msra.mxu1 %v7929_v13  ;;  %v7939_v57 = vpack.c.bf16 %v4821_v3, %v4819_v59  ;;  %v7943_v44 = vpack.c.bf16 %v4825_v60, %v4823_v17  ;;  %v4822_v54 = vld [vmem:[%s11001_s10 + $0xc0] sm:$0xff]  ;;  %v4824_v13 = vld [vmem:[%s11001_s10 + $0xd0] sm:$0xff] }
0x24c7   :  { %3028 = vst.msk [vmem:[#allocation2 + $0x10] sm:$0xc] %vm866_vm2, %v9985_v46  ;;  %v4676_v46 = vld [vmem:[%s10998_s7 + $0xa0] sm:$0xff]  ;;  %7932 = vmatprep.subr.bf16.mxu1 %v7931_v31  ;;  %v7945_v21 = vpack.c.bf16 %v4824_v13, %v4822_v54  ;;  %v4941_v3 = vld [vmem:[%s10999_s8 + $0x70] sm:$0xff] }
0x24c8   :  { %7902 = vmatpush1.bf16.msra.mxu0 %v7901_v6  ;;  %v7909_v37 = vpack.c.bf16 %v4678_v45, %v4676_v46  ;;  %v4939_v59 = vld [vmem:[%s10999_s8 + $0x60] sm:$0xff] }
0x24c9   :  { %7904 = vmatprep.subr.bf16.mxu0 %v7903_v51 }
0x24ca   :  { %7934 = vmatpush1.bf16.msra.mxu1 %v7933_v26  ;;  %v8630_v2 = vpop.eup %8629 }
0x24cb   :  { %v4620_v43 = vadd.f32 1.0, %v8630_v2  ;;  %7936 = vmatprep.subr.bf16.mxu1 %v7935_v53  ;;  %v4935_v53 = vld [vmem:[%s10999_s8 + $0x40] sm:$0xff] }
0x24cc   :  { %7906 = vmatpush1.bf16.msra.mxu0 %v7905_v42  ;;  %v8632_v16 = vpop.eup %8631  ;;  %v4826_v42 = vld [vmem:[%s11001_s10 + $0xe0] sm:$0xff]  ;;  %v10627_v28 = vpack.c.bf16 %v4937_v8, %v4935_v53 }
0x24cd   :  { %7908 = vmatprep.subr.bf16.mxu0 %v7907_v4  ;;  %8633 = vrcp.f32 %v4620_v43  ;;  %v4587_v0 = vadd.f32 1.0, %v8632_v16  ;;  %v4828_v4 = vld [vmem:[%s11001_s10 + $0xf0] sm:$0xff] }
0x24ce   :  { %7938 = vmatpush1.bf16.msra.mxu1 %v7937_v33  ;;  %v7949_v26 = vpack.c.bf16 %v4828_v4, %v4826_v42 }
0x24cf   :  { %8635 = vrcp.f32 %v4587_v0  ;;  %7940 = vmatprep.subr.bf16.mxu1 %v7939_v57 }
0x24d0   :  { %7910 = vmatpush1.bf16.msra.mxu0 %v7909_v37 }
0x24d1   :  { %7912 = vmatprep.subr.bf16.mxu0 %v7911_v23  ;;  %v4933_v23 = vld [vmem:[%s10999_s8 + $0x30] sm:$0xff] }
0x24d2   :  { %7942 = vmatpush1.bf16.msra.mxu1 %v7941_v63  ;;  %v10605_v0 = vpack.c.bf16 %v4933_v23, %v4931_v40  ;;  %v4697_v63 = vrot.slane %v4688_v56, %v9341_v27 }
0x24d3   :  { %7944 = vmatprep.subr.bf16.mxu1 %v7943_v44 }
0x24d4   :  { %7914 = vmatpush1.bf16.msra.mxu0 %v7913_v12 }
0x24d5   :  { %7916 = vmatprep.subr.bf16.mxu0 %v7915_v50  ;;  %v10630_v50 = vpack.c.bf16 %v4942_v48, %v4940_v38 }
0x24d6   :  { %7946 = vmatpush1.bf16.msra.mxu1 %v7945_v21 }
0x24d7   :  { %v8634_v9 = vpop.eup %8633  ;;  %7948 = vmatprep.subr.bf16.mxu1 %v7947_v39 }
0x24d8   :  { %7918 = vmatpush1.bf16.msra.mxu0 %v7917_v5  ;;  %v10641_v5 = vpack.c.bf16 %v4941_v3, %v4939_v59 }
0x24d9   :  { %7952 = vmatprep.subr.bf16.mxu0 %v10525_v61  ;;  %v8636_v46 = vpop.eup %8635 }
0x24da   :  { %7950 = vmatpush1.bf16.msra.mxu1 %v7949_v26 }
0x24db   :  { %7968 = vmatprep.subr.bf16.mxu1 %v10525_v61 }
0x2527   :  { %v4643_v6 = vpop.permute.xlu0 %4642 }
0x2528   :  { %v4645_v51 = vmul.f32 %v8634_v9, %v4643_v6  ;;  %v4830_v6 = vld [vmem:[%s11003_s12] sm:$0x3] }
0x2529   :  { %v4835_v13 = vrot.slane %v4830_v6, %v9335_v25  ;;  %v4839_v21 = vrot.slane %v4830_v6, %v9341_v27 }
0x252a   :  { %4648 = vrot.lane.b32.xlu0 %v4645_v51, %s8862_s3 }
0x252b   :  { %v4109_v31 = vpop.permute.xlu0 %4108 }
0x252c   :  { %4111 = vst.msk [vmem:[#allocation2] sm:$0x30] %vm872_vm7, %v4109_v31 }
0x252d   :  { %v4610_v45 = vpop.permute.xlu1 %4609 }
0x252e   :  { %v4612_v37 = vmul.f32 %v8636_v46, %v4610_v45  ;;  %2492 = vrot.lane.b32.xlu0 %v9766_v32, %s8862_s3 }
0x252f   :  { %v3031_v30 = vpop.permute.xlu0 %3030 }
0x2530   :  { %3033 = vst.msk [vmem:[#allocation2 + $0x8] sm:$0x30] %vm872_vm7, %v3031_v30 }
0x2531   :  { %v870_v10 = vpop.permute.xlu1 %869 }
0x2532   :  { %873 = vst.msk [vmem:[#allocation2 + $0x18] sm:$0x30] %vm872_vm7, %v870_v10  ;;  %595 = vrot.lane.b32.xlu0 %v9367_v19, %s8862_s3 }
0x2533   :  { %4379 = vst.msk [vmem:[#allocation2 + $0x18] sm:$0x30] %vm1141_vm3, %v10292_v52  ;;  %v3571_v2 = vpop.permute.xlu0 %3570  ;;  %v4927_v52 = vld [vmem:[%s10999_s8] sm:$0xff] }
0x2534   :  { %3573 = vst.msk [vmem:[#allocation2 + $0x8] sm:$0x3] %vm1416_vm8, %v3571_v2 }
0x2535   :  { %v1414_v32 = vpop.permute.xlu1 %1413 }
0x2536   :  { %1417 = vst.msk [vmem:[#allocation2 + $0x18] sm:$0x3] %vm1416_vm8, %v1414_v32  ;;  %1144 = vrot.lane.b32.xlu0 %v9436_v18, %s8862_s3  ;;  %v4929_v18 = vld [vmem:[%s10999_s8 + $0x10] sm:$0xff] }
0x2537   :  { %3834 = vst.msk [vmem:[#allocation2 + $0x18] sm:$0x3] %vm592_vm0, %v10105_v11  ;;  %v1953_v43 = vpop.permute.xlu0 %1952  ;;  %v4932_v11 = vld [vmem:[%s10999_s8 + $0x28] sm:$0xff]  ;;  %v10585_v35 = vpack.c.bf16 %v4929_v18, %v4927_v52 }
0x2538   :  { %1955 = vst.msk [vmem:[#allocation2 + $0x10] sm:$0x30] %vm872_vm7, %v1953_v43 }
0x2539   :  { %3301 = vst.msk [vmem:[#allocation2 + $0x10] sm:$0x30] %vm1141_vm3, %v10025_v1  ;;  %v4934_v1 = vld [vmem:[%s10999_s8 + $0x38] sm:$0xff] }
0x253a   :  { %v10587_v15 = vpack.c.bf16 %v4934_v1, %v4932_v11 }
0x253b   :  { %v4653_v33 = vld [vmem:[#allocation2 + $0x8] sm:$0xff] }
0x259c   :  { %v4649_v19 = vpop.permute.xlu0 %4648 }
0x259d   :  { %4651 = vst.msk [vmem:[#allocation2] sm:$0x3] %vm1416_vm8, %v4649_v19 }
0x25a0   :  { %v2493_v16 = vpop.permute.xlu0 %2492 }
0x25a1   :  { %2495 = vst.msk [vmem:[#allocation2 + $0x10] sm:$0x3] %vm1416_vm8, %v2493_v16 }
0x25a2   :  { %2756 = vst.msk [vmem:[#allocation2 + $0x10] sm:$0x3] %vm592_vm0, %v9948_v47  ;;  %v4938_v47 = vld [vmem:[%s10999_s8 + $0x58] sm:$0xff] }
0x25a3   :  { %v10608_v12 = vpack.c.bf16 %v4938_v47, %v4936_v58 }
0x25a4   :  { %v596_v41 = vpop.permute.xlu0 %595  ;;  %v4652_v20 = vld [vmem:[#allocation2] sm:$0xff] }
0x25a5   :  { %599 = vst.msk [vmem:[#allocation2 + $0x18] sm:$0xc0] %vm598_vm5, %v596_v41  ;;  %4765 = vmatmul.mubr.f32.vlgmr.msra.gmra.mrb[40].mxu0 %v4652_v20 }
0x25a6   :  { %4646 = vst.msk [vmem:[#allocation2 + $0x18] sm:$0xc0] %vm1410_vm4, %v4612_v37  ;;  %7954 = vmatpush1.bf16.msra.mxu0 %v10585_v35  ;;  %4770 = vmatprep.mubr.f32.mxu0 %v8861_v7 }
0x25a7   :  { %7956 = vmatprep.subr.bf16.mxu0 %v10587_v15 }
0x25a8   :  { %v1145_v49 = vpop.permute.xlu0 %1144 }
0x25a9   :  { %1148 = vst.msk [vmem:[#allocation2 + $0x18] sm:$0xc] %vm1147_vm6, %v1145_v49  ;;  %4771 = vmatmul.mubr.f32.gmra.mrb[42].mxu0 %v4653_v33  ;;  %v4654_v55 = vld [vmem:[#allocation2 + $0x10] sm:$0xff] }
0x25aa   :  { %4106 = vst.msk [vmem:[#allocation2 + $0x18] sm:$0xc] %vm866_vm2, %v10263_v22  ;;  %7958 = vmatpush1.bf16.msra.mxu0 %v10605_v0  ;;  %4776 = vmatprep.mubr.f32.mxu0 %v8861_v7 }
0x25ab   :  { %7960 = vmatprep.subr.bf16.mxu0 %v10608_v12 }
0x25ad   :  { %4777 = vmatmul.mubr.f32.gmra.mrb[44].mxu0 %v4654_v55  ;;  %v4797_v22 = vld [vmem:[#allocation2 + $0x1e] sm:$0x3] }
0x25ae   :  { %4907 = vmatmul.mubr.f32.vlgmr.msra.gmra.mrb[40].mxu1 %v4797_v22  ;;  %7962 = vmatpush1.bf16.msra.mxu0 %v10627_v28 }
0x25af   :  { %4782 = vmatprep.mubr.f32.mxu0 %v8861_v7  ;;  %7964 = vmatprep.subr.bf16.mxu0 %v10630_v50 }
0x25b0   :  { %7970 = vmatpush1.bf16.msra.mxu1 %v10585_v35  ;;  %5115 = vmatprep.mubr.f32.mxu1 %v8861_v7 }
0x25b1   :  { %v4655_v57 = vld [vmem:[#allocation2 + $0x18] sm:$0xff]  ;;  %7972 = vmatprep.subr.bf16.mxu1 %v10587_v15 }
0x25b2   :  { %4783 = vmatmul.mubr.f32.gmra.mrb[46].mxu0 %v4655_v57 }
0x25b3   :  { %7966 = vmatpush1.bf16.msra.mxu0 %v10641_v5  ;;  %5007 = vmatprep.mubr.f32.mxu0 %v8861_v7 }
0x25b4   :  { %7974 = vmatpush1.bf16.msra.mxu1 %v10605_v0  ;;  %7984 = vmatprep.subr.bf16.mxu0 %v10525_v61 }
0x25b5   :  { %7976 = vmatprep.subr.bf16.mxu1 %v10608_v12 }
0x25b6   :  { %5008 = vmatmul.mubr.f32.vlgmr.msra.gmra.mrb[48].mxu0 %v8861_v7 }
0x25b7   :  { %7986 = vmatpush1.bf16.msra.mxu0 %v10585_v35  ;;  %5233 = vmatprep.mubr.f32.mxu0 %v8861_v7 }
0x25b8   :  { %7978 = vmatpush1.bf16.msra.mxu1 %v10627_v28  ;;  %7988 = vmatprep.subr.bf16.mxu0 %v10587_v15 }
0x25b9   :  { %7980 = vmatprep.subr.bf16.mxu1 %v10630_v50 }
0x25bb   :  { %7990 = vmatpush1.bf16.msra.mxu0 %v10605_v0 }
0x25bc   :  { %7982 = vmatpush1.bf16.msra.mxu1 %v10641_v5  ;;  %7992 = vmatprep.subr.bf16.mxu0 %v10608_v12 }
0x25bd   :  { %8000 = vmatprep.subr.bf16.mxu1 %v10525_v61 }
0x25bf   :  { %7994 = vmatpush1.bf16.msra.mxu0 %v10627_v28 }
0x25c0   :  { %7996 = vmatprep.subr.bf16.mxu0 %v10630_v50 }
0x25c3   :  { %7998 = vmatpush1.bf16.msra.mxu0 %v10641_v5 }
0x25c4   :  { %8016 = vmatprep.subr.bf16.mxu0 %v10525_v61 }
0x2678   :  { %v4766_v36 = vpop.f32.mrb[40].mxu0 }
0x2679   :  { %v4767_v34 = vadd.f32 %v4766_v36, %v4693_v62  ;;  %v4768_v17 = vpop.f32.mrb[41].mxu0 }
0x267a   :  { %v4769_v9 = vadd.f32 %v4768_v17, %v4697_v63 }
0x267b   :  { %4789 = vst [vmem:[#allocation5] sm:$0xff] %v4767_v34 }
0x267c   :  { %4790 = vst [vmem:[#allocation5 + $0x8] sm:$0xff] %v4769_v9  ;;  %v4772_v60 = vpop.f32.mrb[42].mxu0 }
0x267d   :  { %v4773_v51 = vadd.f32 %v4772_v60, %v4693_v62  ;;  %v4774_v44 = vpop.f32.mrb[43].mxu0 }
0x267e   :  { %v4775_v54 = vadd.f32 %v4774_v44, %v4697_v63 }
0x267f   :  { %4791 = vst [vmem:[#allocation5 + $0x10] sm:$0xff] %v4773_v51 }
0x2680   :  { %4792 = vst [vmem:[#allocation5 + $0x18] sm:$0xff] %v4775_v54  ;;  %v4778_v29 = vpop.f32.mrb[44].mxu0 }
0x2681   :  { %v4779_v31 = vadd.f32 %v4778_v29, %v4693_v62  ;;  %v4780_v14 = vpop.f32.mrb[45].mxu0  ;;  %v4908_v39 = vpop.f32.mrb[40].mxu1 }
0x2682   :  { %v4781_v42 = vadd.f32 %v4780_v14, %v4697_v63  ;;  %v4909_v4 = vadd.f32 %v4908_v39, %v4835_v13  ;;  %v4910_v46 = vpop.f32.mrb[41].mxu1  ;;  %v4925_v52 = vld [vmem:[#allocation5] sm:$0x3]  ;;  %v5046_v36 = vld [vmem:[#allocation5] sm:$0xc] }
0x2683   :  { %4793 = vst [vmem:[#allocation5 + $0x20] sm:$0xff] %v4779_v31  ;;  %v4911_v45 = vadd.f32 %v4910_v46, %v4839_v21  ;;  %v4926_v2 = vld [vmem:[#allocation5 + $0x8] sm:$0x3]  ;;  %v5047_v57 = vld [vmem:[#allocation5 + $0x8] sm:$0xc] }
0x2684   :  { %4794 = vst [vmem:[#allocation5 + $0x28] sm:$0xff] %v4781_v42 }
0x2685   :  { %v4915_v26 = vcombine.low %v4909_v4, %v4911_v45  ;;  %v4784_v37 = vpop.f32.mrb[46].mxu0 }
0x2686   :  { %v4785_v30 = vadd.f32 %v4784_v37, %v4693_v62  ;;  %v4786_v10 = vpop.f32.mrb[47].mxu0 }
0x2687   :  { %7203 = vst.sshfl [vmem:[#allocation6] sm:$0x33 pattern:$0x76325410] %v4915_v26  ;;  %v4787_v25 = vadd.f32 %v4786_v10, %v4697_v63 }
0x2688   :  { %4795 = vst [vmem:[#allocation5 + $0x30] sm:$0xff] %v4785_v30 }
0x2689   :  { %4796 = vst [vmem:[#allocation5 + $0x38] sm:$0xff] %v4787_v25  ;;  %v5009_v27 = vpop.f32.mrb[48].mxu0  ;;  %v5164_v25 = vld [vmem:[#allocation5 + $0x8] sm:$0x30] }
0x268a   :  { %v5011_v32 = vpop.f32.mrb[49].mxu0  ;;  %v5014_v18 = vadd.f32 %v5009_v27, %v4925_v52 }
0x268b   :  { %v5015_v43 = vadd.f32 %v5011_v32, %v4926_v2 }
0x268c   :  { %v7204_v16 = vmul.f32 -1.442695, %v5014_v18 }
0x268d   :  { %8637 = vtanh.f32 %v5015_v43  ;;  %v7205_v8 = vmul.f32 -1.442695, %v5015_v43  ;;  %v5163_v43 = vld [vmem:[#allocation5] sm:$0x30] }
0x268e   :  { %8639 = vpow2.f32 %v7204_v16 }
0x2697   :  { %v8638_v19 = vpop.eup %8637 }
0x2698   :  { %5031 = vrot.lane.b32.xlu0 %v8638_v19, %s8862_s3  ;;  %v8640_v11 = vpop.eup %8639 }
0x2699   :  { %v5022_v1 = vadd.f32 1.0, %v8640_v11 }
0x269b   :  { %8641 = vrcp.f32 %v5022_v1 }
0x26a5   :  { %v8642_v40 = vpop.eup %8641 }
0x26a6   :  { %v5029_v20 = vmul.f32 0.0, %v8642_v40 }
0x270a   :  { %v5032_v23 = vpop.permute.xlu0 %5031 }
0x270b   :  { %v5034_v41 = vmul.f32 %v8642_v40, %v5032_v23 }
0x270d   :  { %5036 = vrot.lane.b32.xlu1 %v5034_v41, %s8862_s3 }
0x277f   :  { %v5037_v58 = vpop.permute.xlu1 %5036 }
0x2780   :  { %v5039_v47 = vadd.f32 %v5037_v58, %v5029_v20 }
0x2782   :  { %8643 = vtanh.f32 %v5039_v47  ;;  %v5144_v54 = vrot.slane %v5039_v47, 6 }
0x2783   :  { %8645 = vpow2.f32 %v7205_v8 }
0x278c   :  { %v8644_v53 = vpop.eup %8643 }
0x278d   :  { %5042 = vrot.lane.b32.xlu0 %v8644_v53, %s8862_s3  ;;  %v8646_v49 = vpop.eup %8645 }
0x278e   :  { %v5023_v33 = vadd.f32 1.0, %v8646_v49 }
0x2790   :  { %8647 = vrcp.f32 %v5023_v33 }
0x279a   :  { %v8648_v38 = vpop.eup %8647 }
0x27ff   :  { %v5043_v48 = vpop.permute.xlu0 %5042 }
0x2800   :  { %v5045_v55 = vmul.f32 %v8648_v38, %v5043_v48 }
0x2802   :  { %7206 = vmatmul.mubr.msk.f32.vlgmr.msra.gmra.mrb[42].mxu1 %vm358_vm1, %v5045_v55 }
0x2803   :  { %8002 = vmatpush1.bf16.msra.mxu1 %v10585_v35  ;;  %5351 = vmatprep.mubr.f32.mxu1 %v8861_v7 }
0x2804   :  { %8004 = vmatprep.subr.bf16.mxu1 %v10587_v15 }
0x2807   :  { %8006 = vmatpush1.bf16.msra.mxu1 %v10605_v0 }
0x2808   :  { %8008 = vmatprep.subr.bf16.mxu1 %v10608_v12 }
0x280b   :  { %8010 = vmatpush1.bf16.msra.mxu1 %v10627_v28 }
0x280c   :  { %8012 = vmatprep.subr.bf16.mxu1 %v10630_v50 }
0x280f   :  { %8014 = vmatpush1.bf16.msra.mxu1 %v10641_v5 }
0x2810   :  { %8032 = vmatprep.subr.bf16.mxu1 %v10525_v61 }
0x28d5   :  { %v5117_v59 = vpop.f32.mrb[42].mxu1 }
0x28d6   :  { %v5119_v3 = vpop.f32.mrb[43].mxu1  ;;  %v5124_v63 = vrot.slane %v5117_v59, 6 }
0x28d7   :  { %v5125_v22 = vrot.slane %v5119_v3, 6 }
0x28d8   :  { %v5128_v34 = vadd.f32 %v5124_v63, %v5046_v36  ;;  %v5281_v36 = vld [vmem:[#allocation5] sm:$0xc0] }
0x28d9   :  { %v5129_v56 = vadd.f32 %v5125_v22, %v5047_v57  ;;  %v5282_v57 = vld [vmem:[#allocation5 + $0x8] sm:$0xc0] }
0x28da   :  { %v7207_v17 = vmul.f32 -1.442695, %v5128_v34 }
0x28db   :  { %8649 = vtanh.f32 %v5129_v56  ;;  %v7208_v14 = vmul.f32 -1.442695, %v5129_v56 }
0x28dc   :  { %8651 = vpow2.f32 %v7207_v17 }
0x28e5   :  { %v8650_v62 = vpop.eup %8649 }
0x28e6   :  { %5148 = vrot.lane.b32.xlu1 %v8650_v62, %s8862_s3  ;;  %v8652_v9 = vpop.eup %8651 }
0x28e7   :  { %v5136_v6 = vadd.f32 1.0, %v8652_v9 }
0x28e9   :  { %8653 = vrcp.f32 %v5136_v6 }
0x28f3   :  { %v8654_v60 = vpop.eup %8653 }
0x28f4   :  { %v5146_v13 = vmul.f32 %v8654_v60, %v5144_v54 }
0x2958   :  { %v5149_v51 = vpop.permute.xlu1 %5148 }
0x2959   :  { %v5151_v44 = vmul.f32 %v8654_v60, %v5149_v51 }
0x295b   :  { %5153 = vrot.lane.b32.xlu0 %v5151_v44, %s8862_s3 }
0x29cd   :  { %v5154_v21 = vpop.permute.xlu0 %5153 }
0x29ce   :  { %v5156_v29 = vadd.f32 %v5154_v21, %v5146_v13 }
0x29d0   :  { %8655 = vtanh.f32 %v5156_v29  ;;  %v5262_v23 = vrot.slane %v5156_v29, 6 }
0x29d1   :  { %8657 = vpow2.f32 %v7208_v14 }
0x29da   :  { %v8656_v31 = vpop.eup %8655 }
0x29db   :  { %5159 = vrot.lane.b32.xlu1 %v8656_v31, %s8862_s3  ;;  %v8658_v39 = vpop.eup %8657 }
0x29dc   :  { %v5137_v42 = vadd.f32 1.0, %v8658_v39 }
0x29de   :  { %8659 = vrcp.f32 %v5137_v42 }
0x29e8   :  { %v8660_v4 = vpop.eup %8659 }
0x2a4d   :  { %v5160_v46 = vpop.permute.xlu1 %5159 }
0x2a4e   :  { %v5162_v45 = vmul.f32 %v8660_v4, %v5160_v46 }
0x2a50   :  { %v5166_v26 = vrot.slane %v5162_v45, 2 }
0x2a52   :  { %7209 = vmatmul.mubr.msk.f32.vlgmr.msra.gmra.mrb[50].mxu0 %vm358_vm1, %v5166_v26 }
0x2a53   :  { %8018 = vmatpush1.bf16.msra.mxu0 %v10585_v35  ;;  %5469 = vmatprep.mubr.f32.mxu0 %v8861_v7 }
0x2a54   :  { %8020 = vmatprep.subr.bf16.mxu0 %v10587_v15 }
0x2a57   :  { %8022 = vmatpush1.bf16.msra.mxu0 %v10605_v0 }
0x2a58   :  { %8024 = vmatprep.subr.bf16.mxu0 %v10608_v12 }
0x2a5b   :  { %8026 = vmatpush1.bf16.msra.mxu0 %v10627_v28 }
0x2a5c   :  { %8028 = vmatprep.subr.bf16.mxu0 %v10630_v50 }
0x2a5f   :  { %8030 = vmatpush1.bf16.msra.mxu0 %v10641_v5 }
0x2a60   :  { %8048 = vmatprep.subr.bf16.mxu0 %v10525_v61 }
0x2b25   :  { %v5235_v37 = vpop.f32.mrb[50].mxu0 }
0x2b26   :  { %v5237_v30 = vpop.f32.mrb[51].mxu0  ;;  %v5242_v32 = vrot.slane %v5235_v37, 4 }
0x2b27   :  { %v5243_v10 = vrot.slane %v5237_v30, 4  ;;  %v5400_v30 = vld [vmem:[#allocation5 + $0x18] sm:$0x3] }
0x2b28   :  { %v5246_v19 = vadd.f32 %v5242_v32, %v5163_v43 }
0x2b29   :  { %v5247_v27 = vadd.f32 %v5243_v10, %v5164_v25 }
0x2b2a   :  { %v7210_v52 = vmul.f32 -1.442695, %v5246_v19 }
0x2b2b   :  { %8661 = vtanh.f32 %v5247_v27  ;;  %v7211_v53 = vmul.f32 -1.442695, %v5247_v27 }
0x2b2c   :  { %8663 = vpow2.f32 %v7210_v52 }
0x2b35   :  { %v8662_v2 = vpop.eup %8661 }
0x2b36   :  { %5266 = vrot.lane.b32.xlu0 %v8662_v2, %s8862_s3  ;;  %v8664_v18 = vpop.eup %8663  ;;  %v5399_v2 = vld [vmem:[#allocation5 + $0x10] sm:$0x3] }
0x2b37   :  { %v5254_v16 = vadd.f32 1.0, %v8664_v18 }
0x2b39   :  { %8665 = vrcp.f32 %v5254_v16 }
0x2b43   :  { %v8666_v11 = vpop.eup %8665 }
0x2b44   :  { %v5264_v41 = vmul.f32 %v8666_v11, %v5262_v23 }
0x2ba8   :  { %v5267_v1 = vpop.permute.xlu0 %5266 }
0x2ba9   :  { %v5269_v40 = vmul.f32 %v8666_v11, %v5267_v1 }
0x2bab   :  { %5271 = vrot.lane.b32.xlu1 %v5269_v40, %s8862_s3 }
0x2c1d   :  { %v5272_v20 = vpop.permute.xlu1 %5271 }
0x2c1e   :  { %v5274_v58 = vadd.f32 %v5272_v20, %v5264_v41 }
0x2c20   :  { %8667 = vtanh.f32 %v5274_v58  ;;  %v5380_v54 = vrot.slane %v5274_v58, 6 }
0x2c21   :  { %8669 = vpow2.f32 %v7211_v53 }
0x2c2a   :  { %v8668_v47 = vpop.eup %8667 }
0x2c2b   :  { %5277 = vrot.lane.b32.xlu0 %v8668_v47, %s8862_s3  ;;  %v8670_v8 = vpop.eup %8669 }
0x2c2c   :  { %v5255_v49 = vadd.f32 1.0, %v8670_v8 }
0x2c2e   :  { %8671 = vrcp.f32 %v5255_v49 }
0x2c38   :  { %v8672_v33 = vpop.eup %8671 }
0x2c9d   :  { %v5278_v38 = vpop.permute.xlu0 %5277 }
0x2c9e   :  { %v5280_v48 = vmul.f32 %v8672_v33, %v5278_v38 }
0x2ca0   :  { %v5284_v55 = vrot.slane %v5280_v48, 4 }
0x2ca2   :  { %7212 = vmatmul.mubr.msk.f32.vlgmr.msra.gmra.mrb[44].mxu1 %vm358_vm1, %v5284_v55 }
0x2ca3   :  { %8034 = vmatpush1.bf16.msra.mxu1 %v10585_v35  ;;  %5580 = vmatprep.mubr.f32.mxu1 %v8861_v7 }
0x2ca4   :  { %8036 = vmatprep.subr.bf16.mxu1 %v10587_v15 }
0x2ca7   :  { %8038 = vmatpush1.bf16.msra.mxu1 %v10605_v0 }
0x2ca8   :  { %8040 = vmatprep.subr.bf16.mxu1 %v10608_v12 }
0x2cab   :  { %8042 = vmatpush1.bf16.msra.mxu1 %v10627_v28 }
0x2cac   :  { %8044 = vmatprep.subr.bf16.mxu1 %v10630_v50 }
0x2caf   :  { %8046 = vmatpush1.bf16.msra.mxu1 %v10641_v5 }
0x2cb0   :  { %8064 = vmatprep.subr.bf16.mxu1 %v10525_v61 }
0x2d75   :  { %v5353_v59 = vpop.f32.mrb[44].mxu1 }
0x2d76   :  { %v5355_v3 = vpop.f32.mrb[45].mxu1  ;;  %v5360_v63 = vrot.slane %v5353_v59, 2  ;;  %v5512_v59 = vld [vmem:[#allocation5 + $0x18] sm:$0xc] }
0x2d77   :  { %v5361_v22 = vrot.slane %v5355_v3, 2 }
0x2d78   :  { %v5364_v34 = vadd.f32 %v5360_v63, %v5281_v36 }
0x2d79   :  { %v5365_v56 = vadd.f32 %v5361_v22, %v5282_v57 }
0x2d7a   :  { %v7213_v17 = vmul.f32 -1.442695, %v5364_v34 }
0x2d7b   :  { %8673 = vtanh.f32 %v5365_v56  ;;  %v7214_v14 = vmul.f32 -1.442695, %v5365_v56  ;;  %v5511_v56 = vld [vmem:[#allocation5 + $0x10] sm:$0xc] }
0x2d7c   :  { %8675 = vpow2.f32 %v7213_v17 }
0x2d85   :  { %v8674_v62 = vpop.eup %8673 }
0x2d86   :  { %5384 = vrot.lane.b32.xlu1 %v8674_v62, %s8862_s3  ;;  %v8676_v9 = vpop.eup %8675 }
0x2d87   :  { %v5372_v6 = vadd.f32 1.0, %v8676_v9 }
0x2d89   :  { %8677 = vrcp.f32 %v5372_v6 }
0x2d93   :  { %v8678_v60 = vpop.eup %8677 }
0x2d94   :  { %v5382_v13 = vmul.f32 %v8678_v60, %v5380_v54 }
0x2df8   :  { %v5385_v51 = vpop.permute.xlu1 %5384 }
0x2df9   :  { %v5387_v44 = vmul.f32 %v8678_v60, %v5385_v51 }
0x2dfb   :  { %5389 = vrot.lane.b32.xlu0 %v5387_v44, %s8862_s3 }
0x2e6d   :  { %v5390_v21 = vpop.permute.xlu0 %5389 }
0x2e6e   :  { %v5392_v29 = vadd.f32 %v5390_v21, %v5382_v13 }
0x2e70   :  { %8679 = vtanh.f32 %v5392_v29  ;;  %v5492_v1 = vrot.slane %v5392_v29, 6 }
0x2e71   :  { %8681 = vpow2.f32 %v7214_v14 }
0x2e7a   :  { %v8680_v31 = vpop.eup %8679 }
0x2e7b   :  { %5395 = vrot.lane.b32.xlu1 %v8680_v31, %s8862_s3  ;;  %v8682_v39 = vpop.eup %8681 }
0x2e7c   :  { %v5373_v42 = vadd.f32 1.0, %v8682_v39 }
0x2e7e   :  { %8683 = vrcp.f32 %v5373_v42 }
0x2e88   :  { %v8684_v4 = vpop.eup %8683 }
0x2eed   :  { %v5396_v46 = vpop.permute.xlu1 %5395 }
0x2eee   :  { %v5398_v45 = vmul.f32 %v8684_v4, %v5396_v46 }
0x2ef0   :  { %v5402_v26 = vrot.slane %v5398_v45, 6 }
0x2ef2   :  { %7215 = vmatmul.mubr.msk.f32.vlgmr.msra.gmra.mrb[52].mxu0 %vm358_vm1, %v5402_v26 }
0x2ef3   :  { %8050 = vmatpush1.bf16.msra.mxu0 %v10585_v35  ;;  %5698 = vmatprep.mubr.f32.mxu0 %v8861_v7 }
0x2ef4   :  { %8052 = vmatprep.subr.bf16.mxu0 %v10587_v15 }
0x2ef7   :  { %8054 = vmatpush1.bf16.msra.mxu0 %v10605_v0 }
0x2ef8   :  { %8056 = vmatprep.subr.bf16.mxu0 %v10608_v12 }
0x2efb   :  { %8058 = vmatpush1.bf16.msra.mxu0 %v10627_v28 }
0x2efc   :  { %8060 = vmatprep.subr.bf16.mxu0 %v10630_v50 }
0x2eff   :  { %8062 = vmatpush1.bf16.msra.mxu0 %v10641_v5 }
0x2f00   :  { %8080 = vmatprep.subr.bf16.mxu0 %v10525_v61 }
0x2fc5   :  { %v5471_v37 = vpop.f32.mrb[52].mxu0 }
0x2fc6   :  { %v5473_v10 = vpop.f32.mrb[53].mxu0  ;;  %v5476_v32 = vadd.f32 %v5471_v37, %v5399_v2  ;;  %v5629_v37 = vld [vmem:[#allocation5 + $0x18] sm:$0x30] }
0x2fc7   :  { %v5477_v25 = vadd.f32 %v5473_v10, %v5400_v30 }
0x2fc8   :  { %v7216_v43 = vmul.f32 -1.442695, %v5476_v32 }
0x2fc9   :  { %8685 = vtanh.f32 %v5477_v25  ;;  %v7217_v58 = vmul.f32 -1.442695, %v5477_v25 }
0x2fca   :  { %8687 = vpow2.f32 %v7216_v43 }
0x2fd3   :  { %v8686_v27 = vpop.eup %8685 }
0x2fd4   :  { %5496 = vrot.lane.b32.xlu0 %v8686_v27, %s8862_s3  ;;  %v8688_v19 = vpop.eup %8687  ;;  %v5628_v27 = vld [vmem:[#allocation5 + $0x10] sm:$0x30] }
0x2fd5   :  { %v5484_v52 = vadd.f32 1.0, %v8688_v19 }
0x2fd7   :  { %8689 = vrcp.f32 %v5484_v52 }
0x2fe1   :  { %v8690_v18 = vpop.eup %8689 }
0x2fe2   :  { %v5494_v40 = vmul.f32 %v8690_v18, %v5492_v1 }
0x3046   :  { %v5497_v16 = vpop.permute.xlu0 %5496 }
0x3047   :  { %v5499_v11 = vmul.f32 %v8690_v18, %v5497_v16 }
0x3049   :  { %5501 = vrot.lane.b32.xlu1 %v5499_v11, %s8862_s3 }
0x30bb   :  { %v5502_v23 = vpop.permute.xlu1 %5501 }
0x30bc   :  { %v5504_v41 = vadd.f32 %v5502_v23, %v5494_v40 }
0x30be   :  { %8691 = vtanh.f32 %v5504_v41  ;;  %v5609_v60 = vrot.slane %v5504_v41, 6 }
0x30bf   :  { %8693 = vpow2.f32 %v7217_v58 }
0x30c8   :  { %v8692_v20 = vpop.eup %8691 }
0x30c9   :  { %5507 = vrot.lane.b32.xlu0 %v8692_v20, %s8862_s3  ;;  %v8694_v47 = vpop.eup %8693 }
0x30ca   :  { %v5485_v53 = vadd.f32 1.0, %v8694_v47 }
0x30cc   :  { %8695 = vrcp.f32 %v5485_v53 }
0x30d6   :  { %v8696_v8 = vpop.eup %8695 }
0x313b   :  { %v5508_v49 = vpop.permute.xlu0 %5507 }
0x313c   :  { %v5510_v33 = vmul.f32 %v8696_v8, %v5508_v49 }
0x313e   :  { %7218 = vmatmul.mubr.msk.f32.vlgmr.msra.gmra.mrb[46].mxu1 %vm358_vm1, %v5510_v33 }
0x313f   :  { %8066 = vmatpush1.bf16.msra.mxu1 %v10585_v35  ;;  %5816 = vmatprep.mubr.f32.mxu1 %v8861_v7 }
0x3140   :  { %8068 = vmatprep.subr.bf16.mxu1 %v10587_v15 }
0x3143   :  { %8070 = vmatpush1.bf16.msra.mxu1 %v10605_v0 }
0x3144   :  { %8072 = vmatprep.subr.bf16.mxu1 %v10608_v12 }
0x3147   :  { %8074 = vmatpush1.bf16.msra.mxu1 %v10627_v28 }
0x3148   :  { %8076 = vmatprep.subr.bf16.mxu1 %v10630_v50 }
0x314b   :  { %8078 = vmatpush1.bf16.msra.mxu1 %v10641_v5 }
0x314c   :  { %8096 = vmatprep.subr.bf16.mxu1 %v10525_v61 }
0x3211   :  { %v5582_v38 = vpop.f32.mrb[46].mxu1 }
0x3212   :  { %v5584_v48 = vpop.f32.mrb[47].mxu1  ;;  %v5589_v57 = vrot.slane %v5582_v38, 6 }
0x3213   :  { %v5590_v55 = vrot.slane %v5584_v48, 6 }
0x3214   :  { %v5593_v62 = vadd.f32 %v5589_v57, %v5511_v56  ;;  %v5746_v56 = vld [vmem:[#allocation5 + $0x10] sm:$0xc0] }
0x3215   :  { %v5594_v3 = vadd.f32 %v5590_v55, %v5512_v59  ;;  %v5747_v59 = vld [vmem:[#allocation5 + $0x18] sm:$0xc0] }
0x3216   :  { %v7219_v63 = vmul.f32 -1.442695, %v5593_v62 }
0x3217   :  { %8697 = vtanh.f32 %v5594_v3  ;;  %v7220_v21 = vmul.f32 -1.442695, %v5594_v3 }
0x3218   :  { %8699 = vpow2.f32 %v7219_v63 }
0x3221   :  { %v8698_v22 = vpop.eup %8697 }
0x3222   :  { %5613 = vrot.lane.b32.xlu1 %v8698_v22, %s8862_s3  ;;  %v8700_v36 = vpop.eup %8699 }
0x3223   :  { %v5601_v34 = vadd.f32 1.0, %v8700_v36 }
0x3225   :  { %8701 = vrcp.f32 %v5601_v34 }
0x322f   :  { %v8702_v17 = vpop.eup %8701 }
0x3230   :  { %v5611_v51 = vmul.f32 %v8702_v17, %v5609_v60 }
0x3294   :  { %v5614_v9 = vpop.permute.xlu1 %5613 }
0x3295   :  { %v5616_v6 = vmul.f32 %v8702_v17, %v5614_v9 }
0x3297   :  { %5618 = vrot.lane.b32.xlu0 %v5616_v6, %s8862_s3 }
0x3309   :  { %v5619_v44 = vpop.permute.xlu0 %5618 }
0x330a   :  { %v5621_v54 = vadd.f32 %v5619_v44, %v5611_v51 }
0x330c   :  { %8703 = vtanh.f32 %v5621_v54  ;;  %v5727_v11 = vrot.slane %v5621_v54, 6 }
0x330d   :  { %8705 = vpow2.f32 %v7220_v21 }
0x3316   :  { %v8704_v13 = vpop.eup %8703 }
0x3317   :  { %5624 = vrot.lane.b32.xlu1 %v8704_v13, %s8862_s3  ;;  %v8706_v29 = vpop.eup %8705 }
0x3318   :  { %v5602_v31 = vadd.f32 1.0, %v8706_v29 }
0x331a   :  { %8707 = vrcp.f32 %v5602_v31 }
0x3324   :  { %v8708_v14 = vpop.eup %8707 }
0x3389   :  { %v5625_v39 = vpop.permute.xlu1 %5624 }
0x338a   :  { %v5627_v42 = vmul.f32 %v8708_v14, %v5625_v39 }
0x338c   :  { %v5631_v4 = vrot.slane %v5627_v42, 2 }
0x338e   :  { %7221 = vmatmul.mubr.msk.f32.vlgmr.msra.gmra.mrb[54].mxu0 %vm358_vm1, %v5631_v4 }
0x338f   :  { %8082 = vmatpush1.bf16.msra.mxu0 %v10585_v35  ;;  %5934 = vmatprep.mubr.f32.mxu0 %v8861_v7 }
0x3390   :  { %8084 = vmatprep.subr.bf16.mxu0 %v10587_v15 }
0x3393   :  { %8086 = vmatpush1.bf16.msra.mxu0 %v10605_v0 }
0x3394   :  { %8088 = vmatprep.subr.bf16.mxu0 %v10608_v12 }
0x3397   :  { %8090 = vmatpush1.bf16.msra.mxu0 %v10627_v28 }
0x3398   :  { %8092 = vmatprep.subr.bf16.mxu0 %v10630_v50 }
0x339b   :  { %8094 = vmatpush1.bf16.msra.mxu0 %v10641_v5 }
0x339c   :  { %8112 = vmatprep.subr.bf16.mxu0 %v10525_v61 }
0x3461   :  { %v5700_v46 = vpop.f32.mrb[54].mxu0 }
0x3462   :  { %v5702_v45 = vpop.f32.mrb[55].mxu0  ;;  %v5707_v25 = vrot.slane %v5700_v46, 4 }
0x3463   :  { %v5708_v26 = vrot.slane %v5702_v45, 4  ;;  %v5865_v45 = vld [vmem:[#allocation5 + $0x28] sm:$0x3] }
0x3464   :  { %v5711_v2 = vadd.f32 %v5707_v25, %v5628_v27 }
0x3465   :  { %v5712_v30 = vadd.f32 %v5708_v26, %v5629_v37 }
0x3466   :  { %v7222_v32 = vmul.f32 -1.442695, %v5711_v2 }
0x3467   :  { %8709 = vtanh.f32 %v5712_v30  ;;  %v7223_v20 = vmul.f32 -1.442695, %v5712_v30 }
0x3468   :  { %8711 = vpow2.f32 %v7222_v32 }
0x3471   :  { %v8710_v10 = vpop.eup %8709 }
0x3472   :  { %5731 = vrot.lane.b32.xlu0 %v8710_v10, %s8862_s3  ;;  %v8712_v43 = vpop.eup %8711  ;;  %v5864_v10 = vld [vmem:[#allocation5 + $0x20] sm:$0x3] }
0x3473   :  { %v5719_v19 = vadd.f32 1.0, %v8712_v43 }
0x3475   :  { %8713 = vrcp.f32 %v5719_v19 }
0x347f   :  { %v8714_v52 = vpop.eup %8713 }
0x3480   :  { %v5729_v1 = vmul.f32 %v8714_v52, %v5727_v11 }
0x34e4   :  { %v5732_v18 = vpop.permute.xlu0 %5731 }
0x34e5   :  { %v5734_v16 = vmul.f32 %v8714_v52, %v5732_v18 }
0x34e7   :  { %5736 = vrot.lane.b32.xlu1 %v5734_v16, %s8862_s3 }
0x3559   :  { %v5737_v40 = vpop.permute.xlu1 %5736 }
0x355a   :  { %v5739_v23 = vadd.f32 %v5737_v40, %v5729_v1 }
0x355c   :  { %8715 = vtanh.f32 %v5739_v23  ;;  %v5845_v60 = vrot.slane %v5739_v23, 6 }
0x355d   :  { %8717 = vpow2.f32 %v7223_v20 }
0x3566   :  { %v8716_v41 = vpop.eup %8715 }
0x3567   :  { %5742 = vrot.lane.b32.xlu0 %v8716_v41, %s8862_s3  ;;  %v8718_v58 = vpop.eup %8717 }
0x3568   :  { %v5720_v47 = vadd.f32 1.0, %v8718_v58 }
0x356a   :  { %8719 = vrcp.f32 %v5720_v47 }
0x3574   :  { %v8720_v53 = vpop.eup %8719 }
0x35d9   :  { %v5743_v8 = vpop.permute.xlu0 %5742 }
0x35da   :  { %v5745_v49 = vmul.f32 %v8720_v53, %v5743_v8 }
0x35dc   :  { %v5749_v33 = vrot.slane %v5745_v49, 4 }
0x35de   :  { %7224 = vmatmul.mubr.msk.f32.vlgmr.msra.gmra.mrb[48].mxu1 %vm358_vm1, %v5749_v33 }
0x35df   :  { %8098 = vmatpush1.bf16.msra.mxu1 %v10585_v35  ;;  %6045 = vmatprep.mubr.f32.mxu1 %v8861_v7 }
0x35e0   :  { %8100 = vmatprep.subr.bf16.mxu1 %v10587_v15 }
0x35e3   :  { %8102 = vmatpush1.bf16.msra.mxu1 %v10605_v0 }
0x35e4   :  { %8104 = vmatprep.subr.bf16.mxu1 %v10608_v12 }
0x35e7   :  { %8106 = vmatpush1.bf16.msra.mxu1 %v10627_v28 }
0x35e8   :  { %8108 = vmatprep.subr.bf16.mxu1 %v10630_v50 }
0x35eb   :  { %8110 = vmatpush1.bf16.msra.mxu1 %v10641_v5 }
0x35ec   :  { %8128 = vmatprep.subr.bf16.mxu1 %v10525_v61 }
0x36b1   :  { %v5818_v38 = vpop.f32.mrb[48].mxu1 }
0x36b2   :  { %v5820_v48 = vpop.f32.mrb[49].mxu1  ;;  %v5825_v57 = vrot.slane %v5818_v38, 2  ;;  %v5977_v38 = vld [vmem:[#allocation5 + $0x28] sm:$0xc] }
0x36b3   :  { %v5826_v55 = vrot.slane %v5820_v48, 2 }
0x36b4   :  { %v5829_v62 = vadd.f32 %v5825_v57, %v5746_v56 }
0x36b5   :  { %v5830_v3 = vadd.f32 %v5826_v55, %v5747_v59 }
0x36b6   :  { %v7225_v63 = vmul.f32 -1.442695, %v5829_v62 }
0x36b7   :  { %8721 = vtanh.f32 %v5830_v3  ;;  %v7226_v21 = vmul.f32 -1.442695, %v5830_v3  ;;  %v5976_v3 = vld [vmem:[#allocation5 + $0x20] sm:$0xc] }
0x36b8   :  { %8723 = vpow2.f32 %v7225_v63 }
0x36c1   :  { %v8722_v22 = vpop.eup %8721 }
0x36c2   :  { %5849 = vrot.lane.b32.xlu1 %v8722_v22, %s8862_s3  ;;  %v8724_v36 = vpop.eup %8723 }
0x36c3   :  { %v5837_v34 = vadd.f32 1.0, %v8724_v36 }
0x36c5   :  { %8725 = vrcp.f32 %v5837_v34 }
0x36cf   :  { %v8726_v17 = vpop.eup %8725 }
0x36d0   :  { %v5847_v51 = vmul.f32 %v8726_v17, %v5845_v60 }
0x3734   :  { %v5850_v9 = vpop.permute.xlu1 %5849 }
0x3735   :  { %v5852_v6 = vmul.f32 %v8726_v17, %v5850_v9 }
0x3737   :  { %5854 = vrot.lane.b32.xlu0 %v5852_v6, %s8862_s3 }
0x37a9   :  { %v5855_v44 = vpop.permute.xlu0 %5854 }
0x37aa   :  { %v5857_v54 = vadd.f32 %v5855_v44, %v5847_v51 }
0x37ac   :  { %8727 = vtanh.f32 %v5857_v54  ;;  %v5957_v18 = vrot.slane %v5857_v54, 6 }
0x37ad   :  { %8729 = vpow2.f32 %v7226_v21 }
0x37b6   :  { %v8728_v13 = vpop.eup %8727 }
0x37b7   :  { %5860 = vrot.lane.b32.xlu1 %v8728_v13, %s8862_s3  ;;  %v8730_v29 = vpop.eup %8729 }
0x37b8   :  { %v5838_v31 = vadd.f32 1.0, %v8730_v29 }
0x37ba   :  { %8731 = vrcp.f32 %v5838_v31 }
0x37c4   :  { %v8732_v14 = vpop.eup %8731 }
0x3829   :  { %v5861_v39 = vpop.permute.xlu1 %5860 }
0x382a   :  { %v5863_v42 = vmul.f32 %v8732_v14, %v5861_v39 }
0x382c   :  { %v5867_v4 = vrot.slane %v5863_v42, 6 }
0x382e   :  { %7227 = vmatmul.mubr.msk.f32.vlgmr.msra.gmra.mrb[56].mxu0 %vm358_vm1, %v5867_v4 }
0x382f   :  { %8114 = vmatpush1.bf16.msra.mxu0 %v10585_v35  ;;  %6163 = vmatprep.mubr.f32.mxu0 %v8861_v7 }
0x3830   :  { %8116 = vmatprep.subr.bf16.mxu0 %v10587_v15 }
0x3833   :  { %8118 = vmatpush1.bf16.msra.mxu0 %v10605_v0 }
0x3834   :  { %8120 = vmatprep.subr.bf16.mxu0 %v10608_v12 }
0x3837   :  { %8122 = vmatpush1.bf16.msra.mxu0 %v10627_v28 }
0x3838   :  { %8124 = vmatprep.subr.bf16.mxu0 %v10630_v50 }
0x383b   :  { %8126 = vmatpush1.bf16.msra.mxu0 %v10641_v5 }
0x383c   :  { %8144 = vmatprep.subr.bf16.mxu0 %v10525_v61 }
0x3901   :  { %v5936_v46 = vpop.f32.mrb[56].mxu0 }
0x3902   :  { %v5938_v26 = vpop.f32.mrb[57].mxu0  ;;  %v5941_v25 = vadd.f32 %v5936_v46, %v5864_v10  ;;  %v6094_v46 = vld [vmem:[#allocation5 + $0x28] sm:$0x30] }
0x3903   :  { %v5942_v37 = vadd.f32 %v5938_v26, %v5865_v45 }
0x3904   :  { %v7228_v27 = vmul.f32 -1.442695, %v5941_v25 }
0x3905   :  { %8733 = vtanh.f32 %v5942_v37  ;;  %v7229_v23 = vmul.f32 -1.442695, %v5942_v37 }
0x3906   :  { %8735 = vpow2.f32 %v7228_v27 }
0x390f   :  { %v8734_v30 = vpop.eup %8733 }
0x3910   :  { %5961 = vrot.lane.b32.xlu0 %v8734_v30, %s8862_s3  ;;  %v8736_v2 = vpop.eup %8735  ;;  %v6093_v30 = vld [vmem:[#allocation5 + $0x20] sm:$0x30] }
0x3911   :  { %v5949_v32 = vadd.f32 1.0, %v8736_v2 }
0x3913   :  { %8737 = vrcp.f32 %v5949_v32 }
0x391d   :  { %v8738_v43 = vpop.eup %8737 }
0x391e   :  { %v5959_v16 = vmul.f32 %v8738_v43, %v5957_v18 }
0x3982   :  { %v5962_v19 = vpop.permute.xlu0 %5961 }
0x3983   :  { %v5964_v52 = vmul.f32 %v8738_v43, %v5962_v19 }
0x3985   :  { %5966 = vrot.lane.b32.xlu1 %v5964_v52, %s8862_s3 }
0x39f7   :  { %v5967_v11 = vpop.permute.xlu1 %5966 }
0x39f8   :  { %v5969_v1 = vadd.f32 %v5967_v11, %v5959_v16 }
0x39fa   :  { %8739 = vtanh.f32 %v5969_v1  ;;  %v6074_v17 = vrot.slane %v5969_v1, 6 }
0x39fb   :  { %8741 = vpow2.f32 %v7229_v23 }
0x3a04   :  { %v8740_v40 = vpop.eup %8739 }
0x3a05   :  { %5972 = vrot.lane.b32.xlu0 %v8740_v40, %s8862_s3  ;;  %v8742_v41 = vpop.eup %8741 }
0x3a06   :  { %v5950_v20 = vadd.f32 1.0, %v8742_v41 }
0x3a08   :  { %8743 = vrcp.f32 %v5950_v20 }
0x3a12   :  { %v8744_v58 = vpop.eup %8743 }
0x3a77   :  { %v5973_v47 = vpop.permute.xlu0 %5972 }
0x3a78   :  { %v5975_v53 = vmul.f32 %v8744_v58, %v5973_v47 }
0x3a7a   :  { %7230 = vmatmul.mubr.msk.f32.vlgmr.msra.gmra.mrb[50].mxu1 %vm358_vm1, %v5975_v53 }
0x3a7b   :  { %8130 = vmatpush1.bf16.msra.mxu1 %v10585_v35  ;;  %6281 = vmatprep.mubr.f32.mxu1 %v8861_v7 }
0x3a7c   :  { %8132 = vmatprep.subr.bf16.mxu1 %v10587_v15 }
0x3a7f   :  { %8134 = vmatpush1.bf16.msra.mxu1 %v10605_v0 }
0x3a80   :  { %8136 = vmatprep.subr.bf16.mxu1 %v10608_v12 }
0x3a83   :  { %8138 = vmatpush1.bf16.msra.mxu1 %v10627_v28 }
0x3a84   :  { %8140 = vmatprep.subr.bf16.mxu1 %v10630_v50 }
0x3a87   :  { %8142 = vmatpush1.bf16.msra.mxu1 %v10641_v5 }
0x3a88   :  { %8160 = vmatprep.subr.bf16.mxu1 %v10525_v61 }
0x3b4d   :  { %v6047_v8 = vpop.f32.mrb[50].mxu1 }
0x3b4e   :  { %v6049_v49 = vpop.f32.mrb[51].mxu1  ;;  %v6054_v59 = vrot.slane %v6047_v8, 6 }
0x3b4f   :  { %v6055_v33 = vrot.slane %v6049_v49, 6 }
0x3b50   :  { %v6058_v22 = vadd.f32 %v6054_v59, %v5976_v3  ;;  %v6211_v3 = vld [vmem:[#allocation5 + $0x20] sm:$0xc0] }
0x3b51   :  { %v6059_v48 = vadd.f32 %v6055_v33, %v5977_v38  ;;  %v6212_v38 = vld [vmem:[#allocation5 + $0x28] sm:$0xc0] }
0x3b52   :  { %v7231_v57 = vmul.f32 -1.442695, %v6058_v22 }
0x3b53   :  { %8745 = vtanh.f32 %v6059_v48  ;;  %v7232_v44 = vmul.f32 -1.442695, %v6059_v48 }
0x3b54   :  { %8747 = vpow2.f32 %v7231_v57 }
0x3b5d   :  { %v8746_v55 = vpop.eup %8745 }
0x3b5e   :  { %6078 = vrot.lane.b32.xlu1 %v8746_v55, %s8862_s3  ;;  %v8748_v56 = vpop.eup %8747 }
0x3b5f   :  { %v6066_v62 = vadd.f32 1.0, %v8748_v56 }
0x3b61   :  { %8749 = vrcp.f32 %v6066_v62 }
0x3b6b   :  { %v8750_v63 = vpop.eup %8749 }
0x3b6c   :  { %v6076_v9 = vmul.f32 %v8750_v63, %v6074_v17 }
0x3bd0   :  { %v6079_v36 = vpop.permute.xlu1 %6078 }
0x3bd1   :  { %v6081_v34 = vmul.f32 %v8750_v63, %v6079_v36 }
0x3bd3   :  { %6083 = vrot.lane.b32.xlu0 %v6081_v34, %s8862_s3 }
0x3c45   :  { %v6084_v6 = vpop.permute.xlu0 %6083 }
0x3c46   :  { %v6086_v60 = vadd.f32 %v6084_v6, %v6076_v9 }
0x3c48   :  { %8751 = vtanh.f32 %v6086_v60  ;;  %v6192_v52 = vrot.slane %v6086_v60, 6 }
0x3c49   :  { %8753 = vpow2.f32 %v7232_v44 }
0x3c52   :  { %v8752_v51 = vpop.eup %8751 }
0x3c53   :  { %6089 = vrot.lane.b32.xlu1 %v8752_v51, %s8862_s3  ;;  %v8754_v54 = vpop.eup %8753 }
0x3c54   :  { %v6067_v13 = vadd.f32 1.0, %v8754_v54 }
0x3c56   :  { %8755 = vrcp.f32 %v6067_v13 }
0x3c60   :  { %v8756_v21 = vpop.eup %8755 }
0x3cc5   :  { %v6090_v29 = vpop.permute.xlu1 %6089 }
0x3cc6   :  { %v6092_v31 = vmul.f32 %v8756_v21, %v6090_v29 }
0x3cc8   :  { %v6096_v14 = vrot.slane %v6092_v31, 2 }
0x3cca   :  { %7233 = vmatmul.mubr.msk.f32.vlgmr.msra.gmra.mrb[58].mxu0 %vm358_vm1, %v6096_v14 }
0x3ccb   :  { %8146 = vmatpush1.bf16.msra.mxu0 %v10585_v35  ;;  %6399 = vmatprep.mubr.f32.mxu0 %v8861_v7 }
0x3ccc   :  { %8148 = vmatprep.subr.bf16.mxu0 %v10587_v15 }
0x3ccf   :  { %8150 = vmatpush1.bf16.msra.mxu0 %v10605_v0 }
0x3cd0   :  { %8152 = vmatprep.subr.bf16.mxu0 %v10608_v12 }
0x3cd3   :  { %8154 = vmatpush1.bf16.msra.mxu0 %v10627_v28 }
0x3cd4   :  { %8156 = vmatprep.subr.bf16.mxu0 %v10630_v50 }
0x3cd7   :  { %8158 = vmatpush1.bf16.msra.mxu0 %v10641_v5 }
0x3cd8   :  { %8176 = vmatprep.subr.bf16.mxu0 %v10525_v61 }
0x3d9d   :  { %v6165_v39 = vpop.f32.mrb[58].mxu0 }
0x3d9e   :  { %v6167_v42 = vpop.f32.mrb[59].mxu0  ;;  %v6172_v37 = vrot.slane %v6165_v39, 4  ;;  %v6330_v39 = vld [vmem:[#allocation5 + $0x38] sm:$0x3] }
0x3d9f   :  { %v6173_v4 = vrot.slane %v6167_v42, 4 }
0x3da0   :  { %v6176_v10 = vadd.f32 %v6172_v37, %v6093_v30 }
0x3da1   :  { %v6177_v45 = vadd.f32 %v6173_v4, %v6094_v46 }
0x3da2   :  { %v7234_v25 = vmul.f32 -1.442695, %v6176_v10 }
0x3da3   :  { %8757 = vtanh.f32 %v6177_v45  ;;  %v7235_v40 = vmul.f32 -1.442695, %v6177_v45  ;;  %v6329_v45 = vld [vmem:[#allocation5 + $0x30] sm:$0x3] }
0x3da4   :  { %8759 = vpow2.f32 %v7234_v25 }
0x3dad   :  { %v8758_v26 = vpop.eup %8757 }
0x3dae   :  { %6196 = vrot.lane.b32.xlu0 %v8758_v26, %s8862_s3  ;;  %v8760_v27 = vpop.eup %8759 }
0x3daf   :  { %v6184_v2 = vadd.f32 1.0, %v8760_v27 }
0x3db1   :  { %8761 = vrcp.f32 %v6184_v2 }
0x3dbb   :  { %v8762_v32 = vpop.eup %8761 }
0x3dbc   :  { %v6194_v18 = vmul.f32 %v8762_v32, %v6192_v52 }
0x3e20   :  { %v6197_v43 = vpop.permute.xlu0 %6196 }
0x3e21   :  { %v6199_v19 = vmul.f32 %v8762_v32, %v6197_v43 }
0x3e23   :  { %6201 = vrot.lane.b32.xlu1 %v6199_v19, %s8862_s3 }
0x3e95   :  { %v6202_v16 = vpop.permute.xlu1 %6201 }
0x3e96   :  { %v6204_v11 = vadd.f32 %v6202_v16, %v6194_v18 }
0x3e98   :  { %8763 = vtanh.f32 %v6204_v11  ;;  %v6310_v34 = vrot.slane %v6204_v11, 6 }
0x3e99   :  { %8765 = vpow2.f32 %v7235_v40 }
0x3ea2   :  { %v8764_v1 = vpop.eup %8763 }
0x3ea3   :  { %6207 = vrot.lane.b32.xlu0 %v8764_v1, %s8862_s3  ;;  %v8766_v23 = vpop.eup %8765 }
0x3ea4   :  { %v6185_v41 = vadd.f32 1.0, %v8766_v23 }
0x3ea6   :  { %8767 = vrcp.f32 %v6185_v41 }
0x3eb0   :  { %v8768_v20 = vpop.eup %8767 }
0x3f15   :  { %v6208_v58 = vpop.permute.xlu0 %6207 }
0x3f16   :  { %v6210_v47 = vmul.f32 %v8768_v20, %v6208_v58 }
0x3f18   :  { %v6214_v53 = vrot.slane %v6210_v47, 4 }
0x3f1a   :  { %7236 = vmatmul.mubr.msk.f32.vlgmr.msra.gmra.mrb[52].mxu1 %vm358_vm1, %v6214_v53  ;;  %v6442_v53 = vld [vmem:[#allocation5 + $0x38] sm:$0xc] }
0x3f1b   :  { %8162 = vmatpush1.bf16.msra.mxu1 %v10585_v35  ;;  %6510 = vmatprep.mubr.f32.mxu1 %v8861_v7 }
0x3f1c   :  { %8164 = vmatprep.subr.bf16.mxu1 %v10587_v15 }
0x3f1f   :  { %8166 = vmatpush1.bf16.msra.mxu1 %v10605_v0 }
0x3f20   :  { %8168 = vmatprep.subr.bf16.mxu1 %v10608_v12 }
0x3f23   :  { %8170 = vmatpush1.bf16.msra.mxu1 %v10627_v28 }
0x3f24   :  { %8172 = vmatprep.subr.bf16.mxu1 %v10630_v50 }
0x3f27   :  { %8174 = vmatpush1.bf16.msra.mxu1 %v10641_v5 }
0x3f28   :  { %8192 = vmatprep.subr.bf16.mxu1 %v10525_v61 }
0x3fed   :  { %v6283_v8 = vpop.f32.mrb[52].mxu1 }
0x3fee   :  { %v6285_v49 = vpop.f32.mrb[53].mxu1  ;;  %v6290_v59 = vrot.slane %v6283_v8, 2 }
0x3fef   :  { %v6291_v33 = vrot.slane %v6285_v49, 2  ;;  %v6441_v49 = vld [vmem:[#allocation5 + $0x30] sm:$0xc] }
0x3ff0   :  { %v6294_v22 = vadd.f32 %v6290_v59, %v6211_v3 }
0x3ff1   :  { %v6295_v48 = vadd.f32 %v6291_v33, %v6212_v38 }
0x3ff2   :  { %v7237_v57 = vmul.f32 -1.442695, %v6294_v22  ;;  %v6796_v22 = vld [vmem:[%s11002_s11 + $0x8] sm:$0xff] }
0x3ff3   :  { %8769 = vtanh.f32 %v6295_v48  ;;  %v7238_v51 = vmul.f32 -1.442695, %v6295_v48 }
0x3ff4   :  { %8771 = vpow2.f32 %v7237_v57  ;;  %v6798_v57 = vld [vmem:[%s11002_s11 + $0x18] sm:$0xff] }
0x3ffd   :  { %v8770_v55 = vpop.eup %8769 }
0x3ffe   :  { %6314 = vrot.lane.b32.xlu1 %v8770_v55, %s8862_s3  ;;  %v8772_v56 = vpop.eup %8771 }
0x3fff   :  { %v6302_v62 = vadd.f32 1.0, %v8772_v56  ;;  %v8207_v56 = vpack.c.bf16 %v6798_v57, %v6796_v22 }
0x4001   :  { %8773 = vrcp.f32 %v6302_v62 }
0x400b   :  { %v8774_v63 = vpop.eup %8773 }
0x400c   :  { %v6312_v17 = vmul.f32 %v8774_v63, %v6310_v34  ;;  %v6795_v34 = vld [vmem:[%s11002_s11] sm:$0xff] }
0x4070   :  { %v6315_v36 = vpop.permute.xlu1 %6314 }
0x4071   :  { %v6317_v61 = vmul.f32 %v8774_v63, %v6315_v36 }
0x4073   :  { %6319 = vrot.lane.b32.xlu0 %v6317_v61, %s8862_s3 }
0x40e5   :  { %v6320_v9 = vpop.permute.xlu0 %6319 }
0x40e6   :  { %v6322_v6 = vadd.f32 %v6320_v9, %v6312_v17  ;;  %v6797_v17 = vld [vmem:[%s11002_s11 + $0x10] sm:$0xff] }
0x40e8   :  { %8775 = vtanh.f32 %v6322_v6  ;;  %v6422_v32 = vrot.slane %v6322_v6, 6 }
0x40e9   :  { %8777 = vpow2.f32 %v7238_v51  ;;  %v6802_v51 = vld [vmem:[%s11002_s11 + $0x38] sm:$0xff] }
0x40f2   :  { %v8776_v60 = vpop.eup %8775 }
0x40f3   :  { %6325 = vrot.lane.b32.xlu1 %v8776_v60, %s8862_s3  ;;  %v8778_v44 = vpop.eup %8777  ;;  %v6800_v60 = vld [vmem:[%s11002_s11 + $0x28] sm:$0xff] }
0x40f4   :  { %v6303_v54 = vadd.f32 1.0, %v8778_v44 }
0x40f6   :  { %8779 = vrcp.f32 %v6303_v54  ;;  %v8209_v54 = vpack.c.bf16 %v6797_v17, %v6795_v34 }
0x4100   :  { %v8780_v13 = vpop.eup %8779 }
0x4165   :  { %v6326_v21 = vpop.permute.xlu1 %6325 }
0x4166   :  { %v6328_v29 = vmul.f32 %v8780_v13, %v6326_v21  ;;  %v8211_v21 = vpack.c.bf16 %v6802_v51, %v6800_v60 }
0x4168   :  { %v6332_v31 = vrot.slane %v6328_v29, 6  ;;  %v6799_v29 = vld [vmem:[%s11002_s11 + $0x20] sm:$0xff] }
0x416a   :  { %7239 = vmatmul.mubr.msk.f32.vlgmr.msra.gmra.mrb[60].mxu0 %vm358_vm1, %v6332_v31  ;;  %v6801_v31 = vld [vmem:[%s11002_s11 + $0x30] sm:$0xff] }
0x416b   :  { %8178 = vmatpush1.bf16.msra.mxu0 %v10585_v35  ;;  %6628 = vmatprep.mubr.f32.mxu0 %v8861_v7 }
0x416c   :  { %8180 = vmatprep.subr.bf16.mxu0 %v10587_v15 }
0x416f   :  { %8182 = vmatpush1.bf16.msra.mxu0 %v10605_v0 }
0x4170   :  { %8184 = vmatprep.subr.bf16.mxu0 %v10608_v12 }
0x4173   :  { %8186 = vmatpush1.bf16.msra.mxu0 %v10627_v28 }
0x4174   :  { %8188 = vmatprep.subr.bf16.mxu0 %v10630_v50 }
0x4177   :  { %8190 = vmatpush1.bf16.msra.mxu0 %v10641_v5 }
0x4178   :  { %8208 = vmatprep.subr.bf16.mxu0 %v8207_v56 }
0x423d   :  { %v6401_v14 = vpop.f32.mrb[60].mxu0 }
0x423e   :  { %v6403_v42 = vpop.f32.mrb[61].mxu0  ;;  %v6406_v26 = vadd.f32 %v6401_v14, %v6329_v45  ;;  %v6804_v14 = vld [vmem:[%s11002_s11 + $0x48] sm:$0xff]  ;;  %v6805_v45 = vld [vmem:[%s11002_s11 + $0x50] sm:$0xff] }
0x423f   :  { %v6407_v4 = vadd.f32 %v6403_v42, %v6330_v39  ;;  %v6806_v39 = vld [vmem:[%s11002_s11 + $0x58] sm:$0xff]  ;;  %v8213_v42 = vpack.c.bf16 %v6801_v31, %v6799_v29 }
0x4240   :  { %v7240_v37 = vmul.f32 -1.442695, %v6406_v26  ;;  %v6808_v26 = vld [vmem:[%s11002_s11 + $0x68] sm:$0xff] }
0x4241   :  { %8781 = vtanh.f32 %v6407_v4  ;;  %v7241_v16 = vmul.f32 -1.442695, %v6407_v4  ;;  %v8215_v4 = vpack.c.bf16 %v6806_v39, %v6804_v14 }
0x4242   :  { %8783 = vpow2.f32 %v7240_v37  ;;  %v6810_v37 = vld [vmem:[%s11002_s11 + $0x78] sm:$0xff] }
0x424b   :  { %v8782_v46 = vpop.eup %8781 }
0x424c   :  { %6426 = vrot.lane.b32.xlu0 %v8782_v46, %s8862_s3  ;;  %v8784_v30 = vpop.eup %8783  ;;  %v6803_v46 = vld [vmem:[%s11002_s11 + $0x40] sm:$0xff] }
0x424d   :  { %v6414_v10 = vadd.f32 1.0, %v8784_v30  ;;  %v8217_v30 = vpack.c.bf16 %v6805_v45, %v6803_v46 }
0x424f   :  { %8785 = vrcp.f32 %v6414_v10  ;;  %v8219_v10 = vpack.c.bf16 %v6810_v37, %v6808_v26  ;;  %v6930_v37 = vld [vmem:[%s11005_s14] sm:$0xff] }
0x4259   :  { %v8786_v25 = vpop.eup %8785 }
0x425a   :  { %v6424_v43 = vmul.f32 %v8786_v25, %v6422_v32 }
0x42be   :  { %v6427_v27 = vpop.permute.xlu0 %6426 }
0x42bf   :  { %v6429_v2 = vmul.f32 %v8786_v25, %v6427_v27  ;;  %v6807_v25 = vld [vmem:[%s11002_s11 + $0x60] sm:$0xff]  ;;  %v6809_v27 = vld [vmem:[%s11002_s11 + $0x70] sm:$0xff] }
0x42c1   :  { %6431 = vrot.lane.b32.xlu1 %v6429_v2, %s8862_s3  ;;  %v8221_v2 = vpack.c.bf16 %v6809_v27, %v6807_v25  ;;  %v8864_v25 = vmov 0.0|0.0  }
0x4333   :  { %v6432_v19 = vpop.permute.xlu1 %6431 }
0x4334   :  { %v6434_v52 = vadd.f32 %v6432_v19, %v6424_v43 }
0x4336   :  { %8787 = vtanh.f32 %v6434_v52  ;;  %v6539_v48 = vrot.slane %v6434_v52, 6  ;;  %v6559_v52 = vld [vmem:[#allocation5 + $0x38] sm:$0x30] }
0x4337   :  { %8789 = vpow2.f32 %v7241_v16 }
0x4340   :  { %v8788_v18 = vpop.eup %8787 }
0x4341   :  { %6437 = vrot.lane.b32.xlu0 %v8788_v18, %s8862_s3  ;;  %v8790_v11 = vpop.eup %8789 }
0x4342   :  { %v6415_v1 = vadd.f32 1.0, %v8790_v11 }
0x4344   :  { %8791 = vrcp.f32 %v6415_v1 }
0x434e   :  { %v8792_v40 = vpop.eup %8791 }
0x43b3   :  { %v6438_v23 = vpop.permute.xlu0 %6437 }
0x43b4   :  { %v6440_v41 = vmul.f32 %v8792_v40, %v6438_v23 }
0x43b6   :  { %7242 = vmatmul.mubr.msk.f32.vlgmr.msra.gmra.mrb[54].mxu1 %vm358_vm1, %v6440_v41  ;;  %v6558_v41 = vld [vmem:[#allocation5 + $0x30] sm:$0x30] }
0x43b7   :  { %8194 = vmatpush1.bf16.msra.mxu1 %v10585_v35  ;;  %6746 = vmatprep.mubr.f32.mxu1 %v8861_v7 }
0x43b8   :  { %8196 = vmatprep.subr.bf16.mxu1 %v10587_v15 }
0x43bb   :  { %8198 = vmatpush1.bf16.msra.mxu1 %v10605_v0 }
0x43bc   :  { %8200 = vmatprep.subr.bf16.mxu1 %v10608_v12 }
0x43bf   :  { %8202 = vmatpush1.bf16.msra.mxu1 %v10627_v28 }
0x43c0   :  { %8204 = vmatprep.subr.bf16.mxu1 %v10630_v50 }
0x43c3   :  { %8206 = vmatpush1.bf16.msra.mxu1 %v10641_v5 }
0x43c4   :  { %8223 = vmatprep.subr.bf16.mxu1 %v8864_v25 }
0x4489   :  { %v6512_v20 = vpop.f32.mrb[54].mxu1 }
0x448a   :  { %v6514_v58 = vpop.f32.mrb[55].mxu1  ;;  %v6519_v15 = vrot.slane %v6512_v20, 6 }
0x448b   :  { %v6520_v47 = vrot.slane %v6514_v58, 6 }
0x448c   :  { %v6523_v0 = vadd.f32 %v6519_v15, %v6441_v49 }
0x448d   :  { %v6524_v8 = vadd.f32 %v6520_v47, %v6442_v53 }
0x448e   :  { %v7243_v33 = vmul.f32 -1.442695, %v6523_v0 }
0x448f   :  { %8793 = vtanh.f32 %v6524_v8  ;;  %v7244_v63 = vmul.f32 -1.442695, %v6524_v8  ;;  %v8863_v8 = vmov 1983009808  }
0x4490   :  { %8795 = vpow2.f32 %v7243_v33 }
0x4499   :  { %v8794_v35 = vpop.eup %8793 }
0x449a   :  { %6543 = vrot.lane.b32.xlu1 %v8794_v35, %s8862_s3  ;;  %v8796_v12 = vpop.eup %8795  ;;  %v6886_v35 = vunpack.c.l.s4 %v8863_v8  ;;  %v6924_v8 = vld [vmem:[%s11004_s13 + $0x10] sm:$0xff] }
0x449b   :  { %v6531_v28 = vadd.f32 1.0, %v8796_v12 }
0x449c   :  { %v6887_v15 = vunpack.c.0.s8 %v6886_v35 }
0x449d   :  { %8797 = vrcp.f32 %v6531_v28 }
0x449e   :  { %v6890_v49 = vsub.s32 %v6887_v15, %v9332_v24  ;;  %v6925_v15 = vld [vmem:[%s11004_s13 + $0x18] sm:$0xff] }
0x44a7   :  { %v8798_v50 = vpop.eup %8797 }
0x44a8   :  { %v6541_v55 = vmul.f32 %v8798_v50, %v6539_v48 }
0x450c   :  { %v6544_v38 = vpop.permute.xlu1 %6543 }
0x450d   :  { %v6546_v5 = vmul.f32 %v8798_v50, %v6544_v38  ;;  %v6794_v50 = vld [vmem:[#allocation6] sm:$0xf] }
0x450f   :  { %6548 = vrot.lane.b32.xlu0 %v6546_v5, %s8862_s3 }
0x4581   :  { %v6549_v59 = vpop.permute.xlu0 %6548 }
0x4582   :  { %v10844_v3 = vadd.f32 %v6549_v59, %v6541_v55 }
0x4584   :  { %8799 = vtanh.f32 %v10844_v3  ;;  %v6657_v5 = vrot.slane %v10844_v3, 6 }
0x4585   :  { %8801 = vpow2.f32 %v7244_v63 }
0x458e   :  { %v8800_v62 = vpop.eup %8799 }
0x458f   :  { %6554 = vrot.lane.b32.xlu1 %v8800_v62, %s8862_s3  ;;  %v8802_v36 = vpop.eup %8801 }
0x4590   :  { %v6532_v61 = vadd.f32 1.0, %v8802_v36 }
0x4592   :  { %8803 = vrcp.f32 %v6532_v61 }
0x459c   :  { %v8804_v9 = vpop.eup %8803 }
0x4601   :  { %v6555_v6 = vpop.permute.xlu1 %6554 }
0x4602   :  { %v6557_v44 = vmul.f32 %v8804_v9, %v6555_v6 }
0x4604   :  { %v6561_v13 = vrot.slane %v6557_v44, 2  ;;  %v6677_v44 = vld [vmem:[#allocation5 + $0x38] sm:$0xc0] }
0x4606   :  { %7245 = vmatmul.mubr.msk.f32.vlgmr.msra.gmra.mrb[62].mxu0 %vm358_vm1, %v6561_v13 }
0x4607   :  { %8210 = vmatpush1.bf16.msra.mxu0 %v8209_v54  ;;  %6875 = vmatprep.mubr.f32.mxu0 %v8861_v7 }
0x4608   :  { %8212 = vmatprep.subr.bf16.mxu0 %v8211_v21 }
0x460b   :  { %8214 = vmatpush1.bf16.msra.mxu0 %v8213_v42  ;;  %v6676_v42 = vld [vmem:[#allocation5 + $0x30] sm:$0xc0] }
0x460c   :  { %8216 = vmatprep.subr.bf16.mxu0 %v8215_v4 }
0x460f   :  { %8218 = vmatpush1.bf16.msra.mxu0 %v8217_v30  ;;  %v6931_v30 = vld [vmem:[%s11005_s14 + $0x8] sm:$0xff] }
0x4610   :  { %8220 = vmatprep.subr.bf16.mxu0 %v8219_v10  ;;  %v6932_v10 = vld [vmem:[%s11005_s14 + $0x10] sm:$0xff]  ;;  %v8224_v27 = vpack.c.bf16 %v6931_v30, %v6930_v37 }
0x4613   :  { %8222 = vmatpush1.bf16.msra.mxu0 %v8221_v2  ;;  %v6933_v2 = vld [vmem:[%s11005_s14 + $0x18] sm:$0xff] }
0x4614   :  { %8235 = vmatprep.subr.bf16.mxu0 %v8864_v25 }
0x4616   :  { %6876 = vmatmul.mubr.f32.vlgmr.msra.gmra.mrb[64].mxu0 %v8861_v7 }
0x4617   :  { %7308 = vmatprep.mubr.msk.f32.mxu0 %vm8865_vm9, %v8861_v7 }
0x46d9   :  { %v6630_v32 = vpop.f32.mrb[62].mxu0 }
0x46da   :  { %v6632_v43 = vpop.f32.mrb[63].mxu0  ;;  %v6637_v23 = vrot.slane %v6630_v32, 4  ;;  %v8227_v32 = vpack.c.bf16 %v6933_v2, %v6932_v10 }
0x46db   :  { %v6638_v19 = vrot.slane %v6632_v43, 4  ;;  %v6934_v43 = vld [vmem:[%s11005_s14 + $0x20] sm:$0xff] }
0x46dc   :  { %v6641_v20 = vadd.f32 %v6637_v23, %v6558_v41  ;;  %v6937_v23 = vld [vmem:[%s11005_s14 + $0x38] sm:$0xff] }
0x46dd   :  { %v6642_v18 = vadd.f32 %v6638_v19, %v6559_v52  ;;  %v6935_v19 = vld [vmem:[%s11005_s14 + $0x28] sm:$0xff] }
0x46de   :  { %v7246_v58 = vmul.f32 -1.442695, %v6641_v20  ;;  %v8230_v52 = vpack.c.bf16 %v6935_v19, %v6934_v43 }
0x46df   :  { %8805 = vtanh.f32 %v6642_v18  ;;  %v7247_v24 = vmul.f32 -1.442695, %v6642_v18 }
0x46e0   :  { %8807 = vpow2.f32 %v7246_v58 }
0x46e9   :  { %v8806_v16 = vpop.eup %8805  ;;  %v6877_v11 = vpop.f32.mrb[64].mxu0 }
0x46ea   :  { %v6879_v1 = vpop.f32.mrb[65].mxu0  ;;  %6661 = vrot.lane.b32.xlu0 %v8806_v16, %s8862_s3  ;;  %v8808_v47 = vpop.eup %8807 }
0x46eb   :  { %v6884_v40 = vcombine.low %v6877_v11, %v6879_v1  ;;  %v6649_v53 = vadd.f32 1.0, %v8808_v47  ;;  %v6922_v47 = vld [vmem:[%s11004_s13] sm:$0xff] }
0x46ed   :  { %8809 = vrcp.f32 %v6649_v53  ;;  %v6891_v12 = vrot.slane %v6884_v40, %v6890_v49  ;;  %v6936_v40 = vld [vmem:[%s11005_s14 + $0x30] sm:$0xff]  ;;  %v6923_v53 = vld [vmem:[%s11004_s13 + $0x8] sm:$0xff]  ;;  %v6926_v49 = vld [vmem:[%s11004_s13 + $0x20] sm:$0xff] }
0x46ee   :  { %v8233_v20 = vpack.c.bf16 %v6937_v23, %v6936_v40  ;;  %v8236_v35 = vpack.c.bf16 %v6923_v53, %v6922_v47 }
0x46ef   :  { %v6893_v38 = vadd.f32 %v6891_v12, %v6794_v50 }
0x46f0   :  { %8237 = vmatpush3.bf16.msra.mxu0 %v8236_v35 }
0x46f1   :  { %v7251_v3 = vmul.f32 -1.442695, %v6893_v38  ;;  %8238 = vmatprep.subr.bf16.mxu0 %v8864_v25 }
0x46f7   :  { %v8810_v0 = vpop.eup %8809 }
0x46f8   :  { %v6659_v48 = vmul.f32 %v8810_v0, %v6657_v5 }
0x475c   :  { %v6662_v33 = vpop.permute.xlu0 %6661 }
0x475d   :  { %v6664_v28 = vmul.f32 %v8810_v0, %v6662_v33  ;;  %v6927_v0 = vld [vmem:[%s11004_s13 + $0x28] sm:$0xff] }
0x475e   :  { %v8242_v33 = vpack.c.bf16 %v6927_v0, %v6926_v49 }
0x475f   :  { %6666 = vrot.lane.b32.xlu1 %v6664_v28, %s8862_s3 }
0x4763   :  { %6901 = vrot.lane.b32.xlu1 %v6893_v38, %s8862_s3 }
0x47d1   :  { %v6667_v55 = vpop.permute.xlu1 %6666 }
0x47d2   :  { %v10904_v59 = vadd.f32 %v6667_v55, %v6659_v48  ;;  %v6928_v48 = vld [vmem:[%s11004_s13 + $0x30] sm:$0xff]  ;;  %v6929_v55 = vld [vmem:[%s11004_s13 + $0x38] sm:$0xff] }
0x47d4   :  { %8811 = vtanh.f32 %v10904_v59  ;;  %v6775_v28 = vrot.slane %v10904_v59, 6 }
0x47d5   :  { %8813 = vpow2.f32 %v7247_v24  ;;  %v6902_v34 = vpop.permute.xlu1 %6901 }
0x47d6   :  { %v6903_v6 = vrot.slane %v6902_v34, 2 }
0x47de   :  { %v8812_v22 = vpop.eup %8811 }
0x47df   :  { %6672 = vrot.lane.b32.xlu0 %v8812_v22, %s8862_s3  ;;  %v8814_v57 = vpop.eup %8813  ;;  %v8245_v22 = vpack.c.bf16 %v6929_v55, %v6928_v48 }
0x47e0   :  { %v6650_v56 = vadd.f32 1.0, %v8814_v57 }
0x47e2   :  { %8815 = vrcp.f32 %v6650_v56 }
0x47e3   :  { %8817 = vpow2.f32 %v7251_v3 }
0x47e4   :  { %8819 = vtanh.f32 %v6903_v6 }
0x47ec   :  { %v8816_v62 = vpop.eup %8815 }
0x47ed   :  { %v8818_v9 = vpop.eup %8817 }
0x47ee   :  { %v6897_v54 = vadd.f32 1.0, %v8818_v9  ;;  %v8820_v21 = vpop.eup %8819 }
0x4851   :  { %v6673_v63 = vpop.permute.xlu0 %6672 }
0x4852   :  { %v6675_v36 = vmul.f32 %v8816_v62, %v6673_v63 }
0x4854   :  { %v6679_v61 = vrot.slane %v6675_v36, 4 }
0x4856   :  { %7248 = vmatmul.mubr.msk.f32.vlgmr.msra.gmra.mrb[56].mxu1 %vm358_vm1, %v6679_v61 }
0x4857   :  { %8225 = vmatpush3.bf16.msra.mxu1 %v8224_v27  ;;  %7289 = vmatprep.mubr.msk.f32.mxu1 %vm8865_vm9, %v8861_v7  ;;  %v8239_v7 = vpack.c.bf16 %v6925_v15, %v6924_v8 }
0x4858   :  { %8226 = vmatprep.subr.bf16.mxu1 %v8864_v25 }
0x4859   :  { %8240 = vmatpush3.bf16.msra.mxu0 %v8239_v7 }
0x485a   :  { %8241 = vmatprep.subr.bf16.mxu0 %v8864_v25 }
0x485b   :  { %8228 = vmatpush3.bf16.msra.mxu1 %v8227_v32 }
0x485c   :  { %8229 = vmatprep.subr.bf16.mxu1 %v8864_v25 }
0x485d   :  { %8243 = vmatpush3.bf16.msra.mxu0 %v8242_v33 }
0x485e   :  { %8244 = vmatprep.subr.bf16.mxu0 %v8864_v25 }
0x485f   :  { %8231 = vmatpush3.bf16.msra.mxu1 %v8230_v52 }
0x4860   :  { %8232 = vmatprep.subr.bf16.mxu1 %v8864_v25 }
0x4861   :  { %8246 = vmatpush3.bf16.msra.mxu0 %v8245_v22 }
0x4863   :  { %8234 = vmatpush3.bf16.msra.mxu1 %v8233_v20 }
0x4929   :  { %v6748_v17 = vpop.f32.mrb[56].mxu1 }
0x492a   :  { %v6750_v60 = vpop.f32.mrb[57].mxu1  ;;  %v6755_v39 = vrot.slane %v6748_v17, 2 }
0x492b   :  { %v6756_v51 = vrot.slane %v6750_v60, 2 }
0x492c   :  { %v6759_v4 = vadd.f32 %v6755_v39, %v6676_v42 }
0x492d   :  { %v10909_v13 = vadd.f32 %v6756_v51, %v6677_v44  ;;  %v7254_v51 = vld [vmem:[%s11006_s15] ss:$0 sm:$0xff] }
0x492e   :  { %v7249_v46 = vmul.f32 -1.442695, %v6759_v4 }
0x492f   :  { %8821 = vtanh.f32 %v10909_v13  ;;  %v7250_v62 = vmul.f32 -1.442695, %v10909_v13 }
0x4930   :  { %8823 = vrcp.f32 %v6897_v54 }
0x4931   :  { %8825 = vpow2.f32 %v7249_v46 }
0x4939   :  { %v8822_v29 = vpop.eup %8821 }
0x493a   :  { %6779 = vrot.lane.b32.xlu0 %v8822_v29, %s8862_s3  ;;  %v10913_v31 = vpop.eup %8823 }
0x493b   :  { %v6907_v14 = vmul.f32 %v10913_v31, %v8820_v21  ;;  %v8826_v45 = vpop.eup %8825  ;;  %v6906_v1 = vmul.f32 0.0, %v10913_v31  ;;  %v6915_v57 = vrot.slane %v10913_v31, 2 }
0x493c   :  { %v6767_v26 = vadd.f32 1.0, %v8826_v45 }
0x493e   :  { %6909 = vrot.lane.b32.xlu0 %v6907_v14, %s8862_s3  ;;  %8827 = vrcp.f32 %v6767_v26 }
0x4948   :  { %v8828_v18 = vpop.eup %8827 }
0x4949   :  { %v6777_v50 = vmul.f32 %v8828_v18, %v6775_v28 }
0x49ac   :  { %v6780_v16 = vpop.permute.xlu0 %6779 }
0x49ad   :  { %v6782_v11 = vmul.f32 %v8828_v18, %v6780_v16 }
0x49af   :  { %6784 = vrot.lane.b32.xlu1 %v6782_v11, %s8862_s3 }
0x49b0   :  { %v6910_v41 = vpop.permute.xlu0 %6909 }
0x49b1   :  { %v6912_v58 = vadd.f32 %v6910_v41, %v6906_v1 }
0x49b3   :  { %8829 = vtanh.f32 %v6912_v58 }
0x49bd   :  { %v8830_v12 = vpop.eup %8829 }
0x49be   :  { %6918 = vrot.lane.b32.xlu0 %v8830_v12, %s8862_s3 }
0x4a21   :  { %v6785_v38 = vpop.permute.xlu1 %6784 }
0x4a22   :  { %v6787_v5 = vadd.f32 %v6785_v38, %v6777_v50 }
0x4a24   :  { %8831 = vtanh.f32 %v6787_v5 }
0x4a25   :  { %8833 = vpow2.f32 %v7250_v62 }
0x4a2e   :  { %v8832_v24 = vpop.eup %8831 }
0x4a2f   :  { %6790 = vrot.lane.b32.xlu1 %v8832_v24, %s8862_s3  ;;  %v8834_v63 = vpop.eup %8833 }
0x4a30   :  { %v6919_v59 = vpop.permute.xlu0 %6918  ;;  %v6768_v36 = vadd.f32 1.0, %v8834_v63 }
0x4a31   :  { %v6921_v56 = vmul.f32 %v6919_v59, %v6915_v57 }
0x4a32   :  { %8835 = vrcp.f32 %v6768_v36 }
0x4a33   :  { %7290 = vmatmul.mubr.msk.f32.vlgmr.msra.gmra.mrb[58].mxu1 %vm358_vm1, %v6921_v56 }
0x4a3c   :  { %v8836_v61 = vpop.eup %8835 }
0x4aa1   :  { %v6791_v3 = vpop.permute.xlu1 %6790 }
0x4aa2   :  { %v6793_v34 = vmul.f32 %v8836_v61, %v6791_v3 }
0x4aa4   :  { %v7012_v17 = vrot.slane %v6793_v34, 6 }
0x4aa6   :  { %7309 = vmatmul.mubr.msk.f32.vlgmr.msra.gmra.mrb[66].mxu0 %vm358_vm1, %v7012_v17 }
0x4b06   :  { %v7007_v9 = vpop.f32.mrb[58].mxu1 }
0x4b07   :  { %v7291_v6 = vpop.f32.mrb[59].mxu1 }
0x4b79   :  { %v7081_v60 = vpop.f32.mrb[66].mxu0 }
0x4b7a   :  { %v7082_v44 = vadd.f32 %v7081_v60, %v7007_v9  ;;  %v7310_v54 = vpop.f32.mrb[67].mxu0 }
0x4b7c   :  { %v7092_v13 = vadd.f32 %v7254_v51, %v7082_v44 }
0x4b7e   :  { %7094 = vst.msk [vmem:[#allocation7] sm:$0x3] %vm7093_vm10, %v7092_v13 }
0x4b7f   :  { %8848 = shalt.err (!%p8845_p4)
}
0x4b80   :  { %s8849_s25 = scalar_lea.hbm %s11007_s16, 32 }
0x4b81   :  { %p8850_p5 = scmp.ne.s32.totalorder %s11007_s16, %s8849_s25  ;;  %p8853_p6 = scmp.lt.u32.totalorder %s8849_s25, %s11007_s16 }
0x4b83   :  { %p8855_p7 = pnand %p8853_p6, %p8850_p5 }
0x4b85   :  { %8858 = shalt.err (!%p8855_p7)
}
0x4b86   :  { %7104 = dma.vmem_to_hbm [thread:$0]  %s7102_s6, 32, %s11007_s16, [#allocation8]  }
0x4b87   :  { %8859 = dma.done.wait [#allocation8], 32  }
0x4b88   :  { %8860 = vsyncadd [#allocation8], 4294967264 }
0x4b89   :  { %7108 = vsyncpa [#allocation8], 1 }

</bundles_post_ra>
